<compile_context>
chip_gen: v5e
topology: v5e:2x2
jax: 0.10.0
libtpu: 0.0.40
codegen_flags: <defaults>
</compile_context>

<pallas_src>
import jax
import jax.numpy as jnp
from jax import lax
from jax.experimental import pallas as pl
from jax.experimental.pallas import tpu as pltpu

NUM_EEG_CH = 22      # electrode count (conv "height")
PAD_H = 24           # height rows padded 22 -> 24 (multiple of 8)
K_MAX = 64           # largest temporal kernel == composite filter length
N_SCB = 16           # channels after the spatial conv block
EPS = 1e-5           # BatchNorm eps (torch default)


# --------------------------------------------------------------------------- kernel
def _lenet_kernel(xp_ref,
                  hflat_ref, bscb_ref, p4_ref,
                  wdw_ref, wpw_ref, pb_ref,
                  p8_ref, wc_ref,
                  out_ref,
                  xcol_ref, s4_ref):
    BB = xp_ref.shape[0]                    # batch elements handled per grid step
    L = xp_ref.shape[2] - (K_MAX - 1)       # padded time = L + 63
    TT = xcol_ref.shape[1]                  # time-tile width (multiple of 32, divides L)
    TT4 = TT // 4
    L4 = L // 4
    n_tiles = L // TT

    for bb in range(BB):
        # FFCB input slab: zero it so the ZeroPad2d((7,8)) columns stay zero.
        s4_ref[...] = jnp.zeros_like(s4_ref)

        # ---- TCB_1/2/3 + BN + concat + TCB_fusion + BN + SCB conv + BN + ReLU + pool
        # (all folded into z[m,t] = sum_{h,s} H[m,h,s] * xp[h,t+s] + b, one matmul/tile)
        for i in range(n_tiles):
            base = i * TT
            # shift-im2col: Xcol[s*24 + h, t] = xp[h, base + t + s]
            # (64 sublane-aligned (24, TT) block copies per tile)
            for s in range(K_MAX):
                xcol_ref[s * PAD_H:(s + 1) * PAD_H, :] = (
                    xp_ref[bb, :, base + s: base + s + TT])
            z = jnp.dot(hflat_ref[...], xcol_ref[...],
                        preferred_element_type=jnp.float32)             # (16, TT)
            z = jnp.maximum(z + bscb_ref[...], 0.0)                     # SCB BN + ReLU
            # SCB AvgPool(1,4) as a small per-tile matmul; write at column offset 7
            # so the FFCB ZeroPad2d((7,8,0,0)) is already in the slab layout.
            s4_ref[:, 7 + i * TT4: 7 + (i + 1) * TT4] = jnp.dot(
                z, p4_ref[...], preferred_element_type=jnp.float32)     # (16, TT/4)

        # ---- FFCB: depthwise (1,16) tap loop + pointwise 1x1 (+BN) + ReLU + AvgPool(1,8)
        acc = jnp.zeros((N_SCB, L4), jnp.float32)
        for k in range(16):
            acc = acc + wdw_ref[:, k:k + 1] * s4_ref[:, k:k + L4]
        d = jnp.dot(wpw_ref[...], acc, preferred_element_type=jnp.float32)
        d = jnp.maximum(d + pb_ref[...], 0.0)
        d = jnp.dot(d, p8_ref[...], preferred_element_type=jnp.float32)  # (16, L//32)

        # ---- CCB: 1x1 conv to classes + AdaptiveAvgPool2d((1,1)) + Flatten ---------
        cc = jnp.dot(wc_ref[...], d, preferred_element_type=jnp.float32)  # (C, L//32)
        out_ref[bb] = jnp.mean(cc, axis=-1).reshape(1, -1)


# ----------------------------------------------------------------------- parameters
def _fold_bn(bn):
    scale = bn['gamma'] / jnp.sqrt(bn['var'] + EPS)
    bias = bn['beta'] - bn['mean'] * scale
    return scale, bias


def init_params(key, classes_num=4):
    keys = jax.random.split(key, 20)

    def w(k, shape, fan_in):
        return (jax.random.normal(k, shape, jnp.float32) / jnp.sqrt(fan_in)).astype(jnp.float32)

    def bn(k, c):
        k1, k2, k3, k4 = jax.random.split(k, 4)
        return dict(gamma=jax.random.uniform(k1, (c,), jnp.float32, 0.5, 1.5),
                    beta=0.1 * jax.random.normal(k2, (c,), jnp.float32),
                    mean=0.1 * jax.random.normal(k3, (c,), jnp.float32),
                    var=jax.random.uniform(k4, (c,), jnp.float32, 0.5, 1.5))

    return {
        'w_tcb1': w(keys[0], (8, 1, 1, 64), 64), 'bn_tcb1': bn(keys[1], 8),
        'w_tcb2': w(keys[2], (8, 1, 1, 32), 32), 'bn_tcb2': bn(keys[3], 8),
        'w_tcb3': w(keys[4], (8, 1, 1, 16), 16), 'bn_tcb3': bn(keys[5], 8),
        'w_fuse': w(keys[6], (24, 24, 1, 1), 24), 'bn_fuse': bn(keys[7], 24),
        'w_scb': w(keys[8], (16, 3, 22, 1), 66), 'bn_scb': bn(keys[9], 16),
        'w_dw': w(keys[10], (16, 1, 1, 16), 16),
        'w_pw': w(keys[11], (16, 16, 1, 1), 16), 'bn_ffcb': bn(keys[12], 16),
        'w_ccb': w(keys[13], (classes_num, 16, 1, 1), 16),
    }


def _derive_operands(p, L, TT):
    """O(#weights) constant folding / layout prep; every per-sample MAC stays in-kernel."""
    f32 = jnp.float32

    # -- fold TCB BatchNorm scales into the temporal filters, common 64-tap axis ------
    s1, b1 = _fold_bn(p['bn_tcb1'])
    s2, b2 = _fold_bn(p['bn_tcb2'])
    s3, b3 = _fold_bn(p['bn_tcb3'])
    w1 = p['w_tcb1'][:, 0, 0, :]                  # (8, 64), time offset 0
    w2 = p['w_tcb2'][:, 0, 0, :]                  # (8, 32), time offset 16
    w3 = p['w_tcb3'][:, 0, 0, :]                  # (8, 16), time offset 24
    wtap = jnp.zeros((24, K_MAX), f32)
    wtap = wtap.at[0:8, 0:64].set(s1[:, None] * w1)
    wtap = wtap.at[8:16, 16:48].set(s2[:, None] * w2)
    wtap = wtap.at[16:24, 24:40].set(s3[:, None] * w3)
    b_cat = jnp.concatenate([b1, b2, b3])                                  # (24,)

    # -- fold the 1x1 fusion conv + BN through (linear, no ReLU yet) ------------------
    fs, fb = _fold_bn(p['bn_fuse'])
    wf = p['w_fuse'][:, :, 0, 0]                                           # (24, 24)
    g_filt = fs[:, None] * (wf @ wtap)                                     # (24, 64)
    b_fuse = fs * (wf @ b_cat) + fb                                        # (24,)

    # -- fold the grouped (22,1) SCB conv + BN (groups=8: out m uses in 3*(m//2)+j) ---
    ss, sb = _fold_bn(p['bn_scb'])
    wscb = p['w_scb'][:, :, :, 0]                                          # (16, 3, 22)
    grp = jnp.arange(N_SCB) // 2
    gg = g_filt.reshape(8, 3, K_MAX)[grp]                                  # (16, 3, 64)
    hcomp = jnp.einsum('mjh,mjs->mhs', wscb, gg) * ss[:, None, None]       # (16, 22, 64)
    hcomp = jnp.pad(hcomp, ((0, 0), (0, PAD_H - NUM_EEG_CH), (0, 0)))      # zero rows 22,23
    hflat = hcomp.transpose(0, 2, 1).reshape(N_SCB, K_MAX * PAD_H)         # row = s*24 + h
    b_scb = ss * jnp.einsum('mjh,mj->m', wscb, b_fuse.reshape(8, 3)[grp]) + sb

    # -- pooling matrices (exact averages; p4 is per-tile so it never grows with L) ---
    L32 = L // 32
    p4 = jnp.kron(jnp.eye(TT // 4, dtype=f32), jnp.full((4, 1), 0.25, f32))   # (TT, TT/4)
    p8 = jnp.kron(jnp.eye(L32, dtype=f32), jnp.full((8, 1), 0.125, f32))      # (L/4, L/32)

    # -- FFCB: depthwise taps; BN scale folded into the pointwise conv ---------------
    wdw = p['w_dw'][:, 0, 0, :]                                            # (16, 16)
    ps, pb = _fold_bn(p['bn_ffcb'])
    wpw = ps[:, None] * p['w_pw'][:, :, 0, 0]                              # (16, 16)

    # -- CCB classifier ---------------------------------------------------------------
    wc = p['w_ccb'][:, :, 0, 0]                                            # (classes, 16)

    ops = [hflat, b_scb[:, None], p4, wdw, wpw, pb[:, None], p8, wc]
    return [o.astype(f32) for o in ops]


# ------------------------------------------------------------------------------ wrap
def lenet_forward(x, params):
    # x: (B, 1, 22, L) float32 (PyTorch NCHW)
    B, cin, hgt, L = x.shape
    assert cin == 1 and hgt == NUM_EEG_CH and L % 32 == 0
    classes_num = params['w_ccb'].shape[0]
    TT = next(t for t in (256, 128, 64, 32) if L % t == 0)     # time tile
    BB = next(b for b in (4, 2, 1) if B % b == 0)              # batch elems per grid step

    xp = jnp.pad(x[:, 0], ((0, 0), (0, PAD_H - NUM_EEG_CH), (32, 31)))     # (B, 24, L+63)
    operands = _derive_operands(params, L, TT)

    in_specs = [pl.BlockSpec((BB, PAD_H, L + K_MAX - 1), lambda i: (i, 0, 0))]
    in_specs += [pl.BlockSpec(op.shape, lambda i: (0, 0)) for op in operands]

    out = pl.pallas_call(
        _lenet_kernel,
        out_shape=jax.ShapeDtypeStruct((B, 1, classes_num), jnp.float32),
        grid=(B // BB,),
        in_specs=in_specs,
        out_specs=pl.BlockSpec((BB, 1, classes_num), lambda i: (i, 0, 0)),
        scratch_shapes=[pltpu.VMEM((K_MAX * PAD_H, TT), jnp.float32),      # im2col slab
                        pltpu.VMEM((N_SCB, L // 4 + 15), jnp.float32)],    # padded pooled SCB
        compiler_params=pltpu.CompilerParams(
            dimension_semantics=("parallel",),          # independent batch steps (v7x: 2 TCs)
            vmem_limit_bytes=32 * 1024 * 1024),
    )(xp, *operands)
    return out[:, 0, :]


# ----------------------------------------------------------------- pure-JAX reference
def ref_forward(x, p):
    def conv(x, w, pad=(0, 0), groups=1):
        return lax.conv_general_dilated(
            x, w, window_strides=(1, 1), padding=((0, 0), pad),
            dimension_numbers=('NCHW', 'OIHW', 'NCHW'),
            feature_group_count=groups, precision=lax.Precision.HIGHEST)

    def affine(x, bn):
        s, b = _fold_bn(bn)
        return x * s[None, :, None, None] + b[None, :, None, None]

    x1 = affine(conv(x, p['w_tcb1'], pad=(32, 31)), p['bn_tcb1'])
    x2 = affine(conv(x, p['w_tcb2'], pad=(16, 15)), p['bn_tcb2'])
    x3 = affine(conv(x, p['w_tcb3'], pad=(8, 7)), p['bn_tcb3'])
    y = jnp.concatenate([x1, x2, x3], axis=1)
    y = affine(conv(y, p['w_fuse']), p['bn_fuse'])
    z = jnp.maximum(affine(conv(y, p['w_scb'], groups=8), p['bn_scb']), 0.0)   # (B,16,1,L)
    b_, c_, h_, w_ = z.shape
    z = z.reshape(b_, c_, h_, w_ // 4, 4).mean(-1)                              # AvgPool(1,4)
    zp = jnp.pad(z, ((0, 0), (0, 0), (0, 0), (7, 8)))
    d = conv(zp, p['w_dw'], groups=16)
    d = jnp.maximum(affine(conv(d, p['w_pw']), p['bn_ffcb']), 0.0)
    b_, c_, h_, w_ = d.shape
    d = d.reshape(b_, c_, h_, w_ // 8, 8).mean(-1)                              # AvgPool(1,8)
    o = conv(d, p['w_ccb'])                                                     # (B,C,1,L/32)
    return o.mean(axis=(2, 3))


if __name__ == "__main__":
    key = jax.random.PRNGKey(0)
    pkey, xkey = jax.random.split(key)
    classes_num = 4
    B, L = 2, 128                                  # small stand-in for (64, 1, 22, 1000)
    params = init_params(pkey, classes_num)
    x = jax.random.normal(xkey, (B, 1, NUM_EEG_CH, L), jnp.float32)

    out = jax.block_until_ready(lenet_forward(x, params))
    ref = jax.block_until_ready(ref_forward(x, params))

    assert out.shape == (B, classes_num)
    if not jnp.allclose(out, ref, rtol=2e-2, atol=2e-2):
        raise AssertionError("Pallas LENet output mismatch vs JAX reference")
    print("KERNEL_OK")
</pallas_src>

<mosaic_0001>
module attributes {stable_mosaic.version = 11 : i64} {
  func.func @_lenet_kernel(%arg0: i32, %arg1: memref<2x24x191xf32, #tpu.memory_space<vmem>>, %arg2: memref<16x1536xf32, #tpu.memory_space<vmem>>, %arg3: memref<16x1xf32, #tpu.memory_space<vmem>>, %arg4: memref<128x32xf32, #tpu.memory_space<vmem>>, %arg5: memref<16x16xf32, #tpu.memory_space<vmem>>, %arg6: memref<16x16xf32, #tpu.memory_space<vmem>>, %arg7: memref<16x1xf32, #tpu.memory_space<vmem>>, %arg8: memref<32x4xf32, #tpu.memory_space<vmem>>, %arg9: memref<4x16xf32, #tpu.memory_space<vmem>>, %arg10: memref<2x1x4xf32, #tpu.memory_space<vmem>>, %arg11: memref<1536x128xf32, #tpu.memory_space<vmem>>, %arg12: memref<16x47xf32, #tpu.memory_space<vmem>>) attributes {dimension_semantics = [#tpu.dimension_semantics<parallel>], iteration_bounds = array<i64: 1>, scalar_prefetch = 0 : i64, scratch_operands = 2 : i64, tpu.core_type = #tpu.core_type<tc>, window_params = [{transform_indices = @transform_0, window_bounds = array<i64: 2, 24, 191>}, {pipeline_mode = #tpu.pipeline_mode<synchronous>, transform_indices = @transform_1, window_bounds = array<i64: 16, 1536>}, {pipeline_mode = #tpu.pipeline_mode<synchronous>, transform_indices = @transform_2, window_bounds = array<i64: 16, 1>}, {pipeline_mode = #tpu.pipeline_mode<synchronous>, transform_indices = @transform_3, window_bounds = array<i64: 128, 32>}, {pipeline_mode = #tpu.pipeline_mode<synchronous>, transform_indices = @transform_4, window_bounds = array<i64: 16, 16>}, {pipeline_mode = #tpu.pipeline_mode<synchronous>, transform_indices = @transform_5, window_bounds = array<i64: 16, 16>}, {pipeline_mode = #tpu.pipeline_mode<synchronous>, transform_indices = @transform_6, window_bounds = array<i64: 16, 1>}, {pipeline_mode = #tpu.pipeline_mode<synchronous>, transform_indices = @transform_7, window_bounds = array<i64: 32, 4>}, {pipeline_mode = #tpu.pipeline_mode<synchronous>, transform_indices = @transform_8, window_bounds = array<i64: 4, 16>}, {transform_indices = @transform_9, window_bounds = array<i64: 2, 1, 4>}]} {
    %cst = arith.constant 0.000000e+00 : f32
    %0 = vector.broadcast %cst : f32 to vector<16x47xf32>
    %c0 = arith.constant 0 : index
    %c0_0 = arith.constant 0 : index
    %1 = vector.load %arg12[%c0, %c0_0] : memref<16x47xf32, #tpu.memory_space<vmem>>, vector<16x47xf32>
    tpu.vector_store %arg12[%c0, %c0_0], %0 {strides = array<i32>} : memref<16x47xf32, #tpu.memory_space<vmem>>, vector<16x47xf32>,
    %c0_1 = arith.constant 0 : index
    %c0_2 = arith.constant 0 : index
    %c0_3 = arith.constant 0 : index
    %2 = vector.load %arg1[%c0_1, %c0_2, %c0_3] : memref<2x24x191xf32, #tpu.memory_space<vmem>>, vector<1x24x128xf32>
    %3 = vector.shape_cast %2 : vector<1x24x128xf32> to vector<24x128xf32>
    %c0_4 = arith.constant 0 : index
    %c0_5 = arith.constant 0 : index
    %4 = vector.load %arg11[%c0_4, %c0_5] : memref<1536x128xf32, #tpu.memory_space<vmem>>, vector<24x128xf32>
    tpu.vector_store %arg11[%c0_4, %c0_5], %3 {strides = array<i32>} : memref<1536x128xf32, #tpu.memory_space<vmem>>, vector<24x128xf32>,
    %c0_6 = arith.constant 0 : index
    %c0_7 = arith.constant 0 : index
    %c1 = arith.constant 1 : index
    %5 = vector.load %arg1[%c0_6, %c0_7, %c1] : memref<2x24x191xf32, #tpu.memory_space<vmem>>, vector<1x24x128xf32>
    %6 = vector.shape_cast %5 : vector<1x24x128xf32> to vector<24x128xf32>
    %c24 = arith.constant 24 : index
    %c0_8 = arith.constant 0 : index
    %7 = vector.load %arg11[%c24, %c0_8] : memref<1536x128xf32, #tpu.memory_space<vmem>>, vector<24x128xf32>
    tpu.vector_store %arg11[%c24, %c0_8], %6 {strides = array<i32>} : memref<1536x128xf32, #tpu.memory_space<vmem>>, vector<24x128xf32>,
    %c0_9 = arith.constant 0 : index
    %c0_10 = arith.constant 0 : index
    %c2 = arith.constant 2 : index
    %8 = vector.load %arg1[%c0_9, %c0_10, %c2] : memref<2x24x191xf32, #tpu.memory_space<vmem>>, vector<1x24x128xf32>
    %9 = vector.shape_cast %8 : vector<1x24x128xf32> to vector<24x128xf32>
    %c48 = arith.constant 48 : index
    %c0_11 = arith.constant 0 : index
    %10 = vector.load %arg11[%c48, %c0_11] : memref<1536x128xf32, #tpu.memory_space<vmem>>, vector<24x128xf32>
    tpu.vector_store %arg11[%c48, %c0_11], %9 {strides = array<i32>} : memref<1536x128xf32, #tpu.memory_space<vmem>>, vector<24x128xf32>,
    %c0_12 = arith.constant 0 : index
    %c0_13 = arith.constant 0 : index
    %c3 = arith.constant 3 : index
    %11 = vector.load %arg1[%c0_12, %c0_13, %c3] : memref<2x24x191xf32, #tpu.memory_space<vmem>>, vector<1x24x128xf32>
    %12 = vector.shape_cast %11 : vector<1x24x128xf32> to vector<24x128xf32>
    %c72 = arith.constant 72 : index
    %c0_14 = arith.constant 0 : index
    %13 = vector.load %arg11[%c72, %c0_14] : memref<1536x128xf32, #tpu.memory_space<vmem>>, vector<24x128xf32>
    tpu.vector_store %arg11[%c72, %c0_14], %12 {strides = array<i32>} : memref<1536x128xf32, #tpu.memory_space<vmem>>, vector<24x128xf32>,
    %c0_15 = arith.constant 0 : index
    %c0_16 = arith.constant 0 : index
    %c4 = arith.constant 4 : index
    %14 = vector.load %arg1[%c0_15, %c0_16, %c4] : memref<2x24x191xf32, #tpu.memory_space<vmem>>, vector<1x24x128xf32>
    %15 = vector.shape_cast %14 : vector<1x24x128xf32> to vector<24x128xf32>
    %c96 = arith.constant 96 : index
    %c0_17 = arith.constant 0 : index
    %16 = vector.load %arg11[%c96, %c0_17] : memref<1536x128xf32, #tpu.memory_space<vmem>>, vector<24x128xf32>
    tpu.vector_store %arg11[%c96, %c0_17], %15 {strides = array<i32>} : memref<1536x128xf32, #tpu.memory_space<vmem>>, vector<24x128xf32>,
    %c0_18 = arith.constant 0 : index
    %c0_19 = arith.constant 0 : index
    %c5 = arith.constant 5 : index
    %17 = vector.load %arg1[%c0_18, %c0_19, %c5] : memref<2x24x191xf32, #tpu.memory_space<vmem>>, vector<1x24x128xf32>
    %18 = vector.shape_cast %17 : vector<1x24x128xf32> to vector<24x128xf32>
    %c120 = arith.constant 120 : index
    %c0_20 = arith.constant 0 : index
    %19 = vector.load %arg11[%c120, %c0_20] : memref<1536x128xf32, #tpu.memory_space<vmem>>, vector<24x128xf32>
    tpu.vector_store %arg11[%c120, %c0_20], %18 {strides = array<i32>} : memref<1536x128xf32, #tpu.memory_space<vmem>>, vector<24x128xf32>,
    %c0_21 = arith.constant 0 : index
    %c0_22 = arith.constant 0 : index
    %c6 = arith.constant 6 : index
    %20 = vector.load %arg1[%c0_21, %c0_22, %c6] : memref<2x24x191xf32, #tpu.memory_space<vmem>>, vector<1x24x128xf32>
    %21 = vector.shape_cast %20 : vector<1x24x128xf32> to vector<24x128xf32>
    %c144 = arith.constant 144 : index
    %c0_23 = arith.constant 0 : index
    %22 = vector.load %arg11[%c144, %c0_23] : memref<1536x128xf32, #tpu.memory_space<vmem>>, vector<24x128xf32>
    tpu.vector_store %arg11[%c144, %c0_23], %21 {strides = array<i32>} : memref<1536x128xf32, #tpu.memory_space<vmem>>, vector<24x128xf32>,
    %c0_24 = arith.constant 0 : index
    %c0_25 = arith.constant 0 : index
    %c7 = arith.constant 7 : index
    %23 = vector.load %arg1[%c0_24, %c0_25, %c7] : memref<2x24x191xf32, #tpu.memory_space<vmem>>, vector<1x24x128xf32>
    %24 = vector.shape_cast %23 : vector<1x24x128xf32> to vector<24x128xf32>
    %c168 = arith.constant 168 : index
    %c0_26 = arith.constant 0 : index
    %25 = vector.load %arg11[%c168, %c0_26] : memref<1536x128xf32, #tpu.memory_space<vmem>>, vector<24x128xf32>
    tpu.vector_store %arg11[%c168, %c0_26], %24 {strides = array<i32>} : memref<1536x128xf32, #tpu.memory_space<vmem>>, vector<24x128xf32>,
    %c0_27 = arith.constant 0 : index
    %c0_28 = arith.constant 0 : index
    %c8 = arith.constant 8 : index
    %26 = vector.load %arg1[%c0_27, %c0_28, %c8] : memref<2x24x191xf32, #tpu.memory_space<vmem>>, vector<1x24x128xf32>
    %27 = vector.shape_cast %26 : vector<1x24x128xf32> to vector<24x128xf32>
    %c192 = arith.constant 192 : index
    %c0_29 = arith.constant 0 : index
    %28 = vector.load %arg11[%c192, %c0_29] : memref<1536x128xf32, #tpu.memory_space<vmem>>, vector<24x128xf32>
    tpu.vector_store %arg11[%c192, %c0_29], %27 {strides = array<i32>} : memref<1536x128xf32, #tpu.memory_space<vmem>>, vector<24x128xf32>,
    %c0_30 = arith.constant 0 : index
    %c0_31 = arith.constant 0 : index
    %c9 = arith.constant 9 : index
    %29 = vector.load %arg1[%c0_30, %c0_31, %c9] : memref<2x24x191xf32, #tpu.memory_space<vmem>>, vector<1x24x128xf32>
    %30 = vector.shape_cast %29 : vector<1x24x128xf32> to vector<24x128xf32>
    %c216 = arith.constant 216 : index
    %c0_32 = arith.constant 0 : index
    %31 = vector.load %arg11[%c216, %c0_32] : memref<1536x128xf32, #tpu.memory_space<vmem>>, vector<24x128xf32>
    tpu.vector_store %arg11[%c216, %c0_32], %30 {strides = array<i32>} : memref<1536x128xf32, #tpu.memory_space<vmem>>, vector<24x128xf32>,
    %c0_33 = arith.constant 0 : index
    %c0_34 = arith.constant 0 : index
    %c10 = arith.constant 10 : index
    %32 = vector.load %arg1[%c0_33, %c0_34, %c10] : memref<2x24x191xf32, #tpu.memory_space<vmem>>, vector<1x24x128xf32>
    %33 = vector.shape_cast %32 : vector<1x24x128xf32> to vector<24x128xf32>
    %c240 = arith.constant 240 : index
    %c0_35 = arith.constant 0 : index
    %34 = vector.load %arg11[%c240, %c0_35] : memref<1536x128xf32, #tpu.memory_space<vmem>>, vector<24x128xf32>
    tpu.vector_store %arg11[%c240, %c0_35], %33 {strides = array<i32>} : memref<1536x128xf32, #tpu.memory_space<vmem>>, vector<24x128xf32>,
    %c0_36 = arith.constant 0 : index
    %c0_37 = arith.constant 0 : index
    %c11 = arith.constant 11 : index
    %35 = vector.load %arg1[%c0_36, %c0_37, %c11] : memref<2x24x191xf32, #tpu.memory_space<vmem>>, vector<1x24x128xf32>
    %36 = vector.shape_cast %35 : vector<1x24x128xf32> to vector<24x128xf32>
    %c264 = arith.constant 264 : index
    %c0_38 = arith.constant 0 : index
    %37 = vector.load %arg11[%c264, %c0_38] : memref<1536x128xf32, #tpu.memory_space<vmem>>, vector<24x128xf32>
    tpu.vector_store %arg11[%c264, %c0_38], %36 {strides = array<i32>} : memref<1536x128xf32, #tpu.memory_space<vmem>>, vector<24x128xf32>,
    %c0_39 = arith.constant 0 : index
    %c0_40 = arith.constant 0 : index
    %c12 = arith.constant 12 : index
    %38 = vector.load %arg1[%c0_39, %c0_40, %c12] : memref<2x24x191xf32, #tpu.memory_space<vmem>>, vector<1x24x128xf32>
    %39 = vector.shape_cast %38 : vector<1x24x128xf32> to vector<24x128xf32>
    %c288 = arith.constant 288 : index
    %c0_41 = arith.constant 0 : index
    %40 = vector.load %arg11[%c288, %c0_41] : memref<1536x128xf32, #tpu.memory_space<vmem>>, vector<24x128xf32>
    tpu.vector_store %arg11[%c288, %c0_41], %39 {strides = array<i32>} : memref<1536x128xf32, #tpu.memory_space<vmem>>, vector<24x128xf32>,
    %c0_42 = arith.constant 0 : index
    %c0_43 = arith.constant 0 : index
    %c13 = arith.constant 13 : index
    %41 = vector.load %arg1[%c0_42, %c0_43, %c13] : memref<2x24x191xf32, #tpu.memory_space<vmem>>, vector<1x24x128xf32>
    %42 = vector.shape_cast %41 : vector<1x24x128xf32> to vector<24x128xf32>
    %c312 = arith.constant 312 : index
    %c0_44 = arith.constant 0 : index
    %43 = vector.load %arg11[%c312, %c0_44] : memref<1536x128xf32, #tpu.memory_space<vmem>>, vector<24x128xf32>
    tpu.vector_store %arg11[%c312, %c0_44], %42 {strides = array<i32>} : memref<1536x128xf32, #tpu.memory_space<vmem>>, vector<24x128xf32>,
    %c0_45 = arith.constant 0 : index
    %c0_46 = arith.constant 0 : index
    %c14 = arith.constant 14 : index
    %44 = vector.load %arg1[%c0_45, %c0_46, %c14] : memref<2x24x191xf32, #tpu.memory_space<vmem>>, vector<1x24x128xf32>
    %45 = vector.shape_cast %44 : vector<1x24x128xf32> to vector<24x128xf32>
    %c336 = arith.constant 336 : index
    %c0_47 = arith.constant 0 : index
    %46 = vector.load %arg11[%c336, %c0_47] : memref<1536x128xf32, #tpu.memory_space<vmem>>, vector<24x128xf32>
    tpu.vector_store %arg11[%c336, %c0_47], %45 {strides = array<i32>} : memref<1536x128xf32, #tpu.memory_space<vmem>>, vector<24x128xf32>,
    %c0_48 = arith.constant 0 : index
    %c0_49 = arith.constant 0 : index
    %c15 = arith.constant 15 : index
    %47 = vector.load %arg1[%c0_48, %c0_49, %c15] : memref<2x24x191xf32, #tpu.memory_space<vmem>>, vector<1x24x128xf32>
    %48 = vector.shape_cast %47 : vector<1x24x128xf32> to vector<24x128xf32>
    %c360 = arith.constant 360 : index
    %c0_50 = arith.constant 0 : index
    %49 = vector.load %arg11[%c360, %c0_50] : memref<1536x128xf32, #tpu.memory_space<vmem>>, vector<24x128xf32>
    tpu.vector_store %arg11[%c360, %c0_50], %48 {strides = array<i32>} : memref<1536x128xf32, #tpu.memory_space<vmem>>, vector<24x128xf32>,
    %c0_51 = arith.constant 0 : index
    %c0_52 = arith.constant 0 : index
    %c16 = arith.constant 16 : index
    %50 = vector.load %arg1[%c0_51, %c0_52, %c16] : memref<2x24x191xf32, #tpu.memory_space<vmem>>, vector<1x24x128xf32>
    %51 = vector.shape_cast %50 : vector<1x24x128xf32> to vector<24x128xf32>
    %c384 = arith.constant 384 : index
    %c0_53 = arith.constant 0 : index
    %52 = vector.load %arg11[%c384, %c0_53] : memref<1536x128xf32, #tpu.memory_space<vmem>>, vector<24x128xf32>
    tpu.vector_store %arg11[%c384, %c0_53], %51 {strides = array<i32>} : memref<1536x128xf32, #tpu.memory_space<vmem>>, vector<24x128xf32>,
    %c0_54 = arith.constant 0 : index
    %c0_55 = arith.constant 0 : index
    %c17 = arith.constant 17 : index
    %53 = vector.load %arg1[%c0_54, %c0_55, %c17] : memref<2x24x191xf32, #tpu.memory_space<vmem>>, vector<1x24x128xf32>
    %54 = vector.shape_cast %53 : vector<1x24x128xf32> to vector<24x128xf32>
    %c408 = arith.constant 408 : index
    %c0_56 = arith.constant 0 : index
    %55 = vector.load %arg11[%c408, %c0_56] : memref<1536x128xf32, #tpu.memory_space<vmem>>, vector<24x128xf32>
    tpu.vector_store %arg11[%c408, %c0_56], %54 {strides = array<i32>} : memref<1536x128xf32, #tpu.memory_space<vmem>>, vector<24x128xf32>,
    %c0_57 = arith.constant 0 : index
    %c0_58 = arith.constant 0 : index
    %c18 = arith.constant 18 : index
    %56 = vector.load %arg1[%c0_57, %c0_58, %c18] : memref<2x24x191xf32, #tpu.memory_space<vmem>>, vector<1x24x128xf32>
    %57 = vector.shape_cast %56 : vector<1x24x128xf32> to vector<24x128xf32>
    %c432 = arith.constant 432 : index
    %c0_59 = arith.constant 0 : index
    %58 = vector.load %arg11[%c432, %c0_59] : memref<1536x128xf32, #tpu.memory_space<vmem>>, vector<24x128xf32>
    tpu.vector_store %arg11[%c432, %c0_59], %57 {strides = array<i32>} : memref<1536x128xf32, #tpu.memory_space<vmem>>, vector<24x128xf32>,
    %c0_60 = arith.constant 0 : index
    %c0_61 = arith.constant 0 : index
    %c19 = arith.constant 19 : index
    %59 = vector.load %arg1[%c0_60, %c0_61, %c19] : memref<2x24x191xf32, #tpu.memory_space<vmem>>, vector<1x24x128xf32>
    %60 = vector.shape_cast %59 : vector<1x24x128xf32> to vector<24x128xf32>
    %c456 = arith.constant 456 : index
    %c0_62 = arith.constant 0 : index
    %61 = vector.load %arg11[%c456, %c0_62] : memref<1536x128xf32, #tpu.memory_space<vmem>>, vector<24x128xf32>
    tpu.vector_store %arg11[%c456, %c0_62], %60 {strides = array<i32>} : memref<1536x128xf32, #tpu.memory_space<vmem>>, vector<24x128xf32>,
    %c0_63 = arith.constant 0 : index
    %c0_64 = arith.constant 0 : index
    %c20 = arith.constant 20 : index
    %62 = vector.load %arg1[%c0_63, %c0_64, %c20] : memref<2x24x191xf32, #tpu.memory_space<vmem>>, vector<1x24x128xf32>
    %63 = vector.shape_cast %62 : vector<1x24x128xf32> to vector<24x128xf32>
    %c480 = arith.constant 480 : index
    %c0_65 = arith.constant 0 : index
    %64 = vector.load %arg11[%c480, %c0_65] : memref<1536x128xf32, #tpu.memory_space<vmem>>, vector<24x128xf32>
    tpu.vector_store %arg11[%c480, %c0_65], %63 {strides = array<i32>} : memref<1536x128xf32, #tpu.memory_space<vmem>>, vector<24x128xf32>,
    %c0_66 = arith.constant 0 : index
    %c0_67 = arith.constant 0 : index
    %c21 = arith.constant 21 : index
    %65 = vector.load %arg1[%c0_66, %c0_67, %c21] : memref<2x24x191xf32, #tpu.memory_space<vmem>>, vector<1x24x128xf32>
    %66 = vector.shape_cast %65 : vector<1x24x128xf32> to vector<24x128xf32>
    %c504 = arith.constant 504 : index
    %c0_68 = arith.constant 0 : index
    %67 = vector.load %arg11[%c504, %c0_68] : memref<1536x128xf32, #tpu.memory_space<vmem>>, vector<24x128xf32>
    tpu.vector_store %arg11[%c504, %c0_68], %66 {strides = array<i32>} : memref<1536x128xf32, #tpu.memory_space<vmem>>, vector<24x128xf32>,
    %c0_69 = arith.constant 0 : index
    %c0_70 = arith.constant 0 : index
    %c22 = arith.constant 22 : index
    %68 = vector.load %arg1[%c0_69, %c0_70, %c22] : memref<2x24x191xf32, #tpu.memory_space<vmem>>, vector<1x24x128xf32>
    %69 = vector.shape_cast %68 : vector<1x24x128xf32> to vector<24x128xf32>
    %c528 = arith.constant 528 : index
    %c0_71 = arith.constant 0 : index
    %70 = vector.load %arg11[%c528, %c0_71] : memref<1536x128xf32, #tpu.memory_space<vmem>>, vector<24x128xf32>
    tpu.vector_store %arg11[%c528, %c0_71], %69 {strides = array<i32>} : memref<1536x128xf32, #tpu.memory_space<vmem>>, vector<24x128xf32>,
    %c0_72 = arith.constant 0 : index
    %c0_73 = arith.constant 0 : index
    %c23 = arith.constant 23 : index
    %71 = vector.load %arg1[%c0_72, %c0_73, %c23] : memref<2x24x191xf32, #tpu.memory_space<vmem>>, vector<1x24x128xf32>
    %72 = vector.shape_cast %71 : vector<1x24x128xf32> to vector<24x128xf32>
    %c552 = arith.constant 552 : index
    %c0_74 = arith.constant 0 : index
    %73 = vector.load %arg11[%c552, %c0_74] : memref<1536x128xf32, #tpu.memory_space<vmem>>, vector<24x128xf32>
    tpu.vector_store %arg11[%c552, %c0_74], %72 {strides = array<i32>} : memref<1536x128xf32, #tpu.memory_space<vmem>>, vector<24x128xf32>,
    %c0_75 = arith.constant 0 : index
    %c0_76 = arith.constant 0 : index
    %c24_77 = arith.constant 24 : index
    %74 = vector.load %arg1[%c0_75, %c0_76, %c24_77] : memref<2x24x191xf32, #tpu.memory_space<vmem>>, vector<1x24x128xf32>
    %75 = vector.shape_cast %74 : vector<1x24x128xf32> to vector<24x128xf32>
    %c576 = arith.constant 576 : index
    %c0_78 = arith.constant 0 : index
    %76 = vector.load %arg11[%c576, %c0_78] : memref<1536x128xf32, #tpu.memory_space<vmem>>, vector<24x128xf32>
    tpu.vector_store %arg11[%c576, %c0_78], %75 {strides = array<i32>} : memref<1536x128xf32, #tpu.memory_space<vmem>>, vector<24x128xf32>,
    %c0_79 = arith.constant 0 : index
    %c0_80 = arith.constant 0 : index
    %c25 = arith.constant 25 : index
    %77 = vector.load %arg1[%c0_79, %c0_80, %c25] : memref<2x24x191xf32, #tpu.memory_space<vmem>>, vector<1x24x128xf32>
    %78 = vector.shape_cast %77 : vector<1x24x128xf32> to vector<24x128xf32>
    %c600 = arith.constant 600 : index
    %c0_81 = arith.constant 0 : index
    %79 = vector.load %arg11[%c600, %c0_81] : memref<1536x128xf32, #tpu.memory_space<vmem>>, vector<24x128xf32>
    tpu.vector_store %arg11[%c600, %c0_81], %78 {strides = array<i32>} : memref<1536x128xf32, #tpu.memory_space<vmem>>, vector<24x128xf32>,
    %c0_82 = arith.constant 0 : index
    %c0_83 = arith.constant 0 : index
    %c26 = arith.constant 26 : index
    %80 = vector.load %arg1[%c0_82, %c0_83, %c26] : memref<2x24x191xf32, #tpu.memory_space<vmem>>, vector<1x24x128xf32>
    %81 = vector.shape_cast %80 : vector<1x24x128xf32> to vector<24x128xf32>
    %c624 = arith.constant 624 : index
    %c0_84 = arith.constant 0 : index
    %82 = vector.load %arg11[%c624, %c0_84] : memref<1536x128xf32, #tpu.memory_space<vmem>>, vector<24x128xf32>
    tpu.vector_store %arg11[%c624, %c0_84], %81 {strides = array<i32>} : memref<1536x128xf32, #tpu.memory_space<vmem>>, vector<24x128xf32>,
    %c0_85 = arith.constant 0 : index
    %c0_86 = arith.constant 0 : index
    %c27 = arith.constant 27 : index
    %83 = vector.load %arg1[%c0_85, %c0_86, %c27] : memref<2x24x191xf32, #tpu.memory_space<vmem>>, vector<1x24x128xf32>
    %84 = vector.shape_cast %83 : vector<1x24x128xf32> to vector<24x128xf32>
    %c648 = arith.constant 648 : index
    %c0_87 = arith.constant 0 : index
    %85 = vector.load %arg11[%c648, %c0_87] : memref<1536x128xf32, #tpu.memory_space<vmem>>, vector<24x128xf32>
    tpu.vector_store %arg11[%c648, %c0_87], %84 {strides = array<i32>} : memref<1536x128xf32, #tpu.memory_space<vmem>>, vector<24x128xf32>,
    %c0_88 = arith.constant 0 : index
    %c0_89 = arith.constant 0 : index
    %c28 = arith.constant 28 : index
    %86 = vector.load %arg1[%c0_88, %c0_89, %c28] : memref<2x24x191xf32, #tpu.memory_space<vmem>>, vector<1x24x128xf32>
    %87 = vector.shape_cast %86 : vector<1x24x128xf32> to vector<24x128xf32>
    %c672 = arith.constant 672 : index
    %c0_90 = arith.constant 0 : index
    %88 = vector.load %arg11[%c672, %c0_90] : memref<1536x128xf32, #tpu.memory_space<vmem>>, vector<24x128xf32>
    tpu.vector_store %arg11[%c672, %c0_90], %87 {strides = array<i32>} : memref<1536x128xf32, #tpu.memory_space<vmem>>, vector<24x128xf32>,
    %c0_91 = arith.constant 0 : index
    %c0_92 = arith.constant 0 : index
    %c29 = arith.constant 29 : index
    %89 = vector.load %arg1[%c0_91, %c0_92, %c29] : memref<2x24x191xf32, #tpu.memory_space<vmem>>, vector<1x24x128xf32>
    %90 = vector.shape_cast %89 : vector<1x24x128xf32> to vector<24x128xf32>
    %c696 = arith.constant 696 : index
    %c0_93 = arith.constant 0 : index
    %91 = vector.load %arg11[%c696, %c0_93] : memref<1536x128xf32, #tpu.memory_space<vmem>>, vector<24x128xf32>
    tpu.vector_store %arg11[%c696, %c0_93], %90 {strides = array<i32>} : memref<1536x128xf32, #tpu.memory_space<vmem>>, vector<24x128xf32>,
    %c0_94 = arith.constant 0 : index
    %c0_95 = arith.constant 0 : index
    %c30 = arith.constant 30 : index
    %92 = vector.load %arg1[%c0_94, %c0_95, %c30] : memref<2x24x191xf32, #tpu.memory_space<vmem>>, vector<1x24x128xf32>
    %93 = vector.shape_cast %92 : vector<1x24x128xf32> to vector<24x128xf32>
    %c720 = arith.constant 720 : index
    %c0_96 = arith.constant 0 : index
    %94 = vector.load %arg11[%c720, %c0_96] : memref<1536x128xf32, #tpu.memory_space<vmem>>, vector<24x128xf32>
    tpu.vector_store %arg11[%c720, %c0_96], %93 {strides = array<i32>} : memref<1536x128xf32, #tpu.memory_space<vmem>>, vector<24x128xf32>,
    %c0_97 = arith.constant 0 : index
    %c0_98 = arith.constant 0 : index
    %c31 = arith.constant 31 : index
    %95 = vector.load %arg1[%c0_97, %c0_98, %c31] : memref<2x24x191xf32, #tpu.memory_space<vmem>>, vector<1x24x128xf32>
    %96 = vector.shape_cast %95 : vector<1x24x128xf32> to vector<24x128xf32>
    %c744 = arith.constant 744 : index
    %c0_99 = arith.constant 0 : index
    %97 = vector.load %arg11[%c744, %c0_99] : memref<1536x128xf32, #tpu.memory_space<vmem>>, vector<24x128xf32>
    tpu.vector_store %arg11[%c744, %c0_99], %96 {strides = array<i32>} : memref<1536x128xf32, #tpu.memory_space<vmem>>, vector<24x128xf32>,
    %c0_100 = arith.constant 0 : index
    %c0_101 = arith.constant 0 : index
    %c32 = arith.constant 32 : index
    %98 = vector.load %arg1[%c0_100, %c0_101, %c32] : memref<2x24x191xf32, #tpu.memory_space<vmem>>, vector<1x24x128xf32>
    %99 = vector.shape_cast %98 : vector<1x24x128xf32> to vector<24x128xf32>
    %c768 = arith.constant 768 : index
    %c0_102 = arith.constant 0 : index
    %100 = vector.load %arg11[%c768, %c0_102] : memref<1536x128xf32, #tpu.memory_space<vmem>>, vector<24x128xf32>
    tpu.vector_store %arg11[%c768, %c0_102], %99 {strides = array<i32>} : memref<1536x128xf32, #tpu.memory_space<vmem>>, vector<24x128xf32>,
    %c0_103 = arith.constant 0 : index
    %c0_104 = arith.constant 0 : index
    %c33 = arith.constant 33 : index
    %101 = vector.load %arg1[%c0_103, %c0_104, %c33] : memref<2x24x191xf32, #tpu.memory_space<vmem>>, vector<1x24x128xf32>
    %102 = vector.shape_cast %101 : vector<1x24x128xf32> to vector<24x128xf32>
    %c792 = arith.constant 792 : index
    %c0_105 = arith.constant 0 : index
    %103 = vector.load %arg11[%c792, %c0_105] : memref<1536x128xf32, #tpu.memory_space<vmem>>, vector<24x128xf32>
    tpu.vector_store %arg11[%c792, %c0_105], %102 {strides = array<i32>} : memref<1536x128xf32, #tpu.memory_space<vmem>>, vector<24x128xf32>,
    %c0_106 = arith.constant 0 : index
    %c0_107 = arith.constant 0 : index
    %c34 = arith.constant 34 : index
    %104 = vector.load %arg1[%c0_106, %c0_107, %c34] : memref<2x24x191xf32, #tpu.memory_space<vmem>>, vector<1x24x128xf32>
    %105 = vector.shape_cast %104 : vector<1x24x128xf32> to vector<24x128xf32>
    %c816 = arith.constant 816 : index
    %c0_108 = arith.constant 0 : index
    %106 = vector.load %arg11[%c816, %c0_108] : memref<1536x128xf32, #tpu.memory_space<vmem>>, vector<24x128xf32>
    tpu.vector_store %arg11[%c816, %c0_108], %105 {strides = array<i32>} : memref<1536x128xf32, #tpu.memory_space<vmem>>, vector<24x128xf32>,
    %c0_109 = arith.constant 0 : index
    %c0_110 = arith.constant 0 : index
    %c35 = arith.constant 35 : index
    %107 = vector.load %arg1[%c0_109, %c0_110, %c35] : memref<2x24x191xf32, #tpu.memory_space<vmem>>, vector<1x24x128xf32>
    %108 = vector.shape_cast %107 : vector<1x24x128xf32> to vector<24x128xf32>
    %c840 = arith.constant 840 : index
    %c0_111 = arith.constant 0 : index
    %109 = vector.load %arg11[%c840, %c0_111] : memref<1536x128xf32, #tpu.memory_space<vmem>>, vector<24x128xf32>
    tpu.vector_store %arg11[%c840, %c0_111], %108 {strides = array<i32>} : memref<1536x128xf32, #tpu.memory_space<vmem>>, vector<24x128xf32>,
    %c0_112 = arith.constant 0 : index
    %c0_113 = arith.constant 0 : index
    %c36 = arith.constant 36 : index
    %110 = vector.load %arg1[%c0_112, %c0_113, %c36] : memref<2x24x191xf32, #tpu.memory_space<vmem>>, vector<1x24x128xf32>
    %111 = vector.shape_cast %110 : vector<1x24x128xf32> to vector<24x128xf32>
    %c864 = arith.constant 864 : index
    %c0_114 = arith.constant 0 : index
    %112 = vector.load %arg11[%c864, %c0_114] : memref<1536x128xf32, #tpu.memory_space<vmem>>, vector<24x128xf32>
    tpu.vector_store %arg11[%c864, %c0_114], %111 {strides = array<i32>} : memref<1536x128xf32, #tpu.memory_space<vmem>>, vector<24x128xf32>,
    %c0_115 = arith.constant 0 : index
    %c0_116 = arith.constant 0 : index
    %c37 = arith.constant 37 : index
    %113 = vector.load %arg1[%c0_115, %c0_116, %c37] : memref<2x24x191xf32, #tpu.memory_space<vmem>>, vector<1x24x128xf32>
    %114 = vector.shape_cast %113 : vector<1x24x128xf32> to vector<24x128xf32>
    %c888 = arith.constant 888 : index
    %c0_117 = arith.constant 0 : index
    %115 = vector.load %arg11[%c888, %c0_117] : memref<1536x128xf32, #tpu.memory_space<vmem>>, vector<24x128xf32>
    tpu.vector_store %arg11[%c888, %c0_117], %114 {strides = array<i32>} : memref<1536x128xf32, #tpu.memory_space<vmem>>, vector<24x128xf32>,
    %c0_118 = arith.constant 0 : index
    %c0_119 = arith.constant 0 : index
    %c38 = arith.constant 38 : index
    %116 = vector.load %arg1[%c0_118, %c0_119, %c38] : memref<2x24x191xf32, #tpu.memory_space<vmem>>, vector<1x24x128xf32>
    %117 = vector.shape_cast %116 : vector<1x24x128xf32> to vector<24x128xf32>
    %c912 = arith.constant 912 : index
    %c0_120 = arith.constant 0 : index
    %118 = vector.load %arg11[%c912, %c0_120] : memref<1536x128xf32, #tpu.memory_space<vmem>>, vector<24x128xf32>
    tpu.vector_store %arg11[%c912, %c0_120], %117 {strides = array<i32>} : memref<1536x128xf32, #tpu.memory_space<vmem>>, vector<24x128xf32>,
    %c0_121 = arith.constant 0 : index
    %c0_122 = arith.constant 0 : index
    %c39 = arith.constant 39 : index
    %119 = vector.load %arg1[%c0_121, %c0_122, %c39] : memref<2x24x191xf32, #tpu.memory_space<vmem>>, vector<1x24x128xf32>
    %120 = vector.shape_cast %119 : vector<1x24x128xf32> to vector<24x128xf32>
    %c936 = arith.constant 936 : index
    %c0_123 = arith.constant 0 : index
    %121 = vector.load %arg11[%c936, %c0_123] : memref<1536x128xf32, #tpu.memory_space<vmem>>, vector<24x128xf32>
    tpu.vector_store %arg11[%c936, %c0_123], %120 {strides = array<i32>} : memref<1536x128xf32, #tpu.memory_space<vmem>>, vector<24x128xf32>,
    %c0_124 = arith.constant 0 : index
    %c0_125 = arith.constant 0 : index
    %c40 = arith.constant 40 : index
    %122 = vector.load %arg1[%c0_124, %c0_125, %c40] : memref<2x24x191xf32, #tpu.memory_space<vmem>>, vector<1x24x128xf32>
    %123 = vector.shape_cast %122 : vector<1x24x128xf32> to vector<24x128xf32>
    %c960 = arith.constant 960 : index
    %c0_126 = arith.constant 0 : index
    %124 = vector.load %arg11[%c960, %c0_126] : memref<1536x128xf32, #tpu.memory_space<vmem>>, vector<24x128xf32>
    tpu.vector_store %arg11[%c960, %c0_126], %123 {strides = array<i32>} : memref<1536x128xf32, #tpu.memory_space<vmem>>, vector<24x128xf32>,
    %c0_127 = arith.constant 0 : index
    %c0_128 = arith.constant 0 : index
    %c41 = arith.constant 41 : index
    %125 = vector.load %arg1[%c0_127, %c0_128, %c41] : memref<2x24x191xf32, #tpu.memory_space<vmem>>, vector<1x24x128xf32>
    %126 = vector.shape_cast %125 : vector<1x24x128xf32> to vector<24x128xf32>
    %c984 = arith.constant 984 : index
    %c0_129 = arith.constant 0 : index
    %127 = vector.load %arg11[%c984, %c0_129] : memref<1536x128xf32, #tpu.memory_space<vmem>>, vector<24x128xf32>
    tpu.vector_store %arg11[%c984, %c0_129], %126 {strides = array<i32>} : memref<1536x128xf32, #tpu.memory_space<vmem>>, vector<24x128xf32>,
    %c0_130 = arith.constant 0 : index
    %c0_131 = arith.constant 0 : index
    %c42 = arith.constant 42 : index
    %128 = vector.load %arg1[%c0_130, %c0_131, %c42] : memref<2x24x191xf32, #tpu.memory_space<vmem>>, vector<1x24x128xf32>
    %129 = vector.shape_cast %128 : vector<1x24x128xf32> to vector<24x128xf32>
    %c1008 = arith.constant 1008 : index
    %c0_132 = arith.constant 0 : index
    %130 = vector.load %arg11[%c1008, %c0_132] : memref<1536x128xf32, #tpu.memory_space<vmem>>, vector<24x128xf32>
    tpu.vector_store %arg11[%c1008, %c0_132], %129 {strides = array<i32>} : memref<1536x128xf32, #tpu.memory_space<vmem>>, vector<24x128xf32>,
    %c0_133 = arith.constant 0 : index
    %c0_134 = arith.constant 0 : index
    %c43 = arith.constant 43 : index
    %131 = vector.load %arg1[%c0_133, %c0_134, %c43] : memref<2x24x191xf32, #tpu.memory_space<vmem>>, vector<1x24x128xf32>
    %132 = vector.shape_cast %131 : vector<1x24x128xf32> to vector<24x128xf32>
    %c1032 = arith.constant 1032 : index
    %c0_135 = arith.constant 0 : index
    %133 = vector.load %arg11[%c1032, %c0_135] : memref<1536x128xf32, #tpu.memory_space<vmem>>, vector<24x128xf32>
    tpu.vector_store %arg11[%c1032, %c0_135], %132 {strides = array<i32>} : memref<1536x128xf32, #tpu.memory_space<vmem>>, vector<24x128xf32>,
    %c0_136 = arith.constant 0 : index
    %c0_137 = arith.constant 0 : index
    %c44 = arith.constant 44 : index
    %134 = vector.load %arg1[%c0_136, %c0_137, %c44] : memref<2x24x191xf32, #tpu.memory_space<vmem>>, vector<1x24x128xf32>
    %135 = vector.shape_cast %134 : vector<1x24x128xf32> to vector<24x128xf32>
    %c1056 = arith.constant 1056 : index
    %c0_138 = arith.constant 0 : index
    %136 = vector.load %arg11[%c1056, %c0_138] : memref<1536x128xf32, #tpu.memory_space<vmem>>, vector<24x128xf32>
    tpu.vector_store %arg11[%c1056, %c0_138], %135 {strides = array<i32>} : memref<1536x128xf32, #tpu.memory_space<vmem>>, vector<24x128xf32>,
    %c0_139 = arith.constant 0 : index
    %c0_140 = arith.constant 0 : index
    %c45 = arith.constant 45 : index
    %137 = vector.load %arg1[%c0_139, %c0_140, %c45] : memref<2x24x191xf32, #tpu.memory_space<vmem>>, vector<1x24x128xf32>
    %138 = vector.shape_cast %137 : vector<1x24x128xf32> to vector<24x128xf32>
    %c1080 = arith.constant 1080 : index
    %c0_141 = arith.constant 0 : index
    %139 = vector.load %arg11[%c1080, %c0_141] : memref<1536x128xf32, #tpu.memory_space<vmem>>, vector<24x128xf32>
    tpu.vector_store %arg11[%c1080, %c0_141], %138 {strides = array<i32>} : memref<1536x128xf32, #tpu.memory_space<vmem>>, vector<24x128xf32>,
    %c0_142 = arith.constant 0 : index
    %c0_143 = arith.constant 0 : index
    %c46 = arith.constant 46 : index
    %140 = vector.load %arg1[%c0_142, %c0_143, %c46] : memref<2x24x191xf32, #tpu.memory_space<vmem>>, vector<1x24x128xf32>
    %141 = vector.shape_cast %140 : vector<1x24x128xf32> to vector<24x128xf32>
    %c1104 = arith.constant 1104 : index
    %c0_144 = arith.constant 0 : index
    %142 = vector.load %arg11[%c1104, %c0_144] : memref<1536x128xf32, #tpu.memory_space<vmem>>, vector<24x128xf32>
    tpu.vector_store %arg11[%c1104, %c0_144], %141 {strides = array<i32>} : memref<1536x128xf32, #tpu.memory_space<vmem>>, vector<24x128xf32>,
    %c0_145 = arith.constant 0 : index
    %c0_146 = arith.constant 0 : index
    %c47 = arith.constant 47 : index
    %143 = vector.load %arg1[%c0_145, %c0_146, %c47] : memref<2x24x191xf32, #tpu.memory_space<vmem>>, vector<1x24x128xf32>
    %144 = vector.shape_cast %143 : vector<1x24x128xf32> to vector<24x128xf32>
    %c1128 = arith.constant 1128 : index
    %c0_147 = arith.constant 0 : index
    %145 = vector.load %arg11[%c1128, %c0_147] : memref<1536x128xf32, #tpu.memory_space<vmem>>, vector<24x128xf32>
    tpu.vector_store %arg11[%c1128, %c0_147], %144 {strides = array<i32>} : memref<1536x128xf32, #tpu.memory_space<vmem>>, vector<24x128xf32>,
    %c0_148 = arith.constant 0 : index
    %c0_149 = arith.constant 0 : index
    %c48_150 = arith.constant 48 : index
    %146 = vector.load %arg1[%c0_148, %c0_149, %c48_150] : memref<2x24x191xf32, #tpu.memory_space<vmem>>, vector<1x24x128xf32>
    %147 = vector.shape_cast %146 : vector<1x24x128xf32> to vector<24x128xf32>
    %c1152 = arith.constant 1152 : index
    %c0_151 = arith.constant 0 : index
    %148 = vector.load %arg11[%c1152, %c0_151] : memref<1536x128xf32, #tpu.memory_space<vmem>>, vector<24x128xf32>
    tpu.vector_store %arg11[%c1152, %c0_151], %147 {strides = array<i32>} : memref<1536x128xf32, #tpu.memory_space<vmem>>, vector<24x128xf32>,
    %c0_152 = arith.constant 0 : index
    %c0_153 = arith.constant 0 : index
    %c49 = arith.constant 49 : index
    %149 = vector.load %arg1[%c0_152, %c0_153, %c49] : memref<2x24x191xf32, #tpu.memory_space<vmem>>, vector<1x24x128xf32>
    %150 = vector.shape_cast %149 : vector<1x24x128xf32> to vector<24x128xf32>
    %c1176 = arith.constant 1176 : index
    %c0_154 = arith.constant 0 : index
    %151 = vector.load %arg11[%c1176, %c0_154] : memref<1536x128xf32, #tpu.memory_space<vmem>>, vector<24x128xf32>
    tpu.vector_store %arg11[%c1176, %c0_154], %150 {strides = array<i32>} : memref<1536x128xf32, #tpu.memory_space<vmem>>, vector<24x128xf32>,
    %c0_155 = arith.constant 0 : index
    %c0_156 = arith.constant 0 : index
    %c50 = arith.constant 50 : index
    %152 = vector.load %arg1[%c0_155, %c0_156, %c50] : memref<2x24x191xf32, #tpu.memory_space<vmem>>, vector<1x24x128xf32>
    %153 = vector.shape_cast %152 : vector<1x24x128xf32> to vector<24x128xf32>
    %c1200 = arith.constant 1200 : index
    %c0_157 = arith.constant 0 : index
    %154 = vector.load %arg11[%c1200, %c0_157] : memref<1536x128xf32, #tpu.memory_space<vmem>>, vector<24x128xf32>
    tpu.vector_store %arg11[%c1200, %c0_157], %153 {strides = array<i32>} : memref<1536x128xf32, #tpu.memory_space<vmem>>, vector<24x128xf32>,
    %c0_158 = arith.constant 0 : index
    %c0_159 = arith.constant 0 : index
    %c51 = arith.constant 51 : index
    %155 = vector.load %arg1[%c0_158, %c0_159, %c51] : memref<2x24x191xf32, #tpu.memory_space<vmem>>, vector<1x24x128xf32>
    %156 = vector.shape_cast %155 : vector<1x24x128xf32> to vector<24x128xf32>
    %c1224 = arith.constant 1224 : index
    %c0_160 = arith.constant 0 : index
    %157 = vector.load %arg11[%c1224, %c0_160] : memref<1536x128xf32, #tpu.memory_space<vmem>>, vector<24x128xf32>
    tpu.vector_store %arg11[%c1224, %c0_160], %156 {strides = array<i32>} : memref<1536x128xf32, #tpu.memory_space<vmem>>, vector<24x128xf32>,
    %c0_161 = arith.constant 0 : index
    %c0_162 = arith.constant 0 : index
    %c52 = arith.constant 52 : index
    %158 = vector.load %arg1[%c0_161, %c0_162, %c52] : memref<2x24x191xf32, #tpu.memory_space<vmem>>, vector<1x24x128xf32>
    %159 = vector.shape_cast %158 : vector<1x24x128xf32> to vector<24x128xf32>
    %c1248 = arith.constant 1248 : index
    %c0_163 = arith.constant 0 : index
    %160 = vector.load %arg11[%c1248, %c0_163] : memref<1536x128xf32, #tpu.memory_space<vmem>>, vector<24x128xf32>
    tpu.vector_store %arg11[%c1248, %c0_163], %159 {strides = array<i32>} : memref<1536x128xf32, #tpu.memory_space<vmem>>, vector<24x128xf32>,
    %c0_164 = arith.constant 0 : index
    %c0_165 = arith.constant 0 : index
    %c53 = arith.constant 53 : index
    %161 = vector.load %arg1[%c0_164, %c0_165, %c53] : memref<2x24x191xf32, #tpu.memory_space<vmem>>, vector<1x24x128xf32>
    %162 = vector.shape_cast %161 : vector<1x24x128xf32> to vector<24x128xf32>
    %c1272 = arith.constant 1272 : index
    %c0_166 = arith.constant 0 : index
    %163 = vector.load %arg11[%c1272, %c0_166] : memref<1536x128xf32, #tpu.memory_space<vmem>>, vector<24x128xf32>
    tpu.vector_store %arg11[%c1272, %c0_166], %162 {strides = array<i32>} : memref<1536x128xf32, #tpu.memory_space<vmem>>, vector<24x128xf32>,
    %c0_167 = arith.constant 0 : index
    %c0_168 = arith.constant 0 : index
    %c54 = arith.constant 54 : index
    %164 = vector.load %arg1[%c0_167, %c0_168, %c54] : memref<2x24x191xf32, #tpu.memory_space<vmem>>, vector<1x24x128xf32>
    %165 = vector.shape_cast %164 : vector<1x24x128xf32> to vector<24x128xf32>
    %c1296 = arith.constant 1296 : index
    %c0_169 = arith.constant 0 : index
    %166 = vector.load %arg11[%c1296, %c0_169] : memref<1536x128xf32, #tpu.memory_space<vmem>>, vector<24x128xf32>
    tpu.vector_store %arg11[%c1296, %c0_169], %165 {strides = array<i32>} : memref<1536x128xf32, #tpu.memory_space<vmem>>, vector<24x128xf32>,
    %c0_170 = arith.constant 0 : index
    %c0_171 = arith.constant 0 : index
    %c55 = arith.constant 55 : index
    %167 = vector.load %arg1[%c0_170, %c0_171, %c55] : memref<2x24x191xf32, #tpu.memory_space<vmem>>, vector<1x24x128xf32>
    %168 = vector.shape_cast %167 : vector<1x24x128xf32> to vector<24x128xf32>
    %c1320 = arith.constant 1320 : index
    %c0_172 = arith.constant 0 : index
    %169 = vector.load %arg11[%c1320, %c0_172] : memref<1536x128xf32, #tpu.memory_space<vmem>>, vector<24x128xf32>
    tpu.vector_store %arg11[%c1320, %c0_172], %168 {strides = array<i32>} : memref<1536x128xf32, #tpu.memory_space<vmem>>, vector<24x128xf32>,
    %c0_173 = arith.constant 0 : index
    %c0_174 = arith.constant 0 : index
    %c56 = arith.constant 56 : index
    %170 = vector.load %arg1[%c0_173, %c0_174, %c56] : memref<2x24x191xf32, #tpu.memory_space<vmem>>, vector<1x24x128xf32>
    %171 = vector.shape_cast %170 : vector<1x24x128xf32> to vector<24x128xf32>
    %c1344 = arith.constant 1344 : index
    %c0_175 = arith.constant 0 : index
    %172 = vector.load %arg11[%c1344, %c0_175] : memref<1536x128xf32, #tpu.memory_space<vmem>>, vector<24x128xf32>
    tpu.vector_store %arg11[%c1344, %c0_175], %171 {strides = array<i32>} : memref<1536x128xf32, #tpu.memory_space<vmem>>, vector<24x128xf32>,
    %c0_176 = arith.constant 0 : index
    %c0_177 = arith.constant 0 : index
    %c57 = arith.constant 57 : index
    %173 = vector.load %arg1[%c0_176, %c0_177, %c57] : memref<2x24x191xf32, #tpu.memory_space<vmem>>, vector<1x24x128xf32>
    %174 = vector.shape_cast %173 : vector<1x24x128xf32> to vector<24x128xf32>
    %c1368 = arith.constant 1368 : index
    %c0_178 = arith.constant 0 : index
    %175 = vector.load %arg11[%c1368, %c0_178] : memref<1536x128xf32, #tpu.memory_space<vmem>>, vector<24x128xf32>
    tpu.vector_store %arg11[%c1368, %c0_178], %174 {strides = array<i32>} : memref<1536x128xf32, #tpu.memory_space<vmem>>, vector<24x128xf32>,
    %c0_179 = arith.constant 0 : index
    %c0_180 = arith.constant 0 : index
    %c58 = arith.constant 58 : index
    %176 = vector.load %arg1[%c0_179, %c0_180, %c58] : memref<2x24x191xf32, #tpu.memory_space<vmem>>, vector<1x24x128xf32>
    %177 = vector.shape_cast %176 : vector<1x24x128xf32> to vector<24x128xf32>
    %c1392 = arith.constant 1392 : index
    %c0_181 = arith.constant 0 : index
    %178 = vector.load %arg11[%c1392, %c0_181] : memref<1536x128xf32, #tpu.memory_space<vmem>>, vector<24x128xf32>
    tpu.vector_store %arg11[%c1392, %c0_181], %177 {strides = array<i32>} : memref<1536x128xf32, #tpu.memory_space<vmem>>, vector<24x128xf32>,
    %c0_182 = arith.constant 0 : index
    %c0_183 = arith.constant 0 : index
    %c59 = arith.constant 59 : index
    %179 = vector.load %arg1[%c0_182, %c0_183, %c59] : memref<2x24x191xf32, #tpu.memory_space<vmem>>, vector<1x24x128xf32>
    %180 = vector.shape_cast %179 : vector<1x24x128xf32> to vector<24x128xf32>
    %c1416 = arith.constant 1416 : index
    %c0_184 = arith.constant 0 : index
    %181 = vector.load %arg11[%c1416, %c0_184] : memref<1536x128xf32, #tpu.memory_space<vmem>>, vector<24x128xf32>
    tpu.vector_store %arg11[%c1416, %c0_184], %180 {strides = array<i32>} : memref<1536x128xf32, #tpu.memory_space<vmem>>, vector<24x128xf32>,
    %c0_185 = arith.constant 0 : index
    %c0_186 = arith.constant 0 : index
    %c60 = arith.constant 60 : index
    %182 = vector.load %arg1[%c0_185, %c0_186, %c60] : memref<2x24x191xf32, #tpu.memory_space<vmem>>, vector<1x24x128xf32>
    %183 = vector.shape_cast %182 : vector<1x24x128xf32> to vector<24x128xf32>
    %c1440 = arith.constant 1440 : index
    %c0_187 = arith.constant 0 : index
    %184 = vector.load %arg11[%c1440, %c0_187] : memref<1536x128xf32, #tpu.memory_space<vmem>>, vector<24x128xf32>
    tpu.vector_store %arg11[%c1440, %c0_187], %183 {strides = array<i32>} : memref<1536x128xf32, #tpu.memory_space<vmem>>, vector<24x128xf32>,
    %c0_188 = arith.constant 0 : index
    %c0_189 = arith.constant 0 : index
    %c61 = arith.constant 61 : index
    %185 = vector.load %arg1[%c0_188, %c0_189, %c61] : memref<2x24x191xf32, #tpu.memory_space<vmem>>, vector<1x24x128xf32>
    %186 = vector.shape_cast %185 : vector<1x24x128xf32> to vector<24x128xf32>
    %c1464 = arith.constant 1464 : index
    %c0_190 = arith.constant 0 : index
    %187 = vector.load %arg11[%c1464, %c0_190] : memref<1536x128xf32, #tpu.memory_space<vmem>>, vector<24x128xf32>
    tpu.vector_store %arg11[%c1464, %c0_190], %186 {strides = array<i32>} : memref<1536x128xf32, #tpu.memory_space<vmem>>, vector<24x128xf32>,
    %c0_191 = arith.constant 0 : index
    %c0_192 = arith.constant 0 : index
    %c62 = arith.constant 62 : index
    %188 = vector.load %arg1[%c0_191, %c0_192, %c62] : memref<2x24x191xf32, #tpu.memory_space<vmem>>, vector<1x24x128xf32>
    %189 = vector.shape_cast %188 : vector<1x24x128xf32> to vector<24x128xf32>
    %c1488 = arith.constant 1488 : index
    %c0_193 = arith.constant 0 : index
    %190 = vector.load %arg11[%c1488, %c0_193] : memref<1536x128xf32, #tpu.memory_space<vmem>>, vector<24x128xf32>
    tpu.vector_store %arg11[%c1488, %c0_193], %189 {strides = array<i32>} : memref<1536x128xf32, #tpu.memory_space<vmem>>, vector<24x128xf32>,
    %c0_194 = arith.constant 0 : index
    %c0_195 = arith.constant 0 : index
    %c63 = arith.constant 63 : index
    %191 = vector.load %arg1[%c0_194, %c0_195, %c63] : memref<2x24x191xf32, #tpu.memory_space<vmem>>, vector<1x24x128xf32>
    %192 = vector.shape_cast %191 : vector<1x24x128xf32> to vector<24x128xf32>
    %c1512 = arith.constant 1512 : index
    %c0_196 = arith.constant 0 : index
    %193 = vector.load %arg11[%c1512, %c0_196] : memref<1536x128xf32, #tpu.memory_space<vmem>>, vector<24x128xf32>
    tpu.vector_store %arg11[%c1512, %c0_196], %192 {strides = array<i32>} : memref<1536x128xf32, #tpu.memory_space<vmem>>, vector<24x128xf32>,
    %c0_197 = arith.constant 0 : index
    %c0_198 = arith.constant 0 : index
    %194 = vector.load %arg2[%c0_197, %c0_198] : memref<16x1536xf32, #tpu.memory_space<vmem>>, vector<16x1536xf32>
    %c0_199 = arith.constant 0 : index
    %c0_200 = arith.constant 0 : index
    %195 = vector.load %arg11[%c0_199, %c0_200] : memref<1536x128xf32, #tpu.memory_space<vmem>>, vector<1536x128xf32>
    %cst_201 = arith.constant dense<0.000000e+00> : vector<16x128xf32>
    %196 = tpu.matmul %194, %195, %cst_201 {dimension_numbers = #tpu.dot_dimension_numbers<[1], [0], [0], [1], [0, 0, 1, 1], [], []>} : vector<16x1536xf32>, vector<1536x128xf32>, vector<16x128xf32> -> vector<16x128xf32>
    %c0_202 = arith.constant 0 : index
    %c0_203 = arith.constant 0 : index
    %197 = vector.load %arg3[%c0_202, %c0_203] : memref<16x1xf32, #tpu.memory_space<vmem>>, vector<16x1xf32>
    %198 = vector.broadcast %197 : vector<16x1xf32> to vector<16x128xf32>
    %199 = arith.addf %196, %198 : vector<16x128xf32>
    %cst_204 = arith.constant 0.000000e+00 : f32
    %200 = vector.broadcast %cst_204 : f32 to vector<16x128xf32>
    %201 = arith.maximumf %199, %200 : vector<16x128xf32>
    %c0_205 = arith.constant 0 : index
    %c0_206 = arith.constant 0 : index
    %202 = vector.load %arg4[%c0_205, %c0_206] : memref<128x32xf32, #tpu.memory_space<vmem>>, vector<128x32xf32>
    %cst_207 = arith.constant dense<0.000000e+00> : vector<16x32xf32>
    %203 = tpu.matmul %201, %202, %cst_207 {dimension_numbers = #tpu.dot_dimension_numbers<[1], [0], [0], [1], [0, 0, 1, 1], [], []>} : vector<16x128xf32>, vector<128x32xf32>, vector<16x32xf32> -> vector<16x32xf32>
    %c0_208 = arith.constant 0 : index
    %c7_209 = arith.constant 7 : index
    %204 = vector.load %arg12[%c0_208, %c7_209] : memref<16x47xf32, #tpu.memory_space<vmem>>, vector<16x32xf32>
    tpu.vector_store %arg12[%c0_208, %c7_209], %203 {strides = array<i32>} : memref<16x47xf32, #tpu.memory_space<vmem>>, vector<16x32xf32>,
    %cst_210 = arith.constant 0.000000e+00 : f32
    %205 = vector.broadcast %cst_210 : f32 to vector<16x32xf32>
    %c0_211 = arith.constant 0 : index
    %c0_212 = arith.constant 0 : index
    %206 = vector.load %arg5[%c0_211, %c0_212] : memref<16x16xf32, #tpu.memory_space<vmem>>, vector<16x1xf32>
    %c0_213 = arith.constant 0 : index
    %c0_214 = arith.constant 0 : index
    %207 = vector.load %arg12[%c0_213, %c0_214] : memref<16x47xf32, #tpu.memory_space<vmem>>, vector<16x32xf32>
    %208 = vector.broadcast %206 : vector<16x1xf32> to vector<16x32xf32>
    %209 = arith.mulf %208, %207 : vector<16x32xf32>
    %210 = arith.addf %205, %209 : vector<16x32xf32>
    %c0_215 = arith.constant 0 : index
    %c1_216 = arith.constant 1 : index
    %211 = vector.load %arg5[%c0_215, %c1_216] : memref<16x16xf32, #tpu.memory_space<vmem>>, vector<16x1xf32>
    %c0_217 = arith.constant 0 : index
    %c1_218 = arith.constant 1 : index
    %212 = vector.load %arg12[%c0_217, %c1_218] : memref<16x47xf32, #tpu.memory_space<vmem>>, vector<16x32xf32>
    %213 = vector.broadcast %211 : vector<16x1xf32> to vector<16x32xf32>
    %214 = arith.mulf %213, %212 : vector<16x32xf32>
    %215 = arith.addf %210, %214 : vector<16x32xf32>
    %c0_219 = arith.constant 0 : index
    %c2_220 = arith.constant 2 : index
    %216 = vector.load %arg5[%c0_219, %c2_220] : memref<16x16xf32, #tpu.memory_space<vmem>>, vector<16x1xf32>
    %c0_221 = arith.constant 0 : index
    %c2_222 = arith.constant 2 : index
    %217 = vector.load %arg12[%c0_221, %c2_222] : memref<16x47xf32, #tpu.memory_space<vmem>>, vector<16x32xf32>
    %218 = vector.broadcast %216 : vector<16x1xf32> to vector<16x32xf32>
    %219 = arith.mulf %218, %217 : vector<16x32xf32>
    %220 = arith.addf %215, %219 : vector<16x32xf32>
    %c0_223 = arith.constant 0 : index
    %c3_224 = arith.constant 3 : index
    %221 = vector.load %arg5[%c0_223, %c3_224] : memref<16x16xf32, #tpu.memory_space<vmem>>, vector<16x1xf32>
    %c0_225 = arith.constant 0 : index
    %c3_226 = arith.constant 3 : index
    %222 = vector.load %arg12[%c0_225, %c3_226] : memref<16x47xf32, #tpu.memory_space<vmem>>, vector<16x32xf32>
    %223 = vector.broadcast %221 : vector<16x1xf32> to vector<16x32xf32>
    %224 = arith.mulf %223, %222 : vector<16x32xf32>
    %225 = arith.addf %220, %224 : vector<16x32xf32>
    %c0_227 = arith.constant 0 : index
    %c4_228 = arith.constant 4 : index
    %226 = vector.load %arg5[%c0_227, %c4_228] : memref<16x16xf32, #tpu.memory_space<vmem>>, vector<16x1xf32>
    %c0_229 = arith.constant 0 : index
    %c4_230 = arith.constant 4 : index
    %227 = vector.load %arg12[%c0_229, %c4_230] : memref<16x47xf32, #tpu.memory_space<vmem>>, vector<16x32xf32>
    %228 = vector.broadcast %226 : vector<16x1xf32> to vector<16x32xf32>
    %229 = arith.mulf %228, %227 : vector<16x32xf32>
    %230 = arith.addf %225, %229 : vector<16x32xf32>
    %c0_231 = arith.constant 0 : index
    %c5_232 = arith.constant 5 : index
    %231 = vector.load %arg5[%c0_231, %c5_232] : memref<16x16xf32, #tpu.memory_space<vmem>>, vector<16x1xf32>
    %c0_233 = arith.constant 0 : index
    %c5_234 = arith.constant 5 : index
    %232 = vector.load %arg12[%c0_233, %c5_234] : memref<16x47xf32, #tpu.memory_space<vmem>>, vector<16x32xf32>
    %233 = vector.broadcast %231 : vector<16x1xf32> to vector<16x32xf32>
    %234 = arith.mulf %233, %232 : vector<16x32xf32>
    %235 = arith.addf %230, %234 : vector<16x32xf32>
    %c0_235 = arith.constant 0 : index
    %c6_236 = arith.constant 6 : index
    %236 = vector.load %arg5[%c0_235, %c6_236] : memref<16x16xf32, #tpu.memory_space<vmem>>, vector<16x1xf32>
    %c0_237 = arith.constant 0 : index
    %c6_238 = arith.constant 6 : index
    %237 = vector.load %arg12[%c0_237, %c6_238] : memref<16x47xf32, #tpu.memory_space<vmem>>, vector<16x32xf32>
    %238 = vector.broadcast %236 : vector<16x1xf32> to vector<16x32xf32>
    %239 = arith.mulf %238, %237 : vector<16x32xf32>
    %240 = arith.addf %235, %239 : vector<16x32xf32>
    %c0_239 = arith.constant 0 : index
    %c7_240 = arith.constant 7 : index
    %241 = vector.load %arg5[%c0_239, %c7_240] : memref<16x16xf32, #tpu.memory_space<vmem>>, vector<16x1xf32>
    %c0_241 = arith.constant 0 : index
    %c7_242 = arith.constant 7 : index
    %242 = vector.load %arg12[%c0_241, %c7_242] : memref<16x47xf32, #tpu.memory_space<vmem>>, vector<16x32xf32>
    %243 = vector.broadcast %241 : vector<16x1xf32> to vector<16x32xf32>
    %244 = arith.mulf %243, %242 : vector<16x32xf32>
    %245 = arith.addf %240, %244 : vector<16x32xf32>
    %c0_243 = arith.constant 0 : index
    %c8_244 = arith.constant 8 : index
    %246 = vector.load %arg5[%c0_243, %c8_244] : memref<16x16xf32, #tpu.memory_space<vmem>>, vector<16x1xf32>
    %c0_245 = arith.constant 0 : index
    %c8_246 = arith.constant 8 : index
    %247 = vector.load %arg12[%c0_245, %c8_246] : memref<16x47xf32, #tpu.memory_space<vmem>>, vector<16x32xf32>
    %248 = vector.broadcast %246 : vector<16x1xf32> to vector<16x32xf32>
    %249 = arith.mulf %248, %247 : vector<16x32xf32>
    %250 = arith.addf %245, %249 : vector<16x32xf32>
    %c0_247 = arith.constant 0 : index
    %c9_248 = arith.constant 9 : index
    %251 = vector.load %arg5[%c0_247, %c9_248] : memref<16x16xf32, #tpu.memory_space<vmem>>, vector<16x1xf32>
    %c0_249 = arith.constant 0 : index
    %c9_250 = arith.constant 9 : index
    %252 = vector.load %arg12[%c0_249, %c9_250] : memref<16x47xf32, #tpu.memory_space<vmem>>, vector<16x32xf32>
    %253 = vector.broadcast %251 : vector<16x1xf32> to vector<16x32xf32>
    %254 = arith.mulf %253, %252 : vector<16x32xf32>
    %255 = arith.addf %250, %254 : vector<16x32xf32>
    %c0_251 = arith.constant 0 : index
    %c10_252 = arith.constant 10 : index
    %256 = vector.load %arg5[%c0_251, %c10_252] : memref<16x16xf32, #tpu.memory_space<vmem>>, vector<16x1xf32>
    %c0_253 = arith.constant 0 : index
    %c10_254 = arith.constant 10 : index
    %257 = vector.load %arg12[%c0_253, %c10_254] : memref<16x47xf32, #tpu.memory_space<vmem>>, vector<16x32xf32>
    %258 = vector.broadcast %256 : vector<16x1xf32> to vector<16x32xf32>
    %259 = arith.mulf %258, %257 : vector<16x32xf32>
    %260 = arith.addf %255, %259 : vector<16x32xf32>
    %c0_255 = arith.constant 0 : index
    %c11_256 = arith.constant 11 : index
    %261 = vector.load %arg5[%c0_255, %c11_256] : memref<16x16xf32, #tpu.memory_space<vmem>>, vector<16x1xf32>
    %c0_257 = arith.constant 0 : index
    %c11_258 = arith.constant 11 : index
    %262 = vector.load %arg12[%c0_257, %c11_258] : memref<16x47xf32, #tpu.memory_space<vmem>>, vector<16x32xf32>
    %263 = vector.broadcast %261 : vector<16x1xf32> to vector<16x32xf32>
    %264 = arith.mulf %263, %262 : vector<16x32xf32>
    %265 = arith.addf %260, %264 : vector<16x32xf32>
    %c0_259 = arith.constant 0 : index
    %c12_260 = arith.constant 12 : index
    %266 = vector.load %arg5[%c0_259, %c12_260] : memref<16x16xf32, #tpu.memory_space<vmem>>, vector<16x1xf32>
    %c0_261 = arith.constant 0 : index
    %c12_262 = arith.constant 12 : index
    %267 = vector.load %arg12[%c0_261, %c12_262] : memref<16x47xf32, #tpu.memory_space<vmem>>, vector<16x32xf32>
    %268 = vector.broadcast %266 : vector<16x1xf32> to vector<16x32xf32>
    %269 = arith.mulf %268, %267 : vector<16x32xf32>
    %270 = arith.addf %265, %269 : vector<16x32xf32>
    %c0_263 = arith.constant 0 : index
    %c13_264 = arith.constant 13 : index
    %271 = vector.load %arg5[%c0_263, %c13_264] : memref<16x16xf32, #tpu.memory_space<vmem>>, vector<16x1xf32>
    %c0_265 = arith.constant 0 : index
    %c13_266 = arith.constant 13 : index
    %272 = vector.load %arg12[%c0_265, %c13_266] : memref<16x47xf32, #tpu.memory_space<vmem>>, vector<16x32xf32>
    %273 = vector.broadcast %271 : vector<16x1xf32> to vector<16x32xf32>
    %274 = arith.mulf %273, %272 : vector<16x32xf32>
    %275 = arith.addf %270, %274 : vector<16x32xf32>
    %c0_267 = arith.constant 0 : index
    %c14_268 = arith.constant 14 : index
    %276 = vector.load %arg5[%c0_267, %c14_268] : memref<16x16xf32, #tpu.memory_space<vmem>>, vector<16x1xf32>
    %c0_269 = arith.constant 0 : index
    %c14_270 = arith.constant 14 : index
    %277 = vector.load %arg12[%c0_269, %c14_270] : memref<16x47xf32, #tpu.memory_space<vmem>>, vector<16x32xf32>
    %278 = vector.broadcast %276 : vector<16x1xf32> to vector<16x32xf32>
    %279 = arith.mulf %278, %277 : vector<16x32xf32>
    %280 = arith.addf %275, %279 : vector<16x32xf32>
    %c0_271 = arith.constant 0 : index
    %c15_272 = arith.constant 15 : index
    %281 = vector.load %arg5[%c0_271, %c15_272] : memref<16x16xf32, #tpu.memory_space<vmem>>, vector<16x1xf32>
    %c0_273 = arith.constant 0 : index
    %c15_274 = arith.constant 15 : index
    %282 = vector.load %arg12[%c0_273, %c15_274] : memref<16x47xf32, #tpu.memory_space<vmem>>, vector<16x32xf32>
    %283 = vector.broadcast %281 : vector<16x1xf32> to vector<16x32xf32>
    %284 = arith.mulf %283, %282 : vector<16x32xf32>
    %285 = arith.addf %280, %284 : vector<16x32xf32>
    %c0_275 = arith.constant 0 : index
    %c0_276 = arith.constant 0 : index
    %286 = vector.load %arg6[%c0_275, %c0_276] : memref<16x16xf32, #tpu.memory_space<vmem>>, vector<16x16xf32>
    %cst_277 = arith.constant dense<0.000000e+00> : vector<16x32xf32>
    %287 = tpu.matmul %286, %285, %cst_277 {dimension_numbers = #tpu.dot_dimension_numbers<[1], [0], [0], [1], [0, 0, 1, 1], [], []>} : vector<16x16xf32>, vector<16x32xf32>, vector<16x32xf32> -> vector<16x32xf32>
    %c0_278 = arith.constant 0 : index
    %c0_279 = arith.constant 0 : index
    %288 = vector.load %arg7[%c0_278, %c0_279] : memref<16x1xf32, #tpu.memory_space<vmem>>, vector<16x1xf32>
    %289 = vector.broadcast %288 : vector<16x1xf32> to vector<16x32xf32>
    %290 = arith.addf %287, %289 : vector<16x32xf32>
    %cst_280 = arith.constant 0.000000e+00 : f32
    %291 = vector.broadcast %cst_280 : f32 to vector<16x32xf32>
    %292 = arith.maximumf %290, %291 : vector<16x32xf32>
    %c0_281 = arith.constant 0 : index
    %c0_282 = arith.constant 0 : index
    %293 = vector.load %arg8[%c0_281, %c0_282] : memref<32x4xf32, #tpu.memory_space<vmem>>, vector<32x4xf32>
    %cst_283 = arith.constant dense<0.000000e+00> : vector<16x4xf32>
    %294 = tpu.matmul %292, %293, %cst_283 {dimension_numbers = #tpu.dot_dimension_numbers<[1], [0], [0], [1], [0, 0, 1, 1], [], []>} : vector<16x32xf32>, vector<32x4xf32>, vector<16x4xf32> -> vector<16x4xf32>
    %c0_284 = arith.constant 0 : index
    %c0_285 = arith.constant 0 : index
    %295 = vector.load %arg9[%c0_284, %c0_285] : memref<4x16xf32, #tpu.memory_space<vmem>>, vector<4x16xf32>
    %cst_286 = arith.constant dense<0.000000e+00> : vector<4x4xf32>
    %296 = tpu.matmul %295, %294, %cst_286 {dimension_numbers = #tpu.dot_dimension_numbers<[1], [0], [0], [1], [0, 0, 1, 1], [], []>} : vector<4x16xf32>, vector<16x4xf32>, vector<4x4xf32> -> vector<4x4xf32>
    %cst_287 = arith.constant dense<0.000000e+00> : vector<4xf32>
    %297 = vector.multi_reduction <add>, %296, %cst_287 [1] : vector<4x4xf32> to vector<4xf32>
    %cst_288 = arith.constant 4.000000e+00 : f32
    %298 = vector.broadcast %cst_288 : f32 to vector<4xf32>
    %299 = arith.divf %297, %298 : vector<4xf32>
    %300 = vector.shape_cast %299 : vector<4xf32> to vector<1x4xf32>
    %c0_289 = arith.constant 0 : index
    %c0_290 = arith.constant 0 : index
    %c0_291 = arith.constant 0 : index
    %301 = vector.load %arg10[%c0_289, %c0_290, %c0_291] : memref<2x1x4xf32, #tpu.memory_space<vmem>>, vector<1x1x4xf32>
    %302 = vector.shape_cast %301 : vector<1x1x4xf32> to vector<1x4xf32>
    %303 = vector.shape_cast %300 : vector<1x4xf32> to vector<1x1x4xf32>
    tpu.vector_store %arg10[%c0_289, %c0_290, %c0_291], %303 {strides = array<i32>} : memref<2x1x4xf32, #tpu.memory_space<vmem>>, vector<1x1x4xf32>,
    %cst_292 = arith.constant 0.000000e+00 : f32
    %304 = vector.broadcast %cst_292 : f32 to vector<16x47xf32>
    %c0_293 = arith.constant 0 : index
    %c0_294 = arith.constant 0 : index
    %305 = vector.load %arg12[%c0_293, %c0_294] : memref<16x47xf32, #tpu.memory_space<vmem>>, vector<16x47xf32>
    tpu.vector_store %arg12[%c0_293, %c0_294], %304 {strides = array<i32>} : memref<16x47xf32, #tpu.memory_space<vmem>>, vector<16x47xf32>,
    %c1_295 = arith.constant 1 : index
    %c0_296 = arith.constant 0 : index
    %c0_297 = arith.constant 0 : index
    %306 = vector.load %arg1[%c1_295, %c0_296, %c0_297] : memref<2x24x191xf32, #tpu.memory_space<vmem>>, vector<1x24x128xf32>
    %307 = vector.shape_cast %306 : vector<1x24x128xf32> to vector<24x128xf32>
    %c0_298 = arith.constant 0 : index
    %c0_299 = arith.constant 0 : index
    %308 = vector.load %arg11[%c0_298, %c0_299] : memref<1536x128xf32, #tpu.memory_space<vmem>>, vector<24x128xf32>
    tpu.vector_store %arg11[%c0_298, %c0_299], %307 {strides = array<i32>} : memref<1536x128xf32, #tpu.memory_space<vmem>>, vector<24x128xf32>,
    %c1_300 = arith.constant 1 : index
    %c0_301 = arith.constant 0 : index
    %c1_302 = arith.constant 1 : index
    %309 = vector.load %arg1[%c1_300, %c0_301, %c1_302] : memref<2x24x191xf32, #tpu.memory_space<vmem>>, vector<1x24x128xf32>
    %310 = vector.shape_cast %309 : vector<1x24x128xf32> to vector<24x128xf32>
    %c24_303 = arith.constant 24 : index
    %c0_304 = arith.constant 0 : index
    %311 = vector.load %arg11[%c24_303, %c0_304] : memref<1536x128xf32, #tpu.memory_space<vmem>>, vector<24x128xf32>
    tpu.vector_store %arg11[%c24_303, %c0_304], %310 {strides = array<i32>} : memref<1536x128xf32, #tpu.memory_space<vmem>>, vector<24x128xf32>,
    %c1_305 = arith.constant 1 : index
    %c0_306 = arith.constant 0 : index
    %c2_307 = arith.constant 2 : index
    %312 = vector.load %arg1[%c1_305, %c0_306, %c2_307] : memref<2x24x191xf32, #tpu.memory_space<vmem>>, vector<1x24x128xf32>
    %313 = vector.shape_cast %312 : vector<1x24x128xf32> to vector<24x128xf32>
    %c48_308 = arith.constant 48 : index
    %c0_309 = arith.constant 0 : index
    %314 = vector.load %arg11[%c48_308, %c0_309] : memref<1536x128xf32, #tpu.memory_space<vmem>>, vector<24x128xf32>
    tpu.vector_store %arg11[%c48_308, %c0_309], %313 {strides = array<i32>} : memref<1536x128xf32, #tpu.memory_space<vmem>>, vector<24x128xf32>,
    %c1_310 = arith.constant 1 : index
    %c0_311 = arith.constant 0 : index
    %c3_312 = arith.constant 3 : index
    %315 = vector.load %arg1[%c1_310, %c0_311, %c3_312] : memref<2x24x191xf32, #tpu.memory_space<vmem>>, vector<1x24x128xf32>
    %316 = vector.shape_cast %315 : vector<1x24x128xf32> to vector<24x128xf32>
    %c72_313 = arith.constant 72 : index
    %c0_314 = arith.constant 0 : index
    %317 = vector.load %arg11[%c72_313, %c0_314] : memref<1536x128xf32, #tpu.memory_space<vmem>>, vector<24x128xf32>
    tpu.vector_store %arg11[%c72_313, %c0_314], %316 {strides = array<i32>} : memref<1536x128xf32, #tpu.memory_space<vmem>>, vector<24x128xf32>,
    %c1_315 = arith.constant 1 : index
    %c0_316 = arith.constant 0 : index
    %c4_317 = arith.constant 4 : index
    %318 = vector.load %arg1[%c1_315, %c0_316, %c4_317] : memref<2x24x191xf32, #tpu.memory_space<vmem>>, vector<1x24x128xf32>
    %319 = vector.shape_cast %318 : vector<1x24x128xf32> to vector<24x128xf32>
    %c96_318 = arith.constant 96 : index
    %c0_319 = arith.constant 0 : index
    %320 = vector.load %arg11[%c96_318, %c0_319] : memref<1536x128xf32, #tpu.memory_space<vmem>>, vector<24x128xf32>
    tpu.vector_store %arg11[%c96_318, %c0_319], %319 {strides = array<i32>} : memref<1536x128xf32, #tpu.memory_space<vmem>>, vector<24x128xf32>,
    %c1_320 = arith.constant 1 : index
    %c0_321 = arith.constant 0 : index
    %c5_322 = arith.constant 5 : index
    %321 = vector.load %arg1[%c1_320, %c0_321, %c5_322] : memref<2x24x191xf32, #tpu.memory_space<vmem>>, vector<1x24x128xf32>
    %322 = vector.shape_cast %321 : vector<1x24x128xf32> to vector<24x128xf32>
    %c120_323 = arith.constant 120 : index
    %c0_324 = arith.constant 0 : index
    %323 = vector.load %arg11[%c120_323, %c0_324] : memref<1536x128xf32, #tpu.memory_space<vmem>>, vector<24x128xf32>
    tpu.vector_store %arg11[%c120_323, %c0_324], %322 {strides = array<i32>} : memref<1536x128xf32, #tpu.memory_space<vmem>>, vector<24x128xf32>,
    %c1_325 = arith.constant 1 : index
    %c0_326 = arith.constant 0 : index
    %c6_327 = arith.constant 6 : index
    %324 = vector.load %arg1[%c1_325, %c0_326, %c6_327] : memref<2x24x191xf32, #tpu.memory_space<vmem>>, vector<1x24x128xf32>
    %325 = vector.shape_cast %324 : vector<1x24x128xf32> to vector<24x128xf32>
    %c144_328 = arith.constant 144 : index
    %c0_329 = arith.constant 0 : index
    %326 = vector.load %arg11[%c144_328, %c0_329] : memref<1536x128xf32, #tpu.memory_space<vmem>>, vector<24x128xf32>
    tpu.vector_store %arg11[%c144_328, %c0_329], %325 {strides = array<i32>} : memref<1536x128xf32, #tpu.memory_space<vmem>>, vector<24x128xf32>,
    %c1_330 = arith.constant 1 : index
    %c0_331 = arith.constant 0 : index
    %c7_332 = arith.constant 7 : index
    %327 = vector.load %arg1[%c1_330, %c0_331, %c7_332] : memref<2x24x191xf32, #tpu.memory_space<vmem>>, vector<1x24x128xf32>
    %328 = vector.shape_cast %327 : vector<1x24x128xf32> to vector<24x128xf32>
    %c168_333 = arith.constant 168 : index
    %c0_334 = arith.constant 0 : index
    %329 = vector.load %arg11[%c168_333, %c0_334] : memref<1536x128xf32, #tpu.memory_space<vmem>>, vector<24x128xf32>
    tpu.vector_store %arg11[%c168_333, %c0_334], %328 {strides = array<i32>} : memref<1536x128xf32, #tpu.memory_space<vmem>>, vector<24x128xf32>,
    %c1_335 = arith.constant 1 : index
    %c0_336 = arith.constant 0 : index
    %c8_337 = arith.constant 8 : index
    %330 = vector.load %arg1[%c1_335, %c0_336, %c8_337] : memref<2x24x191xf32, #tpu.memory_space<vmem>>, vector<1x24x128xf32>
    %331 = vector.shape_cast %330 : vector<1x24x128xf32> to vector<24x128xf32>
    %c192_338 = arith.constant 192 : index
    %c0_339 = arith.constant 0 : index
    %332 = vector.load %arg11[%c192_338, %c0_339] : memref<1536x128xf32, #tpu.memory_space<vmem>>, vector<24x128xf32>
    tpu.vector_store %arg11[%c192_338, %c0_339], %331 {strides = array<i32>} : memref<1536x128xf32, #tpu.memory_space<vmem>>, vector<24x128xf32>,
    %c1_340 = arith.constant 1 : index
    %c0_341 = arith.constant 0 : index
    %c9_342 = arith.constant 9 : index
    %333 = vector.load %arg1[%c1_340, %c0_341, %c9_342] : memref<2x24x191xf32, #tpu.memory_space<vmem>>, vector<1x24x128xf32>
    %334 = vector.shape_cast %333 : vector<1x24x128xf32> to vector<24x128xf32>
    %c216_343 = arith.constant 216 : index
    %c0_344 = arith.constant 0 : index
    %335 = vector.load %arg11[%c216_343, %c0_344] : memref<1536x128xf32, #tpu.memory_space<vmem>>, vector<24x128xf32>
    tpu.vector_store %arg11[%c216_343, %c0_344], %334 {strides = array<i32>} : memref<1536x128xf32, #tpu.memory_space<vmem>>, vector<24x128xf32>,
    %c1_345 = arith.constant 1 : index
    %c0_346 = arith.constant 0 : index
    %c10_347 = arith.constant 10 : index
    %336 = vector.load %arg1[%c1_345, %c0_346, %c10_347] : memref<2x24x191xf32, #tpu.memory_space<vmem>>, vector<1x24x128xf32>
    %337 = vector.shape_cast %336 : vector<1x24x128xf32> to vector<24x128xf32>
    %c240_348 = arith.constant 240 : index
    %c0_349 = arith.constant 0 : index
    %338 = vector.load %arg11[%c240_348, %c0_349] : memref<1536x128xf32, #tpu.memory_space<vmem>>, vector<24x128xf32>
    tpu.vector_store %arg11[%c240_348, %c0_349], %337 {strides = array<i32>} : memref<1536x128xf32, #tpu.memory_space<vmem>>, vector<24x128xf32>,
    %c1_350 = arith.constant 1 : index
    %c0_351 = arith.constant 0 : index
    %c11_352 = arith.constant 11 : index
    %339 = vector.load %arg1[%c1_350, %c0_351, %c11_352] : memref<2x24x191xf32, #tpu.memory_space<vmem>>, vector<1x24x128xf32>
    %340 = vector.shape_cast %339 : vector<1x24x128xf32> to vector<24x128xf32>
    %c264_353 = arith.constant 264 : index
    %c0_354 = arith.constant 0 : index
    %341 = vector.load %arg11[%c264_353, %c0_354] : memref<1536x128xf32, #tpu.memory_space<vmem>>, vector<24x128xf32>
    tpu.vector_store %arg11[%c264_353, %c0_354], %340 {strides = array<i32>} : memref<1536x128xf32, #tpu.memory_space<vmem>>, vector<24x128xf32>,
    %c1_355 = arith.constant 1 : index
    %c0_356 = arith.constant 0 : index
    %c12_357 = arith.constant 12 : index
    %342 = vector.load %arg1[%c1_355, %c0_356, %c12_357] : memref<2x24x191xf32, #tpu.memory_space<vmem>>, vector<1x24x128xf32>
    %343 = vector.shape_cast %342 : vector<1x24x128xf32> to vector<24x128xf32>
    %c288_358 = arith.constant 288 : index
    %c0_359 = arith.constant 0 : index
    %344 = vector.load %arg11[%c288_358, %c0_359] : memref<1536x128xf32, #tpu.memory_space<vmem>>, vector<24x128xf32>
    tpu.vector_store %arg11[%c288_358, %c0_359], %343 {strides = array<i32>} : memref<1536x128xf32, #tpu.memory_space<vmem>>, vector<24x128xf32>,
    %c1_360 = arith.constant 1 : index
    %c0_361 = arith.constant 0 : index
    %c13_362 = arith.constant 13 : index
    %345 = vector.load %arg1[%c1_360, %c0_361, %c13_362] : memref<2x24x191xf32, #tpu.memory_space<vmem>>, vector<1x24x128xf32>
    %346 = vector.shape_cast %345 : vector<1x24x128xf32> to vector<24x128xf32>
    %c312_363 = arith.constant 312 : index
    %c0_364 = arith.constant 0 : index
    %347 = vector.load %arg11[%c312_363, %c0_364] : memref<1536x128xf32, #tpu.memory_space<vmem>>, vector<24x128xf32>
    tpu.vector_store %arg11[%c312_363, %c0_364], %346 {strides = array<i32>} : memref<1536x128xf32, #tpu.memory_space<vmem>>, vector<24x128xf32>,
    %c1_365 = arith.constant 1 : index
    %c0_366 = arith.constant 0 : index
    %c14_367 = arith.constant 14 : index
    %348 = vector.load %arg1[%c1_365, %c0_366, %c14_367] : memref<2x24x191xf32, #tpu.memory_space<vmem>>, vector<1x24x128xf32>
    %349 = vector.shape_cast %348 : vector<1x24x128xf32> to vector<24x128xf32>
    %c336_368 = arith.constant 336 : index
    %c0_369 = arith.constant 0 : index
    %350 = vector.load %arg11[%c336_368, %c0_369] : memref<1536x128xf32, #tpu.memory_space<vmem>>, vector<24x128xf32>
    tpu.vector_store %arg11[%c336_368, %c0_369], %349 {strides = array<i32>} : memref<1536x128xf32, #tpu.memory_space<vmem>>, vector<24x128xf32>,
    %c1_370 = arith.constant 1 : index
    %c0_371 = arith.constant 0 : index
    %c15_372 = arith.constant 15 : index
    %351 = vector.load %arg1[%c1_370, %c0_371, %c15_372] : memref<2x24x191xf32, #tpu.memory_space<vmem>>, vector<1x24x128xf32>
    %352 = vector.shape_cast %351 : vector<1x24x128xf32> to vector<24x128xf32>
    %c360_373 = arith.constant 360 : index
    %c0_374 = arith.constant 0 : index
    %353 = vector.load %arg11[%c360_373, %c0_374] : memref<1536x128xf32, #tpu.memory_space<vmem>>, vector<24x128xf32>
    tpu.vector_store %arg11[%c360_373, %c0_374], %352 {strides = array<i32>} : memref<1536x128xf32, #tpu.memory_space<vmem>>, vector<24x128xf32>,
    %c1_375 = arith.constant 1 : index
    %c0_376 = arith.constant 0 : index
    %c16_377 = arith.constant 16 : index
    %354 = vector.load %arg1[%c1_375, %c0_376, %c16_377] : memref<2x24x191xf32, #tpu.memory_space<vmem>>, vector<1x24x128xf32>
    %355 = vector.shape_cast %354 : vector<1x24x128xf32> to vector<24x128xf32>
    %c384_378 = arith.constant 384 : index
    %c0_379 = arith.constant 0 : index
    %356 = vector.load %arg11[%c384_378, %c0_379] : memref<1536x128xf32, #tpu.memory_space<vmem>>, vector<24x128xf32>
    tpu.vector_store %arg11[%c384_378, %c0_379], %355 {strides = array<i32>} : memref<1536x128xf32, #tpu.memory_space<vmem>>, vector<24x128xf32>,
    %c1_380 = arith.constant 1 : index
    %c0_381 = arith.constant 0 : index
    %c17_382 = arith.constant 17 : index
    %357 = vector.load %arg1[%c1_380, %c0_381, %c17_382] : memref<2x24x191xf32, #tpu.memory_space<vmem>>, vector<1x24x128xf32>
    %358 = vector.shape_cast %357 : vector<1x24x128xf32> to vector<24x128xf32>
    %c408_383 = arith.constant 408 : index
    %c0_384 = arith.constant 0 : index
    %359 = vector.load %arg11[%c408_383, %c0_384] : memref<1536x128xf32, #tpu.memory_space<vmem>>, vector<24x128xf32>
    tpu.vector_store %arg11[%c408_383, %c0_384], %358 {strides = array<i32>} : memref<1536x128xf32, #tpu.memory_space<vmem>>, vector<24x128xf32>,
    %c1_385 = arith.constant 1 : index
    %c0_386 = arith.constant 0 : index
    %c18_387 = arith.constant 18 : index
    %360 = vector.load %arg1[%c1_385, %c0_386, %c18_387] : memref<2x24x191xf32, #tpu.memory_space<vmem>>, vector<1x24x128xf32>
    %361 = vector.shape_cast %360 : vector<1x24x128xf32> to vector<24x128xf32>
    %c432_388 = arith.constant 432 : index
    %c0_389 = arith.constant 0 : index
    %362 = vector.load %arg11[%c432_388, %c0_389] : memref<1536x128xf32, #tpu.memory_space<vmem>>, vector<24x128xf32>
    tpu.vector_store %arg11[%c432_388, %c0_389], %361 {strides = array<i32>} : memref<1536x128xf32, #tpu.memory_space<vmem>>, vector<24x128xf32>,
    %c1_390 = arith.constant 1 : index
    %c0_391 = arith.constant 0 : index
    %c19_392 = arith.constant 19 : index
    %363 = vector.load %arg1[%c1_390, %c0_391, %c19_392] : memref<2x24x191xf32, #tpu.memory_space<vmem>>, vector<1x24x128xf32>
    %364 = vector.shape_cast %363 : vector<1x24x128xf32> to vector<24x128xf32>
    %c456_393 = arith.constant 456 : index
    %c0_394 = arith.constant 0 : index
    %365 = vector.load %arg11[%c456_393, %c0_394] : memref<1536x128xf32, #tpu.memory_space<vmem>>, vector<24x128xf32>
    tpu.vector_store %arg11[%c456_393, %c0_394], %364 {strides = array<i32>} : memref<1536x128xf32, #tpu.memory_space<vmem>>, vector<24x128xf32>,
    %c1_395 = arith.constant 1 : index
    %c0_396 = arith.constant 0 : index
    %c20_397 = arith.constant 20 : index
    %366 = vector.load %arg1[%c1_395, %c0_396, %c20_397] : memref<2x24x191xf32, #tpu.memory_space<vmem>>, vector<1x24x128xf32>
    %367 = vector.shape_cast %366 : vector<1x24x128xf32> to vector<24x128xf32>
    %c480_398 = arith.constant 480 : index
    %c0_399 = arith.constant 0 : index
    %368 = vector.load %arg11[%c480_398, %c0_399] : memref<1536x128xf32, #tpu.memory_space<vmem>>, vector<24x128xf32>
    tpu.vector_store %arg11[%c480_398, %c0_399], %367 {strides = array<i32>} : memref<1536x128xf32, #tpu.memory_space<vmem>>, vector<24x128xf32>,
    %c1_400 = arith.constant 1 : index
    %c0_401 = arith.constant 0 : index
    %c21_402 = arith.constant 21 : index
    %369 = vector.load %arg1[%c1_400, %c0_401, %c21_402] : memref<2x24x191xf32, #tpu.memory_space<vmem>>, vector<1x24x128xf32>
    %370 = vector.shape_cast %369 : vector<1x24x128xf32> to vector<24x128xf32>
    %c504_403 = arith.constant 504 : index
    %c0_404 = arith.constant 0 : index
    %371 = vector.load %arg11[%c504_403, %c0_404] : memref<1536x128xf32, #tpu.memory_space<vmem>>, vector<24x128xf32>
    tpu.vector_store %arg11[%c504_403, %c0_404], %370 {strides = array<i32>} : memref<1536x128xf32, #tpu.memory_space<vmem>>, vector<24x128xf32>,
    %c1_405 = arith.constant 1 : index
    %c0_406 = arith.constant 0 : index
    %c22_407 = arith.constant 22 : index
    %372 = vector.load %arg1[%c1_405, %c0_406, %c22_407] : memref<2x24x191xf32, #tpu.memory_space<vmem>>, vector<1x24x128xf32>
    %373 = vector.shape_cast %372 : vector<1x24x128xf32> to vector<24x128xf32>
    %c528_408 = arith.constant 528 : index
    %c0_409 = arith.constant 0 : index
    %374 = vector.load %arg11[%c528_408, %c0_409] : memref<1536x128xf32, #tpu.memory_space<vmem>>, vector<24x128xf32>
    tpu.vector_store %arg11[%c528_408, %c0_409], %373 {strides = array<i32>} : memref<1536x128xf32, #tpu.memory_space<vmem>>, vector<24x128xf32>,
    %c1_410 = arith.constant 1 : index
    %c0_411 = arith.constant 0 : index
    %c23_412 = arith.constant 23 : index
    %375 = vector.load %arg1[%c1_410, %c0_411, %c23_412] : memref<2x24x191xf32, #tpu.memory_space<vmem>>, vector<1x24x128xf32>
    %376 = vector.shape_cast %375 : vector<1x24x128xf32> to vector<24x128xf32>
    %c552_413 = arith.constant 552 : index
    %c0_414 = arith.constant 0 : index
    %377 = vector.load %arg11[%c552_413, %c0_414] : memref<1536x128xf32, #tpu.memory_space<vmem>>, vector<24x128xf32>
    tpu.vector_store %arg11[%c552_413, %c0_414], %376 {strides = array<i32>} : memref<1536x128xf32, #tpu.memory_space<vmem>>, vector<24x128xf32>,
    %c1_415 = arith.constant 1 : index
    %c0_416 = arith.constant 0 : index
    %c24_417 = arith.constant 24 : index
    %378 = vector.load %arg1[%c1_415, %c0_416, %c24_417] : memref<2x24x191xf32, #tpu.memory_space<vmem>>, vector<1x24x128xf32>
    %379 = vector.shape_cast %378 : vector<1x24x128xf32> to vector<24x128xf32>
    %c576_418 = arith.constant 576 : index
    %c0_419 = arith.constant 0 : index
    %380 = vector.load %arg11[%c576_418, %c0_419] : memref<1536x128xf32, #tpu.memory_space<vmem>>, vector<24x128xf32>
    tpu.vector_store %arg11[%c576_418, %c0_419], %379 {strides = array<i32>} : memref<1536x128xf32, #tpu.memory_space<vmem>>, vector<24x128xf32>,
    %c1_420 = arith.constant 1 : index
    %c0_421 = arith.constant 0 : index
    %c25_422 = arith.constant 25 : index
    %381 = vector.load %arg1[%c1_420, %c0_421, %c25_422] : memref<2x24x191xf32, #tpu.memory_space<vmem>>, vector<1x24x128xf32>
    %382 = vector.shape_cast %381 : vector<1x24x128xf32> to vector<24x128xf32>
    %c600_423 = arith.constant 600 : index
    %c0_424 = arith.constant 0 : index
    %383 = vector.load %arg11[%c600_423, %c0_424] : memref<1536x128xf32, #tpu.memory_space<vmem>>, vector<24x128xf32>
    tpu.vector_store %arg11[%c600_423, %c0_424], %382 {strides = array<i32>} : memref<1536x128xf32, #tpu.memory_space<vmem>>, vector<24x128xf32>,
    %c1_425 = arith.constant 1 : index
    %c0_426 = arith.constant 0 : index
    %c26_427 = arith.constant 26 : index
    %384 = vector.load %arg1[%c1_425, %c0_426, %c26_427] : memref<2x24x191xf32, #tpu.memory_space<vmem>>, vector<1x24x128xf32>
    %385 = vector.shape_cast %384 : vector<1x24x128xf32> to vector<24x128xf32>
    %c624_428 = arith.constant 624 : index
    %c0_429 = arith.constant 0 : index
    %386 = vector.load %arg11[%c624_428, %c0_429] : memref<1536x128xf32, #tpu.memory_space<vmem>>, vector<24x128xf32>
    tpu.vector_store %arg11[%c624_428, %c0_429], %385 {strides = array<i32>} : memref<1536x128xf32, #tpu.memory_space<vmem>>, vector<24x128xf32>,
    %c1_430 = arith.constant 1 : index
    %c0_431 = arith.constant 0 : index
    %c27_432 = arith.constant 27 : index
    %387 = vector.load %arg1[%c1_430, %c0_431, %c27_432] : memref<2x24x191xf32, #tpu.memory_space<vmem>>, vector<1x24x128xf32>
    %388 = vector.shape_cast %387 : vector<1x24x128xf32> to vector<24x128xf32>
    %c648_433 = arith.constant 648 : index
    %c0_434 = arith.constant 0 : index
    %389 = vector.load %arg11[%c648_433, %c0_434] : memref<1536x128xf32, #tpu.memory_space<vmem>>, vector<24x128xf32>
    tpu.vector_store %arg11[%c648_433, %c0_434], %388 {strides = array<i32>} : memref<1536x128xf32, #tpu.memory_space<vmem>>, vector<24x128xf32>,
    %c1_435 = arith.constant 1 : index
    %c0_436 = arith.constant 0 : index
    %c28_437 = arith.constant 28 : index
    %390 = vector.load %arg1[%c1_435, %c0_436, %c28_437] : memref<2x24x191xf32, #tpu.memory_space<vmem>>, vector<1x24x128xf32>
    %391 = vector.shape_cast %390 : vector<1x24x128xf32> to vector<24x128xf32>
    %c672_438 = arith.constant 672 : index
    %c0_439 = arith.constant 0 : index
    %392 = vector.load %arg11[%c672_438, %c0_439] : memref<1536x128xf32, #tpu.memory_space<vmem>>, vector<24x128xf32>
    tpu.vector_store %arg11[%c672_438, %c0_439], %391 {strides = array<i32>} : memref<1536x128xf32, #tpu.memory_space<vmem>>, vector<24x128xf32>,
    %c1_440 = arith.constant 1 : index
    %c0_441 = arith.constant 0 : index
    %c29_442 = arith.constant 29 : index
    %393 = vector.load %arg1[%c1_440, %c0_441, %c29_442] : memref<2x24x191xf32, #tpu.memory_space<vmem>>, vector<1x24x128xf32>
    %394 = vector.shape_cast %393 : vector<1x24x128xf32> to vector<24x128xf32>
    %c696_443 = arith.constant 696 : index
    %c0_444 = arith.constant 0 : index
    %395 = vector.load %arg11[%c696_443, %c0_444] : memref<1536x128xf32, #tpu.memory_space<vmem>>, vector<24x128xf32>
    tpu.vector_store %arg11[%c696_443, %c0_444], %394 {strides = array<i32>} : memref<1536x128xf32, #tpu.memory_space<vmem>>, vector<24x128xf32>,
    %c1_445 = arith.constant 1 : index
    %c0_446 = arith.constant 0 : index
    %c30_447 = arith.constant 30 : index
    %396 = vector.load %arg1[%c1_445, %c0_446, %c30_447] : memref<2x24x191xf32, #tpu.memory_space<vmem>>, vector<1x24x128xf32>
    %397 = vector.shape_cast %396 : vector<1x24x128xf32> to vector<24x128xf32>
    %c720_448 = arith.constant 720 : index
    %c0_449 = arith.constant 0 : index
    %398 = vector.load %arg11[%c720_448, %c0_449] : memref<1536x128xf32, #tpu.memory_space<vmem>>, vector<24x128xf32>
    tpu.vector_store %arg11[%c720_448, %c0_449], %397 {strides = array<i32>} : memref<1536x128xf32, #tpu.memory_space<vmem>>, vector<24x128xf32>,
    %c1_450 = arith.constant 1 : index
    %c0_451 = arith.constant 0 : index
    %c31_452 = arith.constant 31 : index
    %399 = vector.load %arg1[%c1_450, %c0_451, %c31_452] : memref<2x24x191xf32, #tpu.memory_space<vmem>>, vector<1x24x128xf32>
    %400 = vector.shape_cast %399 : vector<1x24x128xf32> to vector<24x128xf32>
    %c744_453 = arith.constant 744 : index
    %c0_454 = arith.constant 0 : index
    %401 = vector.load %arg11[%c744_453, %c0_454] : memref<1536x128xf32, #tpu.memory_space<vmem>>, vector<24x128xf32>
    tpu.vector_store %arg11[%c744_453, %c0_454], %400 {strides = array<i32>} : memref<1536x128xf32, #tpu.memory_space<vmem>>, vector<24x128xf32>,
    %c1_455 = arith.constant 1 : index
    %c0_456 = arith.constant 0 : index
    %c32_457 = arith.constant 32 : index
    %402 = vector.load %arg1[%c1_455, %c0_456, %c32_457] : memref<2x24x191xf32, #tpu.memory_space<vmem>>, vector<1x24x128xf32>
    %403 = vector.shape_cast %402 : vector<1x24x128xf32> to vector<24x128xf32>
    %c768_458 = arith.constant 768 : index
    %c0_459 = arith.constant 0 : index
    %404 = vector.load %arg11[%c768_458, %c0_459] : memref<1536x128xf32, #tpu.memory_space<vmem>>, vector<24x128xf32>
    tpu.vector_store %arg11[%c768_458, %c0_459], %403 {strides = array<i32>} : memref<1536x128xf32, #tpu.memory_space<vmem>>, vector<24x128xf32>,
    %c1_460 = arith.constant 1 : index
    %c0_461 = arith.constant 0 : index
    %c33_462 = arith.constant 33 : index
    %405 = vector.load %arg1[%c1_460, %c0_461, %c33_462] : memref<2x24x191xf32, #tpu.memory_space<vmem>>, vector<1x24x128xf32>
    %406 = vector.shape_cast %405 : vector<1x24x128xf32> to vector<24x128xf32>
    %c792_463 = arith.constant 792 : index
    %c0_464 = arith.constant 0 : index
    %407 = vector.load %arg11[%c792_463, %c0_464] : memref<1536x128xf32, #tpu.memory_space<vmem>>, vector<24x128xf32>
    tpu.vector_store %arg11[%c792_463, %c0_464], %406 {strides = array<i32>} : memref<1536x128xf32, #tpu.memory_space<vmem>>, vector<24x128xf32>,
    %c1_465 = arith.constant 1 : index
    %c0_466 = arith.constant 0 : index
    %c34_467 = arith.constant 34 : index
    %408 = vector.load %arg1[%c1_465, %c0_466, %c34_467] : memref<2x24x191xf32, #tpu.memory_space<vmem>>, vector<1x24x128xf32>
    %409 = vector.shape_cast %408 : vector<1x24x128xf32> to vector<24x128xf32>
    %c816_468 = arith.constant 816 : index
    %c0_469 = arith.constant 0 : index
    %410 = vector.load %arg11[%c816_468, %c0_469] : memref<1536x128xf32, #tpu.memory_space<vmem>>, vector<24x128xf32>
    tpu.vector_store %arg11[%c816_468, %c0_469], %409 {strides = array<i32>} : memref<1536x128xf32, #tpu.memory_space<vmem>>, vector<24x128xf32>,
    %c1_470 = arith.constant 1 : index
    %c0_471 = arith.constant 0 : index
    %c35_472 = arith.constant 35 : index
    %411 = vector.load %arg1[%c1_470, %c0_471, %c35_472] : memref<2x24x191xf32, #tpu.memory_space<vmem>>, vector<1x24x128xf32>
    %412 = vector.shape_cast %411 : vector<1x24x128xf32> to vector<24x128xf32>
    %c840_473 = arith.constant 840 : index
    %c0_474 = arith.constant 0 : index
    %413 = vector.load %arg11[%c840_473, %c0_474] : memref<1536x128xf32, #tpu.memory_space<vmem>>, vector<24x128xf32>
    tpu.vector_store %arg11[%c840_473, %c0_474], %412 {strides = array<i32>} : memref<1536x128xf32, #tpu.memory_space<vmem>>, vector<24x128xf32>,
    %c1_475 = arith.constant 1 : index
    %c0_476 = arith.constant 0 : index
    %c36_477 = arith.constant 36 : index
    %414 = vector.load %arg1[%c1_475, %c0_476, %c36_477] : memref<2x24x191xf32, #tpu.memory_space<vmem>>, vector<1x24x128xf32>
    %415 = vector.shape_cast %414 : vector<1x24x128xf32> to vector<24x128xf32>
    %c864_478 = arith.constant 864 : index
    %c0_479 = arith.constant 0 : index
    %416 = vector.load %arg11[%c864_478, %c0_479] : memref<1536x128xf32, #tpu.memory_space<vmem>>, vector<24x128xf32>
    tpu.vector_store %arg11[%c864_478, %c0_479], %415 {strides = array<i32>} : memref<1536x128xf32, #tpu.memory_space<vmem>>, vector<24x128xf32>,
    %c1_480 = arith.constant 1 : index
    %c0_481 = arith.constant 0 : index
    %c37_482 = arith.constant 37 : index
    %417 = vector.load %arg1[%c1_480, %c0_481, %c37_482] : memref<2x24x191xf32, #tpu.memory_space<vmem>>, vector<1x24x128xf32>
    %418 = vector.shape_cast %417 : vector<1x24x128xf32> to vector<24x128xf32>
    %c888_483 = arith.constant 888 : index
    %c0_484 = arith.constant 0 : index
    %419 = vector.load %arg11[%c888_483, %c0_484] : memref<1536x128xf32, #tpu.memory_space<vmem>>, vector<24x128xf32>
    tpu.vector_store %arg11[%c888_483, %c0_484], %418 {strides = array<i32>} : memref<1536x128xf32, #tpu.memory_space<vmem>>, vector<24x128xf32>,
    %c1_485 = arith.constant 1 : index
    %c0_486 = arith.constant 0 : index
    %c38_487 = arith.constant 38 : index
    %420 = vector.load %arg1[%c1_485, %c0_486, %c38_487] : memref<2x24x191xf32, #tpu.memory_space<vmem>>, vector<1x24x128xf32>
    %421 = vector.shape_cast %420 : vector<1x24x128xf32> to vector<24x128xf32>
    %c912_488 = arith.constant 912 : index
    %c0_489 = arith.constant 0 : index
    %422 = vector.load %arg11[%c912_488, %c0_489] : memref<1536x128xf32, #tpu.memory_space<vmem>>, vector<24x128xf32>
    tpu.vector_store %arg11[%c912_488, %c0_489], %421 {strides = array<i32>} : memref<1536x128xf32, #tpu.memory_space<vmem>>, vector<24x128xf32>,
    %c1_490 = arith.constant 1 : index
    %c0_491 = arith.constant 0 : index
    %c39_492 = arith.constant 39 : index
    %423 = vector.load %arg1[%c1_490, %c0_491, %c39_492] : memref<2x24x191xf32, #tpu.memory_space<vmem>>, vector<1x24x128xf32>
    %424 = vector.shape_cast %423 : vector<1x24x128xf32> to vector<24x128xf32>
    %c936_493 = arith.constant 936 : index
    %c0_494 = arith.constant 0 : index
    %425 = vector.load %arg11[%c936_493, %c0_494] : memref<1536x128xf32, #tpu.memory_space<vmem>>, vector<24x128xf32>
    tpu.vector_store %arg11[%c936_493, %c0_494], %424 {strides = array<i32>} : memref<1536x128xf32, #tpu.memory_space<vmem>>, vector<24x128xf32>,
    %c1_495 = arith.constant 1 : index
    %c0_496 = arith.constant 0 : index
    %c40_497 = arith.constant 40 : index
    %426 = vector.load %arg1[%c1_495, %c0_496, %c40_497] : memref<2x24x191xf32, #tpu.memory_space<vmem>>, vector<1x24x128xf32>
    %427 = vector.shape_cast %426 : vector<1x24x128xf32> to vector<24x128xf32>
    %c960_498 = arith.constant 960 : index
    %c0_499 = arith.constant 0 : index
    %428 = vector.load %arg11[%c960_498, %c0_499] : memref<1536x128xf32, #tpu.memory_space<vmem>>, vector<24x128xf32>
    tpu.vector_store %arg11[%c960_498, %c0_499], %427 {strides = array<i32>} : memref<1536x128xf32, #tpu.memory_space<vmem>>, vector<24x128xf32>,
    %c1_500 = arith.constant 1 : index
    %c0_501 = arith.constant 0 : index
    %c41_502 = arith.constant 41 : index
    %429 = vector.load %arg1[%c1_500, %c0_501, %c41_502] : memref<2x24x191xf32, #tpu.memory_space<vmem>>, vector<1x24x128xf32>
    %430 = vector.shape_cast %429 : vector<1x24x128xf32> to vector<24x128xf32>
    %c984_503 = arith.constant 984 : index
    %c0_504 = arith.constant 0 : index
    %431 = vector.load %arg11[%c984_503, %c0_504] : memref<1536x128xf32, #tpu.memory_space<vmem>>, vector<24x128xf32>
    tpu.vector_store %arg11[%c984_503, %c0_504], %430 {strides = array<i32>} : memref<1536x128xf32, #tpu.memory_space<vmem>>, vector<24x128xf32>,
    %c1_505 = arith.constant 1 : index
    %c0_506 = arith.constant 0 : index
    %c42_507 = arith.constant 42 : index
    %432 = vector.load %arg1[%c1_505, %c0_506, %c42_507] : memref<2x24x191xf32, #tpu.memory_space<vmem>>, vector<1x24x128xf32>
    %433 = vector.shape_cast %432 : vector<1x24x128xf32> to vector<24x128xf32>
    %c1008_508 = arith.constant 1008 : index
    %c0_509 = arith.constant 0 : index
    %434 = vector.load %arg11[%c1008_508, %c0_509] : memref<1536x128xf32, #tpu.memory_space<vmem>>, vector<24x128xf32>
    tpu.vector_store %arg11[%c1008_508, %c0_509], %433 {strides = array<i32>} : memref<1536x128xf32, #tpu.memory_space<vmem>>, vector<24x128xf32>,
    %c1_510 = arith.constant 1 : index
    %c0_511 = arith.constant 0 : index
    %c43_512 = arith.constant 43 : index
    %435 = vector.load %arg1[%c1_510, %c0_511, %c43_512] : memref<2x24x191xf32, #tpu.memory_space<vmem>>, vector<1x24x128xf32>
    %436 = vector.shape_cast %435 : vector<1x24x128xf32> to vector<24x128xf32>
    %c1032_513 = arith.constant 1032 : index
    %c0_514 = arith.constant 0 : index
    %437 = vector.load %arg11[%c1032_513, %c0_514] : memref<1536x128xf32, #tpu.memory_space<vmem>>, vector<24x128xf32>
    tpu.vector_store %arg11[%c1032_513, %c0_514], %436 {strides = array<i32>} : memref<1536x128xf32, #tpu.memory_space<vmem>>, vector<24x128xf32>,
    %c1_515 = arith.constant 1 : index
    %c0_516 = arith.constant 0 : index
    %c44_517 = arith.constant 44 : index
    %438 = vector.load %arg1[%c1_515, %c0_516, %c44_517] : memref<2x24x191xf32, #tpu.memory_space<vmem>>, vector<1x24x128xf32>
    %439 = vector.shape_cast %438 : vector<1x24x128xf32> to vector<24x128xf32>
    %c1056_518 = arith.constant 1056 : index
    %c0_519 = arith.constant 0 : index
    %440 = vector.load %arg11[%c1056_518, %c0_519] : memref<1536x128xf32, #tpu.memory_space<vmem>>, vector<24x128xf32>
    tpu.vector_store %arg11[%c1056_518, %c0_519], %439 {strides = array<i32>} : memref<1536x128xf32, #tpu.memory_space<vmem>>, vector<24x128xf32>,
    %c1_520 = arith.constant 1 : index
    %c0_521 = arith.constant 0 : index
    %c45_522 = arith.constant 45 : index
    %441 = vector.load %arg1[%c1_520, %c0_521, %c45_522] : memref<2x24x191xf32, #tpu.memory_space<vmem>>, vector<1x24x128xf32>
    %442 = vector.shape_cast %441 : vector<1x24x128xf32> to vector<24x128xf32>
    %c1080_523 = arith.constant 1080 : index
    %c0_524 = arith.constant 0 : index
    %443 = vector.load %arg11[%c1080_523, %c0_524] : memref<1536x128xf32, #tpu.memory_space<vmem>>, vector<24x128xf32>
    tpu.vector_store %arg11[%c1080_523, %c0_524], %442 {strides = array<i32>} : memref<1536x128xf32, #tpu.memory_space<vmem>>, vector<24x128xf32>,
    %c1_525 = arith.constant 1 : index
    %c0_526 = arith.constant 0 : index
    %c46_527 = arith.constant 46 : index
    %444 = vector.load %arg1[%c1_525, %c0_526, %c46_527] : memref<2x24x191xf32, #tpu.memory_space<vmem>>, vector<1x24x128xf32>
    %445 = vector.shape_cast %444 : vector<1x24x128xf32> to vector<24x128xf32>
    %c1104_528 = arith.constant 1104 : index
    %c0_529 = arith.constant 0 : index
    %446 = vector.load %arg11[%c1104_528, %c0_529] : memref<1536x128xf32, #tpu.memory_space<vmem>>, vector<24x128xf32>
    tpu.vector_store %arg11[%c1104_528, %c0_529], %445 {strides = array<i32>} : memref<1536x128xf32, #tpu.memory_space<vmem>>, vector<24x128xf32>,
    %c1_530 = arith.constant 1 : index
    %c0_531 = arith.constant 0 : index
    %c47_532 = arith.constant 47 : index
    %447 = vector.load %arg1[%c1_530, %c0_531, %c47_532] : memref<2x24x191xf32, #tpu.memory_space<vmem>>, vector<1x24x128xf32>
    %448 = vector.shape_cast %447 : vector<1x24x128xf32> to vector<24x128xf32>
    %c1128_533 = arith.constant 1128 : index
    %c0_534 = arith.constant 0 : index
    %449 = vector.load %arg11[%c1128_533, %c0_534] : memref<1536x128xf32, #tpu.memory_space<vmem>>, vector<24x128xf32>
    tpu.vector_store %arg11[%c1128_533, %c0_534], %448 {strides = array<i32>} : memref<1536x128xf32, #tpu.memory_space<vmem>>, vector<24x128xf32>,
    %c1_535 = arith.constant 1 : index
    %c0_536 = arith.constant 0 : index
    %c48_537 = arith.constant 48 : index
    %450 = vector.load %arg1[%c1_535, %c0_536, %c48_537] : memref<2x24x191xf32, #tpu.memory_space<vmem>>, vector<1x24x128xf32>
    %451 = vector.shape_cast %450 : vector<1x24x128xf32> to vector<24x128xf32>
    %c1152_538 = arith.constant 1152 : index
    %c0_539 = arith.constant 0 : index
    %452 = vector.load %arg11[%c1152_538, %c0_539] : memref<1536x128xf32, #tpu.memory_space<vmem>>, vector<24x128xf32>
    tpu.vector_store %arg11[%c1152_538, %c0_539], %451 {strides = array<i32>} : memref<1536x128xf32, #tpu.memory_space<vmem>>, vector<24x128xf32>,
    %c1_540 = arith.constant 1 : index
    %c0_541 = arith.constant 0 : index
    %c49_542 = arith.constant 49 : index
    %453 = vector.load %arg1[%c1_540, %c0_541, %c49_542] : memref<2x24x191xf32, #tpu.memory_space<vmem>>, vector<1x24x128xf32>
    %454 = vector.shape_cast %453 : vector<1x24x128xf32> to vector<24x128xf32>
    %c1176_543 = arith.constant 1176 : index
    %c0_544 = arith.constant 0 : index
    %455 = vector.load %arg11[%c1176_543, %c0_544] : memref<1536x128xf32, #tpu.memory_space<vmem>>, vector<24x128xf32>
    tpu.vector_store %arg11[%c1176_543, %c0_544], %454 {strides = array<i32>} : memref<1536x128xf32, #tpu.memory_space<vmem>>, vector<24x128xf32>,
    %c1_545 = arith.constant 1 : index
    %c0_546 = arith.constant 0 : index
    %c50_547 = arith.constant 50 : index
    %456 = vector.load %arg1[%c1_545, %c0_546, %c50_547] : memref<2x24x191xf32, #tpu.memory_space<vmem>>, vector<1x24x128xf32>
    %457 = vector.shape_cast %456 : vector<1x24x128xf32> to vector<24x128xf32>
    %c1200_548 = arith.constant 1200 : index
    %c0_549 = arith.constant 0 : index
    %458 = vector.load %arg11[%c1200_548, %c0_549] : memref<1536x128xf32, #tpu.memory_space<vmem>>, vector<24x128xf32>
    tpu.vector_store %arg11[%c1200_548, %c0_549], %457 {strides = array<i32>} : memref<1536x128xf32, #tpu.memory_space<vmem>>, vector<24x128xf32>,
    %c1_550 = arith.constant 1 : index
    %c0_551 = arith.constant 0 : index
    %c51_552 = arith.constant 51 : index
    %459 = vector.load %arg1[%c1_550, %c0_551, %c51_552] : memref<2x24x191xf32, #tpu.memory_space<vmem>>, vector<1x24x128xf32>
    %460 = vector.shape_cast %459 : vector<1x24x128xf32> to vector<24x128xf32>
    %c1224_553 = arith.constant 1224 : index
    %c0_554 = arith.constant 0 : index
    %461 = vector.load %arg11[%c1224_553, %c0_554] : memref<1536x128xf32, #tpu.memory_space<vmem>>, vector<24x128xf32>
    tpu.vector_store %arg11[%c1224_553, %c0_554], %460 {strides = array<i32>} : memref<1536x128xf32, #tpu.memory_space<vmem>>, vector<24x128xf32>,
    %c1_555 = arith.constant 1 : index
    %c0_556 = arith.constant 0 : index
    %c52_557 = arith.constant 52 : index
    %462 = vector.load %arg1[%c1_555, %c0_556, %c52_557] : memref<2x24x191xf32, #tpu.memory_space<vmem>>, vector<1x24x128xf32>
    %463 = vector.shape_cast %462 : vector<1x24x128xf32> to vector<24x128xf32>
    %c1248_558 = arith.constant 1248 : index
    %c0_559 = arith.constant 0 : index
    %464 = vector.load %arg11[%c1248_558, %c0_559] : memref<1536x128xf32, #tpu.memory_space<vmem>>, vector<24x128xf32>
    tpu.vector_store %arg11[%c1248_558, %c0_559], %463 {strides = array<i32>} : memref<1536x128xf32, #tpu.memory_space<vmem>>, vector<24x128xf32>,
    %c1_560 = arith.constant 1 : index
    %c0_561 = arith.constant 0 : index
    %c53_562 = arith.constant 53 : index
    %465 = vector.load %arg1[%c1_560, %c0_561, %c53_562] : memref<2x24x191xf32, #tpu.memory_space<vmem>>, vector<1x24x128xf32>
    %466 = vector.shape_cast %465 : vector<1x24x128xf32> to vector<24x128xf32>
    %c1272_563 = arith.constant 1272 : index
    %c0_564 = arith.constant 0 : index
    %467 = vector.load %arg11[%c1272_563, %c0_564] : memref<1536x128xf32, #tpu.memory_space<vmem>>, vector<24x128xf32>
    tpu.vector_store %arg11[%c1272_563, %c0_564], %466 {strides = array<i32>} : memref<1536x128xf32, #tpu.memory_space<vmem>>, vector<24x128xf32>,
    %c1_565 = arith.constant 1 : index
    %c0_566 = arith.constant 0 : index
    %c54_567 = arith.constant 54 : index
    %468 = vector.load %arg1[%c1_565, %c0_566, %c54_567] : memref<2x24x191xf32, #tpu.memory_space<vmem>>, vector<1x24x128xf32>
    %469 = vector.shape_cast %468 : vector<1x24x128xf32> to vector<24x128xf32>
    %c1296_568 = arith.constant 1296 : index
    %c0_569 = arith.constant 0 : index
    %470 = vector.load %arg11[%c1296_568, %c0_569] : memref<1536x128xf32, #tpu.memory_space<vmem>>, vector<24x128xf32>
    tpu.vector_store %arg11[%c1296_568, %c0_569], %469 {strides = array<i32>} : memref<1536x128xf32, #tpu.memory_space<vmem>>, vector<24x128xf32>,
    %c1_570 = arith.constant 1 : index
    %c0_571 = arith.constant 0 : index
    %c55_572 = arith.constant 55 : index
    %471 = vector.load %arg1[%c1_570, %c0_571, %c55_572] : memref<2x24x191xf32, #tpu.memory_space<vmem>>, vector<1x24x128xf32>
    %472 = vector.shape_cast %471 : vector<1x24x128xf32> to vector<24x128xf32>
    %c1320_573 = arith.constant 1320 : index
    %c0_574 = arith.constant 0 : index
    %473 = vector.load %arg11[%c1320_573, %c0_574] : memref<1536x128xf32, #tpu.memory_space<vmem>>, vector<24x128xf32>
    tpu.vector_store %arg11[%c1320_573, %c0_574], %472 {strides = array<i32>} : memref<1536x128xf32, #tpu.memory_space<vmem>>, vector<24x128xf32>,
    %c1_575 = arith.constant 1 : index
    %c0_576 = arith.constant 0 : index
    %c56_577 = arith.constant 56 : index
    %474 = vector.load %arg1[%c1_575, %c0_576, %c56_577] : memref<2x24x191xf32, #tpu.memory_space<vmem>>, vector<1x24x128xf32>
    %475 = vector.shape_cast %474 : vector<1x24x128xf32> to vector<24x128xf32>
    %c1344_578 = arith.constant 1344 : index
    %c0_579 = arith.constant 0 : index
    %476 = vector.load %arg11[%c1344_578, %c0_579] : memref<1536x128xf32, #tpu.memory_space<vmem>>, vector<24x128xf32>
    tpu.vector_store %arg11[%c1344_578, %c0_579], %475 {strides = array<i32>} : memref<1536x128xf32, #tpu.memory_space<vmem>>, vector<24x128xf32>,
    %c1_580 = arith.constant 1 : index
    %c0_581 = arith.constant 0 : index
    %c57_582 = arith.constant 57 : index
    %477 = vector.load %arg1[%c1_580, %c0_581, %c57_582] : memref<2x24x191xf32, #tpu.memory_space<vmem>>, vector<1x24x128xf32>
    %478 = vector.shape_cast %477 : vector<1x24x128xf32> to vector<24x128xf32>
    %c1368_583 = arith.constant 1368 : index
    %c0_584 = arith.constant 0 : index
    %479 = vector.load %arg11[%c1368_583, %c0_584] : memref<1536x128xf32, #tpu.memory_space<vmem>>, vector<24x128xf32>
    tpu.vector_store %arg11[%c1368_583, %c0_584], %478 {strides = array<i32>} : memref<1536x128xf32, #tpu.memory_space<vmem>>, vector<24x128xf32>,
    %c1_585 = arith.constant 1 : index
    %c0_586 = arith.constant 0 : index
    %c58_587 = arith.constant 58 : index
    %480 = vector.load %arg1[%c1_585, %c0_586, %c58_587] : memref<2x24x191xf32, #tpu.memory_space<vmem>>, vector<1x24x128xf32>
    %481 = vector.shape_cast %480 : vector<1x24x128xf32> to vector<24x128xf32>
    %c1392_588 = arith.constant 1392 : index
    %c0_589 = arith.constant 0 : index
    %482 = vector.load %arg11[%c1392_588, %c0_589] : memref<1536x128xf32, #tpu.memory_space<vmem>>, vector<24x128xf32>
    tpu.vector_store %arg11[%c1392_588, %c0_589], %481 {strides = array<i32>} : memref<1536x128xf32, #tpu.memory_space<vmem>>, vector<24x128xf32>,
    %c1_590 = arith.constant 1 : index
    %c0_591 = arith.constant 0 : index
    %c59_592 = arith.constant 59 : index
    %483 = vector.load %arg1[%c1_590, %c0_591, %c59_592] : memref<2x24x191xf32, #tpu.memory_space<vmem>>, vector<1x24x128xf32>
    %484 = vector.shape_cast %483 : vector<1x24x128xf32> to vector<24x128xf32>
    %c1416_593 = arith.constant 1416 : index
    %c0_594 = arith.constant 0 : index
    %485 = vector.load %arg11[%c1416_593, %c0_594] : memref<1536x128xf32, #tpu.memory_space<vmem>>, vector<24x128xf32>
    tpu.vector_store %arg11[%c1416_593, %c0_594], %484 {strides = array<i32>} : memref<1536x128xf32, #tpu.memory_space<vmem>>, vector<24x128xf32>,
    %c1_595 = arith.constant 1 : index
    %c0_596 = arith.constant 0 : index
    %c60_597 = arith.constant 60 : index
    %486 = vector.load %arg1[%c1_595, %c0_596, %c60_597] : memref<2x24x191xf32, #tpu.memory_space<vmem>>, vector<1x24x128xf32>
    %487 = vector.shape_cast %486 : vector<1x24x128xf32> to vector<24x128xf32>
    %c1440_598 = arith.constant 1440 : index
    %c0_599 = arith.constant 0 : index
    %488 = vector.load %arg11[%c1440_598, %c0_599] : memref<1536x128xf32, #tpu.memory_space<vmem>>, vector<24x128xf32>
    tpu.vector_store %arg11[%c1440_598, %c0_599], %487 {strides = array<i32>} : memref<1536x128xf32, #tpu.memory_space<vmem>>, vector<24x128xf32>,
    %c1_600 = arith.constant 1 : index
    %c0_601 = arith.constant 0 : index
    %c61_602 = arith.constant 61 : index
    %489 = vector.load %arg1[%c1_600, %c0_601, %c61_602] : memref<2x24x191xf32, #tpu.memory_space<vmem>>, vector<1x24x128xf32>
    %490 = vector.shape_cast %489 : vector<1x24x128xf32> to vector<24x128xf32>
    %c1464_603 = arith.constant 1464 : index
    %c0_604 = arith.constant 0 : index
    %491 = vector.load %arg11[%c1464_603, %c0_604] : memref<1536x128xf32, #tpu.memory_space<vmem>>, vector<24x128xf32>
    tpu.vector_store %arg11[%c1464_603, %c0_604], %490 {strides = array<i32>} : memref<1536x128xf32, #tpu.memory_space<vmem>>, vector<24x128xf32>,
    %c1_605 = arith.constant 1 : index
    %c0_606 = arith.constant 0 : index
    %c62_607 = arith.constant 62 : index
    %492 = vector.load %arg1[%c1_605, %c0_606, %c62_607] : memref<2x24x191xf32, #tpu.memory_space<vmem>>, vector<1x24x128xf32>
    %493 = vector.shape_cast %492 : vector<1x24x128xf32> to vector<24x128xf32>
    %c1488_608 = arith.constant 1488 : index
    %c0_609 = arith.constant 0 : index
    %494 = vector.load %arg11[%c1488_608, %c0_609] : memref<1536x128xf32, #tpu.memory_space<vmem>>, vector<24x128xf32>
    tpu.vector_store %arg11[%c1488_608, %c0_609], %493 {strides = array<i32>} : memref<1536x128xf32, #tpu.memory_space<vmem>>, vector<24x128xf32>,
    %c1_610 = arith.constant 1 : index
    %c0_611 = arith.constant 0 : index
    %c63_612 = arith.constant 63 : index
    %495 = vector.load %arg1[%c1_610, %c0_611, %c63_612] : memref<2x24x191xf32, #tpu.memory_space<vmem>>, vector<1x24x128xf32>
    %496 = vector.shape_cast %495 : vector<1x24x128xf32> to vector<24x128xf32>
    %c1512_613 = arith.constant 1512 : index
    %c0_614 = arith.constant 0 : index
    %497 = vector.load %arg11[%c1512_613, %c0_614] : memref<1536x128xf32, #tpu.memory_space<vmem>>, vector<24x128xf32>
    tpu.vector_store %arg11[%c1512_613, %c0_614], %496 {strides = array<i32>} : memref<1536x128xf32, #tpu.memory_space<vmem>>, vector<24x128xf32>,
    %c0_615 = arith.constant 0 : index
    %c0_616 = arith.constant 0 : index
    %498 = vector.load %arg2[%c0_615, %c0_616] : memref<16x1536xf32, #tpu.memory_space<vmem>>, vector<16x1536xf32>
    %c0_617 = arith.constant 0 : index
    %c0_618 = arith.constant 0 : index
    %499 = vector.load %arg11[%c0_617, %c0_618] : memref<1536x128xf32, #tpu.memory_space<vmem>>, vector<1536x128xf32>
    %cst_619 = arith.constant dense<0.000000e+00> : vector<16x128xf32>
    %500 = tpu.matmul %498, %499, %cst_619 {dimension_numbers = #tpu.dot_dimension_numbers<[1], [0], [0], [1], [0, 0, 1, 1], [], []>} : vector<16x1536xf32>, vector<1536x128xf32>, vector<16x128xf32> -> vector<16x128xf32>
    %c0_620 = arith.constant 0 : index
    %c0_621 = arith.constant 0 : index
    %501 = vector.load %arg3[%c0_620, %c0_621] : memref<16x1xf32, #tpu.memory_space<vmem>>, vector<16x1xf32>
    %502 = vector.broadcast %501 : vector<16x1xf32> to vector<16x128xf32>
    %503 = arith.addf %500, %502 : vector<16x128xf32>
    %cst_622 = arith.constant 0.000000e+00 : f32
    %504 = vector.broadcast %cst_622 : f32 to vector<16x128xf32>
    %505 = arith.maximumf %503, %504 : vector<16x128xf32>
    %c0_623 = arith.constant 0 : index
    %c0_624 = arith.constant 0 : index
    %506 = vector.load %arg4[%c0_623, %c0_624] : memref<128x32xf32, #tpu.memory_space<vmem>>, vector<128x32xf32>
    %cst_625 = arith.constant dense<0.000000e+00> : vector<16x32xf32>
    %507 = tpu.matmul %505, %506, %cst_625 {dimension_numbers = #tpu.dot_dimension_numbers<[1], [0], [0], [1], [0, 0, 1, 1], [], []>} : vector<16x128xf32>, vector<128x32xf32>, vector<16x32xf32> -> vector<16x32xf32>
    %c0_626 = arith.constant 0 : index
    %c7_627 = arith.constant 7 : index
    %508 = vector.load %arg12[%c0_626, %c7_627] : memref<16x47xf32, #tpu.memory_space<vmem>>, vector<16x32xf32>
    tpu.vector_store %arg12[%c0_626, %c7_627], %507 {strides = array<i32>} : memref<16x47xf32, #tpu.memory_space<vmem>>, vector<16x32xf32>,
    %cst_628 = arith.constant 0.000000e+00 : f32
    %509 = vector.broadcast %cst_628 : f32 to vector<16x32xf32>
    %c0_629 = arith.constant 0 : index
    %c0_630 = arith.constant 0 : index
    %510 = vector.load %arg5[%c0_629, %c0_630] : memref<16x16xf32, #tpu.memory_space<vmem>>, vector<16x1xf32>
    %c0_631 = arith.constant 0 : index
    %c0_632 = arith.constant 0 : index
    %511 = vector.load %arg12[%c0_631, %c0_632] : memref<16x47xf32, #tpu.memory_space<vmem>>, vector<16x32xf32>
    %512 = vector.broadcast %510 : vector<16x1xf32> to vector<16x32xf32>
    %513 = arith.mulf %512, %511 : vector<16x32xf32>
    %514 = arith.addf %509, %513 : vector<16x32xf32>
    %c0_633 = arith.constant 0 : index
    %c1_634 = arith.constant 1 : index
    %515 = vector.load %arg5[%c0_633, %c1_634] : memref<16x16xf32, #tpu.memory_space<vmem>>, vector<16x1xf32>
    %c0_635 = arith.constant 0 : index
    %c1_636 = arith.constant 1 : index
    %516 = vector.load %arg12[%c0_635, %c1_636] : memref<16x47xf32, #tpu.memory_space<vmem>>, vector<16x32xf32>
    %517 = vector.broadcast %515 : vector<16x1xf32> to vector<16x32xf32>
    %518 = arith.mulf %517, %516 : vector<16x32xf32>
    %519 = arith.addf %514, %518 : vector<16x32xf32>
    %c0_637 = arith.constant 0 : index
    %c2_638 = arith.constant 2 : index
    %520 = vector.load %arg5[%c0_637, %c2_638] : memref<16x16xf32, #tpu.memory_space<vmem>>, vector<16x1xf32>
    %c0_639 = arith.constant 0 : index
    %c2_640 = arith.constant 2 : index
    %521 = vector.load %arg12[%c0_639, %c2_640] : memref<16x47xf32, #tpu.memory_space<vmem>>, vector<16x32xf32>
    %522 = vector.broadcast %520 : vector<16x1xf32> to vector<16x32xf32>
    %523 = arith.mulf %522, %521 : vector<16x32xf32>
    %524 = arith.addf %519, %523 : vector<16x32xf32>
    %c0_641 = arith.constant 0 : index
    %c3_642 = arith.constant 3 : index
    %525 = vector.load %arg5[%c0_641, %c3_642] : memref<16x16xf32, #tpu.memory_space<vmem>>, vector<16x1xf32>
    %c0_643 = arith.constant 0 : index
    %c3_644 = arith.constant 3 : index
    %526 = vector.load %arg12[%c0_643, %c3_644] : memref<16x47xf32, #tpu.memory_space<vmem>>, vector<16x32xf32>
    %527 = vector.broadcast %525 : vector<16x1xf32> to vector<16x32xf32>
    %528 = arith.mulf %527, %526 : vector<16x32xf32>
    %529 = arith.addf %524, %528 : vector<16x32xf32>
    %c0_645 = arith.constant 0 : index
    %c4_646 = arith.constant 4 : index
    %530 = vector.load %arg5[%c0_645, %c4_646] : memref<16x16xf32, #tpu.memory_space<vmem>>, vector<16x1xf32>
    %c0_647 = arith.constant 0 : index
    %c4_648 = arith.constant 4 : index
    %531 = vector.load %arg12[%c0_647, %c4_648] : memref<16x47xf32, #tpu.memory_space<vmem>>, vector<16x32xf32>
    %532 = vector.broadcast %530 : vector<16x1xf32> to vector<16x32xf32>
    %533 = arith.mulf %532, %531 : vector<16x32xf32>
    %534 = arith.addf %529, %533 : vector<16x32xf32>
    %c0_649 = arith.constant 0 : index
    %c5_650 = arith.constant 5 : index
    %535 = vector.load %arg5[%c0_649, %c5_650] : memref<16x16xf32, #tpu.memory_space<vmem>>, vector<16x1xf32>
    %c0_651 = arith.constant 0 : index
    %c5_652 = arith.constant 5 : index
    %536 = vector.load %arg12[%c0_651, %c5_652] : memref<16x47xf32, #tpu.memory_space<vmem>>, vector<16x32xf32>
    %537 = vector.broadcast %535 : vector<16x1xf32> to vector<16x32xf32>
    %538 = arith.mulf %537, %536 : vector<16x32xf32>
    %539 = arith.addf %534, %538 : vector<16x32xf32>
    %c0_653 = arith.constant 0 : index
    %c6_654 = arith.constant 6 : index
    %540 = vector.load %arg5[%c0_653, %c6_654] : memref<16x16xf32, #tpu.memory_space<vmem>>, vector<16x1xf32>
    %c0_655 = arith.constant 0 : index
    %c6_656 = arith.constant 6 : index
    %541 = vector.load %arg12[%c0_655, %c6_656] : memref<16x47xf32, #tpu.memory_space<vmem>>, vector<16x32xf32>
    %542 = vector.broadcast %540 : vector<16x1xf32> to vector<16x32xf32>
    %543 = arith.mulf %542, %541 : vector<16x32xf32>
    %544 = arith.addf %539, %543 : vector<16x32xf32>
    %c0_657 = arith.constant 0 : index
    %c7_658 = arith.constant 7 : index
    %545 = vector.load %arg5[%c0_657, %c7_658] : memref<16x16xf32, #tpu.memory_space<vmem>>, vector<16x1xf32>
    %c0_659 = arith.constant 0 : index
    %c7_660 = arith.constant 7 : index
    %546 = vector.load %arg12[%c0_659, %c7_660] : memref<16x47xf32, #tpu.memory_space<vmem>>, vector<16x32xf32>
    %547 = vector.broadcast %545 : vector<16x1xf32> to vector<16x32xf32>
    %548 = arith.mulf %547, %546 : vector<16x32xf32>
    %549 = arith.addf %544, %548 : vector<16x32xf32>
    %c0_661 = arith.constant 0 : index
    %c8_662 = arith.constant 8 : index
    %550 = vector.load %arg5[%c0_661, %c8_662] : memref<16x16xf32, #tpu.memory_space<vmem>>, vector<16x1xf32>
    %c0_663 = arith.constant 0 : index
    %c8_664 = arith.constant 8 : index
    %551 = vector.load %arg12[%c0_663, %c8_664] : memref<16x47xf32, #tpu.memory_space<vmem>>, vector<16x32xf32>
    %552 = vector.broadcast %550 : vector<16x1xf32> to vector<16x32xf32>
    %553 = arith.mulf %552, %551 : vector<16x32xf32>
    %554 = arith.addf %549, %553 : vector<16x32xf32>
    %c0_665 = arith.constant 0 : index
    %c9_666 = arith.constant 9 : index
    %555 = vector.load %arg5[%c0_665, %c9_666] : memref<16x16xf32, #tpu.memory_space<vmem>>, vector<16x1xf32>
    %c0_667 = arith.constant 0 : index
    %c9_668 = arith.constant 9 : index
    %556 = vector.load %arg12[%c0_667, %c9_668] : memref<16x47xf32, #tpu.memory_space<vmem>>, vector<16x32xf32>
    %557 = vector.broadcast %555 : vector<16x1xf32> to vector<16x32xf32>
    %558 = arith.mulf %557, %556 : vector<16x32xf32>
    %559 = arith.addf %554, %558 : vector<16x32xf32>
    %c0_669 = arith.constant 0 : index
    %c10_670 = arith.constant 10 : index
    %560 = vector.load %arg5[%c0_669, %c10_670] : memref<16x16xf32, #tpu.memory_space<vmem>>, vector<16x1xf32>
    %c0_671 = arith.constant 0 : index
    %c10_672 = arith.constant 10 : index
    %561 = vector.load %arg12[%c0_671, %c10_672] : memref<16x47xf32, #tpu.memory_space<vmem>>, vector<16x32xf32>
    %562 = vector.broadcast %560 : vector<16x1xf32> to vector<16x32xf32>
    %563 = arith.mulf %562, %561 : vector<16x32xf32>
    %564 = arith.addf %559, %563 : vector<16x32xf32>
    %c0_673 = arith.constant 0 : index
    %c11_674 = arith.constant 11 : index
    %565 = vector.load %arg5[%c0_673, %c11_674] : memref<16x16xf32, #tpu.memory_space<vmem>>, vector<16x1xf32>
    %c0_675 = arith.constant 0 : index
    %c11_676 = arith.constant 11 : index
    %566 = vector.load %arg12[%c0_675, %c11_676] : memref<16x47xf32, #tpu.memory_space<vmem>>, vector<16x32xf32>
    %567 = vector.broadcast %565 : vector<16x1xf32> to vector<16x32xf32>
    %568 = arith.mulf %567, %566 : vector<16x32xf32>
    %569 = arith.addf %564, %568 : vector<16x32xf32>
    %c0_677 = arith.constant 0 : index
    %c12_678 = arith.constant 12 : index
    %570 = vector.load %arg5[%c0_677, %c12_678] : memref<16x16xf32, #tpu.memory_space<vmem>>, vector<16x1xf32>
    %c0_679 = arith.constant 0 : index
    %c12_680 = arith.constant 12 : index
    %571 = vector.load %arg12[%c0_679, %c12_680] : memref<16x47xf32, #tpu.memory_space<vmem>>, vector<16x32xf32>
    %572 = vector.broadcast %570 : vector<16x1xf32> to vector<16x32xf32>
    %573 = arith.mulf %572, %571 : vector<16x32xf32>
    %574 = arith.addf %569, %573 : vector<16x32xf32>
    %c0_681 = arith.constant 0 : index
    %c13_682 = arith.constant 13 : index
    %575 = vector.load %arg5[%c0_681, %c13_682] : memref<16x16xf32, #tpu.memory_space<vmem>>, vector<16x1xf32>
    %c0_683 = arith.constant 0 : index
    %c13_684 = arith.constant 13 : index
    %576 = vector.load %arg12[%c0_683, %c13_684] : memref<16x47xf32, #tpu.memory_space<vmem>>, vector<16x32xf32>
    %577 = vector.broadcast %575 : vector<16x1xf32> to vector<16x32xf32>
    %578 = arith.mulf %577, %576 : vector<16x32xf32>
    %579 = arith.addf %574, %578 : vector<16x32xf32>
    %c0_685 = arith.constant 0 : index
    %c14_686 = arith.constant 14 : index
    %580 = vector.load %arg5[%c0_685, %c14_686] : memref<16x16xf32, #tpu.memory_space<vmem>>, vector<16x1xf32>
    %c0_687 = arith.constant 0 : index
    %c14_688 = arith.constant 14 : index
    %581 = vector.load %arg12[%c0_687, %c14_688] : memref<16x47xf32, #tpu.memory_space<vmem>>, vector<16x32xf32>
    %582 = vector.broadcast %580 : vector<16x1xf32> to vector<16x32xf32>
    %583 = arith.mulf %582, %581 : vector<16x32xf32>
    %584 = arith.addf %579, %583 : vector<16x32xf32>
    %c0_689 = arith.constant 0 : index
    %c15_690 = arith.constant 15 : index
    %585 = vector.load %arg5[%c0_689, %c15_690] : memref<16x16xf32, #tpu.memory_space<vmem>>, vector<16x1xf32>
    %c0_691 = arith.constant 0 : index
    %c15_692 = arith.constant 15 : index
    %586 = vector.load %arg12[%c0_691, %c15_692] : memref<16x47xf32, #tpu.memory_space<vmem>>, vector<16x32xf32>
    %587 = vector.broadcast %585 : vector<16x1xf32> to vector<16x32xf32>
    %588 = arith.mulf %587, %586 : vector<16x32xf32>
    %589 = arith.addf %584, %588 : vector<16x32xf32>
    %c0_693 = arith.constant 0 : index
    %c0_694 = arith.constant 0 : index
    %590 = vector.load %arg6[%c0_693, %c0_694] : memref<16x16xf32, #tpu.memory_space<vmem>>, vector<16x16xf32>
    %cst_695 = arith.constant dense<0.000000e+00> : vector<16x32xf32>
    %591 = tpu.matmul %590, %589, %cst_695 {dimension_numbers = #tpu.dot_dimension_numbers<[1], [0], [0], [1], [0, 0, 1, 1], [], []>} : vector<16x16xf32>, vector<16x32xf32>, vector<16x32xf32> -> vector<16x32xf32>
    %c0_696 = arith.constant 0 : index
    %c0_697 = arith.constant 0 : index
    %592 = vector.load %arg7[%c0_696, %c0_697] : memref<16x1xf32, #tpu.memory_space<vmem>>, vector<16x1xf32>
    %593 = vector.broadcast %592 : vector<16x1xf32> to vector<16x32xf32>
    %594 = arith.addf %591, %593 : vector<16x32xf32>
    %cst_698 = arith.constant 0.000000e+00 : f32
    %595 = vector.broadcast %cst_698 : f32 to vector<16x32xf32>
    %596 = arith.maximumf %594, %595 : vector<16x32xf32>
    %c0_699 = arith.constant 0 : index
    %c0_700 = arith.constant 0 : index
    %597 = vector.load %arg8[%c0_699, %c0_700] : memref<32x4xf32, #tpu.memory_space<vmem>>, vector<32x4xf32>
    %cst_701 = arith.constant dense<0.000000e+00> : vector<16x4xf32>
    %598 = tpu.matmul %596, %597, %cst_701 {dimension_numbers = #tpu.dot_dimension_numbers<[1], [0], [0], [1], [0, 0, 1, 1], [], []>} : vector<16x32xf32>, vector<32x4xf32>, vector<16x4xf32> -> vector<16x4xf32>
    %c0_702 = arith.constant 0 : index
    %c0_703 = arith.constant 0 : index
    %599 = vector.load %arg9[%c0_702, %c0_703] : memref<4x16xf32, #tpu.memory_space<vmem>>, vector<4x16xf32>
    %cst_704 = arith.constant dense<0.000000e+00> : vector<4x4xf32>
    %600 = tpu.matmul %599, %598, %cst_704 {dimension_numbers = #tpu.dot_dimension_numbers<[1], [0], [0], [1], [0, 0, 1, 1], [], []>} : vector<4x16xf32>, vector<16x4xf32>, vector<4x4xf32> -> vector<4x4xf32>
    %cst_705 = arith.constant dense<0.000000e+00> : vector<4xf32>
    %601 = vector.multi_reduction <add>, %600, %cst_705 [1] : vector<4x4xf32> to vector<4xf32>
    %cst_706 = arith.constant 4.000000e+00 : f32
    %602 = vector.broadcast %cst_706 : f32 to vector<4xf32>
    %603 = arith.divf %601, %602 : vector<4xf32>
    %604 = vector.shape_cast %603 : vector<4xf32> to vector<1x4xf32>
    %c1_707 = arith.constant 1 : index
    %c0_708 = arith.constant 0 : index
    %c0_709 = arith.constant 0 : index
    %605 = vector.load %arg10[%c1_707, %c0_708, %c0_709] : memref<2x1x4xf32, #tpu.memory_space<vmem>>, vector<1x1x4xf32>
    %606 = vector.shape_cast %605 : vector<1x1x4xf32> to vector<1x4xf32>
    %607 = vector.shape_cast %604 : vector<1x4xf32> to vector<1x1x4xf32>
    tpu.vector_store %arg10[%c1_707, %c0_708, %c0_709], %607 {strides = array<i32>} : memref<2x1x4xf32, #tpu.memory_space<vmem>>, vector<1x1x4xf32>,
    return
  }
  func.func @transform_0(%arg0: i32) -> (i32, i32, i32) {
    %c0_i32 = arith.constant 0 : i32
    %c0_i32_0 = arith.constant 0 : i32
    %c0_i32_1 = arith.constant 0 : i32
    return %arg0, %c0_i32, %c0_i32_0 : i32, i32, i32
  }
  func.func @transform_1(%arg0: i32) -> (i32, i32) {
    %c0_i32 = arith.constant 0 : i32
    %c0_i32_0 = arith.constant 0 : i32
    %c0_i32_1 = arith.constant 0 : i32
    return %c0_i32, %c0_i32_0 : i32, i32
  }
  func.func @transform_2(%arg0: i32) -> (i32, i32) {
    %c0_i32 = arith.constant 0 : i32
    %c0_i32_0 = arith.constant 0 : i32
    %c0_i32_1 = arith.constant 0 : i32
    return %c0_i32, %c0_i32_0 : i32, i32
  }
  func.func @transform_3(%arg0: i32) -> (i32, i32) {
    %c0_i32 = arith.constant 0 : i32
    %c0_i32_0 = arith.constant 0 : i32
    %c0_i32_1 = arith.constant 0 : i32
    return %c0_i32, %c0_i32_0 : i32, i32
  }
  func.func @transform_4(%arg0: i32) -> (i32, i32) {
    %c0_i32 = arith.constant 0 : i32
    %c0_i32_0 = arith.constant 0 : i32
    %c0_i32_1 = arith.constant 0 : i32
    return %c0_i32, %c0_i32_0 : i32, i32
  }
  func.func @transform_5(%arg0: i32) -> (i32, i32) {
    %c0_i32 = arith.constant 0 : i32
    %c0_i32_0 = arith.constant 0 : i32
    %c0_i32_1 = arith.constant 0 : i32
    return %c0_i32, %c0_i32_0 : i32, i32
  }
  func.func @transform_6(%arg0: i32) -> (i32, i32) {
    %c0_i32 = arith.constant 0 : i32
    %c0_i32_0 = arith.constant 0 : i32
    %c0_i32_1 = arith.constant 0 : i32
    return %c0_i32, %c0_i32_0 : i32, i32
  }
  func.func @transform_7(%arg0: i32) -> (i32, i32) {
    %c0_i32 = arith.constant 0 : i32
    %c0_i32_0 = arith.constant 0 : i32
    %c0_i32_1 = arith.constant 0 : i32
    return %c0_i32, %c0_i32_0 : i32, i32
  }
  func.func @transform_8(%arg0: i32) -> (i32, i32) {
    %c0_i32 = arith.constant 0 : i32
    %c0_i32_0 = arith.constant 0 : i32
    %c0_i32_1 = arith.constant 0 : i32
    return %c0_i32, %c0_i32_0 : i32, i32
  }
  func.func @transform_9(%arg0: i32) -> (i32, i32, i32) {
    %c0_i32 = arith.constant 0 : i32
    %c0_i32_0 = arith.constant 0 : i32
    %c0_i32_1 = arith.constant 0 : i32
    return %arg0, %c0_i32, %c0_i32_0 : i32, i32, i32
  }
}

</mosaic_0001>

<bundles_post_ra>
// kernel: tpu_custom_call.1
= control target key start
LH: loop header
LB: loop body
LE: loop exit
PB: predicated region body
PF: predicated region fallthrough
CT: control target
= control target key end

     0   :  { %14 = vsyncpa [#allocation5], 0  ;;  %s11540_s0 = inlined_call_operand.hbm [shape: f32[2,24,191], index: 0, kind: input, shape index: {}]   ;;  %s11541_s1 = inlined_call_operand.vmem [shape: f32[16,1536], index: 1, kind: input, shape index: {}]   ;;  %s11542_s2 = inlined_call_operand.vmem [shape: f32[16,1], index: 2, kind: input, shape index: {}]   ;;  %s11543_s3 = inlined_call_operand.vmem [shape: f32[128,32], index: 3, kind: input, shape index: {}]   ;;  %s11544_s4 = inlined_call_operand.hbm [shape: f32[16,16], index: 4, kind: input, shape index: {}]   ;;  %s11545_s5 = inlined_call_operand.hbm [shape: f32[16,16], index: 5, kind: input, shape index: {}]   ;;  %s11546_s6 = inlined_call_operand.vmem [shape: f32[16,1], index: 6, kind: input, shape index: {}]   ;;  %s11547_s7 = inlined_call_operand.vmem [shape: f32[32,4], index: 7, kind: input, shape index: {}]   ;;  %s11548_s8 = inlined_call_operand.vmem [shape: f32[4,16], index: 8, kind: input, shape index: {}]   ;;  %s11549_s9 = inlined_call_operand.hbm [shape: f32[2,1,4], index: 9, kind: output, shape index: {}]  }
   0x1   :  { %15 = vsyncpa [#allocation8], 0  ;;  %s40_s11 = sshll.u32 %s11544_s4, 4  ;;  %s41_s11 = int_to_ptr.hbm [resolvable:$true] %s40_s11 }
   0x2   :  { %16 = vsyncpa [#allocation6], 0  ;;  %s8483_s12 = smov [#allocation7]   ;;  %s21_s16 = sshll.u32 %s11540_s0, 4  ;;  %s22_s16 = int_to_ptr.hbm [resolvable:$true] %s21_s16 }
   0x3   :  { %s42_s13 = sshll.u32 %s8483_s12, 4  ;;  %s8484_s17 = smov 128   ;;  %s43_s13 = int_to_ptr.vmem [resolvable:$true] %s42_s13 }
   0x4   :  { %s8485_s18 = smov 8   ;;  %s8486_s19 = smov [#allocation4]  }
   0x5   :  { %48 = dma.hbm_to_vmem [thread:$0]  %s41_s11, 256, %s43_s13, [#allocation8], %s8484_s17, %s8484_s17, %s8485_s18  }
   0x6   :  { %s23_s20 = sshll.u32 %s8486_s19, 4  ;;  %s8487_s21 = smov 256   ;;  %s24_s20 = int_to_ptr.vmem [resolvable:$true] %s23_s20 }
   0x7   :  { %s11550_s22 = smov 16   ;;  %s53_s24 = sshll.u32 %s11545_s5, 4  ;;  %s54_s24 = int_to_ptr.hbm [resolvable:$true] %s53_s24 }
   0x8   :  { %29 = dma.hbm_to_vmem [thread:$0]  %s22_s16, 1536, %s24_s20, [#allocation5], %s8487_s21, %s8487_s21, %s11550_s22  }
   0x9   :  { %s8489_s25 = smov [#allocation9]  }
   0xa   :  { %s55_s26 = sshll.u32 %s8489_s25, 4  ;;  %s56_s26 = int_to_ptr.vmem [resolvable:$true] %s55_s26 }
   0xb   :  { %61 = dma.hbm_to_vmem [thread:$0]  %s54_s24, 256, %s56_s26, [#allocation8], %s8484_s17, %s8484_s17, %s8485_s18  }
   0xc   :  { %8477 = dma.done.wait [#allocation5], 1536  }
   0xd   :  { %8478 = vsyncadd [#allocation5], 4294965760 }
   0xe   :  { %8479 = dma.done.wait [#allocation8], 512  }
   0xf   :  { %8480 = vsyncadd [#allocation8], 4294966784  ;;  %v93_v0 = vld [vmem:[#allocation4 + $0x20] sm:$0xff]  ;;  %v94_v1 = vld [vmem:[#allocation4 + $0x28] sm:$0xff]  ;;  %s8490_s0 = smov 127   ;;  %s8491_s5 = smov 126  }
  0x10   :  { %v89_v2 = vld [vmem:[#allocation4] sm:$0xff]  ;;  %v8634_v3 = vpack.i.bf16 %v94_v1, %v93_v0  ;;  %v90_v4 = vld [vmem:[#allocation4 + $0x8] sm:$0xff]  ;;  %v91_v5 = vld [vmem:[#allocation4 + $0x10] sm:$0xff]  ;;  %s8492_s27 = smov 125   ;;  %s8493_s28 = smov 124   ;;  %vm249_vm0 = vcmask 1006592  }
  0x11   :  { %v92_v6 = vld [vmem:[#allocation4 + $0x18] sm:$0xff]  ;;  %v8636_v7 = vpack.i.bf16 %v90_v4, %v89_v2  ;;  %s8494_s29 = smov 123   ;;  %s8495_s30 = smov 122   ;;  %vm215_vm1 = vcmask 1014784   ;;  %vm181_vm2 = vcmask 1022976   ;;  %vm147_vm3 = vcmask 1031168  }
  0x12   :  { %v8638_v8 = vpack.i.bf16 %v92_v6, %v91_v5  ;;  %6432 = vrot.lane.b32.xlu1 %v8634_v3, %s8490_s0  ;;  %s11736_s10 = smov 121   ;;  %s8497_s11 = smov 120   ;;  %vm113_vm4 = vcmask 1039360   ;;  %vm419_vm5 = vcmask 965632   ;;  %vm385_vm6 = vcmask 973824  }
  0x13   :  { %6422 = vrot.lane.b32.xlu0 %v8636_v7, %s8490_s0  ;;  %s11734_s12 = smov 119   ;;  %s11730_s13 = smov 118   ;;  %vm351_vm7 = vcmask 982016   ;;  %vm317_vm8 = vcmask 990208   ;;  %vm11583_vm9 = vcmask 924672   ;;  %vm283_vm10 = vcmask 998400  }
  0x14   :  { %6442 = vrot.lane.b32.xlu2 %v8638_v8, %s8491_s5  ;;  %s11732_s14 = smov 117   ;;  %s11728_s15 = smov 116   ;;  %vm11580_vm11 = vcmask 932864   ;;  %vm11579_vm12 = vcmask 941056   ;;  %vm11576_vm13 = vcmask 949248   ;;  %vm11573_vm14 = vcmask 957440  }
  0x15   :  { %s11726_s16 = smov 115   ;;  %s11716_s17 = smov 114   ;;  %vm793_vm15 = vcmask 875520  }
  0x16   :  { %s11694_s18 = smov 113   ;;  %s11692_s19 = smov 112  }
  0x17   :  { %s11686_s20 = smov 111   ;;  %s11684_s21 = smov 110  }
  0x18   :  { %s11676_s4 = smov 109   ;;  %s11674_s23 = smov 108  }
  0x19   :  { %s11672_s24 = smov 107   ;;  %s11571_s25 = smov 106  }
  0x1a   :  { %6437 = vrot.lane.b32.xlu1 %v8636_v7, %s8491_s5  ;;  %s11559_s26 = smov 105   ;;  %s11551_s22 = smov 104  }
  0x1b   :  { %6427 = vrot.lane.b32.xlu0 %v8638_v8, %s8490_s0 }
  0x1c   :  { %6447 = vrot.lane.b32.xlu2 %v8634_v3, %s8491_s5 }
  0x22   :  { %6457 = vrot.lane.b32.xlu1 %v8638_v8, %s8492_s27 }
  0x23   :  { %6452 = vrot.lane.b32.xlu0 %v8636_v7, %s8492_s27 }
  0x24   :  { %6462 = vrot.lane.b32.xlu2 %v8634_v3, %s8492_s27 }
  0x2a   :  { %6472 = vrot.lane.b32.xlu1 %v8638_v8, %s8493_s28 }
  0x2b   :  { %6467 = vrot.lane.b32.xlu0 %v8636_v7, %s8493_s28 }
  0x2c   :  { %6477 = vrot.lane.b32.xlu2 %v8634_v3, %s8493_s28 }
  0x32   :  { %6487 = vrot.lane.b32.xlu1 %v8638_v8, %s8494_s29 }
  0x33   :  { %6482 = vrot.lane.b32.xlu0 %v8636_v7, %s8494_s29 }
  0x34   :  { %6492 = vrot.lane.b32.xlu2 %v8634_v3, %s8494_s29 }
  0x3a   :  { %6502 = vrot.lane.b32.xlu1 %v8638_v8, %s8495_s30 }
  0x3b   :  { %6497 = vrot.lane.b32.xlu0 %v8636_v7, %s8495_s30 }
  0x3c   :  { %6507 = vrot.lane.b32.xlu2 %v8634_v3, %s8495_s30 }
  0x42   :  { %6517 = vrot.lane.b32.xlu1 %v8638_v8, %s11736_s10 }
  0x43   :  { %6512 = vrot.lane.b32.xlu0 %v8636_v7, %s11736_s10 }
  0x44   :  { %6522 = vrot.lane.b32.xlu2 %v8634_v3, %s11736_s10 }
  0x4a   :  { %6532 = vrot.lane.b32.xlu1 %v8638_v8, %s8497_s11 }
  0x4b   :  { %6527 = vrot.lane.b32.xlu0 %v8636_v7, %s8497_s11 }
  0x4c   :  { %6537 = vrot.lane.b32.xlu2 %v8634_v3, %s8497_s11 }
  0x52   :  { %6547 = vrot.lane.b32.xlu1 %v8638_v8, %s11734_s12 }
  0x53   :  { %6542 = vrot.lane.b32.xlu0 %v8636_v7, %s11734_s12 }
  0x54   :  { %6552 = vrot.lane.b32.xlu2 %v8634_v3, %s11734_s12 }
  0x5a   :  { %6562 = vrot.lane.b32.xlu1 %v8638_v8, %s11730_s13 }
  0x5b   :  { %6557 = vrot.lane.b32.xlu0 %v8636_v7, %s11730_s13 }
  0x5c   :  { %6567 = vrot.lane.b32.xlu2 %v8634_v3, %s11730_s13 }
  0x62   :  { %6577 = vrot.lane.b32.xlu1 %v8638_v8, %s11732_s14 }
  0x63   :  { %6572 = vrot.lane.b32.xlu0 %v8636_v7, %s11732_s14 }
  0x64   :  { %6582 = vrot.lane.b32.xlu2 %v8634_v3, %s11732_s14 }
  0x6a   :  { %6592 = vrot.lane.b32.xlu1 %v8638_v8, %s11728_s15 }
  0x6b   :  { %6587 = vrot.lane.b32.xlu0 %v8636_v7, %s11728_s15 }
  0x6c   :  { %6597 = vrot.lane.b32.xlu2 %v8634_v3, %s11728_s15 }
  0x6e   :  { %v8712_v9 = vpop.permute.xlu2 %6442 }
  0x6f   :  { %v6445_v52 = vunpack.i.h.bf16 %v8712_v9  ;;  %v6444_v53 = vunpack.i.l.bf16 %v8712_v9 }
  0x71   :  { %v149_v63 = vsel %vm147_vm3, %v6444_v53, %v6445_v52 }
  0x72   :  { %6607 = vrot.lane.b32.xlu1 %v8638_v8, %s11726_s16 }
  0x73   :  { %6602 = vrot.lane.b32.xlu0 %v8636_v7, %s11726_s16 }
  0x74   :  { %6612 = vrot.lane.b32.xlu2 %v8634_v3, %s11726_s16 }
  0x76   :  { %v8720_v10 = vpop.permute.xlu2 %6447 }
  0x77   :  { %v6450_v49 = vunpack.i.h.bf16 %v8720_v10  ;;  %v6449_v50 = vunpack.i.l.bf16 %v8720_v10 }
  0x79   :  { %v150_v60 = vsel %vm147_vm3, %v6449_v50, %v6450_v49 }
  0x7a   :  { %6622 = vrot.lane.b32.xlu1 %v8638_v8, %s11716_s17 }
  0x7b   :  { %6617 = vrot.lane.b32.xlu0 %v8636_v7, %s11716_s17 }
  0x7c   :  { %6627 = vrot.lane.b32.xlu2 %v8634_v3, %s11716_s17 }
  0x7e   :  { %v8728_v11 = vpop.permute.xlu2 %6462 }
  0x7f   :  { %v6465_v37 = vunpack.i.h.bf16 %v8728_v11  ;;  %v6464_v38 = vunpack.i.l.bf16 %v8728_v11 }
  0x81   :  { %v184_v48 = vsel %vm181_vm2, %v6464_v38, %v6465_v37 }
  0x82   :  { %6637 = vrot.lane.b32.xlu1 %v8638_v8, %s11694_s18 }
  0x83   :  { %6632 = vrot.lane.b32.xlu0 %v8636_v7, %s11694_s18 }
  0x84   :  { %6642 = vrot.lane.b32.xlu2 %v8634_v3, %s11694_s18  ;;  %v8736_v12 = vpop.permute.xlu1 %6432  ;;  %s11745_s18 = smov 106  }
  0x85   :  { %v8738_v13 = vpop.permute.xlu0 %6422  ;;  %v6435_v61 = vunpack.i.h.bf16 %v8736_v12  ;;  %v6434_v62 = vunpack.i.l.bf16 %v8736_v12 }
  0x86   :  { %v6478_v14 = vpop.permute.xlu2 %6477  ;;  %v6425_v4 = vunpack.i.h.bf16 %v8738_v13  ;;  %v6424_v5 = vunpack.i.l.bf16 %v8738_v13 }
  0x87   :  { %v6480_v27 = vunpack.i.h.bf16 %v6478_v14  ;;  %v6479_v28 = vunpack.i.l.bf16 %v6478_v14  ;;  %v116_v9 = vsel %vm113_vm4, %v6434_v62, %v6435_v61 }
  0x88   :  { %v114_v14 = vsel %vm113_vm4, %v6424_v5, %v6425_v4 }
  0x89   :  { %v218_v36 = vsel %vm215_vm1, %v6479_v28, %v6480_v27  ;;  %v910_v28 = vld [vmem:[#allocation4 + $0x28] sm:$0xff] }
  0x8a   :  { %6652 = vrot.lane.b32.xlu1 %v8638_v8, %s11692_s19 }
  0x8b   :  { %6647 = vrot.lane.b32.xlu0 %v8636_v7, %s11692_s19 }
  0x8c   :  { %6657 = vrot.lane.b32.xlu2 %v8634_v3, %s11692_s19  ;;  %v8746_v15 = vpop.permute.xlu1 %6437  ;;  %s11746_s19 = smov 105  }
  0x8d   :  { %v8748_v16 = vpop.permute.xlu0 %6427  ;;  %v6440_v58 = vunpack.i.h.bf16 %v8746_v15  ;;  %v6439_v59 = vunpack.i.l.bf16 %v8746_v15 }
  0x8e   :  { %v8750_v17 = vpop.permute.xlu2 %6492  ;;  %v6430_v0 = vunpack.i.h.bf16 %v8748_v16  ;;  %v6429_v1 = vunpack.i.l.bf16 %v8748_v16 }
  0x8f   :  { %v148_v2 = vsel %vm147_vm3, %v6439_v59, %v6440_v58 }
  0x90   :  { %v115_v12 = vsel %vm113_vm4, %v6429_v1, %v6430_v0 }
  0x92   :  { %6667 = vrot.lane.b32.xlu1 %v8638_v8, %s11686_s20 }
  0x93   :  { %6662 = vrot.lane.b32.xlu0 %v8636_v7, %s11686_s20 }
  0x94   :  { %6672 = vrot.lane.b32.xlu2 %v8634_v3, %s11686_s20  ;;  %v6458_v18 = vpop.permute.xlu1 %6457  ;;  %s11744_s20 = smov 107  }
  0x95   :  { %v6453_v19 = vpop.permute.xlu0 %6452  ;;  %v6460_v43 = vunpack.i.h.bf16 %v6458_v18  ;;  %v6459_v44 = vunpack.i.l.bf16 %v6458_v18  ;;  %v909_v18 = vld [vmem:[#allocation4 + $0x20] sm:$0xff] }
  0x96   :  { %v8758_v20 = vpop.permute.xlu2 %6507  ;;  %v6455_v46 = vunpack.i.h.bf16 %v6453_v19  ;;  %v6454_v47 = vunpack.i.l.bf16 %v6453_v19 }
  0x97   :  { %v183_v51 = vsel %vm181_vm2, %v6459_v44, %v6460_v43 }
  0x98   :  { %v182_v55 = vsel %vm181_vm2, %v6454_v47, %v6455_v46 }
  0x9a   :  { %6682 = vrot.lane.b32.xlu1 %v8638_v8, %s11684_s21 }
  0x9b   :  { %6677 = vrot.lane.b32.xlu0 %v8636_v7, %s11684_s21 }
  0x9c   :  { %6687 = vrot.lane.b32.xlu2 %v8634_v3, %s11684_s21  ;;  %v6473_v21 = vpop.permute.xlu1 %6472  ;;  %s11738_s21 = smov 113  }
  0x9d   :  { %v6468_v22 = vpop.permute.xlu0 %6467  ;;  %v6475_v31 = vunpack.i.h.bf16 %v6473_v21  ;;  %v6474_v32 = vunpack.i.l.bf16 %v6473_v21 }
  0x9e   :  { %v8766_v23 = vpop.permute.xlu2 %6522  ;;  %v6470_v34 = vunpack.i.h.bf16 %v6468_v22  ;;  %v6469_v35 = vunpack.i.l.bf16 %v6468_v22 }
  0x9f   :  { %v217_v40 = vsel %vm215_vm1, %v6474_v32, %v6475_v31  ;;  %v8857_v31 = vld [vmem:[#allocation4 + $0x10] sm:$0xff]  ;;  %v6525_v58 = vunpack.i.h.bf16 %v8766_v23  ;;  %v6524_v59 = vunpack.i.l.bf16 %v8766_v23 }
  0xa0   :  { %v216_v45 = vsel %vm215_vm1, %v6469_v35, %v6470_v34  ;;  %v8864_v35 = vpack.i.bf16 %v910_v28, %v909_v18  ;;  %v6494_v28 = vunpack.i.l.bf16 %v8750_v17 }
  0xa2   :  { %6697 = vrot.lane.b32.xlu1 %v8638_v8, %s11676_s4 }
  0xa3   :  { %6692 = vrot.lane.b32.xlu0 %v8636_v7, %s11676_s4 }
  0xa4   :  { %6702 = vrot.lane.b32.xlu2 %v8634_v3, %s11676_s4  ;;  %v8774_v24 = vpop.permute.xlu1 %6487  ;;  %s11743_s4 = smov 108  }
  0xa5   :  { %v6483_v25 = vpop.permute.xlu0 %6482 }
  0xa6   :  { %v8776_v26 = vpop.permute.xlu2 %6537  ;;  %v6485_v29 = vunpack.i.h.bf16 %v6483_v25  ;;  %v6484_v30 = vunpack.i.l.bf16 %v6483_v25 }
  0xa7   :  { %v6539_v46 = vunpack.i.l.bf16 %v8776_v26 }
  0xa8   :  { %v250_v33 = vsel %vm249_vm0, %v6484_v30, %v6485_v29 }
  0xa9   :  { %2459 = vmatpush.msra.mxu0 %v250_v33 }
  0xaa   :  { %6712 = vrot.lane.b32.xlu1 %v8638_v8, %s11674_s23 }
  0xab   :  { %6707 = vrot.lane.b32.xlu0 %v8636_v7, %s11674_s23  ;;  %2460 = vmatpush.msra.mxu0 %v218_v36  ;;  %v8866_v36 = vld [vmem:[#allocation4] sm:$0xff] }
  0xac   :  { %v8786_v39 = vpop.permute.xlu1 %6502  ;;  %6717 = vrot.lane.b32.xlu2 %v8634_v3, %s11674_s23  ;;  %s11739_s23 = smov 112  }
  0xad   :  { %v8791_v41 = vpop.permute.xlu0 %6497  ;;  %2461 = vmatpush.msra.mxu0 %v217_v40 }
  0xae   :  { %v8793_v42 = vpop.permute.xlu2 %6552 }
  0xaf   :  { %2462 = vmatpush.msra.mxu0 %v216_v45  ;;  %v6555_v32 = vunpack.i.h.bf16 %v8793_v42  ;;  %v6554_v33 = vunpack.i.l.bf16 %v8793_v42  ;;  %v6540_v45 = vunpack.i.h.bf16 %v8776_v26 }
  0xb1   :  { %2463 = vmatpush.msra.mxu0 %v184_v48  ;;  %v388_v43 = vsel %vm385_vm6, %v6554_v33, %v6555_v32  ;;  %v354_v26 = vsel %vm351_vm7, %v6539_v46, %v6540_v45  ;;  %v6490_v32 = vunpack.i.h.bf16 %v8774_v24 }
  0xb2   :  { %6727 = vrot.lane.b32.xlu1 %v8638_v8, %s11672_s24 }
  0xb3   :  { %6722 = vrot.lane.b32.xlu0 %v8636_v7, %s11672_s24  ;;  %2464 = vmatpush.msra.mxu0 %v183_v51 }
  0xb4   :  { %v8806_v54 = vpop.permute.xlu1 %6517  ;;  %6732 = vrot.lane.b32.xlu2 %v8634_v3, %s11672_s24  ;;  %s11740_s24 = smov 111  }
  0xb5   :  { %v8811_v56 = vpop.permute.xlu0 %6512  ;;  %2465 = vmatpush.msra.mxu0 %v182_v55  ;;  %v6520_v62 = vunpack.i.h.bf16 %v8806_v54 }
  0xb6   :  { %v8813_v57 = vpop.permute.xlu2 %6567  ;;  %v6515_v5 = vunpack.i.h.bf16 %v8811_v56 }
  0xb7   :  { %2466 = vmatpush.msra.mxu0 %v150_v60 }
  0xb9   :  { %2467 = vmatpush.msra.mxu0 %v149_v63  ;;  %v6519_v63 = vunpack.i.l.bf16 %v8806_v54  ;;  %v6510_v54 = vunpack.i.h.bf16 %v8758_v20 }
  0xba   :  { %6742 = vrot.lane.b32.xlu1 %v8638_v8, %s11571_s25 }
  0xbb   :  { %6737 = vrot.lane.b32.xlu0 %v8636_v7, %s11571_s25  ;;  %2468 = vmatpush.msra.mxu0 %v148_v2 }
  0xbc   :  { %v8830_v6 = vpop.permute.xlu1 %6532  ;;  %6747 = vrot.lane.b32.xlu2 %v8634_v3, %s11571_s25  ;;  %s11581_s25 = smov 93  }
  0xbd   :  { %v8835_v10 = vpop.permute.xlu0 %6527  ;;  %2469 = vmatpush.msra.mxu0 %v116_v9  ;;  %v6535_v50 = vunpack.i.h.bf16 %v8830_v6  ;;  %v6534_v51 = vunpack.i.l.bf16 %v8830_v6  ;;  %v6514_v6 = vunpack.i.l.bf16 %v8811_v56  ;;  %v320_v9 = vsel %vm317_vm8, %v6524_v59, %v6525_v58 }
  0xbe   :  { %v8837_v11 = vpop.permute.xlu2 %6582  ;;  %v6530_v53 = vunpack.i.h.bf16 %v8835_v10  ;;  %v6529_v55 = vunpack.i.l.bf16 %v8835_v10  ;;  %v6505_v56 = vunpack.i.h.bf16 %v8786_v39 }
  0xbf   :  { %2470 = vmatpush.msra.mxu0 %v115_v12  ;;  %v353_v60 = vsel %vm351_vm7, %v6534_v51, %v6535_v50  ;;  %v6509_v12 = vunpack.i.l.bf16 %v8758_v20  ;;  %v1008_v20 = vld [vmem:[#allocation4 + $0x8] sm:$0xff] }
  0xc0   :  { %v352_v23 = vsel %vm351_vm7, %v6529_v55, %v6530_v53 }
  0xc1   :  { %2471 = vmatpush.msra.mxu0 %v114_v14  ;;  %v319_v14 = vsel %vm317_vm8, %v6519_v63, %v6520_v62 }
  0xc2   :  { %6757 = vrot.lane.b32.xlu1 %v8638_v8, %s11559_s26 }
  0xc3   :  { %6752 = vrot.lane.b32.xlu0 %v8636_v7, %s11559_s26  ;;  %2472 = vmatpush.msra.mxu0 %v909_v18 }
  0xc4   :  { %v6548_v13 = vpop.permute.xlu1 %6547  ;;  %6762 = vrot.lane.b32.xlu2 %v8634_v3, %s11559_s26  ;;  %s11561_s26 = smov 99  }
  0xc5   :  { %v6543_v15 = vpop.permute.xlu0 %6542  ;;  %2473 = vmatpush.msra.mxu0 %v8857_v31  ;;  %v6550_v37 = vunpack.i.h.bf16 %v6548_v13  ;;  %v6549_v38 = vunpack.i.l.bf16 %v6548_v13  ;;  %v6504_v13 = vunpack.i.l.bf16 %v8786_v39  ;;  %v286_v39 = vsel %vm283_vm10, %v6509_v12, %v6510_v54 }
  0xc6   :  { %v8847_v16 = vpop.permute.xlu2 %6597  ;;  %v6545_v40 = vunpack.i.h.bf16 %v6543_v15  ;;  %v6544_v42 = vunpack.i.l.bf16 %v6543_v15  ;;  %v318_v15 = vsel %vm317_vm8, %v6514_v6, %v6515_v5 }
  0xc7   :  { %2474 = vmatpush.msra.mxu0 %v8866_v36  ;;  %v387_v48 = vsel %vm385_vm6, %v6549_v38, %v6550_v37  ;;  %v6599_v54 = vunpack.i.l.bf16 %v8847_v16 }
  0xc8   :  { %v386_v52 = vsel %vm385_vm6, %v6544_v42, %v6545_v40 }
  0xca   :  { %6772 = vrot.lane.b32.xlu1 %v8638_v8, %s11551_s22 }
  0xcb   :  { %6767 = vrot.lane.b32.xlu0 %v8636_v7, %s11551_s22 }
  0xcc   :  { %v6563_v19 = vpop.permute.xlu1 %6562  ;;  %6777 = vrot.lane.b32.xlu2 %v8634_v3, %s11551_s22  ;;  %s11553_s22 = smov 103  }
  0xcd   :  { %v6565_v21 = vunpack.i.h.bf16 %v6563_v19  ;;  %v6564_v22 = vunpack.i.l.bf16 %v6563_v19  ;;  %v6558_v25 = vpop.permute.xlu0 %6557  ;;  %v6500_v19 = vunpack.i.h.bf16 %v8791_v41 }
  0xce   :  { %v8855_v27 = vpop.permute.xlu2 %6612  ;;  %v6560_v29 = vunpack.i.h.bf16 %v6558_v25  ;;  %v6559_v30 = vunpack.i.l.bf16 %v6558_v25 }
  0xcf   :  { %v421_v34 = vsel %vm419_vm5, %v6564_v22, %v6565_v21  ;;  %v6499_v21 = vunpack.i.l.bf16 %v8791_v41  ;;  %v6489_v41 = vunpack.i.l.bf16 %v8774_v24  ;;  %v6614_v62 = vunpack.i.l.bf16 %v8855_v27 }
  0xd0   :  { %2482 = vmatpush.msra.mxu1 %v421_v34  ;;  %v420_v3 = vsel %vm419_vm5, %v6559_v30, %v6560_v29  ;;  %v285_v29 = vsel %vm283_vm10, %v6504_v13, %v6505_v56  ;;  %v8936_v30 = vpack.i.bf16 %v1008_v20, %v8866_v36  ;;  %v1044_v34 = vld [vmem:[#allocation4 + $0x18] sm:$0xff] }
  0xd1   :  { %v284_v33 = vsel %vm283_vm10, %v6499_v21, %v6500_v19  ;;  %v251_v24 = vsel %vm249_vm0, %v6489_v41, %v6490_v32 }
  0xd2   :  { %6787 = vrot.lane.b32.xlu1 %v8638_v8, %s11553_s22  ;;  %2483 = vmatpush.msra.mxu1 %v420_v3 }
  0xd3   :  { %6782 = vrot.lane.b32.xlu0 %v8636_v7, %s11553_s22 }
  0xd4   :  { %v8874_v44 = vpop.permute.xlu1 %6577  ;;  %2484 = vmatpush.msra.mxu1 %v388_v43  ;;  %6792 = vrot.lane.b32.xlu2 %v8864_v35, %s11553_s22  ;;  %s11555_s22 = smov 102  }
  0xd5   :  { %v8880_v47 = vpop.permute.xlu0 %6572 }
  0xd6   :  { %v8883_v49 = vpop.permute.xlu2 %6627  ;;  %2485 = vmatpush.msra.mxu1 %v387_v48  ;;  %v6574_v32 = vunpack.i.l.bf16 %v8880_v47 }
  0xd7   :  { %v6629_v50 = vunpack.i.l.bf16 %v8883_v49 }
  0xd8   :  { %2486 = vmatpush.msra.mxu1 %v386_v52 }
  0xda   :  { %6802 = vrot.lane.b32.xlu1 %v8638_v8, %s11555_s22  ;;  %2487 = vmatpush.msra.mxu1 %v354_v26 }
  0xdb   :  { %6797 = vrot.lane.b32.xlu0 %v8636_v7, %s11555_s22 }
  0xdc   :  { %v8898_v61 = vpop.permute.xlu1 %6592  ;;  %2488 = vmatpush.msra.mxu1 %v353_v60  ;;  %6807 = vrot.lane.b32.xlu2 %v8864_v35, %s11555_s22  ;;  %s11557_s22 = smov 101   ;;  %v6615_v60 = vunpack.i.h.bf16 %v8855_v27 }
  0xdd   :  { %v8904_v0 = vpop.permute.xlu0 %6587  ;;  %v6595_v56 = vunpack.i.h.bf16 %v8898_v61  ;;  %v6594_v13 = vunpack.i.l.bf16 %v8898_v61 }
  0xde   :  { %v6643_v1 = vpop.permute.xlu2 %6642  ;;  %2489 = vmatpush.msra.mxu1 %v352_v23  ;;  %v524_v27 = vsel %vm11579_vm12, %v6614_v62, %v6615_v60  ;;  %v6590_v20 = vunpack.i.h.bf16 %v8904_v0  ;;  %v6589_v19 = vunpack.i.l.bf16 %v8904_v0 }
  0xdf   :  { %v6645_v2 = vunpack.i.h.bf16 %v6643_v1  ;;  %v6644_v4 = vunpack.i.l.bf16 %v6643_v1  ;;  %v489_v61 = vsel %vm11576_vm13, %v6594_v13, %v6595_v56 }
  0xe0   :  { %2490 = vmatpush.msra.mxu1 %v320_v9  ;;  %v488_v0 = vsel %vm11576_vm13, %v6589_v19, %v6590_v20 }
  0xe1   :  { %v592_v10 = vsel %vm11583_vm9, %v6644_v4, %v6645_v2 }
  0xe2   :  { %2505 = vmatpush.msra.mxu2 %v592_v10  ;;  %6817 = vrot.lane.b32.xlu1 %v8638_v8, %s11557_s22  ;;  %v6600_v10 = vunpack.i.h.bf16 %v8847_v16 }
  0xe3   :  { %2491 = vmatpush.msra.mxu1 %v319_v14  ;;  %6812 = vrot.lane.b32.xlu0 %v8636_v7, %s11557_s22  ;;  %v6495_v7 = vunpack.i.h.bf16 %v8750_v17 }
  0xe4   :  { %v8921_v18 = vpop.permute.xlu1 %6607  ;;  %6822 = vrot.lane.b32.xlu2 %v8864_v35, %s11557_s22  ;;  %s11569_s22 = smov 100   ;;  %v490_v21 = vsel %vm11576_vm13, %v6599_v54, %v6600_v10  ;;  %vm11596_vm13 = vcmask 891904  }
  0xe5   :  { %2492 = vmatpush.msra.mxu1 %v318_v15  ;;  %v8927_v22 = vpop.permute.xlu0 %6602  ;;  %v252_v17 = vsel %vm249_vm0, %v6494_v28, %v6495_v7  ;;  %v6610_v2 = vunpack.i.h.bf16 %v8921_v18  ;;  %v6609_v4 = vunpack.i.l.bf16 %v8921_v18  ;;  %v6580_v7 = vunpack.i.h.bf16 %v8874_v44 }
  0xe6   :  { %v8930_v25 = vpop.permute.xlu2 %6657  ;;  %v6605_v6 = vunpack.i.h.bf16 %v8927_v22  ;;  %v6604_v9 = vunpack.i.l.bf16 %v8927_v22  ;;  %v6585_v22 = vunpack.i.h.bf16 %v8837_v11  ;;  %v6579_v28 = vunpack.i.l.bf16 %v8874_v44 }
  0xe7   :  { %2493 = vmatpush.msra.mxu1 %v286_v39  ;;  %v523_v12 = vsel %vm11579_vm12, %v6609_v4, %v6610_v2  ;;  %v6584_v39 = vunpack.i.l.bf16 %v8837_v11  ;;  %v6575_v11 = vunpack.i.h.bf16 %v8880_v47 }
  0xe8   :  { %v522_v16 = vsel %vm11579_vm12, %v6604_v9, %v6605_v6  ;;  %vm11592_vm12 = vcmask 900096  }
  0xe9   :  { %2494 = vmatpush.msra.mxu1 %v285_v29 }
  0xea   :  { %6832 = vrot.lane.b32.xlu1 %v8638_v8, %s11569_s22  ;;  %v8952_v8 = vpack.i.bf16 %v1044_v34, %v8857_v31  ;;  %v6630_v31 = vunpack.i.h.bf16 %v8883_v49  ;;  %v6569_v34 = vunpack.i.l.bf16 %v8813_v57 }
  0xeb   :  { %2495 = vmatpush.msra.mxu1 %v284_v33  ;;  %6827 = vrot.lane.b32.xlu0 %v8936_v30, %s11569_s22  ;;  %v456_v33 = vsel %vm11573_vm14, %v6584_v39, %v6585_v22 }
  0xec   :  { %v6623_v3 = vpop.permute.xlu1 %6622  ;;  %6837 = vrot.lane.b32.xlu2 %v8864_v35, %s11569_s22  ;;  %v558_v49 = vsel %vm11580_vm11, %v6629_v50, %v6630_v31  ;;  %s11577_s22 = smov 94  }
  0xed   :  { %2496 = vmatpush.msra.mxu1 %v252_v17  ;;  %v6618_v36 = vpop.permute.xlu0 %6617  ;;  %v6625_v53 = vunpack.i.h.bf16 %v6623_v3  ;;  %v6624_v55 = vunpack.i.l.bf16 %v6623_v3  ;;  %v6570_v17 = vunpack.i.h.bf16 %v8813_v57  ;;  %v455_v3 = vsel %vm11573_vm14, %v6579_v28, %v6580_v7 }
  0xee   :  { %v8949_v37 = vpop.permute.xlu2 %6672  ;;  %v6620_v26 = vunpack.i.h.bf16 %v6618_v36  ;;  %v6619_v58 = vunpack.i.l.bf16 %v6618_v36  ;;  %v454_v36 = vsel %vm11573_vm14, %v6574_v32, %v6575_v11  ;;  %vm11646_vm14 = vcmask 883712  }
  0xef   :  { %2497 = vmatpush.msra.mxu1 %v251_v24  ;;  %v557_v23 = vsel %vm11580_vm11, %v6624_v55, %v6625_v53  ;;  %v422_v47 = vsel %vm419_vm5, %v6569_v34, %v6570_v17 }
  0xf0   :  { %v556_v5 = vsel %vm11580_vm11, %v6619_v58, %v6620_v26  ;;  %vm11589_vm11 = vcmask 908288  }
  0xf2   :  { %6847 = vrot.lane.b32.xlu1 %v8952_v8, %s11561_s26 }
  0xf3   :  { %6842 = vrot.lane.b32.xlu0 %v8936_v30, %s11561_s26 }
  0xf4   :  { %v6638_v38 = vpop.permute.xlu1 %6637  ;;  %6852 = vrot.lane.b32.xlu2 %v8864_v35, %s11561_s26  ;;  %s11563_s26 = smov 98  }
  0xf5   :  { %v6640_v40 = vunpack.i.h.bf16 %v6638_v38  ;;  %v6639_v42 = vunpack.i.l.bf16 %v6638_v38  ;;  %v6633_v43 = vpop.permute.xlu0 %6632 }
  0xf6   :  { %v8960_v45 = vpop.permute.xlu2 %6687  ;;  %v6635_v46 = vunpack.i.h.bf16 %v6633_v43  ;;  %v6634_v48 = vunpack.i.l.bf16 %v6633_v43 }
  0xf7   :  { %v591_v51 = vsel %vm11583_vm9, %v6639_v42, %v6640_v40  ;;  %v6690_v13 = vunpack.i.h.bf16 %v8960_v45 }
  0xf8   :  { %2506 = vmatpush.msra.mxu2 %v591_v51  ;;  %v590_v52 = vsel %vm11583_vm9, %v6634_v48, %v6635_v46  ;;  %vm11588_vm9 = vcmask 916480  }
  0xfa   :  { %6862 = vrot.lane.b32.xlu1 %v8952_v8, %s11563_s26  ;;  %2507 = vmatpush.msra.mxu2 %v590_v52 }
  0xfb   :  { %6857 = vrot.lane.b32.xlu0 %v8936_v30, %s11563_s26 }
  0xfc   :  { %v8971_v59 = vpop.permute.xlu1 %6652  ;;  %2508 = vmatpush.msra.mxu2 %v558_v49  ;;  %6867 = vrot.lane.b32.xlu2 %v8864_v35, %s11563_s26  ;;  %s11565_s26 = smov 97  }
  0xfd   :  { %v8977_v63 = vpop.permute.xlu0 %6647 }
  0xfe   :  { %v8980_v1 = vpop.permute.xlu2 %6702  ;;  %2509 = vmatpush.msra.mxu2 %v557_v23 }
  0xff   :  { %v6705_v23 = vunpack.i.h.bf16 %v8980_v1  ;;  %v6704_v2 = vunpack.i.l.bf16 %v8980_v1 }
 0x100   :  { %2510 = vmatpush.msra.mxu2 %v556_v5 }
 0x101   :  { %v728_v56 = vsel %vm11596_vm13, %v6704_v2, %v6705_v23 }
 0x102   :  { %6877 = vrot.lane.b32.xlu1 %v8952_v8, %s11565_s26  ;;  %2511 = vmatpush.msra.mxu2 %v524_v27 }
 0x103   :  { %6872 = vrot.lane.b32.xlu0 %v8936_v30, %s11565_s26 }
 0x104   :  { %v8995_v14 = vpop.permute.xlu1 %6667  ;;  %2512 = vmatpush.msra.mxu2 %v523_v12  ;;  %6882 = vrot.lane.b32.xlu2 %v8864_v35, %s11565_s26  ;;  %s11567_s26 = smov 96  }
 0x105   :  { %v9001_v15 = vpop.permute.xlu0 %6662  ;;  %v6670_v32 = vunpack.i.h.bf16 %v8995_v14 }
 0x106   :  { %2513 = vmatpush.msra.mxu2 %v522_v16  ;;  %v9004_v18 = vpop.permute.xlu2 %6717  ;;  %v6689_v16 = vunpack.i.l.bf16 %v8960_v45  ;;  %v6664_v17 = vunpack.i.l.bf16 %v9001_v15 }
 0x107   :  { %v6720_v31 = vunpack.i.h.bf16 %v9004_v18  ;;  %v6719_v50 = vunpack.i.l.bf16 %v9004_v18 }
 0x108   :  { %2514 = vmatpush.msra.mxu2 %v490_v21  ;;  %v694_v7 = vsel %vm11592_vm12, %v6689_v16, %v6690_v13 }
 0x109   :  { %v762_v62 = vsel %vm11646_vm14, %v6719_v50, %v6720_v31  ;;  %v6649_v31 = vunpack.i.l.bf16 %v8977_v63 }
 0x10a   :  { %6892 = vrot.lane.b32.xlu1 %v8952_v8, %s11567_s26  ;;  %2515 = vmatpush.msra.mxu2 %v489_v61 }
 0x10b   :  { %6887 = vrot.lane.b32.xlu0 %v8936_v30, %s11567_s26 }
 0x10c   :  { %v9019_v29 = vpop.permute.xlu1 %6682  ;;  %2516 = vmatpush.msra.mxu2 %v488_v0  ;;  %6897 = vrot.lane.b32.xlu2 %v8864_v35, %s11567_s26  ;;  %s11574_s26 = smov 95   ;;  %v6675_v0 = vunpack.i.h.bf16 %v8949_v37 }
 0x10d   :  { %v9025_v41 = vpop.permute.xlu0 %6677  ;;  %v6685_v20 = vunpack.i.h.bf16 %v9019_v29  ;;  %v6684_v19 = vunpack.i.l.bf16 %v9019_v29  ;;  %v6674_v29 = vunpack.i.l.bf16 %v8949_v37  ;;  %v6665_v37 = vunpack.i.h.bf16 %v9001_v15 }
 0x10e   :  { %2517 = vmatpush.msra.mxu2 %v456_v33  ;;  %v9028_v44 = vpop.permute.xlu2 %6732  ;;  %v6680_v39 = vunpack.i.h.bf16 %v9025_v41  ;;  %v6679_v61 = vunpack.i.l.bf16 %v9025_v41  ;;  %v6669_v33 = vunpack.i.l.bf16 %v8995_v14  ;;  %v6655_v15 = vunpack.i.h.bf16 %v8971_v59 }
 0x10f   :  { %v693_v11 = vsel %vm11592_vm12, %v6684_v19, %v6685_v20 }
 0x110   :  { %2518 = vmatpush.msra.mxu2 %v455_v3  ;;  %v692_v41 = vsel %vm11592_vm12, %v6679_v61, %v6680_v39  ;;  %v660_v3 = vsel %vm11589_vm11, %v6674_v29, %v6675_v0  ;;  %vm11599_vm12 = vcmask 850944  }
 0x112   :  { %6907 = vrot.lane.b32.xlu1 %v8952_v8, %s11574_s26  ;;  %2519 = vmatpush.msra.mxu2 %v454_v36  ;;  %v6660_v36 = vunpack.i.h.bf16 %v8930_v25 }
 0x113   :  { %6902 = vrot.lane.b32.xlu0 %v8936_v30, %s11574_s26 }
 0x114   :  { %v6698_v24 = vpop.permute.xlu1 %6697  ;;  %2520 = vmatpush.msra.mxu2 %v422_v47  ;;  %6912 = vrot.lane.b32.xlu2 %v8864_v35, %s11574_s26  ;;  %s11586_s26 = smov 92   ;;  %v6659_v47 = vunpack.i.l.bf16 %v8930_v25 }
 0x115   :  { %v9041_v57 = vpop.permute.xlu0 %6692  ;;  %v6700_v9 = vunpack.i.h.bf16 %v6698_v24  ;;  %v6699_v27 = vunpack.i.l.bf16 %v6698_v24  ;;  %v659_v24 = vsel %vm11589_vm11, %v6669_v33, %v6670_v32 }
 0x116   :  { %v9043_v38 = vpop.permute.xlu2 %6747  ;;  %v6695_v1 = vunpack.i.h.bf16 %v9041_v57  ;;  %v6694_v12 = vunpack.i.l.bf16 %v9041_v57  ;;  %v626_v25 = vsel %vm11588_vm9, %v6659_v47, %v6660_v36 }
 0x117   :  { %v727_v18 = vsel %vm11596_vm13, %v6699_v27, %v6700_v9 }
 0x118   :  { %v726_v22 = vsel %vm11596_vm13, %v6694_v12, %v6695_v1  ;;  %vm11607_vm13 = vcmask 793600  }
 0x11a   :  { %6922 = vrot.lane.b32.xlu1 %v8952_v8, %s11577_s22 }
 0x11b   :  { %6917 = vrot.lane.b32.xlu0 %v8936_v30, %s11577_s22 }
 0x11c   :  { %v6713_v40 = vpop.permute.xlu1 %6712  ;;  %6927 = vrot.lane.b32.xlu2 %v8864_v35, %s11577_s22  ;;  %s11618_s22 = smov 91  }
 0x11d   :  { %v6708_v42 = vpop.permute.xlu0 %6707  ;;  %v6715_v55 = vunpack.i.h.bf16 %v6713_v40  ;;  %v6714_v26 = vunpack.i.l.bf16 %v6713_v40  ;;  %v6654_v40 = vunpack.i.l.bf16 %v8971_v59 }
 0x11e   :  { %v9051_v43 = vpop.permute.xlu2 %6762  ;;  %v6710_v49 = vunpack.i.h.bf16 %v6708_v42  ;;  %v6709_v60 = vunpack.i.l.bf16 %v6708_v42  ;;  %v658_v42 = vsel %vm11589_vm11, %v6664_v17, %v6665_v37  ;;  %vm11595_vm11 = vcmask 842752  }
 0x11f   :  { %v761_v5 = vsel %vm11646_vm14, %v6714_v26, %v6715_v55  ;;  %v625_v59 = vsel %vm11588_vm9, %v6654_v40, %v6655_v15  ;;  %v6764_v32 = vunpack.i.l.bf16 %v9051_v43 }
 0x120   :  { %v760_v10 = vsel %vm11646_vm14, %v6709_v60, %v6710_v49  ;;  %vm11666_vm14 = vcmask 662528  }
 0x122   :  { %6937 = vrot.lane.b32.xlu1 %v8952_v8, %s11581_s25 }
 0x123   :  { %6932 = vrot.lane.b32.xlu0 %v8936_v30, %s11581_s25 }
 0x124   :  { %v9057_v46 = vpop.permute.xlu1 %6727  ;;  %6942 = vrot.lane.b32.xlu2 %v8864_v35, %s11581_s25  ;;  %s11584_s25 = smov 90  }
 0x125   :  { %v6723_v48 = vpop.permute.xlu0 %6722 }
 0x126   :  { %v6725_v51 = vunpack.i.h.bf16 %v6723_v48  ;;  %v6724_v52 = vunpack.i.l.bf16 %v6723_v48  ;;  %v9063_v53 = vpop.permute.xlu2 %6777  ;;  %v6650_v48 = vunpack.i.h.bf16 %v8977_v63 }
 0x127   :  { %v6780_v16 = vunpack.i.h.bf16 %v9063_v53 }
 0x128   :  { %v794_v58 = vsel %vm793_vm15, %v6724_v52, %v6725_v51  ;;  %v624_v63 = vsel %vm11588_vm9, %v6649_v31, %v6650_v48  ;;  %vm11640_vm9 = vcmask 834560   ;;  %v6749_v48 = vunpack.i.l.bf16 %v9043_v38 }
 0x129   :  { %2528 = vmatpush.msra.mxu3 %v794_v58 }
 0x12a   :  { %6952 = vrot.lane.b32.xlu1 %v8952_v8, %s11586_s26 }
 0x12b   :  { %6947 = vrot.lane.b32.xlu0 %v8936_v30, %s11586_s26  ;;  %2529 = vmatpush.msra.mxu3 %v762_v62 }
 0x12c   :  { %v9073_v4 = vpop.permute.xlu1 %6742  ;;  %6957 = vrot.lane.b32.xlu2 %v8864_v35, %s11586_s26  ;;  %s11593_s26 = smov 88  }
 0x12d   :  { %v9078_v6 = vpop.permute.xlu0 %6737  ;;  %2530 = vmatpush.msra.mxu3 %v761_v5 }
 0x12e   :  { %v9081_v54 = vpop.permute.xlu2 %6792 }
 0x12f   :  { %2531 = vmatpush.msra.mxu3 %v760_v10  ;;  %v6795_v2 = vunpack.i.h.bf16 %v9081_v54  ;;  %v6794_v5 = vunpack.i.l.bf16 %v9081_v54 }
 0x131   :  { %2532 = vmatpush.msra.mxu3 %v728_v56  ;;  %v932_v54 = vsel %vm11595_vm11, %v6794_v5, %v6795_v2  ;;  %v6729_v2 = vunpack.i.l.bf16 %v9057_v46 }
 0x132   :  { %6967 = vrot.lane.b32.xlu1 %v8952_v8, %s11618_s22 }
 0x133   :  { %6962 = vrot.lane.b32.xlu0 %v8936_v30, %s11618_s22  ;;  %2533 = vmatpush.msra.mxu3 %v727_v18  ;;  %v6779_v18 = vunpack.i.l.bf16 %v9063_v53 }
 0x134   :  { %v9095_v21 = vpop.permute.xlu1 %6757  ;;  %6972 = vrot.lane.b32.xlu2 %v8864_v35, %s11618_s22  ;;  %s11629_s22 = smov 77  }
 0x135   :  { %v9100_v45 = vpop.permute.xlu0 %6752  ;;  %2534 = vmatpush.msra.mxu3 %v726_v22  ;;  %v898_v53 = vsel %vm11599_vm12, %v6779_v18, %v6780_v16  ;;  %v6760_v37 = vunpack.i.h.bf16 %v9095_v21 }
 0x136   :  { %v9105_v28 = vpop.permute.xlu2 %6807  ;;  %v6754_v15 = vunpack.i.l.bf16 %v9100_v45 }
 0x137   :  { %2535 = vmatpush.msra.mxu3 %v694_v7 }
 0x139   :  { %2536 = vmatpush.msra.mxu3 %v693_v11  ;;  %v6765_v11 = vunpack.i.h.bf16 %v9051_v43  ;;  %v6759_v43 = vunpack.i.l.bf16 %v9095_v21  ;;  %v6750_v21 = vunpack.i.h.bf16 %v9043_v38 }
 0x13a   :  { %6982 = vrot.lane.b32.xlu1 %v8952_v8, %s11584_s25 }
 0x13b   :  { %6977 = vrot.lane.b32.xlu0 %v8936_v30, %s11584_s25  ;;  %2537 = vmatpush.msra.mxu3 %v692_v41 }
 0x13c   :  { %v9119_v34 = vpop.permute.xlu1 %6772  ;;  %6987 = vrot.lane.b32.xlu2 %v8864_v35, %s11584_s25  ;;  %s11590_s25 = smov 89  }
 0x13d   :  { %v9124_v14 = vpop.permute.xlu0 %6767  ;;  %2538 = vmatpush.msra.mxu3 %v660_v3  ;;  %v6775_v39 = vunpack.i.h.bf16 %v9119_v34  ;;  %v6774_v61 = vunpack.i.l.bf16 %v9119_v34  ;;  %v1521_v3 = vld [vmem:[#allocation4 + $0x20] sm:$0xff] }
 0x13e   :  { %v9129_v57 = vpop.permute.xlu2 %6822  ;;  %v6770_v0 = vunpack.i.h.bf16 %v9124_v14  ;;  %v6769_v29 = vunpack.i.l.bf16 %v9124_v14  ;;  %v1522_v14 = vld [vmem:[#allocation4 + $0x28] sm:$0xff] }
 0x13f   :  { %2539 = vmatpush.msra.mxu3 %v659_v24  ;;  %v897_v33 = vsel %vm11599_vm12, %v6774_v61, %v6775_v39  ;;  %v6755_v24 = vunpack.i.h.bf16 %v9100_v45  ;;  %v6745_v45 = vunpack.i.h.bf16 %v9073_v4 }
 0x140   :  { %v896_v34 = vsel %vm11599_vm12, %v6769_v29, %v6770_v0  ;;  %vm11604_vm12 = vcmask 867328  }
 0x141   :  { %2540 = vmatpush.msra.mxu3 %v658_v42  ;;  %v9200_v42 = vpack.i.bf16 %v1522_v14, %v1521_v3 }
 0x142   :  { %6997 = vrot.lane.b32.xlu1 %v8952_v8, %s11590_s25 }
 0x143   :  { %6992 = vrot.lane.b32.xlu0 %v8936_v30, %s11590_s25  ;;  %2541 = vmatpush.msra.mxu3 %v626_v25 }
 0x144   :  { %v6788_v50 = vpop.permute.xlu1 %6787  ;;  %7002 = vrot.lane.b32.xlu2 %v8864_v35, %s11590_s25  ;;  %s11597_s25 = smov 87  }
 0x145   :  { %v6783_v51 = vpop.permute.xlu0 %6782  ;;  %2542 = vmatpush.msra.mxu3 %v625_v59  ;;  %v6790_v10 = vunpack.i.h.bf16 %v6788_v50  ;;  %v6789_v1 = vunpack.i.l.bf16 %v6788_v50  ;;  %v6744_v50 = vunpack.i.l.bf16 %v9073_v4  ;;  %v830_v4 = vsel %vm11604_vm12, %v6749_v48, %v6750_v21 }
 0x146   :  { %v9145_v52 = vpop.permute.xlu2 %6837  ;;  %v6785_v12 = vunpack.i.h.bf16 %v6783_v51  ;;  %v6784_v56 = vunpack.i.l.bf16 %v6783_v51  ;;  %v6740_v51 = vunpack.i.h.bf16 %v9078_v6 }
 0x147   :  { %2543 = vmatpush.msra.mxu3 %v624_v63  ;;  %v931_v19 = vsel %vm11595_vm11, %v6789_v1, %v6790_v10  ;;  %v6739_v63 = vunpack.i.l.bf16 %v9078_v6  ;;  %v1619_v1 = vld [vmem:[#allocation4] sm:$0xff] }
 0x148   :  { %v930_v7 = vsel %vm11595_vm11, %v6784_v56, %v6785_v12  ;;  %vm11624_vm11 = vcmask 859136   ;;  %v1620_v12 = vld [vmem:[#allocation4 + $0x8] sm:$0xff] }
 0x149   :  { %v864_v36 = vsel %vm11624_vm11, %v6764_v32, %v6765_v11  ;;  %v863_v31 = vsel %vm11624_vm11, %v6759_v43, %v6760_v37  ;;  %v862_v59 = vsel %vm11624_vm11, %v6754_v15, %v6755_v24  ;;  %v828_v6 = vsel %vm11604_vm12, %v6739_v63, %v6740_v51  ;;  %v1655_v37 = vld [vmem:[#allocation4 + $0x10] sm:$0xff]  ;;  %v1656_v43 = vld [vmem:[#allocation4 + $0x18] sm:$0xff] }
 0x14a   :  { %7012 = vrot.lane.b32.xlu1 %v8952_v8, %s11593_s26  ;;  %vm11628_vm11 = vcmask 760832  }
 0x14b   :  { %7007 = vrot.lane.b32.xlu0 %v8936_v30, %s11593_s26 }
 0x14c   :  { %v6803_v55 = vpop.permute.xlu1 %6802  ;;  %7017 = vrot.lane.b32.xlu2 %v8864_v35, %s11593_s26  ;;  %s11602_s26 = smov 86  }
 0x14d   :  { %v6805_v26 = vunpack.i.h.bf16 %v6803_v55  ;;  %v6804_v58 = vunpack.i.l.bf16 %v6803_v55  ;;  %v6798_v49 = vpop.permute.xlu0 %6797 }
 0x14e   :  { %v6800_v60 = vunpack.i.h.bf16 %v6798_v49  ;;  %v6799_v62 = vunpack.i.l.bf16 %v6798_v49  ;;  %v9153_v23 = vpop.permute.xlu2 %6852  ;;  %v6734_v49 = vunpack.i.l.bf16 %v9028_v44 }
 0x14f   :  { %v965_v9 = vsel %vm11640_vm9, %v6804_v58, %v6805_v26  ;;  %v6735_v58 = vunpack.i.h.bf16 %v9028_v44  ;;  %v6855_v3 = vunpack.i.h.bf16 %v9153_v23 }
 0x150   :  { %2551 = vmatpush.msrb.mxu0 %v965_v9  ;;  %v964_v27 = vsel %vm11640_vm9, %v6799_v62, %v6800_v60  ;;  %v829_v60 = vsel %vm11604_vm12, %v6744_v50, %v6745_v45  ;;  %v6730_v62 = vunpack.i.h.bf16 %v9057_v46  ;;  %vm11610_vm12 = vcmask 801792  }
 0x151   :  { %v796_v5 = vsel %vm793_vm15, %v6734_v49, %v6735_v58  ;;  %v6825_v49 = vunpack.i.h.bf16 %v9129_v57 }
 0x152   :  { %7027 = vrot.lane.b32.xlu1 %v8952_v8, %s11597_s25  ;;  %2552 = vmatpush.msrb.mxu0 %v964_v27  ;;  %v795_v46 = vsel %vm793_vm15, %v6729_v2, %v6730_v62 }
 0x153   :  { %7022 = vrot.lane.b32.xlu0 %v8936_v30, %s11597_s25 }
 0x154   :  { %v9164_v13 = vpop.permute.xlu1 %6817  ;;  %2553 = vmatpush.msrb.mxu0 %v932_v54  ;;  %7032 = vrot.lane.b32.xlu2 %v8864_v35, %s11597_s25  ;;  %s11600_s25 = smov 85  }
 0x155   :  { %v9170_v20 = vpop.permute.xlu0 %6812  ;;  %v6820_v62 = vunpack.i.h.bf16 %v9164_v13  ;;  %v6819_v2 = vunpack.i.l.bf16 %v9164_v13 }
 0x156   :  { %2554 = vmatpush.msrb.mxu0 %v931_v19  ;;  %v9173_v22 = vpop.permute.xlu2 %6867 }
 0x157   :  { %v6870_v61 = vunpack.i.h.bf16 %v9173_v22 }
 0x158   :  { %2555 = vmatpush.msrb.mxu0 %v930_v7  ;;  %v6869_v7 = vunpack.i.l.bf16 %v9173_v22 }
 0x15a   :  { %7042 = vrot.lane.b32.xlu1 %v8952_v8, %s11602_s26  ;;  %2556 = vmatpush.msrb.mxu0 %v898_v53  ;;  %v1102_v22 = vsel %vm11610_vm12, %v6869_v7, %v6870_v61 }
 0x15b   :  { %7037 = vrot.lane.b32.xlu0 %v8936_v30, %s11602_s26 }
 0x15c   :  { %v9188_v41 = vpop.permute.xlu1 %6832  ;;  %2557 = vmatpush.msrb.mxu0 %v897_v33  ;;  %7047 = vrot.lane.b32.xlu2 %v8864_v35, %s11602_s26  ;;  %s11608_s26 = smov 83  }
 0x15d   :  { %v9194_v17 = vpop.permute.xlu0 %6827 }
 0x15e   :  { %2558 = vmatpush.msrb.mxu0 %v896_v34  ;;  %v6883_v47 = vpop.permute.xlu2 %6882 }
 0x15f   :  { %v6885_v35 = vunpack.i.h.bf16 %v6883_v47  ;;  %v6884_v40 = vunpack.i.l.bf16 %v6883_v47  ;;  %v9268_v47 = vpack.i.bf16 %v1656_v43, %v1655_v37 }
 0x160   :  { %2559 = vmatpush.msrb.mxu0 %v864_v36 }
 0x161   :  { %v1136_v25 = vsel %vm11607_vm13, %v6884_v40, %v6885_v35 }
 0x162   :  { %7057 = vrot.lane.b32.xlu1 %v8952_v8, %s11600_s25  ;;  %2560 = vmatpush.msrb.mxu0 %v863_v31  ;;  %v6840_v31 = vunpack.i.h.bf16 %v9145_v52 }
 0x163   :  { %7052 = vrot.lane.b32.xlu0 %v8936_v30, %s11600_s25  ;;  %2574 = vmatpush.msrb.mxu1 %v1136_v25  ;;  %v6839_v25 = vunpack.i.l.bf16 %v9145_v52 }
 0x164   :  { %v9213_v38 = vpop.permute.xlu1 %6847  ;;  %2561 = vmatpush.msrb.mxu0 %v862_v59  ;;  %7062 = vrot.lane.b32.xlu2 %v9200_v42, %s11600_s25  ;;  %s11605_s25 = smov 84   ;;  %v6835_v59 = vunpack.i.h.bf16 %v9188_v41 }
 0x165   :  { %v9219_v55 = vpop.permute.xlu0 %6842  ;;  %v6850_v15 = vunpack.i.h.bf16 %v9213_v38  ;;  %v6849_v35 = vunpack.i.l.bf16 %v9213_v38  ;;  %v6834_v38 = vunpack.i.l.bf16 %v9188_v41 }
 0x166   :  { %2562 = vmatpush.msrb.mxu0 %v830_v4  ;;  %v9222_v26 = vpop.permute.xlu2 %6897  ;;  %v6845_v21 = vunpack.i.h.bf16 %v9219_v55  ;;  %v6829_v4 = vunpack.i.l.bf16 %v9194_v17 }
 0x168   :  { %2563 = vmatpush.msrb.mxu0 %v829_v60  ;;  %v6824_v60 = vunpack.i.l.bf16 %v9129_v57  ;;  %v6815_v57 = vunpack.i.h.bf16 %v9170_v20 }
 0x16a   :  { %7072 = vrot.lane.b32.xlu1 %v8952_v8, %s11605_s25  ;;  %2564 = vmatpush.msrb.mxu0 %v828_v6 }
 0x16b   :  { %7067 = vrot.lane.b32.xlu0 %v8936_v30, %s11605_s25 }
 0x16c   :  { %v6863_v44 = vpop.permute.xlu1 %6862  ;;  %2565 = vmatpush.msrb.mxu0 %v796_v5  ;;  %7077 = vrot.lane.b32.xlu2 %v9200_v42, %s11605_s25  ;;  %s11611_s25 = smov 82   ;;  %v6814_v5 = vunpack.i.l.bf16 %v9170_v20 }
 0x16d   :  { %v6858_v9 = vpop.permute.xlu0 %6857  ;;  %v6865_v53 = vunpack.i.h.bf16 %v6863_v44  ;;  %v6864_v11 = vunpack.i.l.bf16 %v6863_v44 }
 0x16e   :  { %2566 = vmatpush.msrb.mxu0 %v795_v46  ;;  %v9238_v27 = vpop.permute.xlu2 %6912  ;;  %v6860_v32 = vunpack.i.h.bf16 %v6858_v9  ;;  %v6859_v33 = vunpack.i.l.bf16 %v6858_v9  ;;  %v6810_v46 = vunpack.i.h.bf16 %v9105_v28 }
 0x16f   :  { %v1101_v36 = vsel %vm11610_vm12, %v6864_v11, %v6865_v53 }
 0x170   :  { %v1100_v40 = vsel %vm11610_vm12, %v6859_v33, %v6860_v32  ;;  %vm11621_vm12 = vcmask 818176  }
 0x171   :  { %v1034_v58 = vsel %vm11621_vm12, %v6839_v25, %v6840_v31  ;;  %v1033_v41 = vsel %vm11621_vm12, %v6834_v38, %v6835_v59 }
 0x172   :  { %7087 = vrot.lane.b32.xlu1 %v8952_v8, %s11608_s26 }
 0x173   :  { %7082 = vrot.lane.b32.xlu0 %v8936_v30, %s11608_s26  ;;  %v9251_v30 = vpack.i.bf16 %v1620_v12, %v1619_v1 }
 0x174   :  { %v6878_v10 = vpop.permute.xlu1 %6877  ;;  %7092 = vrot.lane.b32.xlu2 %v9200_v42, %s11608_s26  ;;  %s11616_s26 = smov 81  }
 0x175   :  { %v6880_v56 = vunpack.i.h.bf16 %v6878_v10  ;;  %v6879_v54 = vunpack.i.l.bf16 %v6878_v10  ;;  %v6873_v16 = vpop.permute.xlu0 %6872  ;;  %v6809_v10 = vunpack.i.l.bf16 %v9105_v28 }
 0x176   :  { %v6875_v18 = vunpack.i.h.bf16 %v6873_v16  ;;  %v6874_v19 = vunpack.i.l.bf16 %v6873_v16  ;;  %v9246_v39 = vpop.permute.xlu2 %6927 }
 0x177   :  { %v1135_v0 = vsel %vm11607_vm13, %v6879_v54, %v6880_v56  ;;  %v966_v20 = vsel %vm11640_vm9, %v6809_v10, %v6810_v46  ;;  %v6930_v38 = vunpack.i.h.bf16 %v9246_v39  ;;  %vm11647_vm9 = vcmask 719872  }
 0x178   :  { %2575 = vmatpush.msrb.mxu1 %v1135_v0  ;;  %v1134_v29 = vsel %vm11607_vm13, %v6874_v19, %v6875_v18  ;;  %vm11613_vm13 = vcmask 809984  }
 0x179   :  { %v1067_v45 = vsel %vm11613_vm13, %v6849_v35, %v6850_v15 }
 0x17a   :  { %7102 = vrot.lane.b32.xlu1 %v8952_v8, %s11611_s25  ;;  %2576 = vmatpush.msrb.mxu1 %v1134_v29  ;;  %v6854_v8 = vunpack.i.l.bf16 %v9153_v23  ;;  %v6844_v23 = vunpack.i.l.bf16 %v9219_v55  ;;  %v6830_v55 = vunpack.i.h.bf16 %v9194_v17 }
 0x17b   :  { %7097 = vrot.lane.b32.xlu0 %v9251_v30, %s11611_s25 }
 0x17c   :  { %v9259_v34 = vpop.permute.xlu1 %6892  ;;  %2577 = vmatpush.msrb.mxu1 %v1102_v22  ;;  %7107 = vrot.lane.b32.xlu2 %v9200_v42, %s11611_s25  ;;  %v1068_v48 = vsel %vm11613_vm13, %v6854_v8, %v6855_v3  ;;  %v1066_v52 = vsel %vm11613_vm13, %v6844_v23, %v6845_v21  ;;  %s11614_s25 = smov 80   ;;  %vm11620_vm13 = vcmask 826368   ;;  %v1032_v17 = vsel %vm11621_vm12, %v6829_v4, %v6830_v55 }
 0x17d   :  { %v9265_v14 = vpop.permute.xlu0 %6887  ;;  %v1000_v9 = vsel %vm11620_vm13, %v6824_v60, %v6825_v49  ;;  %v999_v1 = vsel %vm11620_vm13, %v6819_v2, %v6820_v62  ;;  %v998_v12 = vsel %vm11620_vm13, %v6814_v5, %v6815_v57  ;;  %vm11682_vm13 = vcmask 744448  }
 0x17e   :  { %2578 = vmatpush.msrb.mxu1 %v1101_v36  ;;  %v9270_v24 = vpop.permute.xlu2 %6942  ;;  %vm11627_vm12 = vcmask 752640  }
 0x17f   :  { %v6945_v36 = vunpack.i.h.bf16 %v9270_v24  ;;  %v6944_v15 = vunpack.i.l.bf16 %v9270_v24 }
 0x180   :  { %2579 = vmatpush.msrb.mxu1 %v1100_v40 }
 0x181   :  { %v1272_v59 = vsel %vm11628_vm11, %v6944_v15, %v6945_v36 }
 0x182   :  { %7117 = vrot.lane.b32.xlu1 %v9268_v47, %s11616_s26  ;;  %2580 = vmatpush.msrb.mxu1 %v1068_v48 }
 0x183   :  { %7112 = vrot.lane.b32.xlu0 %v9251_v30, %s11616_s26 }
 0x184   :  { %v9285_v50 = vpop.permute.xlu1 %6907  ;;  %2581 = vmatpush.msrb.mxu1 %v1067_v45  ;;  %7122 = vrot.lane.b32.xlu2 %v9200_v42, %s11616_s26  ;;  %s11625_s26 = smov 78  }
 0x185   :  { %v9291_v51 = vpop.permute.xlu0 %6902  ;;  %v6910_v5 = vunpack.i.h.bf16 %v9285_v50 }
 0x186   :  { %2582 = vmatpush.msrb.mxu1 %v1066_v52  ;;  %v9294_v63 = vpop.permute.xlu2 %6957  ;;  %v6929_v52 = vunpack.i.l.bf16 %v9246_v39  ;;  %v6904_v46 = vunpack.i.l.bf16 %v9291_v51 }
 0x187   :  { %v6960_v0 = vunpack.i.h.bf16 %v9294_v63  ;;  %v6959_v29 = vunpack.i.l.bf16 %v9294_v63 }
 0x188   :  { %2583 = vmatpush.msrb.mxu1 %v1034_v58 }
 0x189   :  { %v1306_v8 = vsel %vm11627_vm12, %v6959_v29, %v6960_v0  ;;  %v6889_v0 = vunpack.i.l.bf16 %v9265_v14 }
 0x18a   :  { %7132 = vrot.lane.b32.xlu1 %v9268_v47, %s11614_s25  ;;  %2584 = vmatpush.msrb.mxu1 %v1033_v41 }
 0x18b   :  { %7127 = vrot.lane.b32.xlu0 %v9251_v30, %s11614_s25 }
 0x18c   :  { %v9309_v6 = vpop.permute.xlu1 %6922  ;;  %2585 = vmatpush.msrb.mxu1 %v1032_v17  ;;  %7137 = vrot.lane.b32.xlu2 %v9200_v42, %s11614_s25  ;;  %s11622_s25 = smov 79   ;;  %v6915_v17 = vunpack.i.h.bf16 %v9238_v27 }
 0x18d   :  { %v9315_v44 = vpop.permute.xlu0 %6917  ;;  %v6925_v55 = vunpack.i.h.bf16 %v9309_v6  ;;  %v6924_v4 = vunpack.i.l.bf16 %v9309_v6  ;;  %v6914_v6 = vunpack.i.l.bf16 %v9238_v27  ;;  %v6905_v27 = vunpack.i.h.bf16 %v9291_v51 }
 0x18e   :  { %2586 = vmatpush.msrb.mxu1 %v1000_v9  ;;  %v9318_v13 = vpop.permute.xlu2 %6972  ;;  %v6920_v60 = vunpack.i.h.bf16 %v9315_v44  ;;  %v6919_v41 = vunpack.i.l.bf16 %v9315_v44  ;;  %v6909_v9 = vunpack.i.l.bf16 %v9285_v50  ;;  %v6895_v51 = vunpack.i.h.bf16 %v9259_v34 }
 0x190   :  { %2587 = vmatpush.msrb.mxu1 %v999_v1 }
 0x192   :  { %7147 = vrot.lane.b32.xlu1 %v9268_v47, %s11622_s25  ;;  %2588 = vmatpush.msrb.mxu1 %v998_v12  ;;  %v6900_v12 = vunpack.i.h.bf16 %v9222_v26 }
 0x193   :  { %7142 = vrot.lane.b32.xlu0 %v9251_v30, %s11622_s25 }
 0x194   :  { %v6938_v56 = vpop.permute.xlu1 %6937  ;;  %2589 = vmatpush.msrb.mxu1 %v966_v20  ;;  %7152 = vrot.lane.b32.xlu2 %v9200_v42, %s11622_s25  ;;  %s11634_s25 = smov 76   ;;  %v6899_v20 = vunpack.i.l.bf16 %v9222_v26 }
 0x195   :  { %v9331_v28 = vpop.permute.xlu0 %6932  ;;  %v6940_v23 = vunpack.i.h.bf16 %v6938_v56  ;;  %v6939_v48 = vunpack.i.l.bf16 %v6938_v56 }
 0x196   :  { %v9333_v54 = vpop.permute.xlu2 %6987  ;;  %v6935_v24 = vunpack.i.h.bf16 %v9331_v28  ;;  %v6934_v45 = vunpack.i.l.bf16 %v9331_v28 }
 0x197   :  { %v1271_v63 = vsel %vm11628_vm11, %v6939_v48, %v6940_v23 }
 0x198   :  { %v1270_v49 = vsel %vm11628_vm11, %v6934_v45, %v6935_v24  ;;  %vm11637_vm11 = vcmask 777216  }
 0x199   :  { %v1204_v1 = vsel %vm11637_vm11, %v6914_v6, %v6915_v17  ;;  %v1203_v56 = vsel %vm11637_vm11, %v6909_v9, %v6910_v5 }
 0x19a   :  { %7162 = vrot.lane.b32.xlu1 %v9268_v47, %s11625_s26 }
 0x19b   :  { %7157 = vrot.lane.b32.xlu0 %v9251_v30, %s11625_s26 }
 0x19c   :  { %v6953_v16 = vpop.permute.xlu1 %6952  ;;  %7167 = vrot.lane.b32.xlu2 %v9200_v42, %s11625_s26  ;;  %s11643_s26 = smov 75  }
 0x19d   :  { %v6948_v18 = vpop.permute.xlu0 %6947  ;;  %v6955_v33 = vunpack.i.h.bf16 %v6953_v16  ;;  %v6954_v22 = vunpack.i.l.bf16 %v6953_v16  ;;  %v6894_v16 = vunpack.i.l.bf16 %v9259_v34 }
 0x19e   :  { %v9341_v19 = vpop.permute.xlu2 %7002  ;;  %v6950_v43 = vunpack.i.h.bf16 %v6948_v18  ;;  %v6949_v3 = vunpack.i.l.bf16 %v6948_v18  ;;  %v1202_v18 = vsel %vm11637_vm11, %v6904_v46, %v6905_v27  ;;  %vm11645_vm11 = vcmask 711680  }
 0x19f   :  { %v1305_v40 = vsel %vm11627_vm12, %v6954_v22, %v6955_v33  ;;  %v7005_v5 = vunpack.i.h.bf16 %v9341_v19  ;;  %v7004_v9 = vunpack.i.l.bf16 %v9341_v19 }
 0x1a0   :  { %v1304_v31 = vsel %vm11627_vm12, %v6949_v3, %v6950_v43  ;;  %vm11631_vm12 = vcmask 769024  }
 0x1a1   :  { %v1238_v62 = vsel %vm11631_vm12, %v6929_v52, %v6930_v38  ;;  %v1237_v57 = vsel %vm11631_vm12, %v6924_v4, %v6925_v55  ;;  %v1236_v44 = vsel %vm11631_vm12, %v6919_v41, %v6920_v60  ;;  %vm11636_vm12 = vcmask 785408   ;;  %v2231_v60 = vld [vmem:[%s11541_s1] sm:$0xff] }
 0x1a2   :  { %7177 = vrot.lane.b32.xlu1 %v9268_v47, %s11629_s22  ;;  %v1170_v26 = vsel %vm11636_vm12, %v6899_v20, %v6900_v12  ;;  %v1169_v34 = vsel %vm11636_vm12, %v6894_v16, %v6895_v51  ;;  %2475 = vmatmul.f32.vlgmr.msra.gmra.mxu0 %v2231_v60 }
 0x1a3   :  { %7172 = vrot.lane.b32.xlu0 %v9251_v30, %s11629_s22 }
 0x1a4   :  { %v9347_v61 = vpop.permute.xlu1 %6967  ;;  %7182 = vrot.lane.b32.xlu2 %v9200_v42, %s11629_s22  ;;  %s11632_s22 = smov 74  }
 0x1a5   :  { %v6963_v7 = vpop.permute.xlu0 %6962 }
 0x1a6   :  { %v6965_v53 = vunpack.i.h.bf16 %v6963_v7  ;;  %v6964_v11 = vunpack.i.l.bf16 %v6963_v7  ;;  %v9353_v32 = vpop.permute.xlu2 %7017  ;;  %v6890_v7 = vunpack.i.h.bf16 %v9265_v14 }
 0x1a7   :  { %v7020_v52 = vunpack.i.h.bf16 %v9353_v32 }
 0x1a8   :  { %v1338_v37 = vsel %vm11682_vm13, %v6964_v11, %v6965_v53  ;;  %v1168_v14 = vsel %vm11636_vm12, %v6889_v0, %v6890_v7  ;;  %vm11680_vm12 = vcmask 703488  }
 0x1a9   :  { %2597 = vmatpush.msrb.mxu2 %v1338_v37 }
 0x1aa   :  { %7192 = vrot.lane.b32.xlu1 %v9268_v47, %s11634_s25 }
 0x1ab   :  { %7187 = vrot.lane.b32.xlu0 %v9251_v30, %s11634_s25  ;;  %2598 = vmatpush.msrb.mxu2 %v1306_v8 }
 0x1ac   :  { %v9363_v35 = vpop.permute.xlu1 %6982  ;;  %7197 = vrot.lane.b32.xlu2 %v9200_v42, %s11634_s25  ;;  %s11641_s25 = smov 72  }
 0x1ad   :  { %v9368_v21 = vpop.permute.xlu0 %6977  ;;  %2599 = vmatpush.msrb.mxu2 %v1305_v40 }
 0x1ae   :  { %v9371_v25 = vpop.permute.xlu2 %7032 }
 0x1af   :  { %2600 = vmatpush.msrb.mxu2 %v1304_v31  ;;  %v7035_v15 = vunpack.i.h.bf16 %v9371_v25  ;;  %v7034_v40 = vunpack.i.l.bf16 %v9371_v25 }
 0x1b1   :  { %2601 = vmatpush.msrb.mxu2 %v1272_v59  ;;  %v1476_v25 = vsel %vm11645_vm11, %v7034_v40, %v7035_v15 }
 0x1b2   :  { %7207 = vrot.lane.b32.xlu1 %v9268_v47, %s11643_s26 }
 0x1b3   :  { %7202 = vrot.lane.b32.xlu0 %v9251_v30, %s11643_s26  ;;  %2602 = vmatpush.msrb.mxu2 %v1271_v63  ;;  %v7019_v63 = vunpack.i.l.bf16 %v9353_v32 }
 0x1b4   :  { %v9385_v58 = vpop.permute.xlu1 %6997  ;;  %7212 = vrot.lane.b32.xlu2 %v9200_v42, %s11643_s26  ;;  %s11648_s26 = smov 69  }
 0x1b5   :  { %v9390_v39 = vpop.permute.xlu0 %6992  ;;  %2603 = vmatpush.msrb.mxu2 %v1270_v49  ;;  %v7000_v46 = vunpack.i.h.bf16 %v9385_v58  ;;  %v6999_v19 = vunpack.i.l.bf16 %v9385_v58  ;;  %v6989_v58 = vunpack.i.l.bf16 %v9333_v54 }
 0x1b6   :  { %v9395_v2 = vpop.permute.xlu2 %7047  ;;  %v6995_v20 = vunpack.i.h.bf16 %v9390_v39 }
 0x1b7   :  { %2604 = vmatpush.msrb.mxu2 %v1238_v62 }
 0x1b9   :  { %2605 = vmatpush.msrb.mxu2 %v1237_v57  ;;  %v1442_v57 = vsel %vm11647_vm9, %v7019_v63, %v7020_v52 }
 0x1ba   :  { %7222 = vrot.lane.b32.xlu1 %v9268_v47, %s11632_s22 }
 0x1bb   :  { %2606 = vmatpush.msrb.mxu2 %v1236_v44  ;;  %7217 = vrot.lane.b32.xlu0 %v9251_v30, %s11632_s22 }
 0x1bc   :  { %v9409_v10 = vpop.permute.xlu1 %7012  ;;  %7227 = vrot.lane.b32.xlu2 %v9200_v42, %s11632_s22  ;;  %s11638_s22 = smov 73  }
 0x1bd   :  { %v9414_v50 = vpop.permute.xlu0 %7007  ;;  %2607 = vmatpush.msrb.mxu2 %v1204_v1  ;;  %v7015_v41 = vunpack.i.h.bf16 %v9409_v10  ;;  %v7014_v62 = vunpack.i.l.bf16 %v9409_v10 }
 0x1be   :  { %v9419_v28 = vpop.permute.xlu2 %7062  ;;  %v7010_v32 = vunpack.i.h.bf16 %v9414_v50  ;;  %v7009_v6 = vunpack.i.l.bf16 %v9414_v50 }
 0x1bf   :  { %2608 = vmatpush.msrb.mxu2 %v1203_v56  ;;  %v1441_v44 = vsel %vm11647_vm9, %v7014_v62, %v7015_v41  ;;  %v6994_v56 = vunpack.i.l.bf16 %v9390_v39  ;;  %v6984_v39 = vunpack.i.l.bf16 %v9363_v35 }
 0x1c0   :  { %v1440_v1 = vsel %vm11647_vm9, %v7009_v6, %v7010_v32  ;;  %vm11652_vm9 = vcmask 736256  }
 0x1c1   :  { %2609 = vmatpush.msrb.mxu2 %v1202_v18  ;;  %v6990_v18 = vunpack.i.h.bf16 %v9333_v54 }
 0x1c2   :  { %7237 = vrot.lane.b32.xlu1 %v9268_v47, %s11638_s22 }
 0x1c3   :  { %2610 = vmatpush.msrb.mxu2 %v1170_v26  ;;  %7232 = vrot.lane.b32.xlu0 %v9251_v30, %s11638_s22  ;;  %v6985_v26 = vunpack.i.h.bf16 %v9363_v35  ;;  %v1374_v35 = vsel %vm11652_vm9, %v6989_v58, %v6990_v18 }
 0x1c4   :  { %v7028_v29 = vpop.permute.xlu1 %7027  ;;  %7242 = vrot.lane.b32.xlu2 %v9200_v42, %s11638_s22  ;;  %s11650_s22 = smov 71  }
 0x1c5   :  { %v7023_v53 = vpop.permute.xlu0 %7022  ;;  %2611 = vmatpush.msrb.mxu2 %v1169_v34  ;;  %v7030_v31 = vunpack.i.h.bf16 %v7028_v29  ;;  %v7029_v24 = vunpack.i.l.bf16 %v7028_v29  ;;  %v6980_v34 = vunpack.i.h.bf16 %v9368_v21 }
 0x1c6   :  { %v9435_v11 = vpop.permute.xlu2 %7077  ;;  %v7025_v45 = vunpack.i.h.bf16 %v7023_v53  ;;  %v7024_v59 = vunpack.i.l.bf16 %v7023_v53  ;;  %v6979_v53 = vunpack.i.l.bf16 %v9368_v21 }
 0x1c7   :  { %2612 = vmatpush.msrb.mxu2 %v1168_v14  ;;  %v1475_v4 = vsel %vm11645_vm11, %v7029_v24, %v7030_v31  ;;  %v7080_v18 = vunpack.i.h.bf16 %v9435_v11  ;;  %v7079_v58 = vunpack.i.l.bf16 %v9435_v11 }
 0x1c8   :  { %v1474_v17 = vsel %vm11645_vm11, %v7024_v59, %v7025_v45  ;;  %vm11655_vm11 = vcmask 728064   ;;  %v1372_v21 = vsel %vm11652_vm9, %v6979_v53, %v6980_v34 }
 0x1c9   :  { %v1408_v50 = vsel %vm11655_vm11, %v7004_v9, %v7005_v5  ;;  %v1407_v7 = vsel %vm11655_vm11, %v6999_v19, %v7000_v46  ;;  %v1406_v29 = vsel %vm11655_vm11, %v6994_v56, %v6995_v20  ;;  %vm11663_vm11 = vcmask 678912  }
 0x1ca   :  { %7252 = vrot.lane.b32.xlu1 %v9268_v47, %s11641_s25 }
 0x1cb   :  { %7247 = vrot.lane.b32.xlu0 %v9251_v30, %s11641_s25 }
 0x1cc   :  { %v7043_v33 = vpop.permute.xlu1 %7042  ;;  %7257 = vrot.lane.b32.xlu2 %v9200_v42, %s11641_s25  ;;  %s11661_s25 = smov 70  }
 0x1cd   :  { %v7045_v22 = vunpack.i.h.bf16 %v7043_v33  ;;  %v7044_v37 = vunpack.i.l.bf16 %v7043_v33  ;;  %v7038_v43 = vpop.permute.xlu0 %7037 }
 0x1ce   :  { %v7040_v3 = vunpack.i.h.bf16 %v7038_v43  ;;  %v7039_v8 = vunpack.i.l.bf16 %v7038_v43  ;;  %v9443_v36 = vpop.permute.xlu2 %7092  ;;  %v1373_v43 = vsel %vm11652_vm9, %v6984_v39, %v6985_v26  ;;  %vm11658_vm9 = vcmask 670720  }
 0x1cf   :  { %v1509_v23 = vsel %vm11680_vm12, %v7044_v37, %v7045_v22  ;;  %v6975_v22 = vunpack.i.h.bf16 %v9318_v13  ;;  %v6974_v37 = vunpack.i.l.bf16 %v9318_v13  ;;  %v7094_v46 = vunpack.i.l.bf16 %v9443_v36 }
 0x1d0   :  { %2620 = vmatpush.msrb.mxu3 %v1509_v23  ;;  %v1508_v48 = vsel %vm11680_vm12, %v7039_v8, %v7040_v3  ;;  %v6970_v3 = vunpack.i.h.bf16 %v9347_v61  ;;  %v6969_v8 = vunpack.i.l.bf16 %v9347_v61  ;;  %v2133_v23 = vld [vmem:[#allocation4 + $0x20] sm:$0xff] }
 0x1d1   :  { %v1340_v15 = vsel %vm11682_vm13, %v6974_v37, %v6975_v22 }
 0x1d2   :  { %7267 = vrot.lane.b32.xlu1 %v9268_v47, %s11650_s22  ;;  %2621 = vmatpush.msrb.mxu3 %v1508_v48  ;;  %v1339_v61 = vsel %vm11682_vm13, %v6969_v8, %v6970_v3  ;;  %v2134_v48 = vld [vmem:[#allocation4 + $0x28] sm:$0xff]  ;;  %vm11690_vm13 = vcmask 531456  }
 0x1d3   :  { %7262 = vrot.lane.b32.xlu0 %v9251_v30, %s11650_s22  ;;  %v7331_v24 = vpack.i.bf16 %v2134_v48, %v2133_v23 }
 0x1d4   :  { %v9454_v38 = vpop.permute.xlu1 %7057  ;;  %2622 = vmatpush.msrb.mxu3 %v1476_v25  ;;  %7272 = vrot.lane.b32.xlu2 %v9200_v42, %s11650_s22  ;;  %s11656_s22 = smov 67  }
 0x1d5   :  { %v9460_v55 = vpop.permute.xlu0 %7052  ;;  %v7060_v22 = vunpack.i.h.bf16 %v9454_v38  ;;  %v7059_v37 = vunpack.i.l.bf16 %v9454_v38  ;;  %v7049_v38 = vunpack.i.l.bf16 %v9395_v2 }
 0x1d6   :  { %2623 = vmatpush.msrb.mxu3 %v1475_v4  ;;  %v9463_v49 = vpop.permute.xlu2 %7107  ;;  %v7054_v8 = vunpack.i.l.bf16 %v9460_v55 }
 0x1d7   :  { %v7110_v60 = vunpack.i.h.bf16 %v9463_v49  ;;  %v7109_v41 = vunpack.i.l.bf16 %v9463_v49 }
 0x1d8   :  { %2624 = vmatpush.msrb.mxu3 %v1474_v17 }
 0x1d9   :  { %v1646_v49 = vsel %vm11658_vm9, %v7109_v41, %v7110_v60 }
 0x1da   :  { %7282 = vrot.lane.b32.xlu1 %v9268_v47, %s11661_s25  ;;  %2625 = vmatpush.msrb.mxu3 %v1442_v57 }
 0x1db   :  { %7277 = vrot.lane.b32.xlu0 %v9251_v30, %s11661_s25 }
 0x1dc   :  { %v9481_v27 = vpop.permute.xlu1 %7072  ;;  %2626 = vmatpush.msrb.mxu3 %v1441_v44  ;;  %7287 = vrot.lane.b32.xlu2 %v9200_v42, %s11661_s25  ;;  %v7095_v44 = vunpack.i.h.bf16 %v9443_v36  ;;  %s11741_s25 = smov 110  }
 0x1dd   :  { %v9487_v10 = vpop.permute.xlu0 %7067  ;;  %v7075_v26 = vunpack.i.h.bf16 %v9481_v27 }
 0x1de   :  { %2627 = vmatpush.msrb.mxu3 %v1440_v1  ;;  %v7123_v12 = vpop.permute.xlu2 %7122  ;;  %v1612_v36 = vsel %vm11663_vm11, %v7094_v46, %v7095_v44  ;;  %v7069_v34 = vunpack.i.l.bf16 %v9487_v10 }
 0x1df   :  { %v7125_v51 = vunpack.i.h.bf16 %v7123_v12  ;;  %v7124_v16 = vunpack.i.l.bf16 %v7123_v12 }
 0x1e0   :  { %2628 = vmatpush.msrb.mxu3 %v1408_v50 }
 0x1e1   :  { %v1680_v0 = vsel %vm11666_vm14, %v7124_v16, %v7125_v51 }
 0x1e2   :  { %7297 = vrot.lane.b32.xlu1 %v9268_v47, %s11648_s26  ;;  %2629 = vmatpush.msrb.mxu3 %v1407_v7 }
 0x1e3   :  { %7292 = vrot.lane.b32.xlu0 %v9251_v30, %s11648_s26  ;;  %2643 = vmatpush.msra.mxu0 %v1680_v0 }
 0x1e4   :  { %v9504_v54 = vpop.permute.xlu1 %7087  ;;  %2630 = vmatpush.msrb.mxu3 %v1406_v29  ;;  %7302 = vrot.lane.b32.xlu2 %v9200_v42, %s11648_s26  ;;  %s11653_s26 = smov 68  }
 0x1e5   :  { %v9510_v14 = vpop.permute.xlu0 %7082  ;;  %v7090_v12 = vunpack.i.h.bf16 %v9504_v54  ;;  %v7089_v20 = vunpack.i.l.bf16 %v9504_v54  ;;  %v7070_v54 = vunpack.i.h.bf16 %v9487_v10  ;;  %v7055_v10 = vunpack.i.h.bf16 %v9460_v55 }
 0x1e6   :  { %2631 = vmatpush.msrb.mxu3 %v1374_v35  ;;  %v9513_v33 = vpop.permute.xlu2 %7137  ;;  %v7085_v51 = vunpack.i.h.bf16 %v9510_v14  ;;  %v7084_v16 = vunpack.i.l.bf16 %v9510_v14  ;;  %v7064_v14 = vunpack.i.l.bf16 %v9419_v28 }
 0x1e7   :  { %v1611_v7 = vsel %vm11663_vm11, %v7089_v20, %v7090_v12 }
 0x1e8   :  { %2632 = vmatpush.msrb.mxu3 %v1373_v43  ;;  %v1610_v29 = vsel %vm11663_vm11, %v7084_v16, %v7085_v51  ;;  %vm11664_vm11 = vcmask 695296  }
 0x1ea   :  { %7312 = vrot.lane.b32.xlu1 %v9268_v47, %s11653_s26  ;;  %2633 = vmatpush.msrb.mxu3 %v1372_v21 }
 0x1eb   :  { %7307 = vrot.lane.b32.xlu0 %v9251_v30, %s11653_s26 }
 0x1ec   :  { %v7103_v13 = vpop.permute.xlu1 %7102  ;;  %2634 = vmatpush.msrb.mxu3 %v1340_v15  ;;  %7317 = vrot.lane.b32.xlu2 %v9200_v42, %s11653_s26  ;;  %s11659_s26 = smov 66  }
 0x1ed   :  { %v7098_v40 = vpop.permute.xlu0 %7097  ;;  %v7105_v32 = vunpack.i.h.bf16 %v7103_v13  ;;  %v7104_v6 = vunpack.i.l.bf16 %v7103_v13  ;;  %v7050_v13 = vunpack.i.h.bf16 %v9395_v2 }
 0x1ee   :  { %2635 = vmatpush.msrb.mxu3 %v1339_v61  ;;  %v9529_v31 = vpop.permute.xlu2 %7152  ;;  %v7100_v57 = vunpack.i.h.bf16 %v7098_v40  ;;  %v7099_v5 = vunpack.i.l.bf16 %v7098_v40  ;;  %v1543_v40 = vsel %vm11664_vm11, %v7059_v37, %v7060_v22  ;;  %v1542_v61 = vsel %vm11664_vm11, %v7054_v8, %v7055_v10 }
 0x1ef   :  { %v1645_v1 = vsel %vm11658_vm9, %v7104_v6, %v7105_v32  ;;  %v1510_v23 = vsel %vm11680_vm12, %v7049_v38, %v7050_v13  ;;  %v7155_v22 = vunpack.i.h.bf16 %v9529_v31  ;;  %v7154_v37 = vunpack.i.l.bf16 %v9529_v31 }
 0x1f0   :  { %v1644_v56 = vsel %vm11658_vm9, %v7099_v5, %v7100_v57  ;;  %vm11665_vm9 = vcmask 687104   ;;  %vm11683_vm12 = vcmask 588800  }
 0x1f1   :  { %v1578_v53 = vsel %vm11665_vm9, %v7079_v58, %v7080_v18  ;;  %v1576_v43 = vsel %vm11665_vm9, %v7069_v34, %v7070_v54  ;;  %v2233_v18 = vld [vmem:[%s11541_s1 + $0x10] sm:$0xff] }
 0x1f2   :  { %7327 = vrot.lane.b32.xlu1 %v9268_v47, %s11656_s22  ;;  %2521 = vmatmul.f32.vlgmr.msra.gmra.mxu2 %v2233_v18 }
 0x1f3   :  { %7322 = vrot.lane.b32.xlu0 %v9251_v30, %s11656_s22 }
 0x1f4   :  { %v7118_v45 = vpop.permute.xlu1 %7117  ;;  %7332 = vrot.lane.b32.xlu2 %v7331_v24, %s11656_s22  ;;  %s11670_s22 = smov 65  }
 0x1f5   :  { %v7120_v42 = vunpack.i.h.bf16 %v7118_v45  ;;  %v7119_v59 = vunpack.i.l.bf16 %v7118_v45  ;;  %v7113_v25 = vpop.permute.xlu0 %7112 }
 0x1f6   :  { %v7115_v52 = vunpack.i.h.bf16 %v7113_v25  ;;  %v7114_v63 = vunpack.i.l.bf16 %v7113_v25  ;;  %v9536_v4 = vpop.permute.xlu2 %7167 }
 0x1f7   :  { %v1679_v62 = vsel %vm11666_vm14, %v7119_v59, %v7120_v42 }
 0x1f8   :  { %2644 = vmatpush.msra.mxu0 %v1679_v62  ;;  %v1678_v17 = vsel %vm11666_vm14, %v7114_v63, %v7115_v52  ;;  %vm11668_vm14 = vcmask 629760  }
 0x1fa   :  { %7342 = vrot.lane.b32.xlu1 %v9268_v47, %s11659_s26  ;;  %2645 = vmatpush.msra.mxu0 %v1678_v17 }
 0x1fb   :  { %7337 = vrot.lane.b32.xlu0 %v9251_v30, %s11659_s26 }
 0x1fc   :  { %v9547_v9 = vpop.permute.xlu1 %7132  ;;  %2646 = vmatpush.msra.mxu0 %v1646_v49  ;;  %7347 = vrot.lane.b32.xlu2 %v7331_v24, %s11659_s26  ;;  %s11742_s26 = smov 109  }
 0x1fd   :  { %v9552_v19 = vpop.permute.xlu0 %7127 }
 0x1fe   :  { %2647 = vmatpush.msra.mxu0 %v1645_v1  ;;  %v9555_v50 = vpop.permute.xlu2 %7182 }
 0x1ff   :  { %v7185_v44 = vunpack.i.h.bf16 %v9555_v50  ;;  %v7184_v46 = vunpack.i.l.bf16 %v9555_v50 }
 0x200   :  { %2648 = vmatpush.msra.mxu0 %v1644_v56 }
 0x202   :  { %7357 = vrot.lane.b32.xlu1 %v9268_v47, %s11670_s22  ;;  %2649 = vmatpush.msra.mxu0 %v1612_v36  ;;  %v7074_v47 = vunpack.i.l.bf16 %v9481_v27  ;;  %v7065_v27 = vunpack.i.h.bf16 %v9419_v28 }
 0x203   :  { %7352 = vrot.lane.b32.xlu0 %v9251_v30, %s11670_s22  ;;  %v2232_v30 = vld [vmem:[%s11541_s1 + $0x8] sm:$0xff] }
 0x204   :  { %v9570_v0 = vpop.permute.xlu1 %7147  ;;  %2650 = vmatpush.msra.mxu0 %v1611_v7  ;;  %7362 = vrot.lane.b32.xlu2 %v7331_v24, %s11670_s22  ;;  %v1577_v35 = vsel %vm11665_vm9, %v7074_v47, %v7075_v26  ;;  %v1544_v28 = vsel %vm11664_vm11, %v7064_v14, %v7065_v27  ;;  %vm1881_vm11 = vcmask 613376   ;;  %vm11667_vm9 = vcmask 621568   ;;  %s8557_s22 = smov 7  }
 0x205   :  { %v9575_v39 = vpop.permute.xlu0 %7142  ;;  %2498 = vmatmul.f32.vlgmr.msra.gmra.mxu1 %v2232_v30  ;;  %v1816_v7 = vsel %vm11668_vm14, %v7184_v46, %v7185_v44  ;;  %v7170_v26 = vunpack.i.h.bf16 %v9536_v4  ;;  %v7169_v47 = vunpack.i.l.bf16 %v9536_v4  ;;  %v7149_v10 = vunpack.i.l.bf16 %v9570_v0 }
 0x206   :  { %2651 = vmatpush.msra.mxu0 %v1610_v29  ;;  %v7198_v11 = vpop.permute.xlu2 %7197 }
 0x207   :  { %v7200_v52 = vunpack.i.h.bf16 %v7198_v11  ;;  %v7199_v63 = vunpack.i.l.bf16 %v7198_v11 }
 0x208   :  { %2652 = vmatpush.msra.mxu0 %v1578_v53 }
 0x209   :  { %v1850_v49 = vsel %vm11667_vm9, %v7199_v63, %v7200_v52 }
 0x20a   :  { %2653 = vmatpush.msra.mxu0 %v1577_v35 }
 0x20c   :  { %v9590_v3 = vpop.permute.xlu1 %7162  ;;  %2654 = vmatpush.msra.mxu0 %v1576_v43 }
 0x20d   :  { %v9594_v21 = vpop.permute.xlu0 %7157  ;;  %v7165_v11 = vunpack.i.h.bf16 %v9590_v3  ;;  %v7164_v30 = vunpack.i.l.bf16 %v9590_v3  ;;  %v7150_v3 = vunpack.i.h.bf16 %v9570_v0 }
 0x20e   :  { %2655 = vmatpush.msra.mxu0 %v1544_v28  ;;  %v9597_v15 = vpop.permute.xlu2 %7212  ;;  %v7160_v27 = vunpack.i.h.bf16 %v9594_v21  ;;  %v7159_v14 = vunpack.i.l.bf16 %v9594_v21  ;;  %v7145_v21 = vunpack.i.h.bf16 %v9575_v39  ;;  %v7144_v28 = vunpack.i.l.bf16 %v9575_v39 }
 0x20f   :  { %v7134_v39 = vunpack.i.l.bf16 %v9547_v9 }
 0x210   :  { %2656 = vmatpush.msra.mxu0 %v1543_v40  ;;  %v7140_v40 = vunpack.i.h.bf16 %v9513_v33 }
 0x212   :  { %2657 = vmatpush.msra.mxu0 %v1542_v61  ;;  %v7139_v61 = vunpack.i.l.bf16 %v9513_v33 }
 0x214   :  { %v7178_v55 = vpop.permute.xlu1 %7177  ;;  %2658 = vmatpush.msra.mxu0 %v1510_v23 }
 0x215   :  { %v7173_v48 = vpop.permute.xlu0 %7172  ;;  %v7180_v56 = vunpack.i.h.bf16 %v7178_v55  ;;  %v7179_v51 = vunpack.i.l.bf16 %v7178_v55  ;;  %v7135_v55 = vunpack.i.h.bf16 %v9547_v9  ;;  %v2245_v9 = vld [vmem:[%s11541_s1 + $0x70] sm:$0xff] }
 0x216   :  { %v9604_v24 = vpop.permute.xlu2 %7227  ;;  %v7175_v50 = vunpack.i.h.bf16 %v7173_v48  ;;  %v7174_v58 = vunpack.i.l.bf16 %v7173_v48  ;;  %2524 = vmatmul.f32.gmra.mxu2 %v2245_v9  ;;  %v11698_v9 = vmov 0  }
 0x217   :  { %v1815_v29 = vsel %vm11668_vm14, %v7179_v51, %v7180_v56  ;;  %7366 = vset.pattern.permute.xlu0 %v11698_v9  ;;  %7367 = vset.pattern.permute.xlu1 %v11698_v9 }
 0x218   :  { %v1814_v34 = vsel %vm11668_vm14, %v7174_v58, %v7175_v50  ;;  %vm11679_vm14 = vcmask 646144   ;;  %v2237_v50 = vld [vmem:[%s11541_s1 + $0x30] sm:$0xff]  ;;  %7368 = vset.pattern.permute.xlu2 %v11698_v9 }
 0x219   :  { %v1748_v38 = vsel %vm11679_vm14, %v7154_v37, %v7155_v22  ;;  %v1747_v0 = vsel %vm11679_vm14, %v7149_v10, %v7150_v3  ;;  %v1746_v48 = vsel %vm11679_vm14, %v7144_v28, %v7145_v21  ;;  %vm11681_vm14 = vcmask 580608  }
 0x21c   :  { %v7193_v45 = vpop.permute.xlu1 %7192 }
 0x21d   :  { %v7188_v42 = vpop.permute.xlu0 %7187  ;;  %v7195_v17 = vunpack.i.h.bf16 %v7193_v45  ;;  %v7194_v32 = vunpack.i.l.bf16 %v7193_v45  ;;  %v7130_v45 = vunpack.i.h.bf16 %v9552_v19 }
 0x21e   :  { %v9606_v59 = vpop.permute.xlu2 %7242  ;;  %v7190_v57 = vunpack.i.h.bf16 %v7188_v42  ;;  %v7189_v5 = vunpack.i.l.bf16 %v7188_v42  ;;  %v7129_v42 = vunpack.i.l.bf16 %v9552_v19  ;;  %2613 = vmatmul.f32.vlgmr.msrb.gmra.mxu2 %v2237_v50  ;;  %v7215_v50 = vunpack.i.h.bf16 %v9597_v15 }
 0x21f   :  { %v1849_v12 = vsel %vm11667_vm9, %v7194_v32, %v7195_v17  ;;  %v7245_v28 = vunpack.i.h.bf16 %v9606_v59 }
 0x220   :  { %v1848_v16 = vsel %vm11667_vm9, %v7189_v5, %v7190_v57  ;;  %vm11669_vm9 = vcmask 637952   ;;  %v2243_v57 = vld [vmem:[%s11541_s1 + $0x60] sm:$0xff]  ;;  %v2234_v5 = vld [vmem:[%s11541_s1 + $0x18] sm:$0xff] }
 0x221   :  { %v1782_v4 = vsel %vm11669_vm9, %v7169_v47, %v7170_v26  ;;  %v1781_v43 = vsel %vm11669_vm9, %v7164_v30, %v7165_v11  ;;  %v1780_v8 = vsel %vm11669_vm9, %v7159_v14, %v7160_v27  ;;  %vm11678_vm9 = vcmask 654336   ;;  %2478 = vmatmul.f32.gmra.mxu0 %v2243_v57  ;;  %2544 = vmatmul.f32.vlgmr.msra.gmra.mxu3 %v2234_v5  ;;  %v2246_v14 = vld [vmem:[%s11541_s1 + $0x78] sm:$0xff] }
 0x222   :  { %v1713_v52 = vsel %vm11678_vm9, %v7134_v39, %v7135_v55 }
 0x224   :  { %v9608_v25 = vpop.permute.xlu1 %7207 }
 0x225   :  { %v7203_v2 = vpop.permute.xlu0 %7202 }
 0x226   :  { %v7205_v60 = vunpack.i.h.bf16 %v7203_v2  ;;  %v7204_v41 = vunpack.i.l.bf16 %v7203_v2  ;;  %v9610_v62 = vpop.permute.xlu2 %7257  ;;  %v1714_v2 = vsel %vm11678_vm9, %v7139_v61, %v7140_v40 }
 0x227   :  { %v7260_v11 = vunpack.i.h.bf16 %v9610_v62  ;;  %v7259_v30 = vunpack.i.l.bf16 %v9610_v62  ;;  %v2236_v62 = vld [vmem:[%s11541_s1 + $0x28] sm:$0xff] }
 0x228   :  { %v1882_v6 = vsel %vm1881_vm11, %v7204_v41, %v7205_v60  ;;  %v1712_v60 = vsel %vm11678_vm9, %v7129_v42, %v7130_v45  ;;  %vm2051_vm9 = vcmask 572416  }
 0x229   :  { %2666 = vmatpush.msra.mxu1 %v1882_v6  ;;  %2547 = vmatmul.f32.gmra.mxu3 %v2246_v14  ;;  %v1986_v21 = vsel %vm11683_vm12, %v7259_v30, %v7260_v11  ;;  %v2251_v30 = vld [vmem:[%s11541_s1 + $0xa0] sm:$0xff] }
 0x22b   :  { %2667 = vmatpush.msra.mxu1 %v1850_v49 }
 0x22c   :  { %v9616_v1 = vpop.permute.xlu1 %7222 }
 0x22d   :  { %2668 = vmatpush.msra.mxu1 %v1849_v12  ;;  %v9619_v20 = vpop.permute.xlu0 %7217  ;;  %v2244_v12 = vld [vmem:[%s11541_s1 + $0x68] sm:$0xff]  ;;  %v7224_v57 = vunpack.i.l.bf16 %v9616_v1 }
 0x22e   :  { %v9622_v36 = vpop.permute.xlu2 %7272  ;;  %2501 = vmatmul.f32.gmra.mxu1 %v2244_v12  ;;  %v7220_v12 = vunpack.i.h.bf16 %v9619_v20 }
 0x22f   :  { %2669 = vmatpush.msra.mxu1 %v1848_v16  ;;  %v7275_v56 = vunpack.i.h.bf16 %v9622_v36  ;;  %v7274_v51 = vunpack.i.l.bf16 %v9622_v36 }
 0x231   :  { %2670 = vmatpush.msra.mxu1 %v1816_v7 }
 0x233   :  { %2671 = vmatpush.msra.mxu1 %v1815_v29  ;;  %v2020_v29 = vsel %vm11681_vm14, %v7274_v51, %v7275_v56  ;;  %v7219_v56 = vunpack.i.l.bf16 %v9619_v20 }
 0x234   :  { %v9633_v54 = vpop.permute.xlu1 %7237 }
 0x235   :  { %2672 = vmatpush.msra.mxu1 %v1814_v34  ;;  %v9636_v53 = vpop.permute.xlu0 %7232  ;;  %v7239_v55 = vunpack.i.l.bf16 %v9633_v54 }
 0x236   :  { %v9641_v35 = vpop.permute.xlu2 %7287  ;;  %2590 = vmatmul.f32.vlgmr.msrb.gmra.mxu1 %v2236_v62  ;;  %v2253_v62 = vld [vmem:[%s11541_s1 + $0xb0] sm:$0xff] }
 0x237   :  { %2673 = vmatpush.msra.mxu1 %v1782_v4  ;;  %v2235_v4 = vld [vmem:[%s11541_s1 + $0x20] sm:$0xff] }
 0x238   :  { %2567 = vmatmul.f32.vlgmr.msrb.gmra.mxu0 %v2235_v4 }
 0x239   :  { %2674 = vmatpush.msra.mxu1 %v1781_v43 }
 0x23b   :  { %2675 = vmatpush.msra.mxu1 %v1780_v8 }
 0x23c   :  { %v9651_v13 = vpop.permute.xlu1 %7252 }
 0x23d   :  { %2676 = vmatpush.msra.mxu1 %v1748_v38  ;;  %v9654_v31 = vpop.permute.xlu0 %7247  ;;  %v7255_v37 = vunpack.i.h.bf16 %v9651_v13  ;;  %v7254_v43 = vunpack.i.l.bf16 %v9651_v13  ;;  %v7244_v38 = vunpack.i.l.bf16 %v9606_v59  ;;  %v2249_v13 = vld [vmem:[%s11541_s1 + $0x90] sm:$0xff]  ;;  %v2238_v59 = vld [vmem:[%s11541_s1 + $0x38] sm:$0xff] }
 0x23e   :  { %v9659_v23 = vpop.permute.xlu2 %7302  ;;  %v7250_v10 = vunpack.i.h.bf16 %v9654_v31  ;;  %v7249_v8 = vunpack.i.l.bf16 %v9654_v31  ;;  %2616 = vmatmul.f32.gmra.mxu2 %v2249_v13  ;;  %v2247_v31 = vld [vmem:[%s11541_s1 + $0x80] sm:$0xff]  ;;  %2636 = vmatmul.f32.vlgmr.msrb.gmra.mxu3 %v2238_v59 }
 0x23f   :  { %2677 = vmatpush.msra.mxu1 %v1747_v0  ;;  %v1985_v40 = vsel %vm11683_vm12, %v7254_v43, %v7255_v37  ;;  %v7240_v0 = vunpack.i.h.bf16 %v9633_v54  ;;  %v7235_v54 = vunpack.i.h.bf16 %v9636_v53 }
 0x240   :  { %2570 = vmatmul.f32.gmra.mxu0 %v2247_v31 }
 0x241   :  { %2678 = vmatpush.msra.mxu1 %v1746_v48  ;;  %v1984_v48 = vsel %vm11683_vm12, %v7249_v8, %v7250_v10  ;;  %vm11688_vm12 = vcmask 605184  }
 0x243   :  { %2679 = vmatpush.msra.mxu1 %v1714_v2  ;;  %v2248_v2 = vld [vmem:[%s11541_s1 + $0x88] sm:$0xff] }
 0x244   :  { %v7268_v33 = vpop.permute.xlu1 %7267  ;;  %2593 = vmatmul.f32.gmra.mxu1 %v2248_v2 }
 0x245   :  { %2680 = vmatpush.msra.mxu1 %v1713_v52  ;;  %v7263_v63 = vpop.permute.xlu0 %7262  ;;  %v7270_v58 = vunpack.i.h.bf16 %v7268_v33  ;;  %v7269_v7 = vunpack.i.l.bf16 %v7268_v33  ;;  %v2447_v33 = vld [vmem:[%s11542_s2] sm:$0xff]  ;;  %v7234_v52 = vunpack.i.l.bf16 %v9636_v53  ;;  %v7225_v53 = vunpack.i.h.bf16 %v9616_v1 }
 0x246   :  { %v9669_v41 = vpop.permute.xlu2 %7317  ;;  %v7265_v26 = vunpack.i.h.bf16 %v7263_v63  ;;  %v7264_v47 = vunpack.i.l.bf16 %v7263_v63  ;;  %2451 = vperm.xlu0 %7366, %v2447_v33  }
 0x247   :  { %2681 = vmatpush.msra.mxu1 %v1712_v60  ;;  %v2019_v27 = vsel %vm11681_vm14, %v7269_v7, %v7270_v58  ;;  %v7214_v58 = vunpack.i.l.bf16 %v9597_v15  ;;  %v1917_v20 = vsel %vm11688_vm12, %v7224_v57, %v7225_v53  ;;  %v7210_v7 = vunpack.i.h.bf16 %v9608_v25  ;;  %v2241_v15 = vld [vmem:[%s11541_s1 + $0x50] sm:$0xff] }
 0x248   :  { %v2018_v3 = vsel %vm11681_vm14, %v7264_v47, %v7265_v26  ;;  %vm11689_vm14 = vcmask 596992   ;;  %v7209_v26 = vunpack.i.l.bf16 %v9608_v25  ;;  %v1916_v47 = vsel %vm11688_vm12, %v7219_v56, %v7220_v12  ;;  %v2252_v25 = vld [vmem:[%s11541_s1 + $0xa8] sm:$0xff] }
 0x249   :  { %v1952_v45 = vsel %vm11689_vm14, %v7244_v38, %v7245_v28  ;;  %v1950_v5 = vsel %vm11689_vm14, %v7234_v52, %v7235_v54 }
 0x24a   :  { %v1883_v14 = vsel %vm1881_vm11, %v7209_v26, %v7210_v7  ;;  %v2749_v7 = vld [vmem:[%s11543_s3 + $0x60] sm:$0xff]  ;;  %v2748_v26 = vld [vmem:[%s11543_s3 + $0x58] sm:$0xff] }
 0x24c   :  { %v7283_v17 = vpop.permute.xlu1 %7282 }
 0x24d   :  { %v7285_v19 = vunpack.i.h.bf16 %v7283_v17  ;;  %v7284_v32 = vunpack.i.l.bf16 %v7283_v17  ;;  %v7278_v6 = vpop.permute.xlu0 %7277  ;;  %v7230_v17 = vunpack.i.h.bf16 %v9604_v24 }
 0x24e   :  { %v7280_v49 = vunpack.i.h.bf16 %v7278_v6  ;;  %v7279_v44 = vunpack.i.l.bf16 %v7278_v6  ;;  %v9680_v46 = vpop.permute.xlu2 %7332 }
 0x24f   :  { %v2053_v16 = vsel %vm2051_vm9, %v7284_v32, %v7285_v19  ;;  %v7229_v19 = vunpack.i.l.bf16 %v9604_v24  ;;  %v1951_v32 = vsel %vm11689_vm14, %v7239_v55, %v7240_v0  ;;  %v2250_v24 = vld [vmem:[%s11541_s1 + $0x98] sm:$0xff]  ;;  %vm2153_vm14 = vcmask 547840  }
 0x250   :  { %2689 = vmatpush.msra.mxu2 %v2053_v16  ;;  %v2052_v18 = vsel %vm2051_vm9, %v7279_v44, %v7280_v49  ;;  %v2239_v44 = vld [vmem:[%s11541_s1 + $0x40] sm:$0xff]  ;;  %2639 = vmatmul.f32.gmra.mxu3 %v2250_v24  ;;  %v2240_v16 = vld [vmem:[%s11541_s1 + $0x48] sm:$0xff] }
 0x251   :  { %v1918_v51 = vsel %vm11688_vm12, %v7229_v19, %v7230_v17  ;;  %2659 = vmatmul.f32.vlgmr.msra.gmra.mxu0 %v2239_v44  ;;  %2682 = vmatmul.f32.vlgmr.msra.gmra.mxu1 %v2240_v16  ;;  %vm11691_vm12 = vcmask 539648  }
 0x252   :  { %2690 = vmatpush.msra.mxu2 %v2052_v18  ;;  %v2448_v18 = vld [vmem:[%s11542_s2 + $0x8] sm:$0xff] }
 0x253   :  { %2456 = vperm.xlu1 %7367, %v2448_v18  }
 0x254   :  { %v9693_v36 = vpop.permute.xlu1 %7297  ;;  %2691 = vmatpush.msra.mxu2 %v2020_v29  ;;  %v1884_v29 = vsel %vm1881_vm11, %v7214_v58, %v7215_v50  ;;  %v2751_v58 = vld [vmem:[%s11543_s3 + $0x70] sm:$0xff] }
 0x255   :  { %v9697_v34 = vpop.permute.xlu0 %7292  ;;  %v7299_v44 = vunpack.i.l.bf16 %v9693_v36 }
 0x256   :  { %2692 = vmatpush.msra.mxu2 %v2019_v27  ;;  %v9706_v22 = vpop.permute.xlu2 %7347  ;;  %v7294_v56 = vunpack.i.l.bf16 %v9697_v34 }
 0x257   :  { %v7349_v28 = vunpack.i.l.bf16 %v9706_v22 }
 0x258   :  { %2693 = vmatpush.msra.mxu2 %v2018_v3 }
 0x259   :  { %2662 = vmatmul.f32.gmra.mxu0 %v2251_v30  ;;  %2685 = vmatmul.f32.gmra.mxu1 %v2252_v25  ;;  %v2743_v30 = vld [vmem:[%s11543_s3 + $0x30] sm:$0xff]  ;;  %v2740_v25 = vld [vmem:[%s11543_s3 + $0x18] sm:$0xff] }
 0x25a   :  { %2694 = vmatpush.msra.mxu2 %v1986_v21  ;;  %v7350_v21 = vunpack.i.h.bf16 %v9706_v22 }
 0x25c   :  { %v9723_v61 = vpop.permute.xlu1 %7312  ;;  %2695 = vmatpush.msra.mxu2 %v1985_v40  ;;  %v2190_v55 = vsel %vm11691_vm12, %v7349_v28, %v7350_v21 }
 0x25d   :  { %v9733_v39 = vpop.permute.xlu0 %7307  ;;  %v7315_v19 = vunpack.i.h.bf16 %v9723_v61 }
 0x25e   :  { %2696 = vmatpush.msra.mxu2 %v1984_v48  ;;  %v7363_v42 = vpop.permute.xlu2 %7362  ;;  %v7335_v48 = vunpack.i.h.bf16 %v9680_v46  ;;  %v7310_v53 = vunpack.i.h.bf16 %v9733_v39  ;;  %v7309_v57 = vunpack.i.l.bf16 %v9733_v39  ;;  %v7295_v39 = vunpack.i.h.bf16 %v9697_v34  ;;  %v2254_v34 = vld [vmem:[%s11541_s1 + $0xb8] sm:$0xff] }
 0x25f   :  { %v7365_v63 = vunpack.i.h.bf16 %v7363_v42  ;;  %v7364_v60 = vunpack.i.l.bf16 %v7363_v42 }
 0x260   :  { %2697 = vmatpush.msra.mxu2 %v1952_v45  ;;  %v7334_v45 = vunpack.i.l.bf16 %v9680_v46  ;;  %v7320_v46 = vunpack.i.h.bf16 %v9669_v41 }
 0x261   :  { %v2224_v6 = vsel %vm11690_vm13, %v7364_v60, %v7365_v63  ;;  %v7319_v60 = vunpack.i.l.bf16 %v9669_v41  ;;  %v7305_v41 = vunpack.i.h.bf16 %v9659_v23 }
 0x262   :  { %2698 = vmatpush.msra.mxu2 %v1951_v32  ;;  %2712 = vmatpush.msra.mxu3 %v2224_v6  ;;  %v2156_v63 = vsel %vm2153_vm14, %v7334_v45, %v7335_v48  ;;  %v7314_v32 = vunpack.i.l.bf16 %v9723_v61  ;;  %v7300_v61 = vunpack.i.h.bf16 %v9693_v36  ;;  %v2242_v36 = vld [vmem:[%s11541_s1 + $0x58] sm:$0xff]  ;;  %v2738_v48 = vld [vmem:[%s11543_s3 + $0x8] sm:$0xff] }
 0x264   :  { %v9755_v49 = vpop.permute.xlu1 %7327  ;;  %2699 = vmatpush.msra.mxu2 %v1950_v5 }
 0x265   :  { %v9765_v1 = vpop.permute.xlu0 %7322  ;;  %v7330_v42 = vunpack.i.h.bf16 %v9755_v49  ;;  %v7329_v2 = vunpack.i.l.bf16 %v9755_v49  ;;  %v7304_v49 = vunpack.i.l.bf16 %v9659_v23  ;;  %v7290_v23 = vunpack.i.h.bf16 %v9641_v35 }
 0x266   :  { %2700 = vmatpush.msra.mxu2 %v1918_v51  ;;  %v7325_v54 = vunpack.i.h.bf16 %v9765_v1  ;;  %v7324_v52 = vunpack.i.l.bf16 %v9765_v1  ;;  %v7289_v51 = vunpack.i.l.bf16 %v9641_v35  ;;  %v2752_v35 = vld [vmem:[%s11543_s3 + $0x78] sm:$0xff] }
 0x267   :  { %v2155_v17 = vsel %vm2153_vm14, %v7329_v2, %v7330_v42  ;;  %2753 = vmatpush.msrb.mxu0 %v2752_v35  ;;  %v2737_v42 = vld [vmem:[%s11543_s3] sm:$0xff] }
 0x268   :  { %2701 = vmatpush.msra.mxu2 %v1917_v20  ;;  %v2154_v6 = vsel %vm2153_vm14, %v7324_v52, %v7325_v54  ;;  %v2054_v50 = vsel %vm2051_vm9, %v7289_v51, %v7290_v23  ;;  %v2750_v20 = vld [vmem:[%s11543_s3 + $0x68] sm:$0xff] }
 0x269   :  { %2754 = vmatpush.msrb.mxu0 %v2751_v58 }
 0x26a   :  { %2702 = vmatpush.msra.mxu2 %v1916_v47  ;;  %v2747_v47 = vld [vmem:[%s11543_s3 + $0x50] sm:$0xff] }
 0x26b   :  { %2755 = vmatpush.msrb.mxu0 %v2750_v20 }
 0x26c   :  { %v7343_v11 = vpop.permute.xlu1 %7342  ;;  %2703 = vmatpush.msra.mxu2 %v1884_v29  ;;  %v2746_v29 = vld [vmem:[%s11543_s3 + $0x48] sm:$0xff] }
 0x26d   :  { %v7338_v27 = vpop.permute.xlu0 %7337  ;;  %v7345_v40 = vunpack.i.h.bf16 %v7343_v11  ;;  %v7344_v31 = vunpack.i.l.bf16 %v7343_v11  ;;  %2756 = vmatpush.msrb.mxu0 %v2749_v7  ;;  %v2745_v11 = vld [vmem:[%s11543_s3 + $0x40] sm:$0xff] }
 0x26e   :  { %2704 = vmatpush.msra.mxu2 %v1883_v14  ;;  %v7340_v59 = vunpack.i.h.bf16 %v7338_v27  ;;  %v7339_v0 = vunpack.i.l.bf16 %v7338_v27  ;;  %v2742_v27 = vld [vmem:[%s11543_s3 + $0x28] sm:$0xff]  ;;  %v2741_v14 = vld [vmem:[%s11543_s3 + $0x20] sm:$0xff] }
 0x26f   :  { %2705 = vmatmul.f32.vlgmr.msra.gmra.mxu2 %v2241_v15  ;;  %v2189_v22 = vsel %vm11691_vm12, %v7344_v31, %v7345_v40  ;;  %2757 = vmatpush.msrb.mxu0 %v2748_v26  ;;  %v2744_v15 = vld [vmem:[%s11543_s3 + $0x38] sm:$0xff] }
 0x270   :  { %v2188_v33 = vsel %vm11691_vm12, %v7339_v0, %v7340_v59  ;;  %vm11696_vm12 = vcmask 564224   ;;  %v2739_v0 = vld [vmem:[%s11543_s3 + $0x10] sm:$0xff] }
 0x271   :  { %v2088_v1 = vsel %vm11696_vm12, %v7304_v49, %v7305_v41  ;;  %v2087_v16 = vsel %vm11696_vm12, %v7299_v44, %v7300_v61  ;;  %v2086_v18 = vsel %vm11696_vm12, %v7294_v56, %v7295_v39  ;;  %2758 = vmatpush.msrb.mxu0 %v2747_v47  ;;  %v9885_v47 = vld [vmem:[#allocation7 + $0x8] sm:$0xff]  ;;  %vm80_vm12 = vcmask 384000  }
 0x273   :  { %2759 = vmatpush.msrb.mxu0 %v2746_v29  ;;  %v8554_v29 = vmov 2  }
 0x274   :  { %v7358_v4 = vpop.permute.xlu1 %7357  ;;  %7372 = vset.pattern.permute.xlu0 %v8554_v29 }
 0x275   :  { %v7360_v37 = vunpack.i.h.bf16 %v7358_v4  ;;  %v7359_v43 = vunpack.i.l.bf16 %v7358_v4  ;;  %v7353_v3 = vpop.permute.xlu0 %7352  ;;  %2760 = vmatpush.msrb.mxu0 %v2745_v11  ;;  %v2476_v4 = vpop.f32.mrf.mxu0  ;;  %2830 = vperm.xlu0 %7372, %v9885_v47   ;;  %v8555_v11 = vmov 1  }
 0x276   :  { %v7355_v10 = vunpack.i.h.bf16 %v7353_v3  ;;  %v7354_v8 = vunpack.i.l.bf16 %v7353_v3  ;;  %7369 = vset.pattern.permute.xlu1 %v8555_v11 }
 0x277   :  { %v2223_v38 = vsel %vm11690_vm13, %v7359_v43, %v7360_v37  ;;  %2708 = vmatmul.f32.gmra.mxu2 %v2253_v62  ;;  %2761 = vmatpush.msrb.mxu0 %v2744_v15  ;;  %v2522_v37 = vpop.f32.mrf.mxu2  ;;  %v11724_v15 = vmov 4  }
 0x278   :  { %2713 = vmatpush.msra.mxu3 %v2223_v38  ;;  %v2222_v13 = vsel %vm11690_vm13, %v7354_v8, %v7355_v10  ;;  %vm11697_vm13 = vcmask 556032  }
 0x279   :  { %v2122_v5 = vsel %vm11697_vm13, %v7319_v60, %v7320_v46  ;;  %v2121_v24 = vsel %vm11697_vm13, %v7314_v32, %v7315_v19  ;;  %v2120_v12 = vsel %vm11697_vm13, %v7309_v57, %v7310_v53  ;;  %2762 = vmatpush.msrb.mxu0 %v2743_v30  ;;  %vm2784_vm13 = vcmask 318520  }
 0x27a   :  { %2714 = vmatpush.msra.mxu3 %v2222_v13 }
 0x27b   :  { %2763 = vmatpush.msrb.mxu0 %v2742_v27  ;;  %v9893_v27 = vld [vmem:[#allocation7] sm:$0xff] }
 0x27c   :  { %2715 = vmatpush.msra.mxu3 %v2190_v55 }
 0x27d   :  { %2764 = vmatpush.msrb.mxu0 %v2741_v14  ;;  %7376 = vset.pattern.permute.xlu0 %v11724_v15 }
 0x27e   :  { %2716 = vmatpush.msra.mxu3 %v2189_v22  ;;  %2870 = vperm.xlu0 %7376, %v9885_v47  }
 0x27f   :  { %2765 = vmatpush.msrb.mxu0 %v2740_v25  ;;  %v11714_v25 = vmov 6  }
 0x280   :  { %2717 = vmatpush.msra.mxu3 %v2188_v33 }
 0x281   :  { %2766 = vmatpush.msrb.mxu0 %v2739_v0 }
 0x282   :  { %2718 = vmatpush.msra.mxu3 %v2156_v63  ;;  %v2499_v62 = vpop.f32.mrf.mxu1 }
 0x283   :  { %2767 = vmatpush.msrb.mxu0 %v2738_v48 }
 0x284   :  { %2719 = vmatpush.msra.mxu3 %v2155_v17 }
 0x285   :  { %2768 = vmatpush.msrb.mxu0 %v2737_v42 }
 0x286   :  { %2720 = vmatpush.msra.mxu3 %v2154_v6  ;;  %7380 = vset.pattern.permute.xlu0 %v11714_v25 }
 0x288   :  { %2721 = vmatpush.msra.mxu3 %v2122_v5 }
 0x28a   :  { %2722 = vmatpush.msra.mxu3 %v2121_v24 }
 0x28c   :  { %2723 = vmatpush.msra.mxu3 %v2120_v12 }
 0x28e   :  { %2724 = vmatpush.msra.mxu3 %v2088_v1 }
 0x290   :  { %2725 = vmatpush.msra.mxu3 %v2087_v16 }
 0x292   :  { %2726 = vmatpush.msra.mxu3 %v2086_v18 }
 0x294   :  { %2727 = vmatpush.msra.mxu3 %v2054_v50 }
 0x295   :  { %2728 = vmatmul.f32.vlgmr.msra.gmra.mxu3 %v2242_v36 }
 0x299   :  { %v2525_v38 = vpop.f32.mrf.mxu2 }
 0x29d   :  { %2731 = vmatmul.f32.gmra.mxu3 %v2254_v34 }
 0x29e   :  { %v2479_v43 = vpop.f32.mrf.mxu0 }
 0x2a1   :  { %v2614_v33 = vpop.f32.mrf.mxu2 }
 0x2a4   :  { %v2545_v21 = vpop.f32.mrf.mxu3 }
 0x2ab   :  { %v2502_v8 = vpop.f32.mrf.mxu1 }
 0x2ac   :  { %v2548_v2 = vpop.f32.mrf.mxu3 }
 0x2b3   :  { %v2591_v55 = vpop.f32.mrf.mxu1 }
 0x2b5   :  { %v2568_v40 = vpop.f32.mrf.mxu0 }
 0x2b8   :  { %v2452_v3 = vpop.permute.xlu0 %2451 }
 0x2b9   :  { %v2477_v10 = vadd.f32 %v2476_v4, %v2452_v3  ;;  %v8559_v4 = vmov 3  }
 0x2bb   :  { %v2500_v28 = vadd.f32 %v2499_v62, %v2477_v10  ;;  %v8560_v62 = vmov 0.0  }
 0x2bc   :  { %81 = vst.msk [vmem:[#allocation3] sm:$0xff] %vm80_vm12, %v8560_v62 }
 0x2bd   :  { %v2523_v31 = vadd.f32 %v2522_v37, %v2500_v28  ;;  %v2571_v63 = vpop.f32.mrf.mxu0  ;;  %82 = vst.msk [vmem:[#allocation3 + $0x8] sm:$0xff] %vm80_vm12, %v8560_v62  ;;  %v11720_v37 = vmov 5  }
 0x2bf   :  { %v2546_v45 = vadd.f32 %v2545_v21, %v2523_v31 }
 0x2c1   :  { %v2569_v54 = vadd.f32 %v2568_v40, %v2546_v45  ;;  %v2594_v17 = vpop.f32.mrf.mxu1  ;;  %v2637_v19 = vpop.f32.mrf.mxu3 }
 0x2c2   :  { %v2617_v53 = vpop.f32.mrf.mxu2 }
 0x2c3   :  { %v2592_v46 = vadd.f32 %v2591_v55, %v2569_v54 }
 0x2c5   :  { %v2457_v13 = vpop.permute.xlu1 %2456  ;;  %v2615_v32 = vadd.f32 %v2614_v33, %v2592_v46 }
 0x2c6   :  { %v2480_v59 = vadd.f32 %v2479_v43, %v2457_v13 }
 0x2c7   :  { %v2638_v41 = vadd.f32 %v2637_v19, %v2615_v32 }
 0x2c8   :  { %v2503_v22 = vadd.f32 %v2502_v8, %v2480_v59 }
 0x2ca   :  { %v2526_v52 = vadd.f32 %v2525_v38, %v2503_v22 }
 0x2cc   :  { %v2549_v60 = vadd.f32 %v2548_v2, %v2526_v52 }
 0x2ce   :  { %v2572_v6 = vadd.f32 %v2571_v63, %v2549_v60  ;;  %v2660_v57 = vpop.f32.mrf.mxu0  ;;  %v2683_v49 = vpop.f32.mrf.mxu1  ;;  %v11722_v63 = vmov 7  }
 0x2cf   :  { %v2661_v61 = vadd.f32 %v2660_v57, %v2638_v41 }
 0x2d0   :  { %v2595_v5 = vadd.f32 %v2594_v17, %v2572_v6 }
 0x2d1   :  { %v2684_v39 = vadd.f32 %v2683_v49, %v2661_v61 }
 0x2d2   :  { %v2618_v24 = vadd.f32 %v2617_v53, %v2595_v5  ;;  %v11710_v5 = vmov 8  }
 0x2d3   :  { %v2640_v44 = vpop.f32.mrf.mxu3 }
 0x2d4   :  { %v2641_v56 = vadd.f32 %v2640_v44, %v2618_v24 }
 0x2d6   :  { %v2663_v1 = vpop.f32.mrf.mxu0  ;;  %v2686_v16 = vpop.f32.mrf.mxu1 }
 0x2d7   :  { %v2664_v51 = vadd.f32 %v2663_v1, %v2641_v56 }
 0x2d9   :  { %v2687_v50 = vadd.f32 %v2686_v16, %v2664_v51 }
 0x2e7   :  { %v2831_v40 = vpop.permute.xlu0 %2830 }
 0x2f0   :  { %v2871_v22 = vpop.permute.xlu0 %2870 }
 0x2f2   :  { %v2706_v12 = vpop.f32.mrf.mxu2 }
 0x2f3   :  { %v2707_v23 = vadd.f32 %v2706_v12, %v2684_v39 }
 0x2fa   :  { %v2709_v35 = vpop.f32.mrf.mxu2 }
 0x2fb   :  { %v2710_v58 = vadd.f32 %v2709_v35, %v2687_v50 }
 0x318   :  { %v2729_v18 = vpop.f32.mrf.mxu3 }
 0x319   :  { %v2730_v36 = vadd.f32 %v2729_v18, %v2707_v23  ;;  %v11718_v18 = vmov 9  }
 0x31b   :  { %v2735_v34 = vmax.f32 %v2730_v36, 0.0 }
 0x31d   :  { %2769 = vmatmul.f32.vlgmr.msrb.gmra.mxu0 %v2735_v34 }
 0x320   :  { %v2732_v20 = vpop.f32.mrf.mxu3 }
 0x321   :  { %v2733_v7 = vadd.f32 %v2732_v20, %v2710_v58 }
 0x323   :  { %v2736_v26 = vmax.f32 %v2733_v7, 0.0  ;;  %v11708_v7 = vmov 10  }
 0x325   :  { %2772 = vmatmul.f32.gmra.mxu0 %v2736_v26 }
 0x39a   :  { %v2770_v30 = vpop.f32.mrf.mxu0 }
 0x39b   :  { %2778 = vrot.lane.b32.xlu2 %v2770_v30, %s8557_s22 }
 0x3a2   :  { %v2773_v14 = vpop.f32.mrf.mxu0 }
 0x3a3   :  { %2793 = vperm.xlu2 %7368, %v9893_v27   ;;  %2780 = vrot.lane.b32.xlu1 %v2773_v14, %s8557_s22 }
 0x3ab   :  { %7370 = vset.pattern.permute.xlu2 %v8555_v11  ;;  %2806 = vperm.xlu1 %7369, %v9893_v27  }
 0x3ac   :  { %2810 = vperm.xlu2 %7370, %v9885_v47  }
 0x3b3   :  { %7373 = vset.pattern.permute.xlu1 %v8559_v4 }
 0x3b4   :  { %7371 = vset.pattern.permute.xlu2 %v8554_v29  ;;  %2846 = vperm.xlu1 %7373, %v9893_v27  }
 0x3b5   :  { %2826 = vperm.xlu2 %7371, %v9893_v27  }
 0x3bc   :  { %7377 = vset.pattern.permute.xlu1 %v11720_v37 }
 0x3bd   :  { %7374 = vset.pattern.permute.xlu2 %v8559_v4  ;;  %2886 = vperm.xlu1 %7377, %v9893_v27  }
 0x3be   :  { %2850 = vperm.xlu2 %7374, %v9885_v47  }
 0x3c5   :  { %7381 = vset.pattern.permute.xlu1 %v11722_v63 }
 0x3c6   :  { %7375 = vset.pattern.permute.xlu2 %v11724_v15 }
 0x3c7   :  { %2866 = vperm.xlu2 %7375, %v9893_v27  }
 0x3cf   :  { %7378 = vset.pattern.permute.xlu2 %v11720_v37 }
 0x3d0   :  { %2890 = vperm.xlu2 %7378, %v9885_v47  }
 0x3d8   :  { %7379 = vset.pattern.permute.xlu2 %v11714_v25  ;;  %v4228_v25 = vld [vmem:[#allocation4 + $0x38] sm:$0xff] }
 0x3d9   :  { %2906 = vperm.xlu2 %7379, %v9893_v27  }
 0x3e1   :  { %7382 = vset.pattern.permute.xlu2 %v11722_v63  ;;  %v10448_v63 = vld [vmem:[#allocation4 + $0x40] sm:$0xff] }
 0x3f5   :  { %v2779_v43 = vpop.permute.xlu2 %2778 }
 0x3f6   :  { %2785 = vst.msk [vmem:[#allocation3] sm:$0xff] %vm2784_vm13, %v2779_v43 }
 0x3fd   :  { %v9918_v3 = vld [vmem:[#allocation3] sm:$0xff]  ;;  %v9921_v10 = vpop.permute.xlu2 %2793 }
 0x3fe   :  { %3228 = vst.msk [vmem:[#allocation3] sm:$0xff] %vm80_vm12, %v8560_v62 }
 0x406   :  { %v2811_v8 = vpop.permute.xlu2 %2810 }
 0x40f   :  { %v2827_v21 = vpop.permute.xlu2 %2826 }
 0x410   :  { %v2833_v28 = vmul.f32 %v2827_v21, %v9918_v3  ;;  %v11706_v21 = vmov 11  }
 0x412   :  { %2837 = vrot.lane.b32.xlu1 %v2833_v28, %s8491_s5 }
 0x415   :  { %v2781_v38 = vpop.permute.xlu1 %2780 }
 0x416   :  { %2786 = vst.msk [vmem:[#allocation3 + $0x8] sm:$0xff] %vm2784_vm13, %v2781_v38 }
 0x418   :  { %v2851_v13 = vpop.permute.xlu2 %2850 }
 0x41d   :  { %v9926_v31 = vld [vmem:[#allocation3 + $0x8] sm:$0xff]  ;;  %v2807_v59 = vpop.permute.xlu1 %2806 }
 0x41e   :  { %3229 = vst.msk [vmem:[#allocation3 + $0x8] sm:$0xff] %vm80_vm12, %v8560_v62  ;;  %v2813_v0 = vmul.f32 %v2807_v59, %v9918_v3  ;;  %v2834_v55 = vmul.f32 %v2831_v40, %v9926_v31  ;;  %v2874_v42 = vmul.f32 %v2871_v22, %v9926_v31  ;;  %v2814_v19 = vmul.f32 %v2811_v8, %v9926_v31 }
 0x41f   :  { %v2854_v32 = vmul.f32 %v2851_v13, %v9926_v31  ;;  %vm3119_vm12 = vcmask 130048  }
 0x420   :  { %2839 = vrot.lane.b32.xlu2 %v2834_v55, %s8491_s5  ;;  %2817 = vrot.lane.b32.xlu0 %v2813_v0, %s8490_s0  ;;  %v11712_v55 = vmov 12  }
 0x421   :  { %v2867_v48 = vpop.permute.xlu2 %2866 }
 0x422   :  { %v2873_v45 = vmul.f32 %v2867_v48, %v9918_v3 }
 0x424   :  { %2877 = vrot.lane.b32.xlu1 %v2873_v45, %s8493_s28 }
 0x426   :  { %v2847_v2 = vpop.permute.xlu1 %2846 }
 0x427   :  { %v2853_v33 = vmul.f32 %v2847_v2, %v9918_v3 }
 0x428   :  { %2879 = vrot.lane.b32.xlu2 %v2874_v42, %s8493_s28 }
 0x429   :  { %2857 = vrot.lane.b32.xlu0 %v2853_v33, %s8492_s27 }
 0x42a   :  { %v2891_v54 = vpop.permute.xlu2 %2890 }
 0x42b   :  { %v2894_v6 = vmul.f32 %v2891_v54, %v9926_v31 }
 0x42f   :  { %v2887_v52 = vpop.permute.xlu1 %2886 }
 0x430   :  { %v2893_v46 = vmul.f32 %v2887_v52, %v9918_v3  ;;  %v11704_v52 = vmov 13  }
 0x432   :  { %2897 = vrot.lane.b32.xlu0 %v2893_v46, %s8494_s29 }
 0x433   :  { %v2907_v60 = vpop.permute.xlu2 %2906 }
 0x434   :  { %v2913_v17 = vmul.f32 %v2907_v60, %v9918_v3 }
 0x436   :  { %2917 = vrot.lane.b32.xlu1 %v2913_v17, %s8495_s30 }
 0x43a   :  { %2910 = vperm.xlu0 %7380, %v9885_v47  }
 0x43e   :  { %2819 = vrot.lane.b32.xlu1 %v2814_v19, %s8490_s0 }
 0x442   :  { %7384 = vset.pattern.permute.xlu0 %v11710_v5 }
 0x446   :  { %2859 = vrot.lane.b32.xlu1 %v2854_v32, %s8492_s27 }
 0x44e   :  { %2899 = vrot.lane.b32.xlu1 %v2894_v6, %s8494_s29  ;;  %v11702_v6 = vmov 14  }
 0x456   :  { %2926 = vperm.xlu1 %7381, %v9893_v27  }
 0x45e   :  { %7385 = vset.pattern.permute.xlu1 %v11718_v18 }
 0x47a   :  { %v9980_v16 = vpop.permute.xlu2 %2839 }
 0x482   :  { %v9984_v36 = vpop.permute.xlu2 %2879 }
 0x484   :  { %v9955_v57 = vpop.permute.xlu1 %2837 }
 0x492   :  { %v9953_v53 = vpop.permute.xlu0 %2817 }
 0x496   :  { %v9960_v49 = vpop.permute.xlu1 %2877 }
 0x49b   :  { %v9958_v41 = vpop.permute.xlu0 %2857 }
 0x4a4   :  { %v9962_v24 = vpop.permute.xlu0 %2897 }
 0x4a8   :  { %v9964_v61 = vpop.permute.xlu1 %2917 }
 0x4ac   :  { %v2911_v44 = vpop.permute.xlu0 %2910 }
 0x4ad   :  { %v2914_v12 = vmul.f32 %v2911_v44, %v9926_v31 }
 0x4af   :  { %2919 = vrot.lane.b32.xlu2 %v2914_v12, %s8495_s30 }
 0x4b0   :  { %v9968_v39 = vpop.permute.xlu1 %2819 }
 0x4b7   :  { %2930 = vperm.xlu2 %7382, %v9885_v47  }
 0x4b8   :  { %v9971_v56 = vpop.permute.xlu1 %2859 }
 0x4bf   :  { %7383 = vset.pattern.permute.xlu2 %v11710_v5 }
 0x4c0   :  { %v9974_v1 = vpop.permute.xlu1 %2899  ;;  %2946 = vperm.xlu2 %7383, %v9893_v27  }
 0x4c8   :  { %v2927_v23 = vpop.permute.xlu1 %2926  ;;  %7386 = vset.pattern.permute.xlu2 %v11718_v18  ;;  %v3151_v18 = vld [vmem:[%s11547_s7] sm:$0xff] }
 0x4c9   :  { %v2933_v51 = vmul.f32 %v2927_v23, %v9918_v3 }
 0x4cb   :  { %2937 = vrot.lane.b32.xlu0 %v2933_v51, %s11736_s10 }
 0x4d3   :  { %2950 = vperm.xlu0 %7384, %v9885_v47  }
 0x4db   :  { %7388 = vset.pattern.permute.xlu0 %v11708_v7 }
 0x509   :  { %v9986_v50 = vpop.permute.xlu2 %2919 }
 0x511   :  { %v2931_v34 = vpop.permute.xlu2 %2930 }
 0x512   :  { %v2934_v35 = vmul.f32 %v2931_v34, %v9926_v31 }
 0x514   :  { %2939 = vrot.lane.b32.xlu1 %v2934_v35, %s11736_s10 }
 0x51a   :  { %v2947_v58 = vpop.permute.xlu2 %2946 }
 0x51b   :  { %v2953_v20 = vmul.f32 %v2947_v58, %v9918_v3  ;;  %v11700_v58 = vmov 15  }
 0x51d   :  { %2957 = vrot.lane.b32.xlu1 %v2953_v20, %s8497_s11 }
 0x525   :  { %2966 = vperm.xlu1 %7385, %v9893_v27  }
 0x52d   :  { %7389 = vset.pattern.permute.xlu1 %v11706_v21 }
 0x53d   :  { %v9994_v26 = vpop.permute.xlu0 %2937 }
 0x545   :  { %v2951_v30 = vpop.permute.xlu0 %2950 }
 0x546   :  { %v2954_v14 = vmul.f32 %v2951_v30, %v9926_v31 }
 0x548   :  { %2959 = vrot.lane.b32.xlu2 %v2954_v14, %s8497_s11 }
 0x550   :  { %2970 = vperm.xlu2 %7386, %v9885_v47  }
 0x558   :  { %7387 = vset.pattern.permute.xlu2 %v11708_v7 }
 0x559   :  { %2986 = vperm.xlu2 %7387, %v9893_v27  }
 0x561   :  { %7390 = vset.pattern.permute.xlu2 %v11706_v21 }
 0x586   :  { %v10001_v62 = vpop.permute.xlu1 %2939 }
 0x58f   :  { %v10003_v43 = vpop.permute.xlu1 %2957 }
 0x597   :  { %v2967_v8 = vpop.permute.xlu1 %2966 }
 0x598   :  { %v2973_v28 = vmul.f32 %v2967_v8, %v9918_v3 }
 0x59a   :  { %2977 = vrot.lane.b32.xlu0 %v2973_v28, %s11734_s12 }
 0x5a2   :  { %2990 = vperm.xlu0 %7388, %v9885_v47   ;;  %v10010_v38 = vpop.permute.xlu2 %2959 }
 0x5aa   :  { %v2971_v13 = vpop.permute.xlu2 %2970  ;;  %7392 = vset.pattern.permute.xlu0 %v11712_v55 }
 0x5ab   :  { %v2974_v40 = vmul.f32 %v2971_v13, %v9926_v31 }
 0x5ad   :  { %2979 = vrot.lane.b32.xlu1 %v2974_v40, %s11734_s12 }
 0x5b3   :  { %v2987_v59 = vpop.permute.xlu2 %2986 }
 0x5b4   :  { %v2993_v0 = vmul.f32 %v2987_v59, %v9918_v3 }
 0x5b6   :  { %2997 = vrot.lane.b32.xlu1 %v2993_v0, %s11730_s13 }
 0x5be   :  { %3006 = vperm.xlu1 %7389, %v9893_v27  }
 0x5c6   :  { %7393 = vset.pattern.permute.xlu1 %v11704_v52 }
 0x60c   :  { %v10018_v48 = vpop.permute.xlu0 %2977 }
 0x614   :  { %v2991_v45 = vpop.permute.xlu0 %2990 }
 0x615   :  { %v2994_v22 = vmul.f32 %v2991_v45, %v9926_v31 }
 0x617   :  { %2999 = vrot.lane.b32.xlu2 %v2994_v22, %s11730_s13  ;;  %v3107_v22 = vld [vmem:[%s11546_s6] sm:$0xff] }
 0x61f   :  { %v10022_v42 = vpop.permute.xlu1 %2979  ;;  %3010 = vperm.xlu2 %7390, %v9885_v47  }
 0x627   :  { %7391 = vset.pattern.permute.xlu2 %v11712_v55  ;;  %v10403_v55 = vld [vmem:[#allocation4 + $0x30] sm:$0xff] }
 0x628   :  { %v10026_v2 = vpop.permute.xlu1 %2997  ;;  %3026 = vperm.xlu2 %7391, %v9893_v27  }
 0x630   :  { %v3007_v33 = vpop.permute.xlu1 %3006  ;;  %7394 = vset.pattern.permute.xlu2 %v11704_v52 }
 0x631   :  { %v3013_v54 = vmul.f32 %v3007_v33, %v9918_v3  ;;  %v3237_v33 = vld [vmem:[#allocation4 + $0x30] sm:$0xff] }
 0x633   :  { %3017 = vrot.lane.b32.xlu0 %v3013_v54, %s11732_s14  ;;  %v3238_v54 = vld [vmem:[#allocation4 + $0x38] sm:$0xff] }
 0x63b   :  { %3030 = vperm.xlu0 %7392, %v9885_v47  }
 0x643   :  { %7396 = vset.pattern.permute.xlu0 %v11702_v6 }
 0x671   :  { %v10034_v46 = vpop.permute.xlu2 %2999 }
 0x679   :  { %v3011_v60 = vpop.permute.xlu2 %3010 }
 0x67a   :  { %v3014_v17 = vmul.f32 %v3011_v60, %v9926_v31  ;;  %v10081_v60 = vpack.i.bf16 %v3238_v54, %v3237_v33 }
 0x67c   :  { %3019 = vrot.lane.b32.xlu1 %v3014_v17, %s11732_s14 }
 0x682   :  { %v3027_v19 = vpop.permute.xlu2 %3026 }
 0x683   :  { %v3033_v32 = vmul.f32 %v3027_v19, %v9918_v3 }
 0x685   :  { %3037 = vrot.lane.b32.xlu1 %v3033_v32, %s11728_s15  ;;  %v3240_v32 = vld [vmem:[#allocation4 + $0x48] sm:$0xff] }
 0x68d   :  { %3046 = vperm.xlu1 %7393, %v9893_v27  }
 0x695   :  { %7398 = vset.pattern.permute.xlu1 %v11700_v58 }
 0x6a5   :  { %v10042_v44 = vpop.permute.xlu0 %3017 }
 0x6ad   :  { %v3031_v12 = vpop.permute.xlu0 %3030 }
 0x6ae   :  { %v3034_v23 = vmul.f32 %v3031_v12, %v9926_v31 }
 0x6b0   :  { %3039 = vrot.lane.b32.xlu2 %v3034_v23, %s11728_s15  ;;  %v3108_v23 = vld [vmem:[%s11546_s6 + $0x8] sm:$0xff] }
 0x6b8   :  { %3050 = vperm.xlu2 %7394, %v9885_v47  }
 0x6c0   :  { %7395 = vset.pattern.permute.xlu2 %v11702_v6 }
 0x6c1   :  { %3066 = vperm.xlu2 %7395, %v9893_v27  }
 0x6c9   :  { %7399 = vset.pattern.permute.xlu2 %v11700_v58 }
 0x6ee   :  { %v10049_v51 = vpop.permute.xlu1 %3019 }
 0x6f7   :  { %v10051_v34 = vpop.permute.xlu1 %3037 }
 0x6ff   :  { %v3047_v35 = vpop.permute.xlu1 %3046 }
 0x700   :  { %v3053_v20 = vmul.f32 %v3047_v35, %v9918_v3  ;;  %v3241_v35 = vld [vmem:[#allocation4 + $0x50] sm:$0xff] }
 0x702   :  { %3057 = vrot.lane.b32.xlu0 %v3053_v20, %s11726_s16  ;;  %v3242_v20 = vld [vmem:[#allocation4 + $0x58] sm:$0xff] }
 0x70a   :  { %3070 = vperm.xlu0 %7396, %v9885_v47   ;;  %v10058_v30 = vpop.permute.xlu2 %3039 }
 0x712   :  { %7397 = vset.pattern.permute.xlu0 %v11698_v9  ;;  %v3051_v14 = vpop.permute.xlu2 %3050 }
 0x713   :  { %v3054_v8 = vmul.f32 %v3051_v14, %v9926_v31  ;;  %2798 = vperm.xlu0 %7397, %v9885_v47   ;;  %v10094_v14 = vpack.i.bf16 %v3242_v20, %v3241_v35 }
 0x715   :  { %3059 = vrot.lane.b32.xlu1 %v3054_v8, %s11726_s16 }
 0x71b   :  { %v3067_v28 = vpop.permute.xlu2 %3066 }
 0x71c   :  { %v3073_v13 = vmul.f32 %v3067_v28, %v9918_v3 }
 0x71e   :  { %3077 = vrot.lane.b32.xlu1 %v3073_v13, %s11716_s17 }
 0x726   :  { %3086 = vperm.xlu1 %7398, %v9893_v27  }
 0x72e   :  { %8347 = vset.pattern.permute.xlu1 %v8555_v11 }
 0x774   :  { %v10068_v40 = vpop.permute.xlu0 %3057 }
 0x77c   :  { %v3071_v59 = vpop.permute.xlu0 %3070 }
 0x77d   :  { %v3074_v0 = vmul.f32 %v3071_v59, %v9926_v31 }
 0x77f   :  { %3079 = vrot.lane.b32.xlu2 %v3074_v0, %s11716_s17 }
 0x785   :  { %v2799_v54 = vpop.permute.xlu0 %2798 }
 0x786   :  { %v2802_v20 = vmul.f32 %v2799_v54, %v9926_v31 }
 0x787   :  { %v10072_v45 = vpop.permute.xlu1 %3059  ;;  %3090 = vperm.xlu2 %7399, %v9885_v47   ;;  %v3239_v47 = vld [vmem:[#allocation4 + $0x40] sm:$0xff] }
 0x788   :  { %v10087_v12 = vpack.i.bf16 %v3240_v32, %v3239_v47 }
 0x78f   :  { %7400 = vset.pattern.permute.xlu2 %v11698_v9 }
 0x790   :  { %v10079_v27 = vpop.permute.xlu1 %3077  ;;  %3111 = vperm.xlu2 %7400, %v3107_v22  }
 0x798   :  { %v3087_v17 = vpop.permute.xlu1 %3086  ;;  %7402 = vrot.lane.b32.xlu2 %v10081_v60, %s8490_s0 }
 0x799   :  { %v3093_v19 = vmul.f32 %v3087_v17, %v9918_v3 }
 0x79b   :  { %3097 = vrot.lane.b32.xlu0 %v3093_v19, %s11738_s21 }
 0x7a0   :  { %7407 = vrot.lane.b32.xlu2 %v10087_v12, %s8490_s0 }
 0x7a3   :  { %3116 = vperm.xlu0 %7397, %v3108_v23  }
 0x7a8   :  { %7417 = vrot.lane.b32.xlu2 %v10081_v60, %s8491_s5 }
 0x7ab   :  { %7412 = vrot.lane.b32.xlu0 %v10094_v14, %s8490_s0 }
 0x7b0   :  { %7427 = vrot.lane.b32.xlu2 %v10094_v14, %s8491_s5 }
 0x7b3   :  { %7422 = vrot.lane.b32.xlu0 %v10087_v12, %s8491_s5 }
 0x7b8   :  { %7437 = vrot.lane.b32.xlu2 %v10087_v12, %s8492_s27 }
 0x7bb   :  { %7432 = vrot.lane.b32.xlu0 %v10081_v60, %s8492_s27 }
 0x7c0   :  { %7447 = vrot.lane.b32.xlu2 %v10081_v60, %s8493_s28 }
 0x7c3   :  { %7442 = vrot.lane.b32.xlu0 %v10094_v14, %s8492_s27 }
 0x7c8   :  { %7462 = vrot.lane.b32.xlu2 %v10081_v60, %s8494_s29 }
 0x7cb   :  { %7457 = vrot.lane.b32.xlu0 %v10094_v14, %s8493_s28 }
 0x7d0   :  { %7472 = vrot.lane.b32.xlu2 %v10094_v14, %s8494_s29 }
 0x7d3   :  { %7467 = vrot.lane.b32.xlu0 %v10087_v12, %s8494_s29 }
 0x7d8   :  { %7482 = vrot.lane.b32.xlu2 %v10087_v12, %s8495_s30 }
 0x7d9   :  { %v10122_v8 = vpop.permute.xlu2 %3079 }
 0x7db   :  { %7477 = vrot.lane.b32.xlu0 %v10081_v60, %s8495_s30 }
 0x7e0   :  { %7497 = vrot.lane.b32.xlu2 %v10087_v12, %s11736_s10 }
 0x7e1   :  { %v3091_v28 = vpop.permute.xlu2 %3090 }
 0x7e2   :  { %v3094_v13 = vmul.f32 %v3091_v28, %v9926_v31  ;;  %v2824_v28 = vadd.f32 %v9968_v39, %v2802_v20 }
 0x7e3   :  { %7492 = vrot.lane.b32.xlu0 %v10081_v60, %s11736_s10 }
 0x7e4   :  { %3099 = vrot.lane.b32.xlu1 %v3094_v13, %s11738_s21  ;;  %v2844_v9 = vadd.f32 %v9980_v16, %v2824_v28 }
 0x7e6   :  { %v2864_v31 = vadd.f32 %v9971_v56, %v2844_v9  ;;  %v2801_v56 = vmul.f32 %v9921_v10, %v9918_v3 }
 0x7e8   :  { %7512 = vrot.lane.b32.xlu2 %v10087_v12, %s8497_s11  ;;  %v2884_v54 = vadd.f32 %v9984_v36, %v2864_v31  ;;  %v2823_v28 = vadd.f32 %v9953_v53, %v2801_v56 }
 0x7ea   :  { %v10134_v59 = vpop.permute.xlu2 %3111  ;;  %v2904_v20 = vadd.f32 %v9974_v1, %v2884_v54  ;;  %v2843_v54 = vadd.f32 %v9955_v57, %v2823_v28 }
 0x7eb   :  { %7507 = vrot.lane.b32.xlu0 %v10081_v60, %s8497_s11 }
 0x7ec   :  { %7452 = vrot.lane.b32.xlu1 %v10087_v12, %s8493_s28  ;;  %v2924_v36 = vadd.f32 %v9986_v50, %v2904_v20  ;;  %v2863_v10 = vadd.f32 %v9958_v41, %v2843_v54 }
 0x7ee   :  { %v2944_v1 = vadd.f32 %v10001_v62, %v2924_v36  ;;  %v2883_v53 = vadd.f32 %v9960_v49, %v2863_v10 }
 0x7f0   :  { %7527 = vrot.lane.b32.xlu2 %v10087_v12, %s11734_s12  ;;  %v2964_v50 = vadd.f32 %v10010_v38, %v2944_v1  ;;  %v2903_v57 = vadd.f32 %v9962_v24, %v2883_v53 }
 0x7f2   :  { %v10142_v0 = vpop.permute.xlu2 %7402  ;;  %v2984_v62 = vadd.f32 %v10022_v42, %v2964_v50  ;;  %v2923_v38 = vadd.f32 %v9964_v61, %v2903_v57 }
 0x7f3   :  { %7522 = vrot.lane.b32.xlu0 %v10081_v60, %s11734_s12 }
 0x7f4   :  { %7487 = vrot.lane.b32.xlu1 %v10094_v14, %s8495_s30  ;;  %v3004_v56 = vadd.f32 %v10034_v46, %v2984_v62  ;;  %v2943_v49 = vadd.f32 %v9994_v26, %v2923_v38 }
 0x7f6   :  { %v2963_v42 = vadd.f32 %v10003_v43, %v2943_v49  ;;  %v3024_v36 = vadd.f32 %v10049_v51, %v3004_v56 }
 0x7f8   :  { %7542 = vrot.lane.b32.xlu2 %v10087_v12, %s11730_s13  ;;  %v2983_v24 = vadd.f32 %v10018_v48, %v2963_v42  ;;  %v3044_v28 = vadd.f32 %v10058_v30, %v3024_v36 }
 0x7fa   :  { %v10150_v22 = vpop.permute.xlu2 %7407  ;;  %v3003_v46 = vadd.f32 %v10026_v2, %v2983_v24  ;;  %v3064_v51 = vadd.f32 %v10072_v45, %v3044_v28  ;;  %v3105_v45 = vld [vmem:[#allocation9] sm:$0xff] }
 0x7fb   :  { %7537 = vrot.lane.b32.xlu0 %v10081_v60, %s11730_s13 }
 0x7fc   :  { %7502 = vrot.lane.b32.xlu1 %v10094_v14, %s11736_s10  ;;  %v3023_v26 = vadd.f32 %v10042_v44, %v3003_v46  ;;  %v3084_v2 = vadd.f32 %v10122_v8, %v3064_v51  ;;  %v3106_v8 = vld [vmem:[#allocation9 + $0x8] sm:$0xff]  ;;  %s8572_s10 = smov [#allocation10]  }
 0x7fe   :  { %v3043_v43 = vadd.f32 %v10051_v34, %v3023_v26 }
 0x800   :  { %7557 = vrot.lane.b32.xlu2 %v10087_v12, %s11732_s14  ;;  %v3063_v48 = vadd.f32 %v10068_v40, %v3043_v43 }
 0x802   :  { %v10158_v33 = vpop.permute.xlu2 %7417  ;;  %v3083_v10 = vadd.f32 %v10079_v27, %v3063_v48 }
 0x803   :  { %7552 = vrot.lane.b32.xlu0 %v10081_v60, %s11732_s14 }
 0x804   :  { %7517 = vrot.lane.b32.xlu1 %v10094_v14, %s8497_s11 }
 0x808   :  { %7572 = vrot.lane.b32.xlu2 %v10087_v12, %s11728_s15 }
 0x80a   :  { %v10166_v17 = vpop.permute.xlu2 %7427 }
 0x80b   :  { %7567 = vrot.lane.b32.xlu0 %v10081_v60, %s11728_s15 }
 0x80c   :  { %7532 = vrot.lane.b32.xlu1 %v10094_v14, %s11734_s12  ;;  %s11950_s12 = smov 16  }
 0x80d   :  { %v10172_v19 = vpop.permute.xlu0 %3097 }
 0x80e   :  { %v3103_v34 = vadd.f32 %v10172_v19, %v3083_v10 }
 0x810   :  { %7587 = vrot.lane.b32.xlu2 %v10087_v12, %s11726_s16 }
 0x812   :  { %v10178_v47 = vpop.permute.xlu2 %7437 }
 0x813   :  { %7582 = vrot.lane.b32.xlu0 %v10081_v60, %s11726_s16 }
 0x814   :  { %7547 = vrot.lane.b32.xlu1 %v10094_v14, %s11730_s13  ;;  %s11826_s13 = smov 67  }
 0x815   :  { %v10182_v32 = vpop.permute.xlu0 %3116 }
 0x818   :  { %7602 = vrot.lane.b32.xlu2 %v10087_v12, %s11716_s17 }
 0x81a   :  { %v10192_v35 = vpop.permute.xlu2 %7447 }
 0x81b   :  { %7597 = vrot.lane.b32.xlu0 %v10081_v60, %s11716_s17  ;;  %v7450_v7 = vunpack.i.h.bf16 %v10192_v35  ;;  %v7449_v5 = vunpack.i.l.bf16 %v10192_v35 }
 0x81c   :  { %7562 = vrot.lane.b32.xlu1 %v10094_v14, %s11732_s14  ;;  %s11850_s14 = smov 68  }
 0x81d   :  { %v10190_v23 = vpop.permute.xlu0 %7412 }
 0x820   :  { %7617 = vrot.lane.b32.xlu2 %v10087_v12, %s11738_s21 }
 0x822   :  { %v10205_v58 = vpop.permute.xlu2 %7462 }
 0x823   :  { %7612 = vrot.lane.b32.xlu0 %v10081_v60, %s11738_s21  ;;  %v7464_v10 = vunpack.i.l.bf16 %v10205_v58 }
 0x824   :  { %7577 = vrot.lane.b32.xlu1 %v10094_v14, %s11728_s15  ;;  %s11784_s15 = smov 65  }
 0x825   :  { %v10202_v13 = vpop.permute.xlu0 %7422 }
 0x828   :  { %7632 = vrot.lane.b32.xlu2 %v10087_v12, %s11739_s23 }
 0x82a   :  { %v10219_v16 = vpop.permute.xlu2 %7472 }
 0x82b   :  { %7627 = vrot.lane.b32.xlu0 %v10081_v60, %s11739_s23 }
 0x82c   :  { %7592 = vrot.lane.b32.xlu1 %v10094_v14, %s11726_s16  ;;  %s11765_s16 = smov 88  }
 0x82d   :  { %v10214_v39 = vpop.permute.xlu0 %7432 }
 0x830   :  { %7647 = vrot.lane.b32.xlu2 %v10087_v12, %s11740_s24 }
 0x832   :  { %v10237_v31 = vpop.permute.xlu2 %7482 }
 0x833   :  { %7642 = vrot.lane.b32.xlu0 %v10081_v60, %s11740_s24 }
 0x834   :  { %7607 = vrot.lane.b32.xlu1 %v10094_v14, %s11716_s17  ;;  %s11762_s17 = smov 70  }
 0x835   :  { %v10226_v9 = vpop.permute.xlu0 %7442 }
 0x838   :  { %7662 = vrot.lane.b32.xlu2 %v10087_v12, %s11741_s25 }
 0x83a   :  { %v10257_v41 = vpop.permute.xlu2 %7497 }
 0x83b   :  { %7657 = vrot.lane.b32.xlu0 %v10081_v60, %s11741_s25 }
 0x83c   :  { %7622 = vrot.lane.b32.xlu1 %v10094_v14, %s11738_s21 }
 0x83d   :  { %v10242_v3 = vpop.permute.xlu0 %7457 }
 0x840   :  { %7677 = vrot.lane.b32.xlu2 %v10087_v12, %s11742_s26 }
 0x842   :  { %v10275_v1 = vpop.permute.xlu2 %7512 }
 0x843   :  { %7672 = vrot.lane.b32.xlu0 %v10081_v60, %s11742_s26 }
 0x844   :  { %7637 = vrot.lane.b32.xlu1 %v10094_v14, %s11739_s23  ;;  %s11747_s23 = smov 104  }
 0x845   :  { %v10255_v20 = vpop.permute.xlu0 %7467 }
 0x848   :  { %7692 = vrot.lane.b32.xlu2 %v10087_v12, %s11743_s4 }
 0x84a   :  { %v10294_v50 = vpop.permute.xlu2 %7527 }
 0x84b   :  { %7687 = vrot.lane.b32.xlu0 %v10081_v60, %s11743_s4  ;;  %v7529_v15 = vunpack.i.l.bf16 %v10294_v50 }
 0x84c   :  { %7652 = vrot.lane.b32.xlu1 %v10094_v14, %s11740_s24  ;;  %s11748_s24 = smov 103  }
 0x84d   :  { %v10271_v61 = vpop.permute.xlu0 %7477 }
 0x850   :  { %7707 = vrot.lane.b32.xlu2 %v10087_v12, %s11744_s20 }
 0x852   :  { %v10309_v19 = vpop.permute.xlu2 %7542 }
 0x853   :  { %7702 = vrot.lane.b32.xlu0 %v10081_v60, %s11744_s20 }
 0x854   :  { %7667 = vrot.lane.b32.xlu1 %v10094_v14, %s11741_s25  ;;  %s11749_s25 = smov 102  }
 0x855   :  { %v10288_v30 = vpop.permute.xlu0 %7492 }
 0x856   :  { %v3100_v54 = vpop.permute.xlu1 %3099 }
 0x857   :  { %v3104_v44 = vadd.f32 %v3100_v54, %v3084_v2  ;;  %v7465_v54 = vunpack.i.h.bf16 %v10205_v58 }
 0x858   :  { %7722 = vrot.lane.b32.xlu2 %v10087_v12, %s11745_s18 }
 0x859   :  { %3140 = vmatpush.msrb.mxu1 %v3104_v44  ;;  %v7460_v44 = vunpack.i.h.bf16 %v10242_v3  ;;  %v3393_v52 = vsel %vm249_vm0, %v7464_v10, %v7465_v54  ;;  %v7445_v54 = vunpack.i.h.bf16 %v10226_v9  ;;  %v3153_v10 = vld [vmem:[%s11547_s7 + $0x10] sm:$0xff] }
 0x85a   :  { %v10326_v38 = vpop.permute.xlu2 %7557 }
 0x85b   :  { %7717 = vrot.lane.b32.xlu0 %v10081_v60, %s11745_s18  ;;  %3141 = vmatpush.msrb.mxu1 %v3103_v34  ;;  %v7459_v34 = vunpack.i.l.bf16 %v10242_v3  ;;  %v3154_v3 = vld [vmem:[%s11547_s7 + $0x18] sm:$0xff] }
 0x85c   :  { %7682 = vrot.lane.b32.xlu1 %v10094_v14, %s11742_s26  ;;  %6320 = vmatmul.msk.f32.vlgmr.msrb.gmra.mxu1 %vm3119_vm12, %v3105_v45  ;;  %s11750_s26 = smov 101  }
 0x85d   :  { %v10301_v40 = vpop.permute.xlu0 %7507  ;;  %5544 = vmatpush.msra.mxu1 %v3393_v52  ;;  %v3362_v21 = vsel %vm215_vm1, %v7459_v34, %v7460_v44  ;;  %3174 = vmatpush.msrb.mxu2 %v3154_v3  ;;  %v7444_v52 = vunpack.i.l.bf16 %v10226_v9  ;;  %v7439_v44 = vunpack.i.l.bf16 %v10178_v47  ;;  %v7545_v34 = vunpack.i.h.bf16 %v10309_v19 }
 0x85e   :  { %v10303_v27 = vpop.permute.xlu1 %7452  ;;  %v10420_v9 = vpack.i.bf16 %v4228_v25, %v10403_v55  ;;  %v7435_v25 = vunpack.i.h.bf16 %v10214_v39 }
 0x85f   :  { %v7454_v58 = vunpack.i.l.bf16 %v10303_v27  ;;  %5545 = vmatpush.msra.mxu1 %v3362_v21  ;;  %v7544_v21 = vunpack.i.l.bf16 %v10309_v19  ;;  %3175 = vmatpush.msrb.mxu2 %v3153_v10  ;;  %v7434_v10 = vunpack.i.l.bf16 %v10214_v39 }
 0x860   :  { %7737 = vrot.lane.b32.xlu2 %v10087_v12, %s11746_s19 }
 0x862   :  { %v10340_v36 = vpop.permute.xlu2 %7572 }
 0x863   :  { %7732 = vrot.lane.b32.xlu0 %v10081_v60, %s11746_s19 }
 0x864   :  { %7697 = vrot.lane.b32.xlu1 %v10094_v14, %s11743_s4  ;;  %6321 = vmatmul.msk.f32.gmra.mxu1 %vm3119_vm12, %v3106_v8  ;;  %s11751_s4 = smov 100  }
 0x865   :  { %v10314_v53 = vpop.permute.xlu0 %7522 }
 0x866   :  { %v10316_v62 = vpop.permute.xlu1 %7487 }
 0x868   :  { %7752 = vrot.lane.b32.xlu2 %v10087_v12, %s11747_s23 }
 0x86a   :  { %v10354_v28 = vpop.permute.xlu2 %7587 }
 0x86b   :  { %7747 = vrot.lane.b32.xlu0 %v10081_v60, %s11747_s23 }
 0x86c   :  { %7712 = vrot.lane.b32.xlu1 %v10094_v14, %s11744_s20  ;;  %s11752_s20 = smov 99  }
 0x86d   :  { %v10324_v57 = vpop.permute.xlu0 %7537 }
 0x86e   :  { %v10328_v56 = vpop.permute.xlu1 %7502  ;;  %v7539_v19 = vunpack.i.l.bf16 %v10324_v57 }
 0x870   :  { %7767 = vrot.lane.b32.xlu2 %v10087_v12, %s11748_s24 }
 0x872   :  { %v10368_v51 = vpop.permute.xlu2 %7602 }
 0x873   :  { %7762 = vrot.lane.b32.xlu0 %v10081_v60, %s11748_s24 }
 0x874   :  { %7727 = vrot.lane.b32.xlu1 %v10094_v14, %s11745_s18  ;;  %s11753_s18 = smov 97  }
 0x875   :  { %v10336_v49 = vpop.permute.xlu0 %7552 }
 0x876   :  { %v10338_v42 = vpop.permute.xlu1 %7517 }
 0x878   :  { %7782 = vrot.lane.b32.xlu2 %v10087_v12, %s11749_s25 }
 0x87a   :  { %v10388_v8 = vpop.permute.xlu2 %7617 }
 0x87b   :  { %7777 = vrot.lane.b32.xlu0 %v10081_v60, %s11749_s25 }
 0x87c   :  { %7742 = vrot.lane.b32.xlu1 %v10094_v14, %s11746_s19  ;;  %s11758_s19 = smov 86  }
 0x87d   :  { %v10348_v24 = vpop.permute.xlu0 %7567 }
 0x87e   :  { %v10350_v46 = vpop.permute.xlu1 %7532 }
 0x880   :  { %7797 = vrot.lane.b32.xlu2 %v10087_v12, %s11750_s26 }
 0x882   :  { %v10440_v37 = vpop.permute.xlu2 %7632 }
 0x883   :  { %7792 = vrot.lane.b32.xlu0 %v10081_v60, %s11750_s26 }
 0x884   :  { %7757 = vrot.lane.b32.xlu1 %v10094_v14, %s11747_s23  ;;  %s11760_s23 = smov 87  }
 0x885   :  { %v10360_v26 = vpop.permute.xlu0 %7582 }
 0x886   :  { %v10362_v43 = vpop.permute.xlu1 %7547 }
 0x888   :  { %7812 = vrot.lane.b32.xlu2 %v10087_v12, %s11751_s4 }
 0x88b   :  { %7807 = vrot.lane.b32.xlu0 %v10081_v60, %s11751_s4 }
 0x88c   :  { %7772 = vrot.lane.b32.xlu1 %v10094_v14, %s11748_s24  ;;  %s11754_s24 = smov 98  }
 0x88d   :  { %v10372_v48 = vpop.permute.xlu0 %7597 }
 0x88e   :  { %v10374_v2 = vpop.permute.xlu1 %7562 }
 0x890   :  { %7827 = vrot.lane.b32.xlu2 %v10087_v12, %s11752_s20  ;;  %v7455_v12 = vunpack.i.h.bf16 %v10303_v27  ;;  %v7440_v27 = vunpack.i.h.bf16 %v10178_v47  ;;  %v3360_v47 = vsel %vm215_vm1, %v7449_v5, %v7450_v7  ;;  %v7535_v5 = vunpack.i.h.bf16 %v10350_v46 }
 0x891   :  { %v7534_v7 = vunpack.i.l.bf16 %v10350_v46  ;;  %v7420_v46 = vunpack.i.h.bf16 %v10158_v33 }
 0x892   :  { %v3361_v35 = vsel %vm215_vm1, %v7454_v58, %v7455_v12  ;;  %v7540_v12 = vunpack.i.h.bf16 %v10324_v57  ;;  %v3559_v57 = vsel %vm419_vm5, %v7544_v21, %v7545_v34  ;;  %v3328_v39 = vsel %vm181_vm2, %v7439_v44, %v7440_v27 }
 0x893   :  { %7822 = vrot.lane.b32.xlu0 %v10081_v60, %s11752_s20  ;;  %5546 = vmatpush.msra.mxu1 %v3361_v35  ;;  %v3329_v35 = vsel %vm181_vm2, %v7444_v52, %v7445_v54  ;;  %v4395_v54 = vld [vmem:[#allocation4 + $0x48] sm:$0xff]  ;;  %v7530_v52 = vunpack.i.h.bf16 %v10294_v50  ;;  %v7419_v34 = vunpack.i.l.bf16 %v10158_v33  ;;  %v7425_v27 = vunpack.i.h.bf16 %v10202_v13  ;;  %v4198_v33 = vld [vmem:[#allocation4 + $0x50] sm:$0xff] }
 0x894   :  { %7787 = vrot.lane.b32.xlu1 %v10094_v14, %s11749_s25  ;;  %v7424_v44 = vunpack.i.l.bf16 %v10202_v13  ;;  %s11755_s25 = smov 91   ;;  %v7525_v21 = vunpack.i.h.bf16 %v10314_v53  ;;  %v10465_v50 = vpack.i.bf16 %v4395_v54, %v10448_v63  ;;  %v3527_v13 = vsel %vm385_vm6, %v7534_v7, %v7535_v5 }
 0x895   :  { %v10386_v45 = vpop.permute.xlu0 %7612  ;;  %5547 = vmatpush.msra.mxu1 %v3360_v47  ;;  %v7429_v47 = vunpack.i.l.bf16 %v10166_v17  ;;  %v7414_v54 = vunpack.i.l.bf16 %v10190_v23  ;;  %v7515_v7 = vunpack.i.h.bf16 %v10275_v1  ;;  %vm3155_vm1 = vcmask 261120  }
 0x896   :  { %v10390_v6 = vpop.permute.xlu1 %7577  ;;  %v3295_v5 = vsel %vm147_vm3, %v7424_v44, %v7425_v27  ;;  %v7509_v27 = vunpack.i.l.bf16 %v10301_v40  ;;  %v10491_v44 = vpop.permute.xlu2 %7647 }
 0x897   :  { %5548 = vmatpush.msra.mxu1 %v3329_v35  ;;  %v7524_v35 = vunpack.i.l.bf16 %v10314_v53  ;;  %v7519_v53 = vunpack.i.l.bf16 %v10338_v42 }
 0x898   :  { %7842 = vrot.lane.b32.xlu2 %v10094_v14, %s11753_s18 }
 0x899   :  { %5549 = vmatpush.msra.mxu1 %v3328_v39  ;;  %v7415_v39 = vunpack.i.h.bf16 %v10190_v23  ;;  %v7409_v23 = vunpack.i.l.bf16 %v10150_v22 }
 0x89b   :  { %7837 = vrot.lane.b32.xlu0 %v10081_v60, %s11754_s24  ;;  %v3152_v60 = vld [vmem:[%s11547_s7 + $0x8] sm:$0xff] }
 0x89c   :  { %7802 = vrot.lane.b32.xlu1 %v10094_v14, %s11750_s26  ;;  %3176 = vmatpush.msrb.mxu2 %v3152_v60  ;;  %v7430_v60 = vunpack.i.h.bf16 %v10166_v17  ;;  %v3327_v17 = vsel %vm181_vm2, %v7434_v10, %v7435_v25  ;;  %v7520_v10 = vunpack.i.h.bf16 %v10338_v42  ;;  %v3525_v42 = vsel %vm385_vm6, %v7524_v35, %v7525_v21  ;;  %s11761_s26 = smov 75  }
 0x89d   :  { %v10425_v3 = vpop.permute.xlu0 %7627  ;;  %5550 = vmatpush.msra.mxu1 %v3327_v17  ;;  %v7405_v17 = vunpack.i.h.bf16 %v10142_v0  ;;  %v7404_v21 = vunpack.i.l.bf16 %v10142_v0 }
 0x89e   :  { %v10430_v58 = vpop.permute.xlu1 %7592  ;;  %3177 = vmatpush.msrb.mxu2 %v3151_v18  ;;  %v3558_v18 = vsel %vm419_vm5, %v7539_v19, %v7540_v12  ;;  %v4199_v12 = vld [vmem:[#allocation4 + $0x58] sm:$0xff]  ;;  %v3296_v25 = vsel %vm147_vm3, %v7429_v47, %v7430_v60  ;;  %v7514_v60 = vunpack.i.l.bf16 %v10275_v1  ;;  %v7410_v47 = vunpack.i.h.bf16 %v10150_v22 }
 0x89f   :  { %5551 = vmatpush.msra.mxu1 %v3296_v25  ;;  %v3494_v1 = vsel %vm351_vm7, %v7519_v53, %v7520_v10  ;;  %v3263_v22 = vsel %vm113_vm4, %v7414_v54, %v7415_v39  ;;  %v3261_v10 = vsel %vm113_vm4, %v7404_v21, %v7405_v17  ;;  %v7495_v53 = vunpack.i.h.bf16 %v10288_v30 }
 0x8a0   :  { %7857 = vrot.lane.b32.xlu2 %v10420_v9, %s11753_s18  ;;  %5567 = vmatpush.msra.mxu2 %v3559_v57  ;;  %v3262_v0 = vsel %vm113_vm4, %v7409_v23, %v7410_v47  ;;  %v7489_v54 = vunpack.i.l.bf16 %v10316_v62  ;;  %vm11770_vm4 = vcmask 891904  }
 0x8a1   :  { %5552 = vmatpush.msra.mxu1 %v3295_v5 }
 0x8a2   :  { %5568 = vmatpush.msra.mxu2 %v3558_v18  ;;  %v10478_v18 = vpack.i.bf16 %v4199_v12, %v4198_v33  ;;  %v7500_v12 = vunpack.i.h.bf16 %v10257_v41 }
 0x8a3   :  { %7852 = vrot.lane.b32.xlu0 %v10420_v9, %s11755_s25 }
 0x8a4   :  { %7817 = vrot.lane.b32.xlu1 %v10094_v14, %s11751_s4  ;;  %5569 = vmatpush.msra.mxu2 %v3527_v13  ;;  %v3526_v14 = vsel %vm385_vm6, %v7529_v15, %v7530_v52  ;;  %s11756_s4 = smov 92   ;;  %v3294_v15 = vsel %vm147_vm3, %v7419_v34, %v7420_v46  ;;  %v7510_v52 = vunpack.i.h.bf16 %v10301_v40  ;;  %v7505_v46 = vunpack.i.h.bf16 %v10328_v56  ;;  %vm11771_vm6 = vmmov %vm11770_vm4 }
 0x8a5   :  { %v10468_v19 = vpop.permute.xlu0 %7642  ;;  %5553 = vmatpush.msra.mxu1 %v3294_v15  ;;  %v7504_v34 = vunpack.i.l.bf16 %v10328_v56  ;;  %v3493_v40 = vsel %vm351_vm7, %v7514_v60, %v7515_v7  ;;  %v7499_v13 = vunpack.i.l.bf16 %v10257_v41  ;;  %v7490_v41 = vunpack.i.h.bf16 %v10316_v62  ;;  %v10523_v7 = vpop.permute.xlu2 %7662 }
 0x8a6   :  { %v10473_v57 = vpop.permute.xlu1 %7607  ;;  %5570 = vmatpush.msra.mxu2 %v3526_v14  ;;  %v3492_v56 = vsel %vm351_vm7, %v7509_v27, %v7510_v52  ;;  %v7494_v14 = vunpack.i.l.bf16 %v10288_v30  ;;  %vm11773_vm7 = vmmov %vm11770_vm4 }
 0x8a7   :  { %5554 = vmatpush.msra.mxu1 %v3263_v22  ;;  %v3461_v39 = vsel %vm317_vm8, %v7504_v34, %v7505_v46  ;;  %v3460_v5 = vsel %vm317_vm8, %v7499_v13, %v7500_v12  ;;  %v3428_v62 = vsel %vm283_vm10, %v7489_v54, %v7490_v41  ;;  %v7485_v46 = vunpack.i.h.bf16 %v10237_v31 }
 0x8a8   :  { %7872 = vrot.lane.b32.xlu2 %v10465_v50, %s11756_s4  ;;  %5571 = vmatpush.msra.mxu2 %v3525_v42  ;;  %v3459_v30 = vsel %vm317_vm8, %v7494_v14, %v7495_v53  ;;  %v7484_v34 = vunpack.i.l.bf16 %v10237_v31  ;;  %v7474_v31 = vunpack.i.l.bf16 %v10219_v16  ;;  %v7470_v14 = vunpack.i.h.bf16 %v10255_v20 }
 0x8a9   :  { %5555 = vmatpush.msra.mxu1 %v3262_v0  ;;  %v7479_v0 = vunpack.i.l.bf16 %v10271_v61  ;;  %vm11774_vm8 = vcmask 900096  }
 0x8aa   :  { %5572 = vmatpush.msra.mxu2 %v3494_v1  ;;  %v3427_v53 = vsel %vm283_vm10, %v7484_v34, %v7485_v46 }
 0x8ab   :  { %7867 = vrot.lane.b32.xlu0 %v10478_v18, %s11754_s24  ;;  %5556 = vmatpush.msra.mxu1 %v3261_v10 }
 0x8ac   :  { %7832 = vrot.lane.b32.xlu1 %v10478_v18, %s11752_s20  ;;  %5573 = vmatpush.msra.mxu2 %v3493_v40  ;;  %s11757_s20 = smov 93   ;;  %v7480_v40 = vunpack.i.h.bf16 %v10271_v61 }
 0x8ad   :  { %v10504_v35 = vpop.permute.xlu0 %7657  ;;  %5557 = vmatpush.msra.mxu1 %v4198_v33 }
 0x8ae   :  { %v10509_v25 = vpop.permute.xlu1 %7622  ;;  %5574 = vmatpush.msra.mxu2 %v3492_v56  ;;  %v3426_v61 = vsel %vm283_vm10, %v7479_v0, %v7480_v40  ;;  %vm11776_vm10 = vmmov %vm11774_vm8 }
 0x8af   :  { %5558 = vmatpush.msra.mxu1 %v10448_v63  ;;  %v10541_v63 = vpop.permute.xlu2 %7677 }
 0x8b0   :  { %7887 = vrot.lane.b32.xlu2 %v10478_v18, %s11757_s20  ;;  %5575 = vmatpush.msra.mxu2 %v3461_v39  ;;  %v7469_v39 = vunpack.i.l.bf16 %v10255_v20 }
 0x8b1   :  { %5559 = vmatpush.msra.mxu1 %v10403_v55 }
 0x8b2   :  { %5576 = vmatpush.msra.mxu2 %v3460_v5 }
 0x8b3   :  { %7882 = vrot.lane.b32.xlu0 %v10420_v9, %s11756_s4 }
 0x8b4   :  { %7847 = vrot.lane.b32.xlu1 %v10465_v50, %s11753_s18  ;;  %5577 = vmatpush.msra.mxu2 %v3459_v30  ;;  %s11759_s18 = smov 94   ;;  %v3394_v30 = vsel %vm249_vm0, %v7469_v39, %v7470_v14  ;;  %v7680_v39 = vunpack.i.h.bf16 %v10541_v63 }
 0x8b5   :  { %v10532_v42 = vpop.permute.xlu0 %7672 }
 0x8b6   :  { %v10529_v60 = vpop.permute.xlu1 %7637  ;;  %5578 = vmatpush.msra.mxu2 %v3428_v62 }
 0x8b7   :  { %v10555_v47 = vpop.permute.xlu2 %7692 }
 0x8b8   :  { %7902 = vrot.lane.b32.xlu2 %v10420_v9, %s11758_s19  ;;  %5579 = vmatpush.msra.mxu2 %v3427_v53  ;;  %v7695_v40 = vunpack.i.h.bf16 %v10555_v47  ;;  %v7694_v0 = vunpack.i.l.bf16 %v10555_v47 }
 0x8ba   :  { %5580 = vmatpush.msra.mxu2 %v3426_v61 }
 0x8bb   :  { %7897 = vrot.lane.b32.xlu0 %v10465_v50, %s11757_s20 }
 0x8bc   :  { %7862 = vrot.lane.b32.xlu1 %v10478_v18, %s11756_s4  ;;  %s11764_s4 = smov 81  }
 0x8bd   :  { %v10547_v15 = vpop.permute.xlu0 %7687 }
 0x8be   :  { %v10543_v33 = vpop.permute.xlu1 %7652 }
 0x8bf   :  { %v10567_v27 = vpop.permute.xlu2 %7707 }
 0x8c0   :  { %7917 = vrot.lane.b32.xlu2 %v10478_v18, %s11759_s18 }
 0x8c3   :  { %7912 = vrot.lane.b32.xlu0 %v10478_v18, %s11760_s23 }
 0x8c4   :  { %7877 = vrot.lane.b32.xlu1 %v10465_v50, %s11754_s24  ;;  %s11763_s24 = smov 76  }
 0x8c5   :  { %v7703_v23 = vpop.permute.xlu0 %7702 }
 0x8c6   :  { %v10553_v55 = vpop.permute.xlu1 %7667  ;;  %v7704_v20 = vunpack.i.l.bf16 %v7703_v23 }
 0x8c7   :  { %v10584_v12 = vpop.permute.xlu2 %7722 }
 0x8c8   :  { %7932 = vrot.lane.b32.xlu2 %v10465_v50, %s11759_s18 }
 0x8cb   :  { %7927 = vrot.lane.b32.xlu0 %v10420_v9, %s11761_s26 }
 0x8cc   :  { %7892 = vrot.lane.b32.xlu1 %v10465_v50, %s11758_s19 }
 0x8cd   :  { %v10573_v1 = vpop.permute.xlu0 %7717 }
 0x8ce   :  { %v10563_v52 = vpop.permute.xlu1 %7682 }
 0x8cf   :  { %v10608_v62 = vpop.permute.xlu2 %7737  ;;  %v7685_v61 = vunpack.i.h.bf16 %v10563_v52  ;;  %v7684_v47 = vunpack.i.l.bf16 %v10563_v52  ;;  %v7675_v52 = vunpack.i.h.bf16 %v10532_v42 }
 0x8d0   :  { %7947 = vrot.lane.b32.xlu2 %v10465_v50, %s11762_s17 }
 0x8d3   :  { %7942 = vrot.lane.b32.xlu0 %v10478_v18, %s11763_s24 }
 0x8d4   :  { %7907 = vrot.lane.b32.xlu1 %v10420_v9, %s11757_s20  ;;  %s11766_s20 = smov 95  }
 0x8d5   :  { %v10593_v10 = vpop.permute.xlu0 %7732 }
 0x8d6   :  { %v7698_v17 = vpop.permute.xlu1 %7697 }
 0x8d7   :  { %v7700_v46 = vunpack.i.h.bf16 %v7698_v17  ;;  %v7699_v34 = vunpack.i.l.bf16 %v7698_v17  ;;  %v10629_v53 = vpop.permute.xlu2 %7752 }
 0x8d8   :  { %7962 = vrot.lane.b32.xlu2 %v10478_v18, %s11764_s4 }
 0x8d9   :  { %v3143_v21 = vpop.f32.mrf.mxu1 }
 0x8da   :  { %v3144_v22 = vadd.f32 %v3143_v21, %v10134_v59  ;;  %v7475_v59 = vunpack.i.h.bf16 %v10219_v16 }
 0x8db   :  { %7957 = vrot.lane.b32.xlu0 %v10478_v18, %s11765_s16 }
 0x8dc   :  { %v3149_v13 = vmax.f32 %v3144_v22, 0.0  ;;  %7922 = vrot.lane.b32.xlu1 %v10465_v50, %s11760_s23  ;;  %v3395_v16 = vsel %vm249_vm0, %v7474_v31, %v7475_v59  ;;  %v7689_v59 = vunpack.i.l.bf16 %v10547_v15  ;;  %vm11767_vm0 = vcmask 883712  }
 0x8dd   :  { %5581 = vmatpush.msra.mxu2 %v3395_v16  ;;  %v10615_v22 = vpop.permute.xlu0 %7747  ;;  %v3890_v17 = vsel %vm11767_vm0, %v7699_v34, %v7700_v46  ;;  %vm11768_vm2 = vmmov %vm11767_vm0  ;;  %v7674_v16 = vunpack.i.l.bf16 %v10532_v42  ;;  %v7665_v46 = vunpack.i.h.bf16 %v10523_v7  ;;  %v7664_v34 = vunpack.i.l.bf16 %v10523_v7 }
 0x8de   :  { %v10588_v56 = vpop.permute.xlu1 %7712  ;;  %6322 = vmatmul.msk.f32.vlgmr.msrb.gmra.mxu2 %vm3155_vm1, %v3149_v13  ;;  %v3889_v14 = vsel %vm11768_vm2, %v7694_v0, %v7695_v40  ;;  %vm11769_vm3 = vmmov %vm11767_vm0  ;;  %v7660_v40 = vunpack.i.h.bf16 %v10504_v35  ;;  %v7659_v0 = vunpack.i.l.bf16 %v10504_v35  ;;  %v7655_v7 = vunpack.i.h.bf16 %v10543_v33 }
 0x8df   :  { %5582 = vmatpush.msra.mxu2 %v3394_v30  ;;  %v7669_v30 = vunpack.i.l.bf16 %v10553_v55  ;;  %v3855_v42 = vsel %vm11773_vm7, %v7674_v16, %v7675_v52  ;;  %v7650_v35 = vunpack.i.h.bf16 %v10491_v44  ;;  %vm11777_vm0 = vmmov %vm11774_vm8  ;;  %vm11779_vm2 = vcmask 908288  }
 0x8e0   :  { %7977 = vrot.lane.b32.xlu2 %v10478_v18, %s11766_s20  ;;  %v7639_v52 = vunpack.i.l.bf16 %v10529_v60  ;;  %vm11785_vm7 = vcmask 834560  }
 0x8e1   :  { %v3146_v41 = vpop.f32.mrf.mxu1 }
 0x8e2   :  { %v3147_v54 = vadd.f32 %v3146_v41, %v10182_v32  ;;  %v7705_v32 = vunpack.i.h.bf16 %v7703_v23  ;;  %v7690_v23 = vunpack.i.h.bf16 %v10547_v15  ;;  %v7679_v15 = vunpack.i.l.bf16 %v10541_v63 }
 0x8e3   :  { %7972 = vrot.lane.b32.xlu0 %v10420_v9, %s11762_s17  ;;  %v7670_v63 = vunpack.i.h.bf16 %v10553_v55  ;;  %v10660_v55 = vpop.permute.xlu2 %7767 }
 0x8e4   :  { %v3150_v5 = vmax.f32 %v3147_v54, 0.0  ;;  %7937 = vrot.lane.b32.xlu1 %v10420_v9, %s11760_s23  ;;  %v3921_v13 = vsel %vm793_vm15, %v7704_v20, %v7705_v32  ;;  %v3888_v41 = vsel %vm11769_vm3, %v7689_v59, %v7690_v23  ;;  %v3856_v20 = vsel %vm11771_vm6, %v7679_v15, %v7680_v39  ;;  %s11775_s23 = smov 77   ;;  %vm11780_vm3 = vmmov %vm11779_vm2 }
 0x8e5   :  { %5613 = vmatpush.msra.mxu0 %v3921_v13  ;;  %v10639_v54 = vpop.permute.xlu0 %7762  ;;  %v3824_v13 = vsel %vm11774_vm8, %v7669_v30, %v7670_v63  ;;  %v7654_v23 = vunpack.i.l.bf16 %v10543_v33  ;;  %v3823_v59 = vsel %vm11776_vm10, %v7664_v34, %v7665_v46  ;;  %v7645_v39 = vunpack.i.h.bf16 %v10468_v19  ;;  %vm11786_vm8 = vmmov %vm11785_vm7 }
 0x8e6   :  { %v10610_v21 = vpop.permute.xlu1 %7727  ;;  %6323 = vmatmul.msk.f32.gmra.mxu2 %vm3155_vm1, %v3150_v5  ;;  %v3857_v5 = vsel %vm11770_vm4, %v7684_v47, %v7685_v61  ;;  %v7649_v61 = vunpack.i.l.bf16 %v10491_v44  ;;  %v7644_v15 = vunpack.i.l.bf16 %v10468_v19  ;;  %vm11782_vm4 = vmmov %vm11779_vm2  ;;  %vm11783_vm6 = vcmask 916480  }
 0x8e7   :  { %5614 = vmatpush.msra.mxu0 %v3890_v17  ;;  %v3791_v33 = vsel %vm11779_vm2, %v7654_v23, %v7655_v7  ;;  %vm11787_vm10 = vcmask 842752  }
 0x8e8   :  { %7992 = vrot.lane.b32.xlu2 %v10420_v9, %s11763_s24  ;;  %v3790_v44 = vsel %vm11780_vm3, %v7649_v61, %v7650_v35  ;;  %v3789_v19 = vsel %vm11782_vm4, %v7644_v15, %v7645_v39  ;;  %v7769_v35 = vunpack.i.l.bf16 %v10660_v55  ;;  %v7765_v61 = vunpack.i.h.bf16 %v10639_v54 }
 0x8e9   :  { %5615 = vmatpush.msra.mxu0 %v3889_v14  ;;  %v3822_v14 = vsel %vm11777_vm0, %v7659_v0, %v7660_v40  ;;  %vm11788_vm0 = vmmov %vm11787_vm10  ;;  %vm11791_vm3 = vcmask 850944  }
 0x8ea   :  { %vm11789_vm2 = vmmov %vm11788_vm0 }
 0x8eb   :  { %7987 = vrot.lane.b32.xlu0 %v10465_v50, %s11764_s4  ;;  %5616 = vmatpush.msra.mxu0 %v3888_v41  ;;  %v7640_v41 = vunpack.i.h.bf16 %v10529_v60  ;;  %v7783_v16 = vpop.permute.xlu2 %7782  ;;  %vm11792_vm4 = vmmov %vm11791_vm3 }
 0x8ec   :  { %7952 = vrot.lane.b32.xlu1 %v10420_v9, %s11759_s18  ;;  %s11772_s18 = smov 71   ;;  %v7785_v60 = vunpack.i.h.bf16 %v7783_v16 }
 0x8ed   :  { %5617 = vmatpush.msra.mxu0 %v3857_v5  ;;  %v7778_v17 = vpop.permute.xlu0 %7777  ;;  %v3758_v63 = vsel %vm11783_vm6, %v7639_v52, %v7640_v41  ;;  %v7755_v52 = vunpack.i.h.bf16 %v10629_v53  ;;  %vm11793_vm6 = vmmov %vm11791_vm3 }
 0x8ee   :  { %v10626_v31 = vpop.permute.xlu1 %7742  ;;  %v7779_v40 = vunpack.i.l.bf16 %v7778_v17 }
 0x8ef   :  { %5618 = vmatpush.msra.mxu0 %v3856_v20  ;;  %v7784_v20 = vunpack.i.l.bf16 %v7783_v16 }
 0x8f0   :  { %8007 = vrot.lane.b32.xlu2 %v10420_v9, %s11765_s16 }
 0x8f1   :  { %5619 = vmatpush.msra.mxu0 %v3855_v42  ;;  %v7780_v42 = vunpack.i.h.bf16 %v7778_v17  ;;  %v4087_v23 = vsel %vm11785_vm7, %v7784_v20, %v7785_v60  ;;  %v7744_v60 = vunpack.i.l.bf16 %v10626_v31  ;;  %vm11794_vm7 = vcmask 859136  }
 0x8f2   :  { %5636 = vmatpush.msrb.mxu1 %v4087_v23  ;;  %v7734_v23 = vunpack.i.l.bf16 %v10593_v10 }
 0x8f3   :  { %8002 = vrot.lane.b32.xlu0 %v10465_v50, %s11766_s20  ;;  %5620 = vmatpush.msra.mxu0 %v3824_v13  ;;  %v10697_v46 = vpop.permute.xlu2 %7797  ;;  %v4086_v17 = vsel %vm11786_vm8, %v7779_v40, %v7780_v42  ;;  %v7740_v40 = vunpack.i.h.bf16 %v10608_v62  ;;  %vm11796_vm8 = vmmov %vm11794_vm7 }
 0x8f4   :  { %7967 = vrot.lane.b32.xlu1 %v10465_v50, %s11763_s24  ;;  %s11778_s24 = smov 82   ;;  %5637 = vmatpush.msrb.mxu1 %v4086_v17 }
 0x8f5   :  { %5621 = vmatpush.msra.mxu0 %v3823_v59  ;;  %v10689_v30 = vpop.permute.xlu0 %7792  ;;  %v7770_v59 = vunpack.i.h.bf16 %v10660_v55 }
 0x8f6   :  { %v10650_v32 = vpop.permute.xlu1 %7757 }
 0x8f7   :  { %5622 = vmatpush.msra.mxu0 %v3822_v14  ;;  %v7759_v55 = vunpack.i.l.bf16 %v10650_v32  ;;  %v4054_v41 = vsel %vm11788_vm0, %v7769_v35, %v7770_v59  ;;  %v7729_v35 = vunpack.i.l.bf16 %v10610_v21  ;;  %vm11798_vm0 = vcmask 867328  }
 0x8f8   :  { %8022 = vrot.lane.b32.xlu2 %v10465_v50, %s11772_s18 }
 0x8f9   :  { %5623 = vmatpush.msra.mxu0 %v3791_v33  ;;  %v7760_v33 = vunpack.i.h.bf16 %v10650_v32  ;;  %v7750_v32 = vunpack.i.h.bf16 %v10615_v22 }
 0x8fb   :  { %8017 = vrot.lane.b32.xlu0 %v10478_v18, %s11775_s23  ;;  %5624 = vmatpush.msra.mxu0 %v3790_v44  ;;  %v10718_v15 = vpop.permute.xlu2 %7812 }
 0x8fc   :  { %7982 = vrot.lane.b32.xlu1 %v10465_v50, %s11765_s16  ;;  %s11781_s16 = smov 89  }
 0x8fd   :  { %5625 = vmatpush.msra.mxu0 %v3789_v19  ;;  %v10703_v0 = vpop.permute.xlu0 %7807  ;;  %v7749_v19 = vunpack.i.l.bf16 %v10615_v22 }
 0x8fe   :  { %v7773_v47 = vpop.permute.xlu1 %7772 }
 0x8ff   :  { %5626 = vmatpush.msra.mxu0 %v3758_v63  ;;  %v7775_v13 = vunpack.i.h.bf16 %v7773_v47  ;;  %v7774_v7 = vunpack.i.l.bf16 %v7773_v47  ;;  %v7764_v47 = vunpack.i.l.bf16 %v10639_v54  ;;  %v7754_v54 = vunpack.i.l.bf16 %v10629_v53 }
 0x900   :  { %8037 = vrot.lane.b32.xlu2 %v10478_v18, %s11778_s24  ;;  %v4022_v63 = vsel %vm11791_vm3, %v7759_v55, %v7760_v33  ;;  %v7745_v53 = vunpack.i.h.bf16 %v10626_v31  ;;  %v4020_v22 = vsel %vm11793_vm6, %v7749_v19, %v7750_v32  ;;  %v7720_v55 = vunpack.i.h.bf16 %v10573_v1  ;;  %vm11800_vm3 = vmmov %vm11798_vm0 }
 0x901   :  { %v4055_v39 = vsel %vm11787_vm10, %v7774_v7, %v7775_v13  ;;  %v4053_v44 = vsel %vm11789_vm2, %v7764_v47, %v7765_v61  ;;  %v4021_v42 = vsel %vm11792_vm4, %v7754_v54, %v7755_v52  ;;  %v7739_v13 = vunpack.i.l.bf16 %v10608_v62  ;;  %vm11797_vm10 = vmmov %vm11794_vm7 }
 0x902   :  { %5638 = vmatpush.msrb.mxu1 %v4055_v39  ;;  %v7735_v7 = vunpack.i.h.bf16 %v10593_v10  ;;  %v3989_v59 = vsel %vm11794_vm7, %v7744_v60, %v7745_v53  ;;  %v7730_v62 = vunpack.i.h.bf16 %v10610_v21  ;;  %v7725_v10 = vunpack.i.h.bf16 %v10584_v12  ;;  %vm11799_vm2 = vmmov %vm11798_vm0  ;;  %v5053_v60 = vld [vmem:[#allocation4 + $0x38] sm:$0xff] }
 0x903   :  { %8032 = vrot.lane.b32.xlu0 %v10478_v18, %s11781_s16  ;;  %v10749_v31 = vpop.permute.xlu2 %7827  ;;  %v3988_v17 = vsel %vm11796_vm8, %v7739_v13, %v7740_v40  ;;  %v7724_v47 = vunpack.i.l.bf16 %v10584_v12  ;;  %v7715_v52 = vunpack.i.h.bf16 %v10588_v56  ;;  %v7714_v54 = vunpack.i.l.bf16 %v10588_v56 }
 0x904   :  { %7997 = vrot.lane.b32.xlu1 %v10478_v18, %s11772_s18  ;;  %5639 = vmatpush.msrb.mxu1 %v4054_v41  ;;  %v3987_v33 = vsel %vm11797_vm10, %v7734_v23, %v7735_v7  ;;  %v7719_v41 = vunpack.i.l.bf16 %v10573_v1  ;;  %v3956_v21 = vsel %vm11798_vm0, %v7729_v35, %v7730_v62  ;;  %v7634_v23 = vunpack.i.l.bf16 %v10440_v37 }
 0x905   :  { %v10728_v16 = vpop.permute.xlu0 %7822  ;;  %v3955_v12 = vsel %vm11799_vm2, %v7724_v47, %v7725_v10  ;;  %v3923_v19 = vsel %vm793_vm15, %v7714_v54, %v7715_v52  ;;  %vm11804_vm4 = vcmask 793600   ;;  %v7629_v10 = vunpack.i.l.bf16 %v10425_v3  ;;  %v4692_v54 = vld [vmem:[#allocation4 + $0x48] sm:$0xff] }
 0x906   :  { %v10686_v5 = vpop.permute.xlu1 %7787  ;;  %5640 = vmatpush.msrb.mxu1 %v4053_v44  ;;  %v3954_v44 = vsel %vm11800_vm3, %v7719_v41, %v7720_v55  ;;  %vm11805_vm6 = vmmov %vm11804_vm4  ;;  %vm11806_vm7 = vcmask 916480   ;;  %vm11810_vm0 = vcmask 801792  }
 0x907   :  { %vm11807_vm8 = vmmov %vm11804_vm4 }
 0x908   :  { %8052 = vrot.lane.b32.xlu2 %v10478_v18, %s11784_s15  ;;  %5641 = vmatpush.msrb.mxu1 %v4022_v63  ;;  %vm11809_vm10 = vmmov %vm11806_vm7 }
 0x909   :  { %vm11811_vm2 = vmmov %vm11810_vm0 }
 0x90a   :  { %5642 = vmatpush.msrb.mxu1 %v4021_v42  ;;  %v7635_v42 = vunpack.i.h.bf16 %v10440_v37  ;;  %vm11812_vm3 = vmmov %vm11810_vm0 }
 0x90b   :  { %8047 = vrot.lane.b32.xlu0 %v10420_v9, %s11772_s18  ;;  %v7843_v1 = vpop.permute.xlu2 %7842  ;;  %s11802_s18 = smov 90  }
 0x90c   :  { %8012 = vrot.lane.b32.xlu1 %v10420_v9, %s11764_s4  ;;  %s11790_s4 = smov 72   ;;  %5643 = vmatpush.msrb.mxu1 %v4020_v22  ;;  %v7845_v56 = vunpack.i.h.bf16 %v7843_v1  ;;  %v7844_v53 = vunpack.i.l.bf16 %v7843_v1  ;;  %v3757_v37 = vsel %vm11806_vm7, %v7634_v23, %v7635_v42  ;;  %v7829_v42 = vunpack.i.l.bf16 %v10749_v31 }
 0x90d   :  { %v10759_v61 = vpop.permute.xlu0 %7837  ;;  %5627 = vmatpush.msra.mxu0 %v3757_v37 }
 0x90e   :  { %v10699_v34 = vpop.permute.xlu1 %7802  ;;  %5644 = vmatpush.msrb.mxu1 %v3989_v59  ;;  %v7839_v1 = vunpack.i.l.bf16 %v10759_v61 }
 0x910   :  { %8067 = vrot.lane.b32.xlu2 %v10465_v50, %s11778_s24  ;;  %5645 = vmatpush.msrb.mxu1 %v3988_v17  ;;  %v4253_v17 = vsel %vm11804_vm4, %v7844_v53, %v7845_v56  ;;  %vm11813_vm4 = vcmask 809984  }
 0x911   :  { %5659 = vmatpush.msrb.mxu2 %v4253_v17  ;;  %v7814_v17 = vunpack.i.l.bf16 %v10718_v15  ;;  %vm11815_vm7 = vmmov %vm11813_vm4 }
 0x912   :  { %5646 = vmatpush.msrb.mxu1 %v3987_v33 }
 0x913   :  { %8062 = vrot.lane.b32.xlu0 %v10465_v50, %s11781_s16  ;;  %v7858_v40 = vpop.permute.xlu2 %7857 }
 0x914   :  { %8027 = vrot.lane.b32.xlu1 %v10420_v9, %s11766_s20  ;;  %s11795_s20 = smov 96   ;;  %5647 = vmatpush.msrb.mxu1 %v3956_v21  ;;  %v7860_v59 = vunpack.i.h.bf16 %v7858_v40  ;;  %v7859_v62 = vunpack.i.l.bf16 %v7858_v40 }
 0x915   :  { %v10780_v63 = vpop.permute.xlu0 %7852 }
 0x916   :  { %v10715_v14 = vpop.permute.xlu1 %7817  ;;  %5648 = vmatpush.msrb.mxu1 %v3955_v12  ;;  %v4251_v41 = vsel %vm11807_vm8, %v7859_v62, %v7860_v59  ;;  %v7815_v62 = vunpack.i.h.bf16 %v10718_v15  ;;  %vm11816_vm8 = vcmask 818176   ;;  %v7804_v15 = vunpack.i.l.bf16 %v10699_v34 }
 0x918   :  { %8082 = vrot.lane.b32.xlu2 %v10465_v50, %s11784_s15  ;;  %5649 = vmatpush.msrb.mxu1 %v3954_v44  ;;  %v7840_v44 = vunpack.i.h.bf16 %v10759_v61  ;;  %v7830_v61 = vunpack.i.h.bf16 %v10749_v31  ;;  %v7819_v31 = vunpack.i.l.bf16 %v10715_v14 }
 0x91a   :  { %5650 = vmatpush.msrb.mxu1 %v3923_v19  ;;  %v4218_v40 = vsel %vm11812_vm3, %v7839_v1, %v7840_v44  ;;  %v7790_v44 = vunpack.i.h.bf16 %v10686_v5 }
 0x91b   :  { %8077 = vrot.lane.b32.xlu0 %v10478_v18, %s11790_s4 }
 0x91c   :  { %8042 = vrot.lane.b32.xlu1 %v10465_v50, %s11775_s23 }
 0x91d   :  { %v7868_v47 = vpop.permute.xlu0 %7867 }
 0x91e   :  { %v10739_v20 = vpop.permute.xlu1 %7832  ;;  %v7870_v33 = vunpack.i.h.bf16 %v7868_v47 }
 0x91f   :  { %v7835_v53 = vunpack.i.h.bf16 %v10739_v20 }
 0x920   :  { %8097 = vrot.lane.b32.xlu2 %v10420_v9, %s11778_s24  ;;  %s11808_s24 = smov 78  }
 0x923   :  { %8092 = vrot.lane.b32.xlu0 %v10420_v9, %s11781_s16  ;;  %s11819_s16 = smov 73  }
 0x924   :  { %8057 = vrot.lane.b32.xlu1 %v10478_v18, %s11795_s20 }
 0x926   :  { %v7848_v39 = vpop.permute.xlu1 %7847 }
 0x927   :  { %v7850_v13 = vunpack.i.h.bf16 %v7848_v39  ;;  %v7849_v22 = vunpack.i.l.bf16 %v7848_v39  ;;  %v7869_v39 = vunpack.i.l.bf16 %v7868_v47  ;;  %v7805_v47 = vunpack.i.h.bf16 %v10699_v34 }
 0x928   :  { %8112 = vrot.lane.b32.xlu2 %v10420_v9, %s11784_s15  ;;  %s11801_s15 = smov 83   ;;  %v7795_v34 = vunpack.i.h.bf16 %v10689_v30 }
 0x929   :  { %v4252_v55 = vsel %vm11805_vm6, %v7849_v22, %v7850_v13  ;;  %v4220_v56 = vsel %vm11810_vm0, %v7869_v39, %v7870_v33  ;;  %v7825_v13 = vunpack.i.h.bf16 %v10728_v16  ;;  %v7824_v22 = vunpack.i.l.bf16 %v10728_v16  ;;  %vm11814_vm6 = vmmov %vm11813_vm4  ;;  %v10844_v33 = vpop.permute.xlu0 %7882  ;;  %v4825_v39 = vld [vmem:[#allocation4 + $0x50] sm:$0xff] }
 0x92a   :  { %5660 = vmatpush.msrb.mxu2 %v4252_v55  ;;  %v4186_v59 = vsel %vm11814_vm6, %v7829_v42, %v7830_v61  ;;  %v4826_v55 = vld [vmem:[#allocation4 + $0x58] sm:$0xff]  ;;  %vm11818_vm0 = vmmov %vm11816_vm8  ;;  %vm11824_vm6 = vcmask 834560   ;;  %v5316_v61 = vld [vmem:[%s11541_s1] sm:$0xff] }
 0x92b   :  { %8107 = vrot.lane.b32.xlu0 %v10465_v50, %s11790_s4  ;;  %v4185_v16 = vsel %vm11815_vm7, %v7824_v22, %v7825_v13  ;;  %5560 = vmatmul.f32.vlgmr.msra.gmra.mxu1 %v5316_v61  ;;  %v5329_v13 = vld [vmem:[%s11541_s1 + $0x68] sm:$0xff] }
 0x92c   :  { %8072 = vrot.lane.b32.xlu1 %v10420_v9, %s11775_s23  ;;  %v5052_v9 = vld [vmem:[#allocation4 + $0x30] sm:$0xff]  ;;  %s11803_s23 = smov 66   ;;  %5661 = vmatpush.msrb.mxu2 %v4251_v41  ;;  %v7799_v41 = vunpack.i.l.bf16 %v10697_v46 }
 0x92d   :  { %v10790_v35 = vpack.i.bf16 %v5053_v60, %v5052_v9  ;;  %v7834_v9 = vunpack.i.l.bf16 %v10739_v20 }
 0x92e   :  { %v10777_v32 = vpop.permute.xlu1 %7862  ;;  %5662 = vmatpush.msrb.mxu2 %v4220_v56  ;;  %v10866_v56 = vpop.permute.xlu2 %7872 }
 0x92f   :  { %v4187_v20 = vsel %vm11813_vm4, %v7834_v9, %v7835_v53 }
 0x930   :  { %8127 = vrot.lane.b32.xlu2 %v10478_v18, %s11801_s15 }
 0x931   :  { %v10871_v53 = vpop.permute.xlu0 %7897 }
 0x933   :  { %8122 = vrot.lane.b32.xlu0 %v10478_v18, %s11802_s18 }
 0x934   :  { %8087 = vrot.lane.b32.xlu1 %v10465_v50, %s11795_s20  ;;  %v7630_v50 = vunpack.i.h.bf16 %v10425_v3  ;;  %v4691_v3 = vld [vmem:[#allocation4 + $0x40] sm:$0xff] }
 0x936   :  { %v7878_v7 = vpop.permute.xlu1 %7877  ;;  %v3756_v12 = vsel %vm11809_vm10, %v7629_v10, %v7630_v50  ;;  %v7810_v50 = vunpack.i.h.bf16 %v10703_v0  ;;  %v7809_v10 = vunpack.i.l.bf16 %v10703_v0  ;;  %vm11817_vm10 = vmmov %vm11816_vm8  ;;  %v7800_v0 = vunpack.i.h.bf16 %v10697_v46  ;;  %v10888_v42 = vpop.permute.xlu2 %7887 }
 0x937   :  { %v7880_v21 = vunpack.i.h.bf16 %v7878_v7  ;;  %v7879_v52 = vunpack.i.l.bf16 %v7878_v7  ;;  %5628 = vmatpush.msra.mxu0 %v3756_v12  ;;  %v7820_v7 = vunpack.i.h.bf16 %v10715_v14  ;;  %v4153_v37 = vsel %vm11817_vm10, %v7814_v17, %v7815_v62 }
 0x938   :  { %8142 = vrot.lane.b32.xlu2 %v10478_v18, %s11803_s23  ;;  %v7789_v46 = vunpack.i.l.bf16 %v10686_v5  ;;  %vm11830_vm10 = vcmask 932864  }
 0x939   :  { %v4219_v60 = vsel %vm11811_vm2, %v7879_v52, %v7880_v21  ;;  %v4154_v14 = vsel %vm11816_vm8, %v7819_v31, %v7820_v7  ;;  %v4152_v52 = vsel %vm11818_vm0, %v7809_v10, %v7810_v50  ;;  %vm11820_vm2 = vcmask 826368   ;;  %vm11831_vm0 = vmmov %vm11830_vm10 }
 0x93a   :  { %5663 = vmatpush.msrb.mxu2 %v4219_v60  ;;  %v4121_v12 = vsel %vm11820_vm2, %v7804_v15, %v7805_v47  ;;  %vm11821_vm3 = vmmov %vm11820_vm2  ;;  %v4088_v5 = vsel %vm11824_vm6, %v7789_v46, %v7790_v44  ;;  %v5317_v60 = vld [vmem:[%s11541_s1 + $0x8] sm:$0xff]  ;;  %v7710_v7 = vunpack.i.h.bf16 %v10567_v27  ;;  %v7709_v31 = vunpack.i.l.bf16 %v10567_v27  ;;  %v3185_v47 = vld [vmem:[%s11548_s8] sm:$0xf] }
 0x93b   :  { %8137 = vrot.lane.b32.xlu0 %v10790_v35, %s11790_s4  ;;  %v4120_v1 = vsel %vm11821_vm3, %v7799_v41, %v7800_v0  ;;  %s11822_s4 = smov 79   ;;  %vm11823_vm4 = vmmov %vm11820_vm2  ;;  %5583 = vmatmul.f32.vlgmr.msra.gmra.mxu2 %v5317_v60  ;;  %v7625_v27 = vunpack.i.h.bf16 %v10509_v25  ;;  %v7624_v50 = vunpack.i.l.bf16 %v10509_v25  ;;  %v7620_v15 = vunpack.i.h.bf16 %v10388_v8  ;;  %v5321_v44 = vld [vmem:[%s11541_s1 + $0x28] sm:$0xff] }
 0x93c   :  { %8102 = vrot.lane.b32.xlu1 %v10478_v18, %s11808_s24  ;;  %v10812_v18 = vpack.i.bf16 %v4692_v54, %v4691_v3  ;;  %5664 = vmatpush.msrb.mxu2 %v4218_v40  ;;  %v10854_v3 = vpack.i.bf16 %v4826_v55, %v4825_v39  ;;  %v7794_v54 = vunpack.i.l.bf16 %v10689_v30  ;;  %v3922_v17 = vsel %vm793_vm15, %v7709_v31, %v7710_v7  ;;  %vm11832_vm2 = vmmov %vm11831_vm0 }
 0x93d   :  { %5651 = vmatpush.msrb.mxu1 %v3922_v17  ;;  %v7619_v39 = vunpack.i.l.bf16 %v10388_v8  ;;  %v7615_v55 = vunpack.i.h.bf16 %v10386_v45  ;;  %v7614_v25 = vunpack.i.l.bf16 %v10386_v45  ;;  %vm11827_vm15 = vcmask 924672  }
 0x93e   :  { %v10807_v19 = vpop.permute.xlu1 %7892  ;;  %5665 = vmatpush.msrb.mxu2 %v4187_v20  ;;  %v4119_v30 = vsel %vm11823_vm4, %v7794_v54, %v7795_v34  ;;  %v10892_v20 = vpop.permute.xlu0 %7912  ;;  %v7610_v41 = vunpack.i.h.bf16 %v10473_v57  ;;  %vm11828_vm7 = vmmov %vm11827_vm15  ;;  %v7605_v34 = vunpack.i.h.bf16 %v10368_v51  ;;  %v7604_v45 = vunpack.i.l.bf16 %v10368_v51 }
 0x93f   :  { %v3724_v8 = vsel %vm11828_vm7, %v7619_v39, %v7620_v15  ;;  %vm11829_vm8 = vmmov %vm11828_vm7  ;;  %v7599_v46 = vunpack.i.l.bf16 %v10372_v48  ;;  %v7594_v60 = vunpack.i.l.bf16 %v10430_v58  ;;  %v7589_v7 = vunpack.i.l.bf16 %v10354_v28 }
 0x940   :  { %8157 = vrot.lane.b32.xlu2 %v10790_v35, %s11808_s24  ;;  %5666 = vmatpush.msrb.mxu2 %v4186_v59  ;;  %v5328_v59 = vld [vmem:[%s11541_s1 + $0x60] sm:$0xff]  ;;  %v3723_v54 = vsel %vm11829_vm8, %v7614_v25, %v7615_v55  ;;  %v3691_v61 = vsel %vm11831_vm0, %v7604_v45, %v7605_v34  ;;  %vm11833_vm3 = vcmask 941056   ;;  %v7575_v15 = vunpack.i.h.bf16 %v10340_v36 }
 0x941   :  { %5563 = vmatmul.f32.gmra.mxu1 %v5328_v59  ;;  %v7584_v59 = vunpack.i.l.bf16 %v10360_v26  ;;  %vm11835_vm4 = vmmov %vm11833_vm3  ;;  %v7574_v39 = vunpack.i.l.bf16 %v10340_v36  ;;  %v7565_v36 = vunpack.i.h.bf16 %v10374_v2  ;;  %v7564_v34 = vunpack.i.l.bf16 %v10374_v2 }
 0x942   :  { %5667 = vmatpush.msrb.mxu2 %v4185_v16  ;;  %v10909_v16 = vpop.permute.xlu2 %7902  ;;  %vm11836_vm6 = vmmov %vm11833_vm3  ;;  %v7550_v2 = vunpack.i.h.bf16 %v10362_v43 }
 0x943   :  { %8152 = vrot.lane.b32.xlu0 %v10812_v18, %s11801_s15  ;;  %5586 = vmatmul.f32.gmra.mxu2 %v5329_v13  ;;  %v5320_v13 = vld [vmem:[%s11541_s1 + $0x20] sm:$0xff] }
 0x944   :  { %8117 = vrot.lane.b32.xlu1 %v10790_v35, %s11795_s20  ;;  %5668 = vmatpush.msrb.mxu2 %v4154_v14  ;;  %s11825_s20 = smov 84  }
 0x946   :  { %v10829_v23 = vpop.permute.xlu1 %7907  ;;  %5669 = vmatpush.msrb.mxu2 %v4153_v37  ;;  %v10915_v14 = vpop.permute.xlu0 %7927  ;;  %v3725_v37 = vsel %vm11827_vm15, %v7624_v50, %v7625_v27  ;;  %v5333_v27 = vld [vmem:[%s11541_s1 + $0x88] sm:$0xff]  ;;  %v7579_v50 = vunpack.i.l.bf16 %v10390_v6  ;;  %vm11837_vm15 = vcmask 949248  }
 0x947   :  { %vm11838_vm7 = vmmov %vm11837_vm15 }
 0x948   :  { %8172 = vrot.lane.b32.xlu2 %v10790_v35, %s11802_s18  ;;  %5670 = vmatpush.msrb.mxu2 %v4152_v52  ;;  %v7609_v52 = vunpack.i.l.bf16 %v10473_v57  ;;  %v7600_v57 = vunpack.i.h.bf16 %v10372_v48  ;;  %v3625_v45 = vsel %vm11838_vm7, %v7574_v39, %v7575_v15  ;;  %vm11840_vm8 = vmmov %vm11838_vm7  ;;  %v7889_v15 = vunpack.i.l.bf16 %v10888_v42 }
 0x949   :  { %5652 = vmatmul.f32.vlgmr.msrb.gmra.mxu1 %v5320_v13  ;;  %vm11851_vm7 = vcmask 760832  }
 0x94a   :  { %5671 = vmatpush.msrb.mxu2 %v4121_v12  ;;  %v10938_v12 = vpop.permute.xlu2 %7917  ;;  %v3690_v31 = vsel %vm11832_vm2, %v7599_v46, %v7600_v57  ;;  %v7555_v57 = vunpack.i.h.bf16 %v10336_v49  ;;  %v7554_v46 = vunpack.i.l.bf16 %v10336_v49  ;;  %v7865_v49 = vunpack.i.h.bf16 %v10777_v32 }
 0x94b   :  { %8167 = vrot.lane.b32.xlu0 %v10812_v18, %s11803_s23 }
 0x94c   :  { %8132 = vrot.lane.b32.xlu1 %v10812_v18, %s11808_s24  ;;  %5672 = vmatpush.msrb.mxu2 %v4120_v1  ;;  %v3692_v1 = vsel %vm11830_vm10, %v7609_v52, %v7610_v41  ;;  %v7570_v41 = vunpack.i.h.bf16 %v10348_v24  ;;  %v7569_v52 = vunpack.i.l.bf16 %v10348_v24  ;;  %s11839_s24 = smov 80   ;;  %vm11841_vm10 = vcmask 957440  }
 0x94d   :  { %vm11842_vm0 = vmmov %vm11841_vm10 }
 0x94e   :  { %v10851_v21 = vpop.permute.xlu1 %7922  ;;  %5673 = vmatpush.msrb.mxu2 %v4119_v30  ;;  %v10948_v51 = vpop.permute.xlu0 %7942  ;;  %v5319_v30 = vld [vmem:[%s11541_s1 + $0x18] sm:$0xff]  ;;  %v3624_v24 = vsel %vm11840_vm8, %v7569_v52, %v7570_v41  ;;  %vm11843_vm2 = vmmov %vm11842_vm0 }
 0x94f   :  { %5629 = vmatmul.f32.vlgmr.msra.gmra.mxu0 %v5319_v30  ;;  %vm11852_vm8 = vmmov %vm11851_vm7 }
 0x950   :  { %8187 = vrot.lane.b32.xlu2 %v10812_v18, %s11819_s16  ;;  %5674 = vmatpush.msrb.mxu2 %v4088_v5  ;;  %v7595_v5 = vunpack.i.h.bf16 %v10430_v58  ;;  %v7585_v58 = vunpack.i.h.bf16 %v10360_v26  ;;  %v5331_v26 = vld [vmem:[%s11541_s1 + $0x78] sm:$0xff] }
 0x951   :  { %5675 = vmatmul.f32.vlgmr.msrb.gmra.mxu2 %v5321_v44  ;;  %v7559_v44 = vunpack.i.l.bf16 %v10326_v38 }
 0x952   :  { %v3659_v17 = vsel %vm11833_vm3, %v7594_v60, %v7595_v5  ;;  %v3657_v55 = vsel %vm11836_vm6, %v7584_v59, %v7585_v58  ;;  %v7855_v60 = vunpack.i.h.bf16 %v10780_v63  ;;  %v7894_v58 = vunpack.i.l.bf16 %v10807_v19 }
 0x953   :  { %8182 = vrot.lane.b32.xlu0 %v10854_v3, %s11822_s4  ;;  %v7875_v59 = vunpack.i.h.bf16 %v10866_v56  ;;  %vm11845_vm3 = vcmask 744448   ;;  %vm11847_vm6 = vcmask 703488  }
 0x954   :  { %8147 = vrot.lane.b32.xlu1 %v10812_v18, %s11802_s18  ;;  %s11844_s18 = smov 85  }
 0x956   :  { %v10873_v9 = vpop.permute.xlu1 %7937 }
 0x957   :  { %5632 = vmatmul.f32.gmra.mxu0 %v5331_v26  ;;  %v7890_v26 = vunpack.i.h.bf16 %v10888_v42  ;;  %v5330_v42 = vld [vmem:[%s11541_s1 + $0x70] sm:$0xff] }
 0x958   :  { %8202 = vrot.lane.b32.xlu2 %v10854_v3, %s11825_s20 }
 0x959   :  { %5678 = vmatmul.f32.gmra.mxu2 %v5333_v27 }
 0x95b   :  { %8197 = vrot.lane.b32.xlu0 %v10854_v3, %s11755_s25 }
 0x95c   :  { %8162 = vrot.lane.b32.xlu1 %v10854_v3, %s11819_s16 }
 0x95e   :  { %v10890_v40 = vpop.permute.xlu1 %7952 }
 0x960   :  { %8217 = vrot.lane.b32.xlu2 %v10854_v3, %s11826_s13 }
 0x961   :  { %v3179_v22 = vpop.f32.mrf.mxu2 }
 0x963   :  { %8212 = vrot.lane.b32.xlu0 %v10790_v35, %s11819_s16 }
 0x966   :  { %v10906_v62 = vpop.permute.xlu1 %7967 }
 0x968   :  { %8232 = vrot.lane.b32.xlu2 %v10790_v35, %s11822_s4 }
 0x969   :  { %v3182_v10 = vpop.f32.mrf.mxu2 }
 0x96a   :  { %3203 = vmatpush.msrb.mxu3 %v3182_v10 }
 0x96b   :  { %8227 = vrot.lane.b32.xlu0 %v10812_v18, %s11825_s20 }
 0x96c   :  { %3204 = vmatpush.msrb.mxu3 %v3179_v22  ;;  %v7590_v22 = vunpack.i.h.bf16 %v10354_v28  ;;  %v7580_v28 = vunpack.i.h.bf16 %v10390_v6  ;;  %v10985_v6 = vpop.permute.xlu0 %7957 }
 0x96d   :  { %6324 = vmatmul.msk.f32.vlgmr.msrb.gmra.mxu3 %vm3119_vm12, %v3185_v47  ;;  %v10980_v47 = vpop.permute.xlu2 %7932 }
 0x96e   :  { %5590 = vmatpush.msra.mxu3 %v3725_v37  ;;  %v10928_v0 = vpop.permute.xlu1 %7982  ;;  %v3658_v10 = vsel %vm11835_vm4, %v7589_v7, %v7590_v22  ;;  %v5332_v37 = vld [vmem:[%s11541_s1 + $0x80] sm:$0xff]  ;;  %v7864_v7 = vunpack.i.l.bf16 %v10777_v32  ;;  %vm11846_vm4 = vcmask 752640  }
 0x96f   :  { %5655 = vmatmul.f32.gmra.mxu1 %v5332_v37  ;;  %v7899_v37 = vunpack.i.l.bf16 %v10871_v53 }
 0x970   :  { %5591 = vmatpush.msra.mxu3 %v3724_v8  ;;  %8247 = vrot.lane.b32.xlu2 %v10790_v35, %s11825_s20  ;;  %s11834_s20 = smov 74   ;;  %v3626_v8 = vsel %vm11837_vm15, %v7579_v50, %v7580_v28  ;;  %v7885_v28 = vunpack.i.h.bf16 %v10844_v33  ;;  %v4418_v50 = vsel %vm11846_vm4, %v7864_v7, %v7865_v49  ;;  %vm11849_vm15 = vmmov %vm11846_vm4 }
 0x972   :  { %5592 = vmatpush.msra.mxu3 %v3723_v54  ;;  %v7560_v54 = vunpack.i.h.bf16 %v10326_v38  ;;  %v7549_v38 = vunpack.i.l.bf16 %v10362_v43  ;;  %v7895_v43 = vunpack.i.h.bf16 %v10807_v19  ;;  %v7884_v19 = vunpack.i.l.bf16 %v10844_v33 }
 0x973   :  { %8242 = vrot.lane.b32.xlu0 %v10812_v18, %s11826_s13  ;;  %v7900_v33 = vunpack.i.h.bf16 %v10871_v53  ;;  %v7920_v53 = vunpack.i.h.bf16 %v10938_v12 }
 0x974   :  { %5593 = vmatpush.msra.mxu3 %v3692_v1  ;;  %v3593_v1 = vsel %vm11841_vm10, %v7564_v34, %v7565_v36  ;;  %v3592_v13 = vsel %vm11842_vm0, %v7559_v44, %v7560_v54  ;;  %v11017_v22 = vpop.permute.xlu0 %7972  ;;  %v3560_v32 = vsel %vm419_vm5, %v7549_v38, %v7550_v2  ;;  %vm11848_vm5 = vmmov %vm11846_vm4  ;;  %v4416_v41 = vsel %vm11849_vm15, %v7884_v19, %v7885_v28 }
 0x975   :  { %v11009_v30 = vpop.permute.xlu2 %7947  ;;  %v7909_v36 = vunpack.i.l.bf16 %v10829_v23  ;;  %v4385_v34 = vsel %vm11851_vm7, %v7889_v15, %v7890_v26  ;;  %v4384_v54 = vsel %vm11852_vm8, %v7899_v37, %v7900_v33  ;;  %v7905_v44 = vunpack.i.h.bf16 %v10909_v16  ;;  %vm11853_vm10 = vmmov %vm11851_vm7 }
 0x976   :  { %5594 = vmatpush.msra.mxu3 %v3691_v61  ;;  %v10956_v48 = vpop.permute.xlu1 %7997  ;;  %v7854_v61 = vunpack.i.l.bf16 %v10780_v63  ;;  %v5318_v63 = vld [vmem:[%s11541_s1 + $0x10] sm:$0xff]  ;;  %v7914_v2 = vunpack.i.l.bf16 %v10892_v20  ;;  %vm11854_vm0 = vcmask 769024   ;;  %vm11857_vm4 = vcmask 711680  }
 0x977   :  { %vm11860_vm15 = vcmask 777216   ;;  %v7940_v26 = vunpack.i.h.bf16 %v10873_v9  ;;  %v7939_v15 = vunpack.i.l.bf16 %v10873_v9 }
 0x978   :  { %5595 = vmatpush.msra.mxu3 %v3690_v31  ;;  %8262 = vrot.lane.b32.xlu2 %v10790_v35, %s11826_s13  ;;  %v3591_v31 = vsel %vm11843_vm2, %v7554_v46, %v7555_v57  ;;  %v4449_v27 = vsel %vm11845_vm3, %v7854_v61, %v7855_v60  ;;  %v7935_v57 = vunpack.i.h.bf16 %v10980_v47  ;;  %v7934_v46 = vunpack.i.l.bf16 %v10980_v47  ;;  %vm11855_vm2 = vmmov %vm11847_vm6  ;;  %s6304_s13 = sshll.u32 %s8572_s10, 4  ;;  %s6305_s13 = int_to_ptr.vmem [resolvable:$true] %s6304_s13 }
 0x979   :  { %v7924_v47 = vunpack.i.l.bf16 %v10851_v21  ;;  %vm11856_vm3 = vmmov %vm11854_vm0 }
 0x97a   :  { %5596 = vmatpush.msra.mxu3 %v3659_v17  ;;  %v7874_v17 = vunpack.i.l.bf16 %v10866_v56  ;;  %v4615_v56 = vsel %vm11847_vm6, %v7894_v58, %v7895_v43  ;;  %vm11858_vm6 = vmmov %vm11854_vm0 }
 0x97b   :  { %8257 = vrot.lane.b32.xlu0 %v10812_v18, %s11834_s20  ;;  %5705 = vmatpush.msrb.mxu0 %v4615_v56  ;;  %vm11862_vm7 = vmmov %vm11860_vm15 }
 0x97c   :  { %5597 = vmatpush.msra.mxu3 %v3658_v10  ;;  %v4417_v39 = vsel %vm11848_vm5, %v7874_v17, %v7875_v59  ;;  %v11051_v52 = vpop.permute.xlu0 %7987  ;;  %vm11859_vm5 = vmmov %vm11857_vm4 }
 0x97d   :  { %vm11863_vm8 = vmmov %vm11862_vm7 }
 0x97e   :  { %5598 = vmatpush.msra.mxu3 %v3657_v55  ;;  %v10987_v25 = vpop.permute.xlu1 %8012  ;;  %v11044_v55 = vpop.permute.xlu2 %7962 }
 0x980   :  { %5599 = vmatpush.msra.mxu3 %v3626_v8  ;;  %8277 = vrot.lane.b32.xlu2 %v10790_v35, %s11834_s20  ;;  %v7910_v8 = vunpack.i.h.bf16 %v10829_v23 }
 0x982   :  { %5600 = vmatpush.msra.mxu3 %v3625_v45  ;;  %v7919_v45 = vunpack.i.l.bf16 %v10938_v12  ;;  %v4383_v38 = vsel %vm11853_vm10, %v7909_v36, %v7910_v8  ;;  %v7955_v12 = vunpack.i.h.bf16 %v10890_v40  ;;  %vm11864_vm10 = vcmask 785408  }
 0x983   :  { %8272 = vrot.lane.b32.xlu0 %v10812_v18, %s11839_s24  ;;  %v7930_v8 = vunpack.i.h.bf16 %v10915_v14  ;;  %v7929_v36 = vunpack.i.l.bf16 %v10915_v14 }
 0x984   :  { %5601 = vmatpush.msra.mxu3 %v3624_v24  ;;  %v7904_v24 = vunpack.i.l.bf16 %v10909_v16  ;;  %v7954_v16 = vunpack.i.l.bf16 %v10890_v40  ;;  %v4352_v60 = vsel %vm11854_vm0, %v7919_v45, %v7920_v53  ;;  %v8003_v43 = vpop.permute.xlu0 %8002  ;;  %vm11865_vm0 = vmmov %vm11857_vm4  ;;  %v7945_v53 = vunpack.i.h.bf16 %v10948_v51 }
 0x985   :  { %v8005_v58 = vunpack.i.h.bf16 %v8003_v43  ;;  %v4581_v37 = vsel %vm11865_vm0, %v7939_v15, %v7940_v26  ;;  %v7944_v45 = vunpack.i.l.bf16 %v10948_v51  ;;  %v7959_v51 = vunpack.i.l.bf16 %v10985_v6 }
 0x986   :  { %5602 = vmatpush.msra.mxu3 %v3593_v1  ;;  %v11011_v5 = vpop.permute.xlu1 %8027  ;;  %v7915_v1 = vunpack.i.h.bf16 %v10892_v20  ;;  %v7978_v61 = vpop.permute.xlu2 %7977  ;;  %v4614_v20 = vsel %vm11855_vm2, %v7904_v24, %v7905_v44  ;;  %v4350_v59 = vsel %vm11858_vm6, %v7954_v16, %v7955_v12  ;;  %vm11866_vm2 = vmmov %vm11864_vm10  ;;  %v7969_v44 = vunpack.i.l.bf16 %v10906_v62 }
 0x987   :  { %v7980_v49 = vunpack.i.h.bf16 %v7978_v61  ;;  %v7979_v7 = vunpack.i.l.bf16 %v7978_v61  ;;  %5706 = vmatpush.msrb.mxu0 %v4614_v20  ;;  %v4977_v24 = vsel %vm1881_vm11, %v7929_v36, %v7930_v8  ;;  %vm11869_vm6 = vmmov %vm11866_vm2  ;;  %v7984_v12 = vunpack.i.l.bf16 %v10928_v0 }
 0x988   :  { %5603 = vmatpush.msra.mxu3 %v3592_v13  ;;  %8292 = vrot.lane.b32.xlu2 %v10790_v35, %s11839_s24  ;;  %v7925_v13 = vunpack.i.h.bf16 %v10851_v21  ;;  %v4583_v40 = vsel %vm11857_vm4, %v7914_v2, %v7915_v1  ;;  %v8000_v20 = vunpack.i.h.bf16 %v10956_v48 }
 0x989   :  { %5707 = vmatpush.msrb.mxu0 %v4583_v40  ;;  %v4319_v28 = vsel %vm11860_vm15, %v7979_v7, %v7980_v49  ;;  %5751 = vmatpush.msra.mxu2 %v4977_v24  ;;  %v7999_v49 = vunpack.i.l.bf16 %v10956_v48  ;;  %v7964_v40 = vunpack.i.l.bf16 %v11044_v55  ;;  %v8015_v48 = vunpack.i.h.bf16 %v10987_v25 }
 0x98a   :  { %5604 = vmatpush.msra.mxu3 %v3591_v31  ;;  %v4351_v31 = vsel %vm11856_vm3, %v7934_v46, %v7935_v57  ;;  %v4582_v17 = vsel %vm11859_vm5, %v7924_v47, %v7925_v13  ;;  %vm11867_vm3 = vcmask 621568   ;;  %v7960_v46 = vunpack.i.h.bf16 %v10985_v6 }
 0x98b   :  { %8287 = vrot.lane.b32.xlu0 %v10812_v18, %s11844_s18  ;;  %5708 = vmatpush.msrb.mxu0 %v4582_v17  ;;  %v4946_v57 = vsel %vm11867_vm3, %v7944_v45, %v7945_v53  ;;  %vm11868_vm4 = vmmov %vm11867_vm3  ;;  %vm11870_vm5 = vcmask 719872   ;;  %v7950_v6 = vunpack.i.h.bf16 %v11009_v30  ;;  %v7975_v13 = vunpack.i.h.bf16 %v11017_v22 }
 0x98c   :  { %5605 = vmatpush.msra.mxu3 %v3560_v32  ;;  %v8030_v32 = vunpack.i.h.bf16 %v11011_v5  ;;  %5752 = vmatpush.msra.mxu2 %v4946_v57  ;;  %v4550_v16 = vsel %vm11870_vm5, %v7959_v51, %v7960_v46  ;;  %vm11871_vm15 = vmmov %vm11870_vm5  ;;  %v7974_v47 = vunpack.i.l.bf16 %v11017_v22  ;;  %v8018_v22 = vpop.permute.xlu0 %8017 }
 0x98d   :  { %5606 = vmatmul.f32.vlgmr.msra.gmra.mxu3 %v5318_v63  ;;  %v8004_v63 = vunpack.i.l.bf16 %v8003_v43  ;;  %5709 = vmatpush.msrb.mxu0 %v4581_v37 }
 0x98e   :  { %v11038_v10 = vpop.permute.xlu1 %8042  ;;  %5682 = vmatpush.msrb.mxu3 %v4449_v27  ;;  %v8029_v27 = vunpack.i.l.bf16 %v11011_v5 }
 0x98f   :  { %v4318_v56 = vsel %vm11862_vm7, %v8004_v63, %v8005_v58  ;;  %5710 = vmatpush.msrb.mxu0 %v4550_v16  ;;  %vm11872_vm7 = vcmask 580608   ;;  %v7990_v58 = vunpack.i.h.bf16 %v11051_v52  ;;  %v7989_v63 = vunpack.i.l.bf16 %v11051_v52 }
 0x990   :  { %8307 = vrot.lane.b32.xlu2 %v10790_v35, %s11844_s18  ;;  %5683 = vmatpush.msrb.mxu3 %v4418_v50  ;;  %v4317_v5 = vsel %vm11863_vm8, %v8029_v27, %v8030_v32  ;;  %v5111_v43 = vsel %vm11872_vm7, %v7999_v49, %v8000_v20  ;;  %vm11873_vm8 = vcmask 662528   ;;  %v8019_v52 = vunpack.i.l.bf16 %v8018_v22 }
 0x991   :  { %vm11875_vm0 = vmmov %vm11873_vm8  ;;  %v8045_v15 = vunpack.i.h.bf16 %v11038_v10  ;;  %vm11881_vm7 = vcmask 719872  }
 0x992   :  { %5684 = vmatpush.msrb.mxu3 %v4417_v39 }
 0x993   :  { %8302 = vrot.lane.b32.xlu0 %v10812_v18, %s11850_s14 }
 0x994   :  { %5685 = vmatpush.msrb.mxu3 %v4416_v41  ;;  %v8033_v27 = vpop.permute.xlu0 %8032 }
 0x995   :  { %5609 = vmatmul.f32.gmra.mxu3 %v5330_v42 }
 0x996   :  { %v8058_v23 = vpop.permute.xlu1 %8057  ;;  %5686 = vmatpush.msrb.mxu3 %v4385_v34 }
 0x997   :  { %v8060_v19 = vunpack.i.h.bf16 %v8058_v23  ;;  %v8059_v50 = vunpack.i.l.bf16 %v8058_v23 }
 0x998   :  { %8322 = vrot.lane.b32.xlu2 %v10854_v3, %s11758_s19  ;;  %5687 = vmatpush.msrb.mxu3 %v4384_v54  ;;  %s11861_s19 = smov 69   ;;  %v7970_v54 = vunpack.i.h.bf16 %v10906_v62  ;;  %v5322_v62 = vld [vmem:[%s11541_s1 + $0x30] sm:$0xff] }
 0x999   :  { %v4286_v39 = vsel %vm11864_vm10, %v8059_v50, %v8060_v19  ;;  %vm11874_vm10 = vmmov %vm11873_vm8 }
 0x99a   :  { %5688 = vmatpush.msrb.mxu3 %v4383_v38  ;;  %v4945_v23 = vsel %vm11868_vm4, %v7969_v44, %v7970_v54  ;;  %v7985_v38 = vunpack.i.h.bf16 %v10928_v0  ;;  %v5334_v0 = vld [vmem:[%s11541_s1 + $0x90] sm:$0xff]  ;;  %v4780_v32 = vsel %vm11874_vm10, %v7989_v63, %v7990_v58 }
 0x99b   :  { %8317 = vrot.lane.b32.xlu0 %v10790_v35, %s11850_s14  ;;  %5753 = vmatpush.msra.mxu2 %v4945_v23 }
 0x99c   :  { %5689 = vmatpush.msrb.mxu3 %v4352_v60  ;;  %v7949_v60 = vunpack.i.l.bf16 %v11009_v30  ;;  %v4549_v61 = vsel %vm11871_vm15, %v7984_v12, %v7985_v38  ;;  %v5142_v30 = vsel %vm2051_vm9, %v7974_v47, %v7975_v13  ;;  %v11151_v26 = vpop.permute.xlu0 %8047  ;;  %vm11880_vm15 = vcmask 637952  }
 0x99d   :  { %5711 = vmatpush.msrb.mxu0 %v4549_v61  ;;  %v8035_v12 = vunpack.i.h.bf16 %v8033_v27  ;;  %vm11883_vm10 = vmmov %vm11880_vm15  ;;  %v8050_v63 = vunpack.i.h.bf16 %v11151_v26 }
 0x99e   :  { %v11084_v21 = vpop.permute.xlu1 %8072  ;;  %5690 = vmatpush.msrb.mxu3 %v4351_v31  ;;  %v5143_v7 = vsel %vm2051_vm9, %v7949_v60, %v7950_v6  ;;  %v7965_v31 = vunpack.i.h.bf16 %v11044_v55 }
 0x9a0   :  { %8337 = vrot.lane.b32.xlu2 %v10790_v35, %s11861_s19  ;;  %5691 = vmatpush.msrb.mxu3 %v4350_v59  ;;  %v5533_v35 = vld [vmem:[%s11542_s2 + $0x8] sm:$0xff]  ;;  %v8014_v59 = vunpack.i.l.bf16 %v10987_v25  ;;  %v4781_v17 = vsel %vm11873_vm8, %v7964_v40, %v7965_v31  ;;  %v8044_v25 = vunpack.i.l.bf16 %v11038_v10  ;;  %vm11882_vm8 = vcmask 728064  }
 0x9a1   :  { %5728 = vmatpush.msra.mxu1 %v4781_v17 }
 0x9a2   :  { %5692 = vmatpush.msrb.mxu3 %v4319_v28  ;;  %v4779_v55 = vsel %vm11875_vm0, %v8014_v59, %v8015_v48  ;;  %v7993_v28 = vpop.permute.xlu2 %7992  ;;  %vm11884_vm0 = vcmask 580608   ;;  %v8049_v48 = vunpack.i.l.bf16 %v11151_v26 }
 0x9a3   :  { %8332 = vrot.lane.b32.xlu0 %v10812_v18, %s11861_s19  ;;  %v5532_v18 = vld [vmem:[%s11542_s2] sm:$0xff]  ;;  %5729 = vmatpush.msra.mxu1 %v4780_v32  ;;  %v7995_v19 = vunpack.i.h.bf16 %v7993_v28  ;;  %v7994_v50 = vunpack.i.l.bf16 %v7993_v28  ;;  %s6306_s2 = sshll.u32 %s11549_s9, 4  ;;  %s6307_s2 = int_to_ptr.hbm [resolvable:$true] %s6306_s2 }
 0x9a4   :  { %5693 = vmatpush.msrb.mxu3 %v4318_v56  ;;  %v8020_v56 = vunpack.i.h.bf16 %v8018_v22  ;;  %v8063_v37 = vpop.permute.xlu0 %8062 }
 0x9a5   :  { %5730 = vmatpush.msra.mxu1 %v4779_v55  ;;  %v8065_v16 = vunpack.i.h.bf16 %v8063_v37  ;;  %v8064_v6 = vunpack.i.l.bf16 %v8063_v37 }
 0x9a6   :  { %v8088_v33 = vpop.permute.xlu1 %8087  ;;  %5694 = vmatpush.msrb.mxu3 %v4317_v5 }
 0x9a7   :  { %v8090_v41 = vunpack.i.h.bf16 %v8088_v33  ;;  %v8089_v42 = vunpack.i.l.bf16 %v8088_v33 }
 0x9a8   :  { %5541 = vperm.xlu2 %7400, %v5533_v35   ;;  %5695 = vmatpush.msrb.mxu3 %v4286_v39 }
 0x9a9   :  { %v4285_v9 = vsel %vm11866_vm2, %v8089_v42, %v8090_v41  ;;  %vm11876_vm2 = vmmov %vm11867_vm3  ;;  %vm11877_vm3 = vcmask 629760   ;;  %v8075_v42 = vunpack.i.h.bf16 %v11084_v21 }
 0x9aa   :  { %5696 = vmatpush.msrb.mxu3 %v4285_v9  ;;  %v4944_v5 = vsel %vm11876_vm2, %v7994_v50, %v7995_v19  ;;  %v4913_v35 = vsel %vm11877_vm3, %v8019_v52, %v8020_v56  ;;  %v8008_v39 = vpop.permute.xlu2 %8007  ;;  %vm11878_vm4 = vmmov %vm11877_vm3 }
 0x9ab   :  { %5536 = vperm.xlu0 %7397, %v5532_v18   ;;  %5754 = vmatpush.msra.mxu2 %v4944_v5  ;;  %v4912_v33 = vsel %vm11878_vm4, %v8044_v25, %v8045_v15  ;;  %v8074_v18 = vunpack.i.l.bf16 %v11084_v21  ;;  %vm11879_vm5 = vmmov %vm11877_vm3  ;;  %v8010_v57 = vunpack.i.h.bf16 %v8008_v39  ;;  %vm11887_vm4 = vcmask 736256   ;;  %v4823_v5 = vld [vmem:[#allocation4 + $0x40] sm:$0xff] }
 0x9ac   :  { %v11160_v9 = vpop.permute.xlu0 %8077  ;;  %vm11885_vm2 = vmmov %vm11882_vm8 }
 0x9ad   :  { %5755 = vmatpush.msra.mxu2 %v4913_v35  ;;  %v4911_v10 = vsel %vm11879_vm5, %v8074_v18, %v8075_v42  ;;  %vm11886_vm3 = vmmov %vm11885_vm2  ;;  %v8080_v28 = vunpack.i.h.bf16 %v11160_v9  ;;  %v8079_v19 = vunpack.i.l.bf16 %v11160_v9  ;;  %v4824_v35 = vld [vmem:[#allocation4 + $0x48] sm:$0xff] }
 0x9ae   :  { %v11109_v34 = vpop.permute.xlu1 %8102  ;;  %vm11888_vm5 = vmmov %vm11887_vm4  ;;  %v8206_v18 = vpack.i.bf16 %v4824_v35, %v4823_v5 }
 0x9af   :  { %5756 = vmatpush.msra.mxu2 %v4912_v33  ;;  %v8105_v54 = vunpack.i.h.bf16 %v11109_v34  ;;  %v8104_v44 = vunpack.i.l.bf16 %v11109_v34  ;;  %v8034_v34 = vunpack.i.l.bf16 %v8033_v27 }
 0x9b0   :  { %8346 = vset.pattern.permute.xlu2 %v8555_v11 }
 0x9b1   :  { %5757 = vmatpush.msra.mxu2 %v4911_v10  ;;  %v4880_v21 = vsel %vm11880_vm15, %v8104_v44, %v8105_v54  ;;  %v4517_v20 = vsel %vm11882_vm8, %v8034_v34, %v8035_v12  ;;  %vm11889_vm15 = vmmov %vm11884_vm0  ;;  %vm11891_vm8 = vcmask 588800  }
 0x9b2   :  { %v8023_v41 = vpop.permute.xlu2 %8022  ;;  %v5109_v15 = vsel %vm11889_vm15, %v8049_v48, %v8050_v63 }
 0x9b3   :  { %8348 = vset.pattern.permute.xlu0 %v8554_v29  ;;  %5758 = vmatpush.msra.mxu2 %v4880_v21  ;;  %v8024_v38 = vunpack.i.l.bf16 %v8023_v41 }
 0x9b4   :  { %v8093_v45 = vpop.permute.xlu0 %8092 }
 0x9b5   :  { %v8095_v47 = vunpack.i.h.bf16 %v8093_v45 }
 0x9b6   :  { %v8118_v14 = vpop.permute.xlu1 %8117 }
 0x9b7   :  { %v8120_v11 = vunpack.i.h.bf16 %v8118_v14  ;;  %v8119_v1 = vunpack.i.l.bf16 %v8118_v14  ;;  %v8009_v14 = vunpack.i.l.bf16 %v8008_v39  ;;  %v5078_v39 = vsel %vm11891_vm8, %v8079_v19, %v8080_v28 }
 0x9b8   :  { %v3222_v19 = vlaneseq }
 0x9b9   :  { %v4284_v2 = vsel %vm11869_vm6, %v8119_v1, %v8120_v11  ;;  %vm3209_vm6 = vcmask 27648   ;;  %v4548_v46 = vsel %vm11881_vm7, %v8009_v14, %v8010_v57  ;;  %v4689_v11 = vld [vmem:[#allocation4 + $0x30] sm:$0xff]  ;;  %v4690_v1 = vld [vmem:[#allocation4 + $0x38] sm:$0xff]  ;;  %vm11890_vm7 = vcmask 670720  }
 0x9ba   :  { %5697 = vmatpush.msrb.mxu3 %v4284_v2  ;;  %v8038_v36 = vpop.permute.xlu2 %8037  ;;  %5712 = vmatpush.msrb.mxu0 %v4548_v46  ;;  %v8176_v60 = vpack.i.bf16 %v4690_v1, %v4689_v11  ;;  %v4792_v14 = vld [vmem:[#allocation4 + $0x50] sm:$0xff]  ;;  %v11221_v35 = vand.u32 127, %v3222_v19 }
 0x9bb   :  { %5698 = vmatmul.f32.vlgmr.msrb.gmra.mxu3 %v5322_v62  ;;  %v8025_v62 = vunpack.i.h.bf16 %v8023_v41  ;;  %v8039_v58 = vunpack.i.l.bf16 %v8038_v36 }
 0x9bc   :  { %5774 = vmatpush.msra.mxu3 %v5143_v7  ;;  %v8108_v23 = vpop.permute.xlu0 %8107  ;;  %5713 = vmatpush.msrb.mxu0 %v4517_v20 }
 0x9bd   :  { %v5110_v7 = vsel %vm11884_vm0, %v8024_v38, %v8025_v62  ;;  %v8110_v50 = vunpack.i.h.bf16 %v8108_v23  ;;  %v8109_v56 = vunpack.i.l.bf16 %v8108_v23  ;;  %vm11893_vm0 = vmmov %vm11891_vm8  ;;  %v4793_v23 = vld [vmem:[#allocation4 + $0x58] sm:$0xff] }
 0x9be   :  { %5775 = vmatpush.msra.mxu3 %v5142_v30  ;;  %v8133_v51 = vpop.permute.xlu1 %8132  ;;  %v4516_v30 = vsel %vm11885_vm2, %v8064_v6, %v8065_v16  ;;  %vm11894_vm2 = vcmask 596992   ;;  %v8251_v1 = vpack.i.bf16 %v4793_v23, %v4792_v14 }
 0x9bf   :  { %v8135_v61 = vunpack.i.h.bf16 %v8133_v51  ;;  %v8134_v13 = vunpack.i.l.bf16 %v8133_v51  ;;  %5714 = vmatpush.msrb.mxu0 %v4516_v30 }
 0x9c0   :  { %5776 = vmatpush.msra.mxu3 %v5111_v43  ;;  %v8040_v43 = vunpack.i.h.bf16 %v8038_v36 }
 0x9c1   :  { %v4879_v49 = vsel %vm11883_vm10, %v8134_v13, %v8135_v61  ;;  %vm11892_vm10 = vmmov %vm11891_vm8  ;;  %vm11900_vm8 = vcmask 736256  }
 0x9c2   :  { %v11166_v24 = vpop.permute.xlu2 %8052  ;;  %5759 = vmatpush.msra.mxu2 %v4879_v49  ;;  %5777 = vmatpush.msra.mxu3 %v5110_v7  ;;  %v4748_v25 = vsel %vm11890_vm7, %v8039_v58, %v8040_v43  ;;  %v5077_v33 = vsel %vm11892_vm10, %v8109_v56, %v8110_v50 }
 0x9c3   :  { %5701 = vmatmul.f32.gmra.mxu3 %v5334_v0  ;;  %v8094_v0 = vunpack.i.l.bf16 %v8093_v45  ;;  %5731 = vmatpush.msra.mxu1 %v4748_v25 }
 0x9c4   :  { %v8123_v31 = vpop.permute.xlu0 %8122  ;;  %5778 = vmatpush.msra.mxu3 %v5109_v15 }
 0x9c5   :  { %v4515_v22 = vsel %vm11886_vm3, %v8094_v0, %v8095_v47  ;;  %v8125_v17 = vunpack.i.h.bf16 %v8123_v31  ;;  %v8124_v32 = vunpack.i.l.bf16 %v8123_v31  ;;  %vm11895_vm3 = vmmov %vm11890_vm7  ;;  %v8571_v47 = vmov 4.0  }
 0x9c6   :  { %v8148_v40 = vpop.permute.xlu1 %8147  ;;  %5715 = vmatpush.msrb.mxu0 %v4515_v22  ;;  %5779 = vmatpush.msra.mxu3 %v5078_v39  ;;  %8379 = vrcp.f32 %v8571_v47  ;;  %vm11899_vm7 = vcmask 637952  }
 0x9c7   :  { %v8150_v55 = vunpack.i.h.bf16 %v8148_v40  ;;  %v8149_v27 = vunpack.i.l.bf16 %v8148_v40  ;;  %v4484_v52 = vsel %vm11887_vm4, %v8124_v32, %v8125_v17  ;;  %vm11896_vm4 = vmmov %vm11895_vm3 }
 0x9c8   :  { %5716 = vmatpush.msrb.mxu0 %v4484_v52  ;;  %5780 = vmatpush.msra.mxu3 %v5077_v33 }
 0x9c9   :  { %v4483_v26 = vsel %vm11888_vm5, %v8149_v27, %v8150_v55  ;;  %vm11897_vm5 = vcmask 678912  }
 0x9ca   :  { %v11170_v2 = vpop.permute.xlu2 %8067  ;;  %5717 = vmatpush.msrb.mxu0 %v4483_v26  ;;  %vm11898_vm15 = vmmov %vm11897_vm5 }
 0x9cb   :  { %v8070_v54 = vunpack.i.h.bf16 %v11170_v2  ;;  %v8069_v44 = vunpack.i.l.bf16 %v11170_v2 }
 0x9cc   :  { %v8138_v37 = vpop.permute.xlu0 %8137  ;;  %v8380_v30 = vpop.eup %8379 }
 0x9cd   :  { %v8140_v41 = vunpack.i.h.bf16 %v8138_v37  ;;  %v8139_v42 = vunpack.i.l.bf16 %v8138_v37  ;;  %v4747_v57 = vsel %vm11895_vm3, %v8069_v44, %v8070_v54  ;;  %v3214_v31 = vmul.f32 4.0, %v8380_v30 }
 0x9ce   :  { %v8163_v9 = vpop.permute.xlu1 %8162  ;;  %5732 = vmatpush.msra.mxu1 %v4747_v57  ;;  %vm3218_vm10 = vweird.f32 %v8380_v30  ;;  %vm11902_vm3 = vcmask 744448  }
 0x9cf   :  { %v8164_v36 = vunpack.i.l.bf16 %v8163_v9  ;;  %v3215_v43 = vsub.f32 1.0, %v3214_v31 }
 0x9d1   :  { %v3216_v48 = vmul.f32 %v8380_v30, %v3215_v43  ;;  %v8055_v43 = vunpack.i.h.bf16 %v11166_v24 }
 0x9d2   :  { %v11180_v59 = vpop.permute.xlu2 %8082 }
 0x9d3   :  { %v3217_v28 = vadd.f32 %v8380_v30, %v3216_v48 }
 0x9d4   :  { %v8153_v16 = vpop.permute.xlu0 %8152 }
 0x9d5   :  { %v8154_v61 = vunpack.i.l.bf16 %v8153_v16  ;;  %v11219_v5 = vsel %vm3218_vm10, %v8380_v30, %v3217_v28 }
 0x9da   :  { %v8098_v10 = vpop.permute.xlu2 %8097 }
 0x9db   :  { %v8100_v51 = vunpack.i.h.bf16 %v8098_v10  ;;  %v8099_v11 = vunpack.i.l.bf16 %v8098_v10 }
 0x9dc   :  { %v11212_v7 = vpop.permute.xlu0 %8167 }
 0x9dd   :  { %v4746_v62 = vsel %vm11896_vm4, %v8099_v11, %v8100_v51  ;;  %vm3226_vm4 = vcmask 24576  }
 0x9de   :  { %5733 = vmatpush.msra.mxu1 %v4746_v62 }
 0x9e2   :  { %v11196_v21 = vpop.permute.xlu2 %8112 }
 0x9e3   :  { %v8115_v19 = vunpack.i.h.bf16 %v11196_v21 }
 0x9e4   :  { %v8183_v22 = vpop.permute.xlu0 %8182 }
 0x9e5   :  { %v8185_v17 = vunpack.i.h.bf16 %v8183_v22  ;;  %v8184_v32 = vunpack.i.l.bf16 %v8183_v22 }
 0x9ea   :  { %v8128_v46 = vpop.permute.xlu2 %8127 }
 0x9eb   :  { %v8130_v12 = vunpack.i.h.bf16 %v8128_v46  ;;  %v8129_v34 = vunpack.i.l.bf16 %v8128_v46 }
 0x9ec   :  { %v8198_v50 = vpop.permute.xlu0 %8197 }
 0x9ed   :  { %v4715_v13 = vsel %vm11897_vm5, %v8129_v34, %v8130_v12  ;;  %v8200_v15 = vunpack.i.h.bf16 %v8198_v50  ;;  %v8199_v25 = vunpack.i.l.bf16 %v8198_v50  ;;  %vm11903_vm5 = vmmov %vm11894_vm2  ;;  %v8114_v50 = vunpack.i.l.bf16 %v11196_v21 }
 0x9ee   :  { %5734 = vmatpush.msra.mxu1 %v4715_v13 }
 0x9f0   :  { %v3206_v8 = vpop.f32.mrf.mxu3 }
 0x9f1   :  { %v3210_v53 = vsel %vm3209_vm6, %v3206_v8, 0.0  ;;  %v8165_v8 = vunpack.i.h.bf16 %v8163_v9 }
 0x9f2   :  { %3211 = vadd.xlane.f32.xlu1 %v3210_v53  ;;  %v5076_v53 = vsel %vm11893_vm0, %v8139_v42, %v8140_v41  ;;  %v11204_v2 = vpop.permute.xlu2 %8142  ;;  %vm11901_vm0 = vcmask 646144   ;;  %v4451_v41 = vsel %vm11902_vm3, %v8199_v25, %v8200_v15 }
 0x9f3   :  { %5781 = vmatpush.msra.mxu3 %v5076_v53  ;;  %v5045_v45 = vsel %vm11894_vm2, %v8164_v36, %v8165_v8  ;;  %v4847_v56 = vsel %vm11901_vm0, %v8184_v32, %v8185_v17  ;;  %v5323_v32 = vld [vmem:[%s11541_s1 + $0x38] sm:$0xff] }
 0x9f4   :  { %v8213_v9 = vpop.permute.xlu0 %8212 }
 0x9f5   :  { %5782 = vmatpush.msra.mxu3 %v5045_v45  ;;  %v8215_v10 = vunpack.i.h.bf16 %v8213_v9  ;;  %v8214_v8 = vunpack.i.l.bf16 %v8213_v9 }
 0x9f7   :  { %v5043_v36 = vsel %vm11903_vm5, %v8214_v8, %v8215_v10  ;;  %vm11908_vm5 = vcmask 531456   ;;  %v5335_v8 = vld [vmem:[%s11541_s1 + $0x98] sm:$0xff] }
 0x9fa   :  { %v8158_v38 = vpop.permute.xlu2 %8157 }
 0x9fb   :  { %v8159_v6 = vunpack.i.l.bf16 %v8158_v38 }
 0x9fc   :  { %v8228_v45 = vpop.permute.xlu0 %8227 }
 0x9fd   :  { %v8230_v23 = vunpack.i.h.bf16 %v8228_v45  ;;  %v8229_v46 = vunpack.i.l.bf16 %v8228_v45 }
 0xa02   :  { %v8173_v49 = vpop.permute.xlu2 %8172 }
 0xa03   :  { %v8175_v58 = vunpack.i.h.bf16 %v8173_v49  ;;  %v8174_v63 = vunpack.i.l.bf16 %v8173_v49 }
 0xa05   :  { %v4482_v55 = vsel %vm11900_vm8, %v8174_v63, %v8175_v58  ;;  %v8054_v58 = vunpack.i.l.bf16 %v11166_v24 }
 0xa06   :  { %5718 = vmatpush.msrb.mxu0 %v4482_v55  ;;  %v8085_v55 = vunpack.i.h.bf16 %v11180_v59 }
 0xa07   :  { %v5309_v24 = vsel %vm11908_vm5, %v8054_v58, %v8055_v43 }
 0xa08   :  { %5719 = vmatpush.msrb.mxu0 %v4451_v41 }
 0xa0a   :  { %v8188_v40 = vpop.permute.xlu2 %8187 }
 0xa0b   :  { %8177 = vrot.lane.b32.xlu1 %v8176_v60, %s11801_s15  ;;  %v8190_v52 = vunpack.i.h.bf16 %v8188_v40  ;;  %v8189_v26 = vunpack.i.l.bf16 %v8188_v40  ;;  %s11946_s15 = smov 118  }
 0xa0d   :  { %v5044_v37 = vsel %vm11894_vm2, %v8189_v26, %v8190_v52  ;;  %vm11907_vm2 = vmmov %vm11901_vm0  ;;  %v8144_v52 = vunpack.i.l.bf16 %v11204_v2 }
 0xa0e   :  { %5783 = vmatpush.msra.mxu3 %v5044_v37 }
 0xa10   :  { %5784 = vmatpush.msra.mxu3 %v5043_v36 }
 0xa12   :  { %v8203_v27 = vpop.permute.xlu2 %8202 }
 0xa13   :  { %8192 = vrot.lane.b32.xlu1 %v8176_v60, %s11803_s23  ;;  %v8155_v60 = vunpack.i.h.bf16 %v8153_v16  ;;  %v8205_v54 = vunpack.i.h.bf16 %v8203_v27  ;;  %v8204_v44 = vunpack.i.l.bf16 %v8203_v27  ;;  %v11234_v16 = vpop.permute.xlu0 %8242  ;;  %v8084_v27 = vunpack.i.l.bf16 %v11180_v59  ;;  %s11947_s23 = smov 116  }
 0xa15   :  { %v4714_v0 = vsel %vm11898_vm15, %v8154_v61, %v8155_v60 }
 0xa16   :  { %5735 = vmatpush.msra.mxu1 %v4714_v0 }
 0xa1b   :  { %8207 = vrot.lane.b32.xlu1 %v8206_v18, %s11822_s4  ;;  %v8258_v47 = vpop.permute.xlu0 %8257  ;;  %s11948_s4 = smov 115  }
 0xa1c   :  { %v8260_v15 = vunpack.i.h.bf16 %v8258_v47  ;;  %v8259_v25 = vunpack.i.l.bf16 %v8258_v47 }
 0xa23   :  { %8222 = vrot.lane.b32.xlu1 %v8206_v18, %s11755_s25  ;;  %v11245_v17 = vpop.permute.xlu0 %8272 }
 0xa2b   :  { %8237 = vrot.lane.b32.xlu1 %v10854_v3, %s11834_s20  ;;  %v8160_v3 = vunpack.i.h.bf16 %v8158_v38 }
 0xa2d   :  { %v4878_v20 = vsel %vm11899_vm7, %v8159_v6, %v8160_v3  ;;  %vm11904_vm7 = vcmask 687104  }
 0xa2e   :  { %5760 = vmatpush.msra.mxu2 %v4878_v20  ;;  %v4682_v62 = vsel %vm11904_vm7, %v8204_v44, %v8205_v54  ;;  %vm11905_vm8 = vmmov %vm11904_vm7  ;;  %v8288_v54 = vpop.permute.xlu0 %8287 }
 0xa2f   :  { %v4681_v38 = vsel %vm11905_vm8, %v8229_v46, %v8230_v23  ;;  %vm11906_vm10 = vmmov %vm11904_vm7  ;;  %vm11911_vm8 = vcmask 539648  }
 0xa30   :  { %5761 = vmatpush.msra.mxu2 %v4847_v56  ;;  %v8145_v56 = vunpack.i.h.bf16 %v11204_v2  ;;  %vm11910_vm7 = vmmov %vm11908_vm5 }
 0xa31   :  { %v5307_v10 = vsel %vm11910_vm7, %v8114_v50, %v8115_v19 }
 0xa32   :  { %v5276_v2 = vsel %vm11911_vm8, %v8144_v52, %v8145_v56 }
 0xa33   :  { %8252 = vrot.lane.b32.xlu1 %v8251_v1, %s11839_s24 }
 0xa3b   :  { %8267 = vrot.lane.b32.xlu1 %v8251_v1, %s11844_s18 }
 0xa43   :  { %8282 = vrot.lane.b32.xlu1 %v8251_v1, %s11850_s14 }
 0xa4b   :  { %8297 = vrot.lane.b32.xlu1 %v8251_v1, %s11761_s26 }
 0xa53   :  { %8312 = vrot.lane.b32.xlu1 %v8206_v18, %s11761_s26  ;;  %v11227_v18 = vpop.permute.xlu2 %8217 }
 0xa54   :  { %v8220_v44 = vunpack.i.h.bf16 %v11227_v18 }
 0xa5b   :  { %8327 = vrot.lane.b32.xlu1 %v8251_v1, %s11861_s19  ;;  %v8233_v53 = vpop.permute.xlu2 %8232 }
 0xa5c   :  { %v8235_v61 = vunpack.i.h.bf16 %v8233_v53  ;;  %v8234_v13 = vunpack.i.l.bf16 %v8233_v53 }
 0xa5e   :  { %v4845_v31 = vsel %vm11907_vm2, %v8234_v13, %v8235_v61  ;;  %vm11914_vm2 = vmmov %vm11911_vm8 }
 0xa63   :  { %8342 = vrot.lane.b32.xlu1 %v8251_v1, %s11762_s17  ;;  %v8248_v57 = vpop.permute.xlu2 %8247  ;;  %s11945_s17 = smov 117  }
 0xa64   :  { %v8250_v12 = vunpack.i.h.bf16 %v8248_v57  ;;  %v8249_v34 = vunpack.i.l.bf16 %v8248_v57  ;;  %v8219_v57 = vunpack.i.l.bf16 %v11227_v18 }
 0xa65   :  { %v3212_v39 = vpop.xlane.xlu1 %3211 }
 0xa66   :  { %v3220_v33 = vmul.f32 %v11219_v5, %v3212_v39  ;;  %v4680_v60 = vsel %vm11906_vm10, %v8249_v34, %v8250_v12  ;;  %v8170_v39 = vunpack.i.h.bf16 %v11212_v7  ;;  %vm11912_vm10 = vcmask 605184  }
 0xa67   :  { %v5243_v13 = vsel %vm2153_vm14, %v8219_v57, %v8220_v44  ;;  %v5326_v44 = vld [vmem:[%s11541_s1 + $0x50] sm:$0xff] }
 0xa68   :  { %v3224_v42 = vperm.slane %v3220_v33, %v11221_v35  ;;  %v8169_v33 = vunpack.i.l.bf16 %v11212_v7 }
 0xa6a   :  { %3227 = vst.msk [vmem:[#allocation10] sm:$0x1] %vm3226_vm4, %v3224_v42 }
 0xa6b   :  { %v11238_v6 = vpop.permute.xlu2 %8262 }
 0xa6c   :  { %v8265_v46 = vunpack.i.h.bf16 %v11238_v6 }
 0xa73   :  { %v8278_v40 = vpop.permute.xlu2 %8277 }
 0xa74   :  { %v8280_v37 = vunpack.i.h.bf16 %v8278_v40  ;;  %v8279_v41 = vunpack.i.l.bf16 %v8278_v40  ;;  %v8290_v40 = vunpack.i.h.bf16 %v8288_v54 }
 0xa7b   :  { %v8293_v26 = vpop.permute.xlu2 %8292 }
 0xa7c   :  { %v8295_v12 = vunpack.i.h.bf16 %v8293_v26 }
 0xa7d   :  { %v8178_v14 = vpop.permute.xlu1 %8177 }
 0xa7e   :  { %v8180_v51 = vunpack.i.h.bf16 %v8178_v14  ;;  %v8179_v11 = vunpack.i.l.bf16 %v8178_v14  ;;  %v5275_v14 = vsel %vm11914_vm2, %v8169_v33, %v8170_v39 }
 0xa80   :  { %v4713_v1 = vsel %vm11898_vm15, %v8179_v11, %v8180_v51  ;;  %vm11909_vm15 = vmmov %vm11908_vm5  ;;  %v8264_v51 = vunpack.i.l.bf16 %v11238_v6  ;;  %v8245_v11 = vunpack.i.h.bf16 %v11234_v16 }
 0xa81   :  { %5736 = vmatpush.msra.mxu1 %v4713_v1  ;;  %v5308_v59 = vsel %vm11909_vm15, %v8084_v27, %v8085_v55  ;;  %v8244_v1 = vunpack.i.l.bf16 %v11234_v16  ;;  %vm11916_vm5 = vmmov %vm11914_vm2  ;;  %vm11917_vm15 = vcmask 654336   ;;  %vm11923_vm2 = vcmask 703488  }
 0xa82   :  { %vm11918_vm7 = vmmov %vm11917_vm15 }
 0xa83   :  { %5737 = vmatpush.msra.mxu1 %v4682_v62  ;;  %v8275_v62 = vunpack.i.h.bf16 %v11245_v17  ;;  %v8308_v34 = vpop.permute.xlu2 %8307  ;;  %v5242_v47 = vsel %vm2153_vm14, %v8244_v1, %v8245_v11  ;;  %vm11919_vm8 = vmmov %vm11918_vm7 }
 0xa84   :  { %v8310_v58 = vunpack.i.h.bf16 %v8308_v34 }
 0xa85   :  { %v11236_v3 = vpop.permute.xlu1 %8192  ;;  %5738 = vmatpush.msra.mxu1 %v4681_v38  ;;  %v8274_v38 = vunpack.i.l.bf16 %v11245_v17 }
 0xa86   :  { %v8195_v36 = vunpack.i.h.bf16 %v11236_v3  ;;  %v8194_v53 = vunpack.i.l.bf16 %v11236_v3 }
 0xa87   :  { %5739 = vmatpush.msra.mxu1 %v4680_v60  ;;  %v8294_v60 = vunpack.i.l.bf16 %v8293_v26 }
 0xa88   :  { %v5274_v18 = vsel %vm11916_vm5, %v8194_v53, %v8195_v36 }
 0xa8d   :  { %v8208_v0 = vpop.permute.xlu1 %8207 }
 0xa8e   :  { %v8210_v20 = vunpack.i.h.bf16 %v8208_v0  ;;  %v8209_v49 = vunpack.i.l.bf16 %v8208_v0  ;;  %v5241_v0 = vsel %vm2153_vm14, %v8264_v51, %v8265_v46  ;;  %vm11920_vm14 = vcmask 695296  }
 0xa90   :  { %v4846_v30 = vsel %vm11901_vm0, %v8209_v49, %v8210_v20  ;;  %vm11913_vm0 = vmmov %vm11912_vm10  ;;  %v4813_v20 = vsel %vm11918_vm7, %v8274_v38, %v8275_v62  ;;  %v4812_v49 = vsel %vm11919_vm8, %v8294_v60, %v8295_v12  ;;  %v5338_v12 = vld [vmem:[%s11541_s1 + $0xb0] sm:$0xff]  ;;  %vm11927_vm7 = vcmask 564224  }
 0xa91   :  { %5762 = vmatpush.msra.mxu2 %v4846_v30  ;;  %v5011_v45 = vsel %vm11913_vm0, %v8259_v25, %v8260_v15  ;;  %v8303_v30 = vpop.permute.xlu0 %8302  ;;  %vm11928_vm8 = vmmov %vm11927_vm7 }
 0xa92   :  { %v8305_v56 = vunpack.i.h.bf16 %v8303_v30  ;;  %v8304_v52 = vunpack.i.l.bf16 %v8303_v30  ;;  %v5835_v30 = vld [vmem:[%s11543_s3 + $0x68] sm:$0xff] }
 0xa93   :  { %5763 = vmatpush.msra.mxu2 %v4845_v31  ;;  %v5325_v31 = vld [vmem:[%s11541_s1 + $0x48] sm:$0xff] }
 0xa95   :  { %v8223_v22 = vpop.permute.xlu1 %8222 }
 0xa96   :  { %v8225_v63 = vunpack.i.h.bf16 %v8223_v22  ;;  %v8224_v48 = vunpack.i.l.bf16 %v8223_v22  ;;  %v8289_v22 = vunpack.i.l.bf16 %v8288_v54 }
 0xa98   :  { %v4450_v28 = vsel %vm11902_vm3, %v8224_v48, %v8225_v63  ;;  %vm11915_vm3 = vmmov %vm11913_vm0  ;;  %v8309_v63 = vunpack.i.l.bf16 %v8308_v34 }
 0xa99   :  { %5720 = vmatpush.msrb.mxu0 %v4450_v28  ;;  %v5010_v23 = vsel %vm11915_vm3, %v8279_v41, %v8280_v37  ;;  %v8318_v15 = vpop.permute.xlu0 %8317  ;;  %vm11924_vm3 = vcmask 556032  }
 0xa9a   :  { %5721 = vmatmul.f32.vlgmr.msrb.gmra.mxu0 %v5323_v32  ;;  %v8323_v32 = vpop.permute.xlu2 %8322  ;;  %v8320_v39 = vunpack.i.h.bf16 %v8318_v15  ;;  %v8319_v33 = vunpack.i.l.bf16 %v8318_v15  ;;  %vm11925_vm5 = vmmov %vm11924_vm3 }
 0xa9b   :  { %5797 = vmatpush.msra.mxu0 %v5309_v24  ;;  %v8325_v55 = vunpack.i.h.bf16 %v8323_v32  ;;  %v8324_v27 = vunpack.i.l.bf16 %v8323_v32  ;;  %v5337_v24 = vld [vmem:[%s11541_s1 + $0xa8] sm:$0xff]  ;;  %v5829_v32 = vld [vmem:[%s11543_s3 + $0x38] sm:$0xff] }
 0xa9d   :  { %5798 = vmatpush.msra.mxu0 %v5308_v59  ;;  %v8238_v21 = vpop.permute.xlu1 %8237  ;;  %v4616_v26 = vsel %vm11923_vm2, %v8324_v27, %v8325_v55  ;;  %v5324_v59 = vld [vmem:[%s11541_s1 + $0x40] sm:$0xff]  ;;  %v5828_v55 = vld [vmem:[%s11543_s3 + $0x30] sm:$0xff]  ;;  %v5827_v27 = vld [vmem:[%s11543_s3 + $0x28] sm:$0xff] }
 0xa9e   :  { %v8240_v42 = vunpack.i.h.bf16 %v8238_v21  ;;  %v8239_v9 = vunpack.i.l.bf16 %v8238_v21 }
 0xa9f   :  { %5799 = vmatpush.msra.mxu0 %v5307_v10 }
 0xaa0   :  { %v5012_v7 = vsel %vm11912_vm10, %v8239_v9, %v8240_v42  ;;  %vm11921_vm10 = vmmov %vm11920_vm14  ;;  %v5209_v42 = vsel %vm11925_vm5, %v8304_v52, %v8305_v56  ;;  %v5825_v52 = vld [vmem:[%s11543_s3 + $0x18] sm:$0xff] }
 0xaa1   :  { %5800 = vmatpush.msra.mxu0 %v5276_v2  ;;  %5785 = vmatpush.msra.mxu3 %v5012_v7  ;;  %v4648_v19 = vsel %vm11921_vm10, %v8289_v22, %v8290_v40  ;;  %vm11922_vm0 = vmmov %vm11921_vm10  ;;  %v5336_v2 = vld [vmem:[%s11541_s1 + $0xa0] sm:$0xff]  ;;  %v5833_v40 = vld [vmem:[%s11543_s3 + $0x58] sm:$0xff] }
 0xaa2   :  { %5724 = vmatmul.f32.gmra.mxu0 %v5335_v8  ;;  %v4647_v50 = vsel %vm11922_vm0, %v8309_v63, %v8310_v58  ;;  %v8338_v51 = vpop.permute.xlu2 %8337  ;;  %v5832_v22 = vld [vmem:[%s11543_s3 + $0x50] sm:$0xff]  ;;  %v5831_v58 = vld [vmem:[%s11543_s3 + $0x48] sm:$0xff]  ;;  %v5830_v63 = vld [vmem:[%s11543_s3 + $0x40] sm:$0xff] }
 0xaa3   :  { %5801 = vmatpush.msra.mxu0 %v5275_v14  ;;  %5786 = vmatpush.msra.mxu3 %v5011_v45  ;;  %v8333_v14 = vpop.permute.xlu0 %8332  ;;  %v8340_v1 = vunpack.i.h.bf16 %v8338_v51  ;;  %v8339_v62 = vunpack.i.l.bf16 %v8338_v51 }
 0xaa4   :  { %v8334_v46 = vunpack.i.l.bf16 %v8333_v14 }
 0xaa5   :  { %5802 = vmatpush.msra.mxu0 %v5274_v18  ;;  %v8253_v3 = vpop.permute.xlu1 %8252  ;;  %5787 = vmatpush.msra.mxu3 %v5010_v23  ;;  %v8335_v23 = vunpack.i.h.bf16 %v8333_v14 }
 0xaa6   :  { %v8255_v61 = vunpack.i.h.bf16 %v8253_v3  ;;  %v8254_v6 = vunpack.i.l.bf16 %v8253_v3 }
 0xaa7   :  { %5803 = vmatpush.msra.mxu0 %v5243_v13  ;;  %v5176_v3 = vsel %vm11928_vm8, %v8334_v46, %v8335_v23 }
 0xaa8   :  { %v4814_v16 = vsel %vm11917_vm15, %v8254_v6, %v8255_v61  ;;  %vm11926_vm15 = vmmov %vm11924_vm3 }
 0xaa9   :  { %5804 = vmatpush.msra.mxu0 %v5242_v47  ;;  %5764 = vmatpush.msra.mxu2 %v4814_v16  ;;  %v5208_v9 = vsel %vm11926_vm15, %v8319_v33, %v8320_v39  ;;  %v5327_v47 = vld [vmem:[%s11541_s1 + $0x58] sm:$0xff]  ;;  %v5823_v39 = vld [vmem:[%s11543_s3 + $0x8] sm:$0xff] }
 0xaab   :  { %5805 = vmatpush.msra.mxu0 %v5241_v0  ;;  %5765 = vmatpush.msra.mxu2 %v4813_v20  ;;  %v5339_v0 = vld [vmem:[%s11541_s1 + $0xb8] sm:$0xff] }
 0xaac   :  { %v5837_v20 = vld [vmem:[%s11543_s3 + $0x78] sm:$0xff] }
 0xaad   :  { %v8268_v43 = vpop.permute.xlu1 %8267  ;;  %5766 = vmatpush.msra.mxu2 %v4812_v49  ;;  %v5836_v49 = vld [vmem:[%s11543_s3 + $0x70] sm:$0xff] }
 0xaae   :  { %v8270_v48 = vunpack.i.h.bf16 %v8268_v43  ;;  %v8269_v17 = vunpack.i.l.bf16 %v8268_v43  ;;  %5767 = vmatmul.f32.vlgmr.msra.gmra.mxu2 %v5325_v31  ;;  %v5834_v31 = vld [vmem:[%s11543_s3 + $0x60] sm:$0xff]  ;;  %v5561_v43 = vpop.f32.mrf.mxu1 }
 0xab0   :  { %v4649_v28 = vsel %vm11920_vm14, %v8269_v17, %v8270_v48  ;;  %v5584_v48 = vpop.f32.mrf.mxu2  ;;  %v5607_v17 = vpop.f32.mrf.mxu3 }
 0xab1   :  { %5740 = vmatpush.msra.mxu1 %v4649_v28 }
 0xab3   :  { %5741 = vmatpush.msra.mxu1 %v4648_v19  ;;  %v5826_v19 = vld [vmem:[%s11543_s3 + $0x20] sm:$0xff] }
 0xab5   :  { %v8283_v25 = vpop.permute.xlu1 %8282  ;;  %5742 = vmatpush.msra.mxu1 %v4647_v50  ;;  %v5630_v50 = vpop.f32.mrf.mxu0 }
 0xab6   :  { %v8285_v37 = vunpack.i.h.bf16 %v8283_v25  ;;  %v8284_v21 = vunpack.i.l.bf16 %v8283_v25  ;;  %5770 = vmatmul.f32.gmra.mxu2 %v5337_v24  ;;  %v5564_v28 = vpop.f32.mrf.mxu1  ;;  %v5537_v24 = vpop.permute.xlu0 %5536  ;;  %v5824_v25 = vld [vmem:[%s11543_s3 + $0x10] sm:$0xff] }
 0xab7   :  { %5743 = vmatpush.msra.mxu1 %v4616_v26  ;;  %v5562_v26 = vadd.f32 %v5561_v43, %v5537_v24  ;;  %v11939_v24 = vmov 13  }
 0xab8   :  { %5744 = vmatmul.f32.vlgmr.msra.gmra.mxu1 %v5324_v59  ;;  %v5210_v41 = vsel %vm11924_vm3, %v8284_v21, %v8285_v37  ;;  %v5587_v56 = vpop.f32.mrf.mxu2  ;;  %v5610_v15 = vpop.f32.mrf.mxu3  ;;  %v5822_v37 = vld [vmem:[%s11543_s3] sm:$0xff]  ;;  %s11943_s3 = smov 121  }
 0xab9   :  { %5806 = vmatpush.msra.mxu0 %v5210_v41  ;;  %5838 = vmatpush.msrb.mxu1 %v5837_v20  ;;  %v5585_v33 = vadd.f32 %v5584_v48, %v5562_v26  ;;  %v5542_v41 = vpop.permute.xlu2 %5541  ;;  %v11932_v48 = vmov 5   ;;  %v11942_v26 = vmov 0  }
 0xabb   :  { %5807 = vmatpush.msra.mxu0 %v5209_v42  ;;  %5839 = vmatpush.msrb.mxu1 %v5836_v49 }
 0xabd   :  { %v8298_v10 = vpop.permute.xlu1 %8297  ;;  %5808 = vmatpush.msra.mxu0 %v5208_v9  ;;  %5840 = vmatpush.msrb.mxu1 %v5835_v30  ;;  %v5633_v42 = vpop.f32.mrf.mxu0  ;;  %v5608_v9 = vadd.f32 %v5607_v17, %v5585_v33  ;;  %v11931_v30 = vmov 7   ;;  %v11933_v17 = vmov 9  }
 0xabe   :  { %v8300_v8 = vunpack.i.h.bf16 %v8298_v10  ;;  %v8299_v36 = vunpack.i.l.bf16 %v8298_v10  ;;  %v5653_v59 = vpop.f32.mrf.mxu1 }
 0xabf   :  { %5841 = vmatpush.msrb.mxu1 %v5834_v31 }
 0xac0   :  { %5747 = vmatmul.f32.gmra.mxu1 %v5336_v2  ;;  %v4979_v53 = vsel %vm1881_vm11, %v8299_v36, %v8300_v8  ;;  %v5676_v21 = vpop.f32.mrf.mxu2  ;;  %v5699_v10 = vpop.f32.mrf.mxu3  ;;  %v5565_v2 = vadd.f32 %v5564_v28, %v5542_v41  ;;  %v5631_v8 = vadd.f32 %v5630_v50, %v5608_v9  ;;  %v11936_v28 = vmov 8  }
 0xac1   :  { %5788 = vmatpush.msra.mxu3 %v4979_v53  ;;  %5842 = vmatpush.msrb.mxu1 %v5833_v40  ;;  %v11938_v50 = vmov 11  }
 0xac2   :  { %v5588_v53 = vadd.f32 %v5587_v56, %v5565_v2  ;;  %v11940_v56 = vmov 14  }
 0xac3   :  { %5843 = vmatpush.msrb.mxu1 %v5832_v22 }
 0xac5   :  { %v8313_v7 = vpop.permute.xlu1 %8312  ;;  %5844 = vmatpush.msrb.mxu1 %v5831_v58 }
 0xac6   :  { %v8315_v45 = vunpack.i.h.bf16 %v8313_v7  ;;  %v8314_v54 = vunpack.i.l.bf16 %v8313_v7  ;;  %v5656_v36 = vpop.f32.mrf.mxu1  ;;  %v11372_v7 = vld [vmem:[#allocation7] sm:$0xff] }
 0xac7   :  { %5845 = vmatpush.msrb.mxu1 %v5830_v63  ;;  %5890 = vperm.xlu1 %8347, %v11372_v7  }
 0xac8   :  { %v4978_v57 = vsel %vm1881_vm11, %v8314_v54, %v8315_v45  ;;  %vm11929_vm11 = vmmov %vm11927_vm7  ;;  %v11374_v45 = vld [vmem:[#allocation7 + $0x8] sm:$0xff]  ;;  %v5679_v14 = vpop.f32.mrf.mxu2  ;;  %v5702_v23 = vpop.f32.mrf.mxu3 }
 0xac9   :  { %5789 = vmatpush.msra.mxu3 %v4978_v57  ;;  %v5175_v60 = vsel %vm11929_vm11, %v8339_v62, %v8340_v1  ;;  %5846 = vmatpush.msrb.mxu1 %v5829_v32  ;;  %v5654_v57 = vadd.f32 %v5653_v59, %v5631_v8 }
 0xaca   :  { %5790 = vmatmul.f32.vlgmr.msra.gmra.mxu3 %v5326_v44  ;;  %5894 = vperm.xlu2 %8346, %v11374_v45   ;;  %v5611_v44 = vadd.f32 %v5610_v15, %v5588_v53 }
 0xacb   :  { %5847 = vmatpush.msrb.mxu1 %v5828_v55  ;;  %5914 = vperm.xlu0 %8348, %v11374_v45   ;;  %v5677_v51 = vadd.f32 %v5676_v21, %v5654_v57  ;;  %v11934_v55 = vmov 6  }
 0xacc   :  { %v5634_v46 = vadd.f32 %v5633_v42, %v5611_v44 }
 0xacd   :  { %v8328_v11 = vpop.permute.xlu1 %8327  ;;  %5848 = vmatpush.msrb.mxu1 %v5827_v27  ;;  %v5700_v1 = vadd.f32 %v5699_v10, %v5677_v51  ;;  %v11935_v27 = vmov 12  }
 0xace   :  { %v8330_v38 = vunpack.i.h.bf16 %v8328_v11  ;;  %v8329_v18 = vunpack.i.l.bf16 %v8328_v11  ;;  %v5657_v62 = vadd.f32 %v5656_v36, %v5634_v46 }
 0xacf   :  { %5849 = vmatpush.msrb.mxu1 %v5826_v19  ;;  %8350 = vset.pattern.permute.xlu1 %v8559_v4  ;;  %v11937_v19 = vmov 10  }
 0xad0   :  { %v5177_v34 = vsel %vm11927_vm7, %v8329_v18, %v8330_v38  ;;  %5934 = vperm.xlu1 %8350, %v11374_v45  }
 0xad1   :  { %5809 = vmatpush.msra.mxu0 %v5177_v34  ;;  %5850 = vmatpush.msrb.mxu1 %v5825_v52  ;;  %v11930_v34 = vmov 4   ;;  %v11941_v52 = vmov 15  }
 0xad2   :  { %5793 = vmatmul.f32.gmra.mxu3 %v5338_v12  ;;  %8349 = vset.pattern.permute.xlu2 %v8554_v29 }
 0xad3   :  { %5810 = vmatpush.msra.mxu0 %v5176_v3  ;;  %5851 = vmatpush.msrb.mxu1 %v5824_v25 }
 0xad4   :  { %5910 = vperm.xlu2 %8349, %v11372_v7   ;;  %8353 = vset.pattern.permute.xlu0 %v11930_v34 }
 0xad5   :  { %v8343_v61 = vpop.permute.xlu1 %8342  ;;  %5811 = vmatpush.msra.mxu0 %v5175_v60  ;;  %5852 = vmatpush.msrb.mxu1 %v5823_v39 }
 0xad6   :  { %v8345_v6 = vunpack.i.h.bf16 %v8343_v61  ;;  %v8344_v13 = vunpack.i.l.bf16 %v8343_v61  ;;  %5950 = vperm.xlu0 %8353, %v11372_v7   ;;  %v5680_v61 = vadd.f32 %v5679_v14, %v5657_v62 }
 0xad7   :  { %5853 = vmatpush.msrb.mxu1 %v5822_v37 }
 0xad8   :  { %v5144_v16 = vsel %vm2051_vm9, %v8344_v13, %v8345_v6  ;;  %v5703_v6 = vadd.f32 %v5702_v23, %v5680_v61  ;;  %8352 = vset.pattern.permute.xlu1 %v11930_v34 }
 0xad9   :  { %5812 = vmatpush.msra.mxu0 %v5144_v16  ;;  %5954 = vperm.xlu1 %8352, %v11374_v45  }
 0xada   :  { %5813 = vmatmul.f32.vlgmr.msra.gmra.mxu0 %v5327_v47 }
 0xadc   :  { %8351 = vset.pattern.permute.xlu2 %v8559_v4 }
 0xadd   :  { %5930 = vperm.xlu2 %8351, %v11372_v7  }
 0xade   :  { %8358 = vset.pattern.permute.xlu0 %v11931_v30 }
 0xadf   :  { %6014 = vperm.xlu0 %8358, %v11374_v45  }
 0xae1   :  { %8355 = vset.pattern.permute.xlu1 %v11932_v48 }
 0xae2   :  { %5816 = vmatmul.f32.gmra.mxu0 %v5339_v0  ;;  %5970 = vperm.xlu1 %8355, %v11372_v7  }
 0xae5   :  { %8354 = vset.pattern.permute.xlu2 %v11932_v48 }
 0xae6   :  { %5974 = vperm.xlu2 %8354, %v11374_v45  }
 0xae7   :  { %8363 = vset.pattern.permute.xlu0 %v11933_v17 }
 0xae8   :  { %6050 = vperm.xlu0 %8363, %v11372_v7  }
 0xaea   :  { %8357 = vset.pattern.permute.xlu1 %v11934_v55 }
 0xaeb   :  { %5990 = vperm.xlu1 %8357, %v11372_v7  }
 0xaee   :  { %8356 = vset.pattern.permute.xlu2 %v11934_v55 }
 0xaef   :  { %5994 = vperm.xlu2 %8356, %v11374_v45  }
 0xaf0   :  { %8368 = vset.pattern.permute.xlu0 %v11935_v27 }
 0xaf3   :  { %8360 = vset.pattern.permute.xlu1 %v11936_v28 }
 0xaf4   :  { %6034 = vperm.xlu1 %8360, %v11374_v45  }
 0xaf7   :  { %8359 = vset.pattern.permute.xlu2 %v11931_v30 }
 0xaf8   :  { %6010 = vperm.xlu2 %8359, %v11372_v7  }
 0xafc   :  { %8362 = vset.pattern.permute.xlu1 %v11933_v17 }
 0xafd   :  { %6054 = vperm.xlu1 %8362, %v11374_v45  }
 0xb00   :  { %8361 = vset.pattern.permute.xlu2 %v11936_v28 }
 0xb01   :  { %6030 = vperm.xlu2 %8361, %v11372_v7  }
 0xb05   :  { %8365 = vset.pattern.permute.xlu1 %v11937_v19 }
 0xb06   :  { %6070 = vperm.xlu1 %8365, %v11372_v7  }
 0xb09   :  { %8364 = vset.pattern.permute.xlu2 %v11937_v19 }
 0xb0a   :  { %6074 = vperm.xlu2 %8364, %v11374_v45  }
 0xb0e   :  { %8367 = vset.pattern.permute.xlu1 %v11938_v50 }
 0xb0f   :  { %6090 = vperm.xlu1 %8367, %v11372_v7  }
 0xb12   :  { %8366 = vset.pattern.permute.xlu2 %v11938_v50 }
 0xb13   :  { %6094 = vperm.xlu2 %8366, %v11374_v45  }
 0xb17   :  { %v5722_v54 = vpop.f32.mrf.mxu0  ;;  %8370 = vset.pattern.permute.xlu1 %v11939_v24 }
 0xb18   :  { %v5723_v38 = vadd.f32 %v5722_v54, %v5700_v1  ;;  %6134 = vperm.xlu1 %8370, %v11374_v45  }
 0xb1b   :  { %8369 = vset.pattern.permute.xlu2 %v11935_v27 }
 0xb1c   :  { %6110 = vperm.xlu2 %8369, %v11372_v7  }
 0xb1f   :  { %v5725_v18 = vpop.f32.mrf.mxu0 }
 0xb20   :  { %v5726_v16 = vadd.f32 %v5725_v18, %v5703_v6  ;;  %8372 = vset.pattern.permute.xlu1 %v11940_v56 }
 0xb21   :  { %6154 = vperm.xlu1 %8372, %v11374_v45  }
 0xb24   :  { %8371 = vset.pattern.permute.xlu2 %v11939_v24  ;;  %v5895_v41 = vpop.permute.xlu2 %5894 }
 0xb25   :  { %6130 = vperm.xlu2 %8371, %v11372_v7  }
 0xb29   :  { %8375 = vset.pattern.permute.xlu1 %v11941_v52 }
 0xb2d   :  { %8374 = vset.pattern.permute.xlu2 %v11941_v52 }
 0xb2e   :  { %6174 = vperm.xlu2 %8374, %v11374_v45   ;;  %v5911_v9 = vpop.permute.xlu2 %5910 }
 0xb31   :  { %v5768_v12 = vpop.f32.mrf.mxu2 }
 0xb35   :  { %v5745_v11 = vpop.f32.mrf.mxu1 }
 0xb36   :  { %v5746_v3 = vadd.f32 %v5745_v11, %v5723_v38  ;;  %8376 = vset.pattern.permute.xlu2 %v11942_v26 }
 0xb37   :  { %5882 = vperm.xlu2 %8376, %v11374_v45   ;;  %v5931_v2 = vpop.permute.xlu2 %5930 }
 0xb38   :  { %v5769_v13 = vadd.f32 %v5768_v12, %v5746_v3 }
 0xb39   :  { %v5771_v31 = vpop.f32.mrf.mxu2  ;;  %v5891_v59 = vpop.permute.xlu1 %5890 }
 0xb3d   :  { %v5748_v47 = vpop.f32.mrf.mxu1  ;;  %v5915_v8 = vpop.permute.xlu0 %5914 }
 0xb3e   :  { %v5749_v20 = vadd.f32 %v5748_v47, %v5726_v16 }
 0xb40   :  { %v5772_v43 = vadd.f32 %v5771_v31, %v5749_v20  ;;  %v5975_v53 = vpop.permute.xlu2 %5974 }
 0xb42   :  { %v11437_v39 = vpop.permute.xlu1 %5934 }
 0xb49   :  { %v5995_v44 = vpop.permute.xlu2 %5994 }
 0xb4b   :  { %v5955_v33 = vpop.permute.xlu1 %5954 }
 0xb4d   :  { %v5791_v60 = vpop.f32.mrf.mxu3 }
 0xb4e   :  { %v5792_v29 = vadd.f32 %v5791_v60, %v5769_v13 }
 0xb52   :  { %v6011_v14 = vpop.permute.xlu2 %6010 }
 0xb54   :  { %v5971_v37 = vpop.permute.xlu1 %5970 }
 0xb55   :  { %v5794_v22 = vpop.f32.mrf.mxu3 }
 0xb56   :  { %v5795_v58 = vadd.f32 %v5794_v22, %v5772_v43 }
 0xb57   :  { %v5814_v0 = vpop.f32.mrf.mxu0 }
 0xb58   :  { %v5815_v49 = vadd.f32 %v5814_v0, %v5792_v29 }
 0xb5a   :  { %v5820_v40 = vmax.f32 %v5815_v49, 0.0 }
 0xb5b   :  { %v6031_v51 = vpop.permute.xlu2 %6030 }
 0xb5c   :  { %5854 = vmatmul.f32.vlgmr.msrb.gmra.mxu1 %v5820_v40 }
 0xb5d   :  { %v5991_v21 = vpop.permute.xlu1 %5990 }
 0xb5f   :  { %v5817_v63 = vpop.f32.mrf.mxu0 }
 0xb60   :  { %v5818_v4 = vadd.f32 %v5817_v63, %v5795_v58 }
 0xb62   :  { %v5821_v32 = vmax.f32 %v5818_v4, 0.0 }
 0xb64   :  { %5857 = vmatmul.f32.gmra.mxu1 %v5821_v32  ;;  %v6075_v34 = vpop.permute.xlu2 %6074 }
 0xb66   :  { %v11442_v42 = vpop.permute.xlu1 %6034 }
 0xb6d   :  { %v6095_v6 = vpop.permute.xlu2 %6094 }
 0xb6f   :  { %v11444_v10 = vpop.permute.xlu1 %6054 }
 0xb76   :  { %v6111_v29 = vpop.permute.xlu2 %6110 }
 0xb78   :  { %v6071_v36 = vpop.permute.xlu1 %6070 }
 0xb7f   :  { %v6131_v31 = vpop.permute.xlu2 %6130 }
 0xb81   :  { %v6091_v54 = vpop.permute.xlu1 %6090 }
 0xbd9   :  { %v5855_v15 = vpop.f32.mrf.mxu1 }
 0xbda   :  { %5863 = vrot.lane.b32.xlu0 %v5855_v15, %s8557_s22  ;;  %v6175_v15 = vpop.permute.xlu2 %6174 }
 0xbe1   :  { %v5858_v25 = vpop.f32.mrf.mxu1 }
 0xbe2   :  { %6114 = vperm.xlu0 %8368, %v11374_v45   ;;  %5865 = vrot.lane.b32.xlu1 %v5858_v25, %s8557_s22  ;;  %v5951_v45 = vpop.permute.xlu0 %5950  ;;  %s11944_s22 = smov 119  }
 0xbea   :  { %8373 = vset.pattern.permute.xlu0 %v11940_v56  ;;  %6170 = vperm.xlu1 %8375, %v11372_v7   ;;  %v6015_v57 = vpop.permute.xlu0 %6014 }
 0xbeb   :  { %6150 = vperm.xlu0 %8373, %v11372_v7  }
 0xbf2   :  { %8377 = vset.pattern.permute.xlu1 %v11942_v26  ;;  %v6051_v23 = vpop.permute.xlu0 %6050 }
 0xbf3   :  { %5877 = vperm.xlu1 %8377, %v11372_v7   ;;  %8378 = vset.pattern.permute.xlu0 %v11942_v26  ;;  %v11446_v7 = vpop.permute.xlu1 %6134 }
 0xbfb   :  { %v11448_v46 = vpop.permute.xlu1 %6154 }
 0xc4c   :  { %v5864_v11 = vpop.permute.xlu0 %5863 }
 0xc4d   :  { %5869 = vst.msk [vmem:[#allocation3] sm:$0xff] %vm2784_vm13, %v5864_v11 }
 0xc54   :  { %v11451_v1 = vld [vmem:[#allocation3] sm:$0xff]  ;;  %v5866_v62 = vpop.permute.xlu1 %5865  ;;  %v6115_v19 = vpop.permute.xlu0 %6114 }
 0xc55   :  { %5870 = vst.msk [vmem:[#allocation3 + $0x8] sm:$0xff] %vm2784_vm13, %v5866_v62  ;;  %v5917_v38 = vmul.f32 %v5911_v9, %v11451_v1  ;;  %v5897_v18 = vmul.f32 %v5891_v59, %v11451_v1  ;;  %v5937_v12 = vmul.f32 %v5931_v2, %v11451_v1  ;;  %v5977_v3 = vmul.f32 %v5971_v37, %v11451_v1  ;;  %v5883_v37 = vpop.permute.xlu2 %5882 }
 0xc56   :  { %v5957_v60 = vmul.f32 %v5951_v45, %v11451_v1  ;;  %v5997_v61 = vmul.f32 %v5991_v21, %v11451_v1  ;;  %v6037_v13 = vmul.f32 %v6031_v51, %v11451_v1  ;;  %v6017_v47 = vmul.f32 %v6011_v14, %v11451_v1 }
 0xc57   :  { %5921 = vrot.lane.b32.xlu0 %v5917_v38, %s8491_s5  ;;  %5901 = vrot.lane.b32.xlu2 %v5897_v18, %s8490_s0  ;;  %v6057_v16 = vmul.f32 %v6051_v23, %v11451_v1  ;;  %v6097_v0 = vmul.f32 %v6091_v54, %v11451_v1  ;;  %v6077_v20 = vmul.f32 %v6071_v36, %v11451_v1 }
 0xc58   :  { %5941 = vrot.lane.b32.xlu1 %v5937_v12, %s8492_s27  ;;  %v6117_v49 = vmul.f32 %v6111_v29, %v11451_v1  ;;  %v6137_v40 = vmul.f32 %v6131_v31, %v11451_v1 }
 0xc5c   :  { %v5874_v30 = vld [vmem:[#allocation3 + $0x8] sm:$0xff]  ;;  %v6171_v26 = vpop.permute.xlu1 %6170 }
 0xc5d   :  { %v5898_v22 = vmul.f32 %v5895_v41, %v5874_v30  ;;  %v5918_v43 = vmul.f32 %v5915_v8, %v5874_v30  ;;  %v5938_v58 = vmul.f32 %v11437_v39, %v5874_v30  ;;  %v5958_v63 = vmul.f32 %v5955_v33, %v5874_v30  ;;  %v6151_v52 = vpop.permute.xlu0 %6150  ;;  %v6192_v33 = vld [vmem:[%s11546_s6 + $0x8] sm:$0xff] }
 0xc5e   :  { %v5978_v48 = vmul.f32 %v5975_v53, %v5874_v30  ;;  %v5998_v4 = vmul.f32 %v5995_v44, %v5874_v30  ;;  %v6018_v17 = vmul.f32 %v6015_v57, %v5874_v30  ;;  %v6038_v32 = vmul.f32 %v11442_v42, %v5874_v30 }
 0xc5f   :  { %5981 = vrot.lane.b32.xlu0 %v5977_v3, %s8494_s29  ;;  %5961 = vrot.lane.b32.xlu2 %v5957_v60, %s8493_s28  ;;  %v6058_v55 = vmul.f32 %v11444_v10, %v5874_v30  ;;  %v6078_v27 = vmul.f32 %v6075_v34, %v5874_v30  ;;  %v6098_v28 = vmul.f32 %v6095_v6, %v5874_v30 }
 0xc60   :  { %6001 = vrot.lane.b32.xlu1 %v5997_v61, %s8495_s30  ;;  %v6118_v50 = vmul.f32 %v6115_v19, %v5874_v30  ;;  %v6138_v24 = vmul.f32 %v11446_v7, %v5874_v30  ;;  %v6158_v56 = vmul.f32 %v11448_v46, %v5874_v30  ;;  %v6157_v25 = vmul.f32 %v6151_v52, %v11451_v1 }
 0xc61   :  { %v6178_v59 = vmul.f32 %v6175_v15, %v5874_v30  ;;  %v6177_v39 = vmul.f32 %v6171_v26, %v11451_v1  ;;  %v5886_v46 = vmul.f32 %v5883_v37, %v5874_v30 }
 0xc65   :  { %v5878_v42 = vpop.permute.xlu1 %5877 }
 0xc66   :  { %v5885_v23 = vmul.f32 %v5878_v42, %v11451_v1 }
 0xc67   :  { %6041 = vrot.lane.b32.xlu0 %v6037_v13, %s8497_s11  ;;  %6021 = vrot.lane.b32.xlu2 %v6017_v47, %s11943_s3 }
 0xc68   :  { %6061 = vrot.lane.b32.xlu1 %v6057_v16, %s11944_s22 }
 0xc6f   :  { %6101 = vrot.lane.b32.xlu0 %v6097_v0, %s11945_s17  ;;  %6081 = vrot.lane.b32.xlu2 %v6077_v20, %s11946_s15 }
 0xc70   :  { %6121 = vrot.lane.b32.xlu1 %v6117_v49, %s11947_s23 }
 0xc77   :  { %6141 = vrot.lane.b32.xlu2 %v6137_v40, %s11948_s4  ;;  %5903 = vrot.lane.b32.xlu0 %v5898_v22, %s8490_s0  ;;  %s11949_s0 = smov 114  }
 0xc78   :  { %5923 = vrot.lane.b32.xlu1 %v5918_v43, %s8491_s5 }
 0xc7f   :  { %5943 = vrot.lane.b32.xlu2 %v5938_v58, %s8492_s27  ;;  %5963 = vrot.lane.b32.xlu0 %v5958_v63, %s8493_s28  ;;  %v6191_v58 = vld [vmem:[%s11546_s6] sm:$0xff]  ;;  %v6237_v63 = vld [vmem:[%s11547_s7 + $0x18] sm:$0xff] }
 0xc80   :  { %5983 = vrot.lane.b32.xlu1 %v5978_v48, %s8494_s29  ;;  %v6236_v48 = vld [vmem:[%s11547_s7 + $0x10] sm:$0xff]  ;;  %6256 = vmatpush.msrb.mxu3 %v6237_v63 }
 0xc82   :  { %6257 = vmatpush.msrb.mxu3 %v6236_v48 }
 0xc87   :  { %6003 = vrot.lane.b32.xlu2 %v5998_v4, %s8495_s30  ;;  %6023 = vrot.lane.b32.xlu0 %v6018_v17, %s11943_s3 }
 0xc88   :  { %6043 = vrot.lane.b32.xlu1 %v6038_v32, %s8497_s11 }
 0xc8f   :  { %6063 = vrot.lane.b32.xlu2 %v6058_v55, %s11944_s22  ;;  %6083 = vrot.lane.b32.xlu0 %v6078_v27, %s11946_s15 }
 0xc90   :  { %6103 = vrot.lane.b32.xlu1 %v6098_v28, %s11945_s17 }
 0xc97   :  { %6123 = vrot.lane.b32.xlu2 %v6118_v50, %s11947_s23  ;;  %6143 = vrot.lane.b32.xlu0 %v6138_v24, %s11948_s4 }
 0xc98   :  { %6163 = vrot.lane.b32.xlu1 %v6158_v56, %s11949_s0 }
 0xc9f   :  { %6183 = vrot.lane.b32.xlu2 %v6178_v59, %s11738_s21  ;;  %6161 = vrot.lane.b32.xlu0 %v6157_v25, %s11949_s0 }
 0xca0   :  { %6181 = vrot.lane.b32.xlu1 %v6177_v39, %s11738_s21 }
 0xca7   :  { %6200 = vperm.xlu2 %8376, %v6192_v33   ;;  %6195 = vperm.xlu0 %8378, %v6191_v58  }
 0xcb1   :  { %v5902_v21 = vpop.permute.xlu2 %5901 }
 0xcb2   :  { %v5907_v51 = vadd.f32 %v5902_v21, %v5885_v23 }
 0xcb9   :  { %v5962_v41 = vpop.permute.xlu2 %5961 }
 0xcc1   :  { %v6022_v9 = vpop.permute.xlu2 %6021 }
 0xcc9   :  { %v5922_v10 = vpop.permute.xlu0 %5921  ;;  %v6082_v8 = vpop.permute.xlu2 %6081 }
 0xcca   :  { %v5942_v2 = vpop.permute.xlu1 %5941  ;;  %v5927_v62 = vadd.f32 %v5922_v10, %v5907_v51  ;;  %v6189_v10 = vld [vmem:[#allocation9] sm:$0xff] }
 0xccc   :  { %v5947_v34 = vadd.f32 %v5942_v2, %v5927_v62  ;;  %v6190_v2 = vld [vmem:[#allocation9 + $0x8] sm:$0xff] }
 0xcce   :  { %v5967_v6 = vadd.f32 %v5962_v41, %v5947_v34 }
 0xcd1   :  { %v5982_v36 = vpop.permute.xlu0 %5981  ;;  %v6142_v44 = vpop.permute.xlu2 %6141 }
 0xcd2   :  { %v6002_v53 = vpop.permute.xlu1 %6001  ;;  %v5987_v16 = vadd.f32 %v5982_v36, %v5967_v6  ;;  %v6234_v36 = vld [vmem:[%s11547_s7] sm:$0xff] }
 0xcd4   :  { %v6007_v0 = vadd.f32 %v6002_v53, %v5987_v16 }
 0xcd6   :  { %v6027_v40 = vadd.f32 %v6022_v9, %v6007_v0 }
 0xcd9   :  { %v6042_v45 = vpop.permute.xlu0 %6041  ;;  %v5944_v14 = vpop.permute.xlu2 %5943 }
 0xcda   :  { %v6062_v54 = vpop.permute.xlu1 %6061  ;;  %v6047_v43 = vadd.f32 %v6042_v45, %v6027_v40 }
 0xcdc   :  { %v6067_v32 = vadd.f32 %v6062_v54, %v6047_v43 }
 0xcde   :  { %v6087_v50 = vadd.f32 %v6082_v8, %v6067_v32  ;;  %v6235_v8 = vld [vmem:[%s11547_s7 + $0x8] sm:$0xff] }
 0xcdf   :  { %6258 = vmatpush.msrb.mxu3 %v6235_v8 }
 0xce1   :  { %v6102_v57 = vpop.permute.xlu0 %6101  ;;  %v6004_v3 = vpop.permute.xlu2 %6003  ;;  %6259 = vmatpush.msrb.mxu3 %v6234_v36 }
 0xce2   :  { %v6122_v7 = vpop.permute.xlu1 %6121  ;;  %v6107_v24 = vadd.f32 %v6102_v57, %v6087_v50 }
 0xce4   :  { %v6127_v25 = vadd.f32 %v6122_v7, %v6107_v24 }
 0xce6   :  { %v6147_v37 = vadd.f32 %v6142_v44, %v6127_v25 }
 0xce9   :  { %v5904_v11 = vpop.permute.xlu0 %5903  ;;  %v6064_v49 = vpop.permute.xlu2 %6063 }
 0xcea   :  { %v5908_v38 = vadd.f32 %v5904_v11, %v5886_v46  ;;  %v5924_v18 = vpop.permute.xlu1 %5923  ;;  %v6267_v11 = vld [vmem:[%s11548_s8] sm:$0xf]  ;;  %s8573_s8 = smov 1  }
 0xcec   :  { %v5928_v12 = vadd.f32 %v5924_v18, %v5908_v38 }
 0xcee   :  { %v5948_v60 = vadd.f32 %v5944_v14, %v5928_v12 }
 0xcf1   :  { %v5964_v61 = vpop.permute.xlu0 %5963  ;;  %v6124_v28 = vpop.permute.xlu2 %6123 }
 0xcf2   :  { %v5968_v13 = vadd.f32 %v5964_v61, %v5948_v60  ;;  %v5984_v47 = vpop.permute.xlu1 %5983 }
 0xcf4   :  { %v5988_v29 = vadd.f32 %v5984_v47, %v5968_v13 }
 0xcf6   :  { %v6008_v20 = vadd.f32 %v6004_v3, %v5988_v29 }
 0xcf9   :  { %v6024_v1 = vpop.permute.xlu0 %6023  ;;  %v6184_v39 = vpop.permute.xlu2 %6183 }
 0xcfa   :  { %v6028_v30 = vadd.f32 %v6024_v1, %v6008_v20  ;;  %v6044_v31 = vpop.permute.xlu1 %6043 }
 0xcfc   :  { %v6048_v22 = vadd.f32 %v6044_v31, %v6028_v30 }
 0xcfe   :  { %v6068_v4 = vadd.f32 %v6064_v49, %v6048_v22 }
 0xd01   :  { %v6084_v17 = vpop.permute.xlu0 %6083  ;;  %v6201_v57 = vpop.permute.xlu2 %6200 }
 0xd02   :  { %v6088_v55 = vadd.f32 %v6084_v17, %v6068_v4  ;;  %v6104_v27 = vpop.permute.xlu1 %6103 }
 0xd04   :  { %v6108_v19 = vadd.f32 %v6104_v27, %v6088_v55 }
 0xd06   :  { %v6128_v56 = vadd.f32 %v6124_v28, %v6108_v19 }
 0xd09   :  { %v6144_v52 = vpop.permute.xlu0 %6143 }
 0xd0a   :  { %v6148_v26 = vadd.f32 %v6144_v52, %v6128_v56  ;;  %v6164_v15 = vpop.permute.xlu1 %6163 }
 0xd0c   :  { %v6168_v59 = vadd.f32 %v6164_v15, %v6148_v26 }
 0xd0e   :  { %v6188_v33 = vadd.f32 %v6184_v39, %v6168_v59 }
 0xd10   :  { %6223 = vmatpush.msrb.mxu2 %v6188_v33 }
 0xd11   :  { %v6162_v21 = vpop.permute.xlu0 %6161 }
 0xd12   :  { %v6167_v41 = vadd.f32 %v6162_v21, %v6147_v37  ;;  %v6182_v42 = vpop.permute.xlu1 %6181 }
 0xd14   :  { %v6187_v9 = vadd.f32 %v6182_v42, %v6167_v41 }
 0xd16   :  { %6224 = vmatpush.msrb.mxu2 %v6187_v9 }
 0xd17   :  { %6325 = vmatmul.msk.f32.vlgmr.msrb.gmra.mxu2 %vm3119_vm12, %v6189_v10 }
 0xd19   :  { %v6196_v53 = vpop.permute.xlu0 %6195 }
 0xd1f   :  { %6326 = vmatmul.msk.f32.gmra.mxu2 %vm3119_vm12, %v6190_v2 }
 0xd9a   :  { %v6226_v45 = vpop.f32.mrf.mxu2 }
 0xd9b   :  { %v6227_v54 = vadd.f32 %v6226_v45, %v6196_v53 }
 0xd9d   :  { %v6232_v44 = vmax.f32 %v6227_v54, 0.0 }
 0xd9f   :  { %6327 = vmatmul.msk.f32.vlgmr.msrb.gmra.mxu3 %vm3155_vm1, %v6232_v44 }
 0xda2   :  { %v6229_v7 = vpop.f32.mrf.mxu2 }
 0xda3   :  { %v6230_v14 = vadd.f32 %v6229_v7, %v6201_v57 }
 0xda5   :  { %v6233_v23 = vmax.f32 %v6230_v14, 0.0 }
 0xda7   :  { %6328 = vmatmul.msk.f32.gmra.mxu3 %vm3155_vm1, %v6233_v23 }
 0xe22   :  { %v6261_v46 = vpop.f32.mrf.mxu3 }
 0xe2a   :  { %v6264_v51 = vpop.f32.mrf.mxu3 }
 0xe2b   :  { %6285 = vmatpush.msrb.mxu0 %v6264_v51 }
 0xe2d   :  { %6286 = vmatpush.msrb.mxu0 %v6261_v46 }
 0xe2e   :  { %6329 = vmatmul.msk.f32.vlgmr.msrb.gmra.mxu0 %vm3119_vm12, %v6267_v11 }
 0xeab   :  { %v6288_v62 = vpop.f32.mrf.mxu0 }
 0xeac   :  { %v6291_v38 = vsel %vm3209_vm6, %v6288_v62, 0.0 }
 0xead   :  { %6292 = vadd.xlane.f32.xlu1 %v6291_v38 }
 0xf20   :  { %v6293_v18 = vpop.xlane.xlu1 %6292 }
 0xf21   :  { %v6294_v12 = vmul.f32 %v6293_v18, %v11219_v5 }
 0xf23   :  { %v6296_v34 = vperm.slane %v6294_v12, %v11221_v35 }
 0xf25   :  { %6299 = vst.msk [vmem:[#allocation10 + $0x1] sm:$0x1] %vm3226_vm4, %v6296_v34 }
 0xf26   :  { %6312 = dma.vmem_to_hbm [thread:$0]  %s6305_s13, 32, %s6307_s2, [#allocation6], %s11950_s12, %s11950_s12, %s8573_s8  }
 0xf27   :  { %8481 = dma.done.wait [#allocation6], 32  }
 0xf28   :  { %8482 = vsyncadd [#allocation6], 4294967264 }
 0xf29   :  { %6317 = vsyncpa [#allocation5], 1 }
 0xf2a   :  { %6318 = vsyncpa [#allocation8], 1 }
 0xf2b   :  { %6319 = vsyncpa [#allocation6], 1 }

</bundles_post_ra>
